<compile_context>
chip_gen: v5e
topology: v5e:2x2
jax: 0.10.0
libtpu: 0.0.40
codegen_flags: <defaults>
</compile_context>

<pallas_src>
import functools
import math

import numpy as np
import jax
import jax.numpy as jnp
from jax.experimental import pallas as pl
from jax.experimental.pallas import tpu as pltpu  # noqa: F401  (not needed: no scratch/DMA)


# Geometry implied by the module: fc1 = Linear(256 + 50, 128) with three 2x2 pools
# and 4 output channels forces a 64x64x3 input (input_state_feats = 12288).
H_IN, W_IN = 64, 64
C_STAGES = (3, 4, 4, 4)        # channels: input, after conv1, conv2, conv3
H_STAGES = (64, 32, 16, 8)     # spatial size entering conv1/2/3, and after pool3
DESC_DIM = 50
DESC_PAD = 64                  # pad desc features up to a multiple of 8 for the MXU
N_CLASSES = 2
N_CLASSES_PAD = 8              # fc2 output padded; sliced back before the softmax
EPS = 1e-5


# --------------------------------------------------------------------------------
# Pallas kernel
# --------------------------------------------------------------------------------

def _conv_stage(x, a_ref, du_ref, st_ref, rs_ref, cs_ref):
    """One Conv3x3(pad=1) + eval-BN(+bias) + ReLU + MaxPool2x2 stage on one image.

    x: (H, W*Cin) value, lanes ordered w*Cin + ci.
      * channel mixing + horizontal (dw) taps live in the banded matrices a[dh]
      * vertical (dh) taps are applied with 0/1 row-shift matrices du[0]/du[1]
      * BN (eval, bias folded) is a per-lane scale/shift st[0]/st[1]
      * 2x2 max-pool = elementwise max of 0/1 selection matmuls (rows then lanes)
    Everything maps onto plain 2-D matmuls + elementwise ops.
    """
    f32 = jnp.float32
    y = (jnp.dot(jnp.dot(du_ref[0], x, preferred_element_type=f32), a_ref[0],
                 preferred_element_type=f32)
         + jnp.dot(x, a_ref[1], preferred_element_type=f32)
         + jnp.dot(jnp.dot(du_ref[1], x, preferred_element_type=f32), a_ref[2],
                   preferred_element_type=f32))
    y = jnp.maximum(y * st_ref[0] + st_ref[1], 0.0)                      # BN + ReLU
    v = jnp.maximum(jnp.dot(rs_ref[0], y, preferred_element_type=f32),   # row pairs
                    jnp.dot(rs_ref[1], y, preferred_element_type=f32))
    return jnp.maximum(jnp.dot(v, cs_ref[0], preferred_element_type=f32),  # col pairs
                       jnp.dot(v, cs_ref[1], preferred_element_type=f32))


def _simple_cnn_kernel(x_ref, desc_ref,
                       a1, du1, st1, rs1, cs1,
                       a2, du2, st2, rs2, cs2,
                       a3, du3, st3, rs3, cs3,
                       w1a, w1b, b1, w2, b2,
                       out_ref, *, batch):
    f32 = jnp.float32
    for b in range(batch):                       # B is tiny; unrolled at trace time
        p = x_ref[b]                                           # (64, 64*3)
        p = _conv_stage(p, a1, du1, st1, rs1, cs1)             # (32, 32*4)
        p = _conv_stage(p, a2, du2, st2, rs2, cs2)             # (16, 16*4)
        p = _conv_stage(p, a3, du3, st3, rs3, cs3)             # (8,   8*4)

        # head: flatten + concat(desc) + fc1 + ReLU + fc2 + ReLU + softmax.
        # fc1 is split into a desc part and one (W*C x 128) slab per conv-output row,
        # avoiding any in-kernel sublane->lane reshape of the flattened features.
        acc = jnp.dot(desc_ref[b:b + 1, :], w1b[...],
                      preferred_element_type=f32) + b1[...]
        for h in range(H_STAGES[3]):
            acc = acc + jnp.dot(p[h:h + 1, :], w1a[h], preferred_element_type=f32)
        hid = jnp.maximum(acc, 0.0)                                       # relu(fc1)
        o = jnp.maximum(jnp.dot(hid, w2[...], preferred_element_type=f32)
                        + b2[...], 0.0)                                   # relu(fc2)
        logits = o[:, :N_CLASSES]
        m = jnp.max(logits, axis=-1, keepdims=True)
        e = jnp.exp(logits - m)
        out_ref[b:b + 1, :] = e / jnp.sum(e, axis=-1, keepdims=True)      # softmax


# --------------------------------------------------------------------------------
# One-time parameter / layout preparation (PyTorch layouts -> kernel layouts)
# --------------------------------------------------------------------------------

def _band_matrices(conv_w, width):
    """(Cout,Cin,3,3) torch conv weight -> 3 banded (W*Cin x W*Cout) matrices.

    A[dh, wi*Cin+ci, w*Cout+co] = conv_w[co, ci, dh, dw] with wi = w + dw - 1
    (implicit zero padding in the width direction)."""
    cw = np.asarray(conv_w, np.float32)
    cout, cin, kh, kw = cw.shape
    a = np.zeros((kh, width * cin, width * cout), np.float32)
    for dh in range(kh):
        for dw in range(kw):
            blk = cw[:, :, dh, dw].T                       # (Cin, Cout)
            for w in range(width):
                wi = w + dw - 1
                if 0 <= wi < width:
                    a[dh, wi * cin:(wi + 1) * cin, w * cout:(w + 1) * cout] = blk
    return a


def _shift_matrices(h):
    """D (row h <- row h-1) and U (row h <- row h+1) with zero boundary rows."""
    d = np.zeros((h, h), np.float32)
    u = np.zeros((h, h), np.float32)
    d[np.arange(1, h), np.arange(0, h - 1)] = 1.0
    u[np.arange(0, h - 1), np.arange(1, h)] = 1.0
    return np.stack([d, u])


def _pool_selectors(height, width, ch):
    """Even/odd row selectors and even/odd column-block selectors for MaxPool2x2."""
    ho, wo = height // 2, width // 2
    se = np.zeros((ho, height), np.float32)
    so = np.zeros((ho, height), np.float32)
    se[np.arange(ho), 2 * np.arange(ho)] = 1.0
    so[np.arange(ho), 2 * np.arange(ho) + 1] = 1.0
    te = np.zeros((width * ch, wo * ch), np.float32)
    to = np.zeros((width * ch, wo * ch), np.float32)
    for j in range(wo):
        for c in range(ch):
            te[(2 * j) * ch + c, j * ch + c] = 1.0
            to[(2 * j + 1) * ch + c, j * ch + c] = 1.0
    return np.stack([se, so]), np.stack([te, to])


def prepare_params(p):
    """Build every operand the kernel consumes, in kernel layouts (done once)."""
    out = []
    for i, (cin, cout, hh) in enumerate(
            zip(C_STAGES[:-1], C_STAGES[1:], H_STAGES[:-1]), start=1):
        a = _band_matrices(p[f"conv{i}_w"], hh)                       # square images
        gamma = np.asarray(p[f"bn{i}_g"], np.float32)
        beta = np.asarray(p[f"bn{i}_b"], np.float32)
        bias = np.asarray(p[f"conv{i}_b"], np.float32)
        scale = gamma / np.sqrt(1.0 + EPS)            # eval BN: running_var = 1
        shift = scale * bias + beta                   # running_mean = 0, bias folded
        st = np.stack([np.tile(scale, hh)[None, :],
                       np.tile(shift, hh)[None, :]]).astype(np.float32)  # (2,1,W*C)
        du = _shift_matrices(hh)
        rs, cs = _pool_selectors(hh, hh, cout)
        out += [a, du, st, rs, cs]

    # fc1: state part permuted from torch (C,H,W) flatten order to the kernel's
    # (row h, lane = w*C + c) layout, one (W*C x 128) slab per conv-output row.
    w1 = np.asarray(p["fc1_w"], np.float32).T                         # (306, 128)
    c3, h3 = C_STAGES[-1], H_STAGES[-1]
    w1a = (w1[: c3 * h3 * h3]
           .reshape(c3, h3, h3, 128)
           .transpose(1, 2, 0, 3)
           .reshape(h3, h3 * c3, 128)
           .astype(np.float32))
    w1b = np.zeros((DESC_PAD, 128), np.float32)
    w1b[:DESC_DIM] = w1[c3 * h3 * h3:]
    b1 = np.asarray(p["fc1_b"], np.float32)[None, :]
    w2 = np.zeros((128, N_CLASSES_PAD), np.float32)
    w2[:, :N_CLASSES] = np.asarray(p["fc2_w"], np.float32).T
    b2 = np.zeros((1, N_CLASSES_PAD), np.float32)
    b2[0, :N_CLASSES] = np.asarray(p["fc2_b"], np.float32)
    out += [w1a, w1b, b1, w2, b2]
    return [jnp.asarray(x) for x in out]


def init_torch_params(key):
    """Parameters in PyTorch layouts with PyTorch-default init (BN affine randomized
    slightly so the eval-mode BN is non-trivial)."""
    ks = iter(jax.random.split(key, 32))

    def conv(cout, cin, k=3):
        fan_in = cin * k * k
        bound = 1.0 / math.sqrt(fan_in)
        w = jax.random.uniform(next(ks), (cout, cin, k, k), jnp.float32, -bound, bound)
        b = jax.random.uniform(next(ks), (cout,), jnp.float32, -bound, bound)
        return w, b

    def linear(fout, fin):
        bound = 1.0 / math.sqrt(fin)
        w = jax.random.uniform(next(ks), (fout, fin), jnp.float32, -bound, bound)
        b = jax.random.uniform(next(ks), (fout,), jnp.float32, -bound, bound)
        return w, b

    def bn(c):
        gamma = 1.0 + 0.1 * jax.random.normal(next(ks), (c,), jnp.float32)
        beta = 0.1 * jax.random.normal(next(ks), (c,), jnp.float32)
        return gamma, beta

    p = {}
    p["conv1_w"], p["conv1_b"] = conv(4, 3)
    p["bn1_g"], p["bn1_b"] = bn(4)
    p["conv2_w"], p["conv2_b"] = conv(4, 4)
    p["bn2_g"], p["bn2_b"] = bn(4)
    p["conv3_w"], p["conv3_b"] = conv(4, 4)
    p["bn3_g"], p["bn3_b"] = bn(4)
    p["fc1_w"], p["fc1_b"] = linear(128, 256 + DESC_DIM)
    p["fc2_w"], p["fc2_b"] = linear(N_CLASSES, 128)
    return p


# --------------------------------------------------------------------------------
# Forward pass: exactly one pallas_call
# --------------------------------------------------------------------------------

@jax.jit
def simple_cnn_forward(kparams, state, desc):
    """state: (B, 3, 64, 64) NCHW float, desc: (B, 50) float -> (B, 2) softmax."""
    B = state.shape[0]
    # NCHW -> lane-dense (B, H, W*C) slab with lanes ordered w*C + c (layout plumbing)
    x = jnp.transpose(state.astype(jnp.float32), (0, 2, 3, 1)).reshape(
        B, H_IN, W_IN * C_STAGES[0])
    desc_p = jnp.pad(desc.astype(jnp.float32), ((0, 0), (0, DESC_PAD - DESC_DIM)))
    return pl.pallas_call(
        functools.partial(_simple_cnn_kernel, batch=B),
        out_shape=jax.ShapeDtypeStruct((B, N_CLASSES), jnp.float32),
    )(x, desc_p, *kparams)


# --------------------------------------------------------------------------------
# Pure-XLA reference (same math, eval-mode BN) for a correctness cross-check
# --------------------------------------------------------------------------------

def reference_forward(p, state, desc):
    prec = jax.lax.Precision.HIGHEST
    x = state.astype(jnp.float32)
    for i in (1, 2, 3):
        w, b = p[f"conv{i}_w"], p[f"conv{i}_b"]
        x = jax.lax.conv_general_dilated(
            x, w, window_strides=(1, 1), padding="SAME",
            dimension_numbers=("NCHW", "OIHW", "NCHW"), precision=prec)
        x = x + b[None, :, None, None]
        g, bb = p[f"bn{i}_g"], p[f"bn{i}_b"]
        x = g[None, :, None, None] * x / np.sqrt(1.0 + EPS) + bb[None, :, None, None]
        x = jnp.maximum(x, 0.0)
        x = jax.lax.reduce_window(x, -jnp.inf, jax.lax.max,
                                  (1, 1, 2, 2), (1, 1, 2, 2), "VALID")
    x = x.reshape(x.shape[0], -1)
    x = jnp.concatenate([x, desc.astype(jnp.float32)], axis=1)
    x = jnp.maximum(jnp.dot(x, p["fc1_w"].T, precision=prec) + p["fc1_b"], 0.0)
    x = jnp.maximum(jnp.dot(x, p["fc2_w"].T, precision=prec) + p["fc2_b"], 0.0)
    return jax.nn.softmax(x, axis=1)


if __name__ == "__main__":
    B = 2
    key = jax.random.PRNGKey(0)
    kp, ks, kd = jax.random.split(key, 3)

    torch_params = init_torch_params(kp)
    kernel_params = prepare_params(torch_params)

    state = jax.random.uniform(ks, (B, 3, H_IN, W_IN), jnp.float32)  # NCHW like PyTorch
    desc = jax.random.uniform(kd, (B, DESC_DIM), jnp.float32)

    out = simple_cnn_forward(kernel_params, state, desc)
    jax.block_until_ready(out)

    assert out.shape == (B, N_CLASSES)
    assert bool(jnp.all(jnp.isfinite(out)))
    assert bool(jnp.allclose(jnp.sum(out, axis=1), 1.0, atol=1e-5))   # softmax rows

    # cross-check against plain XLA (loose tol absorbs MXU f32 pass differences)
    ref = reference_forward(torch_params, state, desc)
    assert bool(jnp.allclose(out, ref, atol=2e-2, rtol=0.0)), (out, ref)

    print("KERNEL_OK")
</pallas_src>

<mosaic_0001>
module attributes {stable_mosaic.version = 11 : i64} {
  func.func @_simple_cnn_kernel(%arg0: memref<2x64x192xf32, #tpu.memory_space<vmem>>, %arg1: memref<2x64xf32, #tpu.memory_space<vmem>>, %arg2: memref<3x192x256xf32, #tpu.memory_space<vmem>>, %arg3: memref<2x64x64xf32, #tpu.memory_space<vmem>>, %arg4: memref<2x1x256xf32, #tpu.memory_space<vmem>>, %arg5: memref<2x32x64xf32, #tpu.memory_space<vmem>>, %arg6: memref<2x256x128xf32, #tpu.memory_space<vmem>>, %arg7: memref<3x128x128xf32, #tpu.memory_space<vmem>>, %arg8: memref<2x32x32xf32, #tpu.memory_space<vmem>>, %arg9: memref<2x1x128xf32, #tpu.memory_space<vmem>>, %arg10: memref<2x16x32xf32, #tpu.memory_space<vmem>>, %arg11: memref<2x128x64xf32, #tpu.memory_space<vmem>>, %arg12: memref<3x64x64xf32, #tpu.memory_space<vmem>>, %arg13: memref<2x16x16xf32, #tpu.memory_space<vmem>>, %arg14: memref<2x1x64xf32, #tpu.memory_space<vmem>>, %arg15: memref<2x8x16xf32, #tpu.memory_space<vmem>>, %arg16: memref<2x64x32xf32, #tpu.memory_space<vmem>>, %arg17: memref<8x32x128xf32, #tpu.memory_space<vmem>>, %arg18: memref<64x128xf32, #tpu.memory_space<vmem>>, %arg19: memref<1x128xf32, #tpu.memory_space<vmem>>, %arg20: memref<128x8xf32, #tpu.memory_space<vmem>>, %arg21: memref<1x8xf32, #tpu.memory_space<vmem>>, %arg22: memref<2x2xf32, #tpu.memory_space<vmem>>) attributes {dimension_semantics = [], scalar_prefetch = 0 : i64, scratch_operands = 0 : i64, tpu.core_type = #tpu.core_type<tc>} {
    %c0 = arith.constant 0 : index
    %c0_0 = arith.constant 0 : index
    %c0_1 = arith.constant 0 : index
    %0 = vector.load %arg0[%c0, %c0_0, %c0_1] : memref<2x64x192xf32, #tpu.memory_space<vmem>>, vector<1x64x192xf32>
    %1 = vector.shape_cast %0 : vector<1x64x192xf32> to vector<64x192xf32>
    %c0_2 = arith.constant 0 : index
    %c0_3 = arith.constant 0 : index
    %c0_4 = arith.constant 0 : index
    %2 = vector.load %arg3[%c0_2, %c0_3, %c0_4] : memref<2x64x64xf32, #tpu.memory_space<vmem>>, vector<1x64x64xf32>
    %3 = vector.shape_cast %2 : vector<1x64x64xf32> to vector<64x64xf32>
    %cst = arith.constant dense<0.000000e+00> : vector<64x192xf32>
    %4 = tpu.matmul %3, %1, %cst {dimension_numbers = #tpu.dot_dimension_numbers<[1], [0], [0], [1], [0, 0, 1, 1], [], []>} : vector<64x64xf32>, vector<64x192xf32>, vector<64x192xf32> -> vector<64x192xf32>
    %c0_5 = arith.constant 0 : index
    %c0_6 = arith.constant 0 : index
    %c0_7 = arith.constant 0 : index
    %5 = vector.load %arg2[%c0_5, %c0_6, %c0_7] : memref<3x192x256xf32, #tpu.memory_space<vmem>>, vector<1x192x256xf32>
    %6 = vector.shape_cast %5 : vector<1x192x256xf32> to vector<192x256xf32>
    %cst_8 = arith.constant dense<0.000000e+00> : vector<64x256xf32>
    %7 = tpu.matmul %4, %6, %cst_8 {dimension_numbers = #tpu.dot_dimension_numbers<[1], [0], [0], [1], [0, 0, 1, 1], [], []>} : vector<64x192xf32>, vector<192x256xf32>, vector<64x256xf32> -> vector<64x256xf32>
    %c1 = arith.constant 1 : index
    %c0_9 = arith.constant 0 : index
    %c0_10 = arith.constant 0 : index
    %8 = vector.load %arg2[%c1, %c0_9, %c0_10] : memref<3x192x256xf32, #tpu.memory_space<vmem>>, vector<1x192x256xf32>
    %9 = vector.shape_cast %8 : vector<1x192x256xf32> to vector<192x256xf32>
    %cst_11 = arith.constant dense<0.000000e+00> : vector<64x256xf32>
    %10 = tpu.matmul %1, %9, %cst_11 {dimension_numbers = #tpu.dot_dimension_numbers<[1], [0], [0], [1], [0, 0, 1, 1], [], []>} : vector<64x192xf32>, vector<192x256xf32>, vector<64x256xf32> -> vector<64x256xf32>
    %11 = arith.addf %7, %10 : vector<64x256xf32>
    %c1_12 = arith.constant 1 : index
    %c0_13 = arith.constant 0 : index
    %c0_14 = arith.constant 0 : index
    %12 = vector.load %arg3[%c1_12, %c0_13, %c0_14] : memref<2x64x64xf32, #tpu.memory_space<vmem>>, vector<1x64x64xf32>
    %13 = vector.shape_cast %12 : vector<1x64x64xf32> to vector<64x64xf32>
    %cst_15 = arith.constant dense<0.000000e+00> : vector<64x192xf32>
    %14 = tpu.matmul %13, %1, %cst_15 {dimension_numbers = #tpu.dot_dimension_numbers<[1], [0], [0], [1], [0, 0, 1, 1], [], []>} : vector<64x64xf32>, vector<64x192xf32>, vector<64x192xf32> -> vector<64x192xf32>
    %c2 = arith.constant 2 : index
    %c0_16 = arith.constant 0 : index
    %c0_17 = arith.constant 0 : index
    %15 = vector.load %arg2[%c2, %c0_16, %c0_17] : memref<3x192x256xf32, #tpu.memory_space<vmem>>, vector<1x192x256xf32>
    %16 = vector.shape_cast %15 : vector<1x192x256xf32> to vector<192x256xf32>
    %cst_18 = arith.constant dense<0.000000e+00> : vector<64x256xf32>
    %17 = tpu.matmul %14, %16, %cst_18 {dimension_numbers = #tpu.dot_dimension_numbers<[1], [0], [0], [1], [0, 0, 1, 1], [], []>} : vector<64x192xf32>, vector<192x256xf32>, vector<64x256xf32> -> vector<64x256xf32>
    %18 = arith.addf %11, %17 : vector<64x256xf32>
    %c0_19 = arith.constant 0 : index
    %c0_20 = arith.constant 0 : index
    %c0_21 = arith.constant 0 : index
    %19 = vector.load %arg4[%c0_19, %c0_20, %c0_21] : memref<2x1x256xf32, #tpu.memory_space<vmem>>, vector<1x1x256xf32>
    %20 = vector.shape_cast %19 : vector<1x1x256xf32> to vector<1x256xf32>
    %21 = vector.broadcast %20 : vector<1x256xf32> to vector<64x256xf32>
    %22 = arith.mulf %18, %21 : vector<64x256xf32>
    %c1_22 = arith.constant 1 : index
    %c0_23 = arith.constant 0 : index
    %c0_24 = arith.constant 0 : index
    %23 = vector.load %arg4[%c1_22, %c0_23, %c0_24] : memref<2x1x256xf32, #tpu.memory_space<vmem>>, vector<1x1x256xf32>
    %24 = vector.shape_cast %23 : vector<1x1x256xf32> to vector<1x256xf32>
    %25 = vector.broadcast %24 : vector<1x256xf32> to vector<64x256xf32>
    %26 = arith.addf %22, %25 : vector<64x256xf32>
    %cst_25 = arith.constant 0.000000e+00 : f32
    %27 = vector.broadcast %cst_25 : f32 to vector<64x256xf32>
    %28 = arith.maximumf %26, %27 : vector<64x256xf32>
    %c0_26 = arith.constant 0 : index
    %c0_27 = arith.constant 0 : index
    %c0_28 = arith.constant 0 : index
    %29 = vector.load %arg5[%c0_26, %c0_27, %c0_28] : memref<2x32x64xf32, #tpu.memory_space<vmem>>, vector<1x32x64xf32>
    %30 = vector.shape_cast %29 : vector<1x32x64xf32> to vector<32x64xf32>
    %cst_29 = arith.constant dense<0.000000e+00> : vector<32x256xf32>
    %31 = tpu.matmul %30, %28, %cst_29 {dimension_numbers = #tpu.dot_dimension_numbers<[1], [0], [0], [1], [0, 0, 1, 1], [], []>} : vector<32x64xf32>, vector<64x256xf32>, vector<32x256xf32> -> vector<32x256xf32>
    %c1_30 = arith.constant 1 : index
    %c0_31 = arith.constant 0 : index
    %c0_32 = arith.constant 0 : index
    %32 = vector.load %arg5[%c1_30, %c0_31, %c0_32] : memref<2x32x64xf32, #tpu.memory_space<vmem>>, vector<1x32x64xf32>
    %33 = vector.shape_cast %32 : vector<1x32x64xf32> to vector<32x64xf32>
    %cst_33 = arith.constant dense<0.000000e+00> : vector<32x256xf32>
    %34 = tpu.matmul %33, %28, %cst_33 {dimension_numbers = #tpu.dot_dimension_numbers<[1], [0], [0], [1], [0, 0, 1, 1], [], []>} : vector<32x64xf32>, vector<64x256xf32>, vector<32x256xf32> -> vector<32x256xf32>
    %35 = arith.maximumf %31, %34 : vector<32x256xf32>
    %c0_34 = arith.constant 0 : index
    %c0_35 = arith.constant 0 : index
    %c0_36 = arith.constant 0 : index
    %36 = vector.load %arg6[%c0_34, %c0_35, %c0_36] : memref<2x256x128xf32, #tpu.memory_space<vmem>>, vector<1x256x128xf32>
    %37 = vector.shape_cast %36 : vector<1x256x128xf32> to vector<256x128xf32>
    %cst_37 = arith.constant dense<0.000000e+00> : vector<32x128xf32>
    %38 = tpu.matmul %35, %37, %cst_37 {dimension_numbers = #tpu.dot_dimension_numbers<[1], [0], [0], [1], [0, 0, 1, 1], [], []>} : vector<32x256xf32>, vector<256x128xf32>, vector<32x128xf32> -> vector<32x128xf32>
    %c1_38 = arith.constant 1 : index
    %c0_39 = arith.constant 0 : index
    %c0_40 = arith.constant 0 : index
    %39 = vector.load %arg6[%c1_38, %c0_39, %c0_40] : memref<2x256x128xf32, #tpu.memory_space<vmem>>, vector<1x256x128xf32>
    %40 = vector.shape_cast %39 : vector<1x256x128xf32> to vector<256x128xf32>
    %cst_41 = arith.constant dense<0.000000e+00> : vector<32x128xf32>
    %41 = tpu.matmul %35, %40, %cst_41 {dimension_numbers = #tpu.dot_dimension_numbers<[1], [0], [0], [1], [0, 0, 1, 1], [], []>} : vector<32x256xf32>, vector<256x128xf32>, vector<32x128xf32> -> vector<32x128xf32>
    %42 = arith.maximumf %38, %41 : vector<32x128xf32>
    %c0_42 = arith.constant 0 : index
    %c0_43 = arith.constant 0 : index
    %c0_44 = arith.constant 0 : index
    %43 = vector.load %arg8[%c0_42, %c0_43, %c0_44] : memref<2x32x32xf32, #tpu.memory_space<vmem>>, vector<1x32x32xf32>
    %44 = vector.shape_cast %43 : vector<1x32x32xf32> to vector<32x32xf32>
    %cst_45 = arith.constant dense<0.000000e+00> : vector<32x128xf32>
    %45 = tpu.matmul %44, %42, %cst_45 {dimension_numbers = #tpu.dot_dimension_numbers<[1], [0], [0], [1], [0, 0, 1, 1], [], []>} : vector<32x32xf32>, vector<32x128xf32>, vector<32x128xf32> -> vector<32x128xf32>
    %c0_46 = arith.constant 0 : index
    %c0_47 = arith.constant 0 : index
    %c0_48 = arith.constant 0 : index
    %46 = vector.load %arg7[%c0_46, %c0_47, %c0_48] : memref<3x128x128xf32, #tpu.memory_space<vmem>>, vector<1x128x128xf32>
    %47 = vector.shape_cast %46 : vector<1x128x128xf32> to vector<128x128xf32>
    %cst_49 = arith.constant dense<0.000000e+00> : vector<32x128xf32>
    %48 = tpu.matmul %45, %47, %cst_49 {dimension_numbers = #tpu.dot_dimension_numbers<[1], [0], [0], [1], [0, 0, 1, 1], [], []>} : vector<32x128xf32>, vector<128x128xf32>, vector<32x128xf32> -> vector<32x128xf32>
    %c1_50 = arith.constant 1 : index
    %c0_51 = arith.constant 0 : index
    %c0_52 = arith.constant 0 : index
    %49 = vector.load %arg7[%c1_50, %c0_51, %c0_52] : memref<3x128x128xf32, #tpu.memory_space<vmem>>, vector<1x128x128xf32>
    %50 = vector.shape_cast %49 : vector<1x128x128xf32> to vector<128x128xf32>
    %cst_53 = arith.constant dense<0.000000e+00> : vector<32x128xf32>
    %51 = tpu.matmul %42, %50, %cst_53 {dimension_numbers = #tpu.dot_dimension_numbers<[1], [0], [0], [1], [0, 0, 1, 1], [], []>} : vector<32x128xf32>, vector<128x128xf32>, vector<32x128xf32> -> vector<32x128xf32>
    %52 = arith.addf %48, %51 : vector<32x128xf32>
    %c1_54 = arith.constant 1 : index
    %c0_55 = arith.constant 0 : index
    %c0_56 = arith.constant 0 : index
    %53 = vector.load %arg8[%c1_54, %c0_55, %c0_56] : memref<2x32x32xf32, #tpu.memory_space<vmem>>, vector<1x32x32xf32>
    %54 = vector.shape_cast %53 : vector<1x32x32xf32> to vector<32x32xf32>
    %cst_57 = arith.constant dense<0.000000e+00> : vector<32x128xf32>
    %55 = tpu.matmul %54, %42, %cst_57 {dimension_numbers = #tpu.dot_dimension_numbers<[1], [0], [0], [1], [0, 0, 1, 1], [], []>} : vector<32x32xf32>, vector<32x128xf32>, vector<32x128xf32> -> vector<32x128xf32>
    %c2_58 = arith.constant 2 : index
    %c0_59 = arith.constant 0 : index
    %c0_60 = arith.constant 0 : index
    %56 = vector.load %arg7[%c2_58, %c0_59, %c0_60] : memref<3x128x128xf32, #tpu.memory_space<vmem>>, vector<1x128x128xf32>
    %57 = vector.shape_cast %56 : vector<1x128x128xf32> to vector<128x128xf32>
    %cst_61 = arith.constant dense<0.000000e+00> : vector<32x128xf32>
    %58 = tpu.matmul %55, %57, %cst_61 {dimension_numbers = #tpu.dot_dimension_numbers<[1], [0], [0], [1], [0, 0, 1, 1], [], []>} : vector<32x128xf32>, vector<128x128xf32>, vector<32x128xf32> -> vector<32x128xf32>
    %59 = arith.addf %52, %58 : vector<32x128xf32>
    %c0_62 = arith.constant 0 : index
    %c0_63 = arith.constant 0 : index
    %c0_64 = arith.constant 0 : index
    %60 = vector.load %arg9[%c0_62, %c0_63, %c0_64] : memref<2x1x128xf32, #tpu.memory_space<vmem>>, vector<1x1x128xf32>
    %61 = vector.shape_cast %60 : vector<1x1x128xf32> to vector<1x128xf32>
    %62 = vector.broadcast %61 : vector<1x128xf32> to vector<32x128xf32>
    %63 = arith.mulf %59, %62 : vector<32x128xf32>
    %c1_65 = arith.constant 1 : index
    %c0_66 = arith.constant 0 : index
    %c0_67 = arith.constant 0 : index
    %64 = vector.load %arg9[%c1_65, %c0_66, %c0_67] : memref<2x1x128xf32, #tpu.memory_space<vmem>>, vector<1x1x128xf32>
    %65 = vector.shape_cast %64 : vector<1x1x128xf32> to vector<1x128xf32>
    %66 = vector.broadcast %65 : vector<1x128xf32> to vector<32x128xf32>
    %67 = arith.addf %63, %66 : vector<32x128xf32>
    %cst_68 = arith.constant 0.000000e+00 : f32
    %68 = vector.broadcast %cst_68 : f32 to vector<32x128xf32>
    %69 = arith.maximumf %67, %68 : vector<32x128xf32>
    %c0_69 = arith.constant 0 : index
    %c0_70 = arith.constant 0 : index
    %c0_71 = arith.constant 0 : index
    %70 = vector.load %arg10[%c0_69, %c0_70, %c0_71] : memref<2x16x32xf32, #tpu.memory_space<vmem>>, vector<1x16x32xf32>
    %71 = vector.shape_cast %70 : vector<1x16x32xf32> to vector<16x32xf32>
    %cst_72 = arith.constant dense<0.000000e+00> : vector<16x128xf32>
    %72 = tpu.matmul %71, %69, %cst_72 {dimension_numbers = #tpu.dot_dimension_numbers<[1], [0], [0], [1], [0, 0, 1, 1], [], []>} : vector<16x32xf32>, vector<32x128xf32>, vector<16x128xf32> -> vector<16x128xf32>
    %c1_73 = arith.constant 1 : index
    %c0_74 = arith.constant 0 : index
    %c0_75 = arith.constant 0 : index
    %73 = vector.load %arg10[%c1_73, %c0_74, %c0_75] : memref<2x16x32xf32, #tpu.memory_space<vmem>>, vector<1x16x32xf32>
    %74 = vector.shape_cast %73 : vector<1x16x32xf32> to vector<16x32xf32>
    %cst_76 = arith.constant dense<0.000000e+00> : vector<16x128xf32>
    %75 = tpu.matmul %74, %69, %cst_76 {dimension_numbers = #tpu.dot_dimension_numbers<[1], [0], [0], [1], [0, 0, 1, 1], [], []>} : vector<16x32xf32>, vector<32x128xf32>, vector<16x128xf32> -> vector<16x128xf32>
    %76 = arith.maximumf %72, %75 : vector<16x128xf32>
    %c0_77 = arith.constant 0 : index
    %c0_78 = arith.constant 0 : index
    %c0_79 = arith.constant 0 : index
    %77 = vector.load %arg11[%c0_77, %c0_78, %c0_79] : memref<2x128x64xf32, #tpu.memory_space<vmem>>, vector<1x128x64xf32>
    %78 = vector.shape_cast %77 : vector<1x128x64xf32> to vector<128x64xf32>
    %cst_80 = arith.constant dense<0.000000e+00> : vector<16x64xf32>
    %79 = tpu.matmul %76, %78, %cst_80 {dimension_numbers = #tpu.dot_dimension_numbers<[1], [0], [0], [1], [0, 0, 1, 1], [], []>} : vector<16x128xf32>, vector<128x64xf32>, vector<16x64xf32> -> vector<16x64xf32>
    %c1_81 = arith.constant 1 : index
    %c0_82 = arith.constant 0 : index
    %c0_83 = arith.constant 0 : index
    %80 = vector.load %arg11[%c1_81, %c0_82, %c0_83] : memref<2x128x64xf32, #tpu.memory_space<vmem>>, vector<1x128x64xf32>
    %81 = vector.shape_cast %80 : vector<1x128x64xf32> to vector<128x64xf32>
    %cst_84 = arith.constant dense<0.000000e+00> : vector<16x64xf32>
    %82 = tpu.matmul %76, %81, %cst_84 {dimension_numbers = #tpu.dot_dimension_numbers<[1], [0], [0], [1], [0, 0, 1, 1], [], []>} : vector<16x128xf32>, vector<128x64xf32>, vector<16x64xf32> -> vector<16x64xf32>
    %83 = arith.maximumf %79, %82 : vector<16x64xf32>
    %c0_85 = arith.constant 0 : index
    %c0_86 = arith.constant 0 : index
    %c0_87 = arith.constant 0 : index
    %84 = vector.load %arg13[%c0_85, %c0_86, %c0_87] : memref<2x16x16xf32, #tpu.memory_space<vmem>>, vector<1x16x16xf32>
    %85 = vector.shape_cast %84 : vector<1x16x16xf32> to vector<16x16xf32>
    %cst_88 = arith.constant dense<0.000000e+00> : vector<16x64xf32>
    %86 = tpu.matmul %85, %83, %cst_88 {dimension_numbers = #tpu.dot_dimension_numbers<[1], [0], [0], [1], [0, 0, 1, 1], [], []>} : vector<16x16xf32>, vector<16x64xf32>, vector<16x64xf32> -> vector<16x64xf32>
    %c0_89 = arith.constant 0 : index
    %c0_90 = arith.constant 0 : index
    %c0_91 = arith.constant 0 : index
    %87 = vector.load %arg12[%c0_89, %c0_90, %c0_91] : memref<3x64x64xf32, #tpu.memory_space<vmem>>, vector<1x64x64xf32>
    %88 = vector.shape_cast %87 : vector<1x64x64xf32> to vector<64x64xf32>
    %cst_92 = arith.constant dense<0.000000e+00> : vector<16x64xf32>
    %89 = tpu.matmul %86, %88, %cst_92 {dimension_numbers = #tpu.dot_dimension_numbers<[1], [0], [0], [1], [0, 0, 1, 1], [], []>} : vector<16x64xf32>, vector<64x64xf32>, vector<16x64xf32> -> vector<16x64xf32>
    %c1_93 = arith.constant 1 : index
    %c0_94 = arith.constant 0 : index
    %c0_95 = arith.constant 0 : index
    %90 = vector.load %arg12[%c1_93, %c0_94, %c0_95] : memref<3x64x64xf32, #tpu.memory_space<vmem>>, vector<1x64x64xf32>
    %91 = vector.shape_cast %90 : vector<1x64x64xf32> to vector<64x64xf32>
    %cst_96 = arith.constant dense<0.000000e+00> : vector<16x64xf32>
    %92 = tpu.matmul %83, %91, %cst_96 {dimension_numbers = #tpu.dot_dimension_numbers<[1], [0], [0], [1], [0, 0, 1, 1], [], []>} : vector<16x64xf32>, vector<64x64xf32>, vector<16x64xf32> -> vector<16x64xf32>
    %93 = arith.addf %89, %92 : vector<16x64xf32>
    %c1_97 = arith.constant 1 : index
    %c0_98 = arith.constant 0 : index
    %c0_99 = arith.constant 0 : index
    %94 = vector.load %arg13[%c1_97, %c0_98, %c0_99] : memref<2x16x16xf32, #tpu.memory_space<vmem>>, vector<1x16x16xf32>
    %95 = vector.shape_cast %94 : vector<1x16x16xf32> to vector<16x16xf32>
    %cst_100 = arith.constant dense<0.000000e+00> : vector<16x64xf32>
    %96 = tpu.matmul %95, %83, %cst_100 {dimension_numbers = #tpu.dot_dimension_numbers<[1], [0], [0], [1], [0, 0, 1, 1], [], []>} : vector<16x16xf32>, vector<16x64xf32>, vector<16x64xf32> -> vector<16x64xf32>
    %c2_101 = arith.constant 2 : index
    %c0_102 = arith.constant 0 : index
    %c0_103 = arith.constant 0 : index
    %97 = vector.load %arg12[%c2_101, %c0_102, %c0_103] : memref<3x64x64xf32, #tpu.memory_space<vmem>>, vector<1x64x64xf32>
    %98 = vector.shape_cast %97 : vector<1x64x64xf32> to vector<64x64xf32>
    %cst_104 = arith.constant dense<0.000000e+00> : vector<16x64xf32>
    %99 = tpu.matmul %96, %98, %cst_104 {dimension_numbers = #tpu.dot_dimension_numbers<[1], [0], [0], [1], [0, 0, 1, 1], [], []>} : vector<16x64xf32>, vector<64x64xf32>, vector<16x64xf32> -> vector<16x64xf32>
    %100 = arith.addf %93, %99 : vector<16x64xf32>
    %c0_105 = arith.constant 0 : index
    %c0_106 = arith.constant 0 : index
    %c0_107 = arith.constant 0 : index
    %101 = vector.load %arg14[%c0_105, %c0_106, %c0_107] : memref<2x1x64xf32, #tpu.memory_space<vmem>>, vector<1x1x64xf32>
    %102 = vector.shape_cast %101 : vector<1x1x64xf32> to vector<1x64xf32>
    %103 = vector.broadcast %102 : vector<1x64xf32> to vector<16x64xf32>
    %104 = arith.mulf %100, %103 : vector<16x64xf32>
    %c1_108 = arith.constant 1 : index
    %c0_109 = arith.constant 0 : index
    %c0_110 = arith.constant 0 : index
    %105 = vector.load %arg14[%c1_108, %c0_109, %c0_110] : memref<2x1x64xf32, #tpu.memory_space<vmem>>, vector<1x1x64xf32>
    %106 = vector.shape_cast %105 : vector<1x1x64xf32> to vector<1x64xf32>
    %107 = vector.broadcast %106 : vector<1x64xf32> to vector<16x64xf32>
    %108 = arith.addf %104, %107 : vector<16x64xf32>
    %cst_111 = arith.constant 0.000000e+00 : f32
    %109 = vector.broadcast %cst_111 : f32 to vector<16x64xf32>
    %110 = arith.maximumf %108, %109 : vector<16x64xf32>
    %c0_112 = arith.constant 0 : index
    %c0_113 = arith.constant 0 : index
    %c0_114 = arith.constant 0 : index
    %111 = vector.load %arg15[%c0_112, %c0_113, %c0_114] : memref<2x8x16xf32, #tpu.memory_space<vmem>>, vector<1x8x16xf32>
    %112 = vector.shape_cast %111 : vector<1x8x16xf32> to vector<8x16xf32>
    %cst_115 = arith.constant dense<0.000000e+00> : vector<8x64xf32>
    %113 = tpu.matmul %112, %110, %cst_115 {dimension_numbers = #tpu.dot_dimension_numbers<[1], [0], [0], [1], [0, 0, 1, 1], [], []>} : vector<8x16xf32>, vector<16x64xf32>, vector<8x64xf32> -> vector<8x64xf32>
    %c1_116 = arith.constant 1 : index
    %c0_117 = arith.constant 0 : index
    %c0_118 = arith.constant 0 : index
    %114 = vector.load %arg15[%c1_116, %c0_117, %c0_118] : memref<2x8x16xf32, #tpu.memory_space<vmem>>, vector<1x8x16xf32>
    %115 = vector.shape_cast %114 : vector<1x8x16xf32> to vector<8x16xf32>
    %cst_119 = arith.constant dense<0.000000e+00> : vector<8x64xf32>
    %116 = tpu.matmul %115, %110, %cst_119 {dimension_numbers = #tpu.dot_dimension_numbers<[1], [0], [0], [1], [0, 0, 1, 1], [], []>} : vector<8x16xf32>, vector<16x64xf32>, vector<8x64xf32> -> vector<8x64xf32>
    %117 = arith.maximumf %113, %116 : vector<8x64xf32>
    %c0_120 = arith.constant 0 : index
    %c0_121 = arith.constant 0 : index
    %c0_122 = arith.constant 0 : index
    %118 = vector.load %arg16[%c0_120, %c0_121, %c0_122] : memref<2x64x32xf32, #tpu.memory_space<vmem>>, vector<1x64x32xf32>
    %119 = vector.shape_cast %118 : vector<1x64x32xf32> to vector<64x32xf32>
    %cst_123 = arith.constant dense<0.000000e+00> : vector<8x32xf32>
    %120 = tpu.matmul %117, %119, %cst_123 {dimension_numbers = #tpu.dot_dimension_numbers<[1], [0], [0], [1], [0, 0, 1, 1], [], []>} : vector<8x64xf32>, vector<64x32xf32>, vector<8x32xf32> -> vector<8x32xf32>
    %c1_124 = arith.constant 1 : index
    %c0_125 = arith.constant 0 : index
    %c0_126 = arith.constant 0 : index
    %121 = vector.load %arg16[%c1_124, %c0_125, %c0_126] : memref<2x64x32xf32, #tpu.memory_space<vmem>>, vector<1x64x32xf32>
    %122 = vector.shape_cast %121 : vector<1x64x32xf32> to vector<64x32xf32>
    %cst_127 = arith.constant dense<0.000000e+00> : vector<8x32xf32>
    %123 = tpu.matmul %117, %122, %cst_127 {dimension_numbers = #tpu.dot_dimension_numbers<[1], [0], [0], [1], [0, 0, 1, 1], [], []>} : vector<8x64xf32>, vector<64x32xf32>, vector<8x32xf32> -> vector<8x32xf32>
    %124 = arith.maximumf %120, %123 : vector<8x32xf32>
    %c0_128 = arith.constant 0 : index
    %c0_129 = arith.constant 0 : index
    %125 = vector.load %arg1[%c0_128, %c0_129] : memref<2x64xf32, #tpu.memory_space<vmem>>, vector<1x64xf32>
    %c0_130 = arith.constant 0 : index
    %c0_131 = arith.constant 0 : index
    %126 = vector.load %arg18[%c0_130, %c0_131] : memref<64x128xf32, #tpu.memory_space<vmem>>, vector<64x128xf32>
    %cst_132 = arith.constant dense<0.000000e+00> : vector<1x128xf32>
    %127 = tpu.matmul %125, %126, %cst_132 {dimension_numbers = #tpu.dot_dimension_numbers<[1], [0], [0], [1], [0, 0, 1, 1], [], []>} : vector<1x64xf32>, vector<64x128xf32>, vector<1x128xf32> -> vector<1x128xf32>
    %c0_133 = arith.constant 0 : index
    %c0_134 = arith.constant 0 : index
    %128 = vector.load %arg19[%c0_133, %c0_134] : memref<1x128xf32, #tpu.memory_space<vmem>>, vector<1x128xf32>
    %129 = arith.addf %127, %128 : vector<1x128xf32>
    %130 = vector.extract_strided_slice %124 {offsets = [0, 0], sizes = [1, 32], strides = [1, 1]} : vector<8x32xf32> to vector<1x32xf32>
    %c0_135 = arith.constant 0 : index
    %c0_136 = arith.constant 0 : index
    %c0_137 = arith.constant 0 : index
    %131 = vector.load %arg17[%c0_135, %c0_136, %c0_137] : memref<8x32x128xf32, #tpu.memory_space<vmem>>, vector<1x32x128xf32>
    %132 = vector.shape_cast %131 : vector<1x32x128xf32> to vector<32x128xf32>
    %cst_138 = arith.constant dense<0.000000e+00> : vector<1x128xf32>
    %133 = tpu.matmul %130, %132, %cst_138 {dimension_numbers = #tpu.dot_dimension_numbers<[1], [0], [0], [1], [0, 0, 1, 1], [], []>} : vector<1x32xf32>, vector<32x128xf32>, vector<1x128xf32> -> vector<1x128xf32>
    %134 = arith.addf %129, %133 : vector<1x128xf32>
    %135 = vector.extract_strided_slice %124 {offsets = [1, 0], sizes = [1, 32], strides = [1, 1]} : vector<8x32xf32> to vector<1x32xf32>
    %c1_139 = arith.constant 1 : index
    %c0_140 = arith.constant 0 : index
    %c0_141 = arith.constant 0 : index
    %136 = vector.load %arg17[%c1_139, %c0_140, %c0_141] : memref<8x32x128xf32, #tpu.memory_space<vmem>>, vector<1x32x128xf32>
    %137 = vector.shape_cast %136 : vector<1x32x128xf32> to vector<32x128xf32>
    %cst_142 = arith.constant dense<0.000000e+00> : vector<1x128xf32>
    %138 = tpu.matmul %135, %137, %cst_142 {dimension_numbers = #tpu.dot_dimension_numbers<[1], [0], [0], [1], [0, 0, 1, 1], [], []>} : vector<1x32xf32>, vector<32x128xf32>, vector<1x128xf32> -> vector<1x128xf32>
    %139 = arith.addf %134, %138 : vector<1x128xf32>
    %140 = vector.extract_strided_slice %124 {offsets = [2, 0], sizes = [1, 32], strides = [1, 1]} : vector<8x32xf32> to vector<1x32xf32>
    %c2_143 = arith.constant 2 : index
    %c0_144 = arith.constant 0 : index
    %c0_145 = arith.constant 0 : index
    %141 = vector.load %arg17[%c2_143, %c0_144, %c0_145] : memref<8x32x128xf32, #tpu.memory_space<vmem>>, vector<1x32x128xf32>
    %142 = vector.shape_cast %141 : vector<1x32x128xf32> to vector<32x128xf32>
    %cst_146 = arith.constant dense<0.000000e+00> : vector<1x128xf32>
    %143 = tpu.matmul %140, %142, %cst_146 {dimension_numbers = #tpu.dot_dimension_numbers<[1], [0], [0], [1], [0, 0, 1, 1], [], []>} : vector<1x32xf32>, vector<32x128xf32>, vector<1x128xf32> -> vector<1x128xf32>
    %144 = arith.addf %139, %143 : vector<1x128xf32>
    %145 = vector.extract_strided_slice %124 {offsets = [3, 0], sizes = [1, 32], strides = [1, 1]} : vector<8x32xf32> to vector<1x32xf32>
    %c3 = arith.constant 3 : index
    %c0_147 = arith.constant 0 : index
    %c0_148 = arith.constant 0 : index
    %146 = vector.load %arg17[%c3, %c0_147, %c0_148] : memref<8x32x128xf32, #tpu.memory_space<vmem>>, vector<1x32x128xf32>
    %147 = vector.shape_cast %146 : vector<1x32x128xf32> to vector<32x128xf32>
    %cst_149 = arith.constant dense<0.000000e+00> : vector<1x128xf32>
    %148 = tpu.matmul %145, %147, %cst_149 {dimension_numbers = #tpu.dot_dimension_numbers<[1], [0], [0], [1], [0, 0, 1, 1], [], []>} : vector<1x32xf32>, vector<32x128xf32>, vector<1x128xf32> -> vector<1x128xf32>
    %149 = arith.addf %144, %148 : vector<1x128xf32>
    %150 = vector.extract_strided_slice %124 {offsets = [4, 0], sizes = [1, 32], strides = [1, 1]} : vector<8x32xf32> to vector<1x32xf32>
    %c4 = arith.constant 4 : index
    %c0_150 = arith.constant 0 : index
    %c0_151 = arith.constant 0 : index
    %151 = vector.load %arg17[%c4, %c0_150, %c0_151] : memref<8x32x128xf32, #tpu.memory_space<vmem>>, vector<1x32x128xf32>
    %152 = vector.shape_cast %151 : vector<1x32x128xf32> to vector<32x128xf32>
    %cst_152 = arith.constant dense<0.000000e+00> : vector<1x128xf32>
    %153 = tpu.matmul %150, %152, %cst_152 {dimension_numbers = #tpu.dot_dimension_numbers<[1], [0], [0], [1], [0, 0, 1, 1], [], []>} : vector<1x32xf32>, vector<32x128xf32>, vector<1x128xf32> -> vector<1x128xf32>
    %154 = arith.addf %149, %153 : vector<1x128xf32>
    %155 = vector.extract_strided_slice %124 {offsets = [5, 0], sizes = [1, 32], strides = [1, 1]} : vector<8x32xf32> to vector<1x32xf32>
    %c5 = arith.constant 5 : index
    %c0_153 = arith.constant 0 : index
    %c0_154 = arith.constant 0 : index
    %156 = vector.load %arg17[%c5, %c0_153, %c0_154] : memref<8x32x128xf32, #tpu.memory_space<vmem>>, vector<1x32x128xf32>
    %157 = vector.shape_cast %156 : vector<1x32x128xf32> to vector<32x128xf32>
    %cst_155 = arith.constant dense<0.000000e+00> : vector<1x128xf32>
    %158 = tpu.matmul %155, %157, %cst_155 {dimension_numbers = #tpu.dot_dimension_numbers<[1], [0], [0], [1], [0, 0, 1, 1], [], []>} : vector<1x32xf32>, vector<32x128xf32>, vector<1x128xf32> -> vector<1x128xf32>
    %159 = arith.addf %154, %158 : vector<1x128xf32>
    %160 = vector.extract_strided_slice %124 {offsets = [6, 0], sizes = [1, 32], strides = [1, 1]} : vector<8x32xf32> to vector<1x32xf32>
    %c6 = arith.constant 6 : index
    %c0_156 = arith.constant 0 : index
    %c0_157 = arith.constant 0 : index
    %161 = vector.load %arg17[%c6, %c0_156, %c0_157] : memref<8x32x128xf32, #tpu.memory_space<vmem>>, vector<1x32x128xf32>
    %162 = vector.shape_cast %161 : vector<1x32x128xf32> to vector<32x128xf32>
    %cst_158 = arith.constant dense<0.000000e+00> : vector<1x128xf32>
    %163 = tpu.matmul %160, %162, %cst_158 {dimension_numbers = #tpu.dot_dimension_numbers<[1], [0], [0], [1], [0, 0, 1, 1], [], []>} : vector<1x32xf32>, vector<32x128xf32>, vector<1x128xf32> -> vector<1x128xf32>
    %164 = arith.addf %159, %163 : vector<1x128xf32>
    %165 = vector.extract_strided_slice %124 {offsets = [7, 0], sizes = [1, 32], strides = [1, 1]} : vector<8x32xf32> to vector<1x32xf32>
    %c7 = arith.constant 7 : index
    %c0_159 = arith.constant 0 : index
    %c0_160 = arith.constant 0 : index
    %166 = vector.load %arg17[%c7, %c0_159, %c0_160] : memref<8x32x128xf32, #tpu.memory_space<vmem>>, vector<1x32x128xf32>
    %167 = vector.shape_cast %166 : vector<1x32x128xf32> to vector<32x128xf32>
    %cst_161 = arith.constant dense<0.000000e+00> : vector<1x128xf32>
    %168 = tpu.matmul %165, %167, %cst_161 {dimension_numbers = #tpu.dot_dimension_numbers<[1], [0], [0], [1], [0, 0, 1, 1], [], []>} : vector<1x32xf32>, vector<32x128xf32>, vector<1x128xf32> -> vector<1x128xf32>
    %169 = arith.addf %164, %168 : vector<1x128xf32>
    %cst_162 = arith.constant 0.000000e+00 : f32
    %170 = vector.broadcast %cst_162 : f32 to vector<1x128xf32>
    %171 = arith.maximumf %169, %170 : vector<1x128xf32>
    %c0_163 = arith.constant 0 : index
    %c0_164 = arith.constant 0 : index
    %172 = vector.load %arg20[%c0_163, %c0_164] : memref<128x8xf32, #tpu.memory_space<vmem>>, vector<128x8xf32>
    %cst_165 = arith.constant dense<0.000000e+00> : vector<1x8xf32>
    %173 = tpu.matmul %171, %172, %cst_165 {dimension_numbers = #tpu.dot_dimension_numbers<[1], [0], [0], [1], [0, 0, 1, 1], [], []>} : vector<1x128xf32>, vector<128x8xf32>, vector<1x8xf32> -> vector<1x8xf32>
    %c0_166 = arith.constant 0 : index
    %c0_167 = arith.constant 0 : index
    %174 = vector.load %arg21[%c0_166, %c0_167] : memref<1x8xf32, #tpu.memory_space<vmem>>, vector<1x8xf32>
    %175 = arith.addf %173, %174 : vector<1x8xf32>
    %cst_168 = arith.constant 0.000000e+00 : f32
    %176 = vector.broadcast %cst_168 : f32 to vector<1x8xf32>
    %177 = arith.maximumf %175, %176 : vector<1x8xf32>
    %178 = vector.extract_strided_slice %177 {offsets = [0, 0], sizes = [1, 2], strides = [1, 1]} : vector<1x8xf32> to vector<1x2xf32>
    %cst_169 = arith.constant dense<0xFF800000> : vector<1xf32>
    %179 = vector.multi_reduction <maximumf>, %178, %cst_169 [1] : vector<1x2xf32> to vector<1xf32>
    %180 = vector.shape_cast %179 : vector<1xf32> to vector<1x1xf32>
    %181 = vector.broadcast %180 : vector<1x1xf32> to vector<1x2xf32>
    %182 = arith.subf %178, %181 : vector<1x2xf32>
    %183 = math.exp %182 : vector<1x2xf32>
    %cst_170 = arith.constant dense<0.000000e+00> : vector<1xf32>
    %184 = vector.multi_reduction <add>, %183, %cst_170 [1] : vector<1x2xf32> to vector<1xf32>
    %185 = vector.shape_cast %184 : vector<1xf32> to vector<1x1xf32>
    %186 = vector.broadcast %185 : vector<1x1xf32> to vector<1x2xf32>
    %187 = arith.divf %183, %186 : vector<1x2xf32>
    %c0_171 = arith.constant 0 : index
    %c0_172 = arith.constant 0 : index
    %188 = vector.load %arg22[%c0_171, %c0_172] : memref<2x2xf32, #tpu.memory_space<vmem>>, vector<1x2xf32>
    tpu.vector_store %arg22[%c0_171, %c0_172], %187 {strides = array<i32>} : memref<2x2xf32, #tpu.memory_space<vmem>>, vector<1x2xf32>,
    %c1_173 = arith.constant 1 : index
    %c0_174 = arith.constant 0 : index
    %c0_175 = arith.constant 0 : index
    %189 = vector.load %arg0[%c1_173, %c0_174, %c0_175] : memref<2x64x192xf32, #tpu.memory_space<vmem>>, vector<1x64x192xf32>
    %190 = vector.shape_cast %189 : vector<1x64x192xf32> to vector<64x192xf32>
    %c0_176 = arith.constant 0 : index
    %c0_177 = arith.constant 0 : index
    %c0_178 = arith.constant 0 : index
    %191 = vector.load %arg3[%c0_176, %c0_177, %c0_178] : memref<2x64x64xf32, #tpu.memory_space<vmem>>, vector<1x64x64xf32>
    %192 = vector.shape_cast %191 : vector<1x64x64xf32> to vector<64x64xf32>
    %cst_179 = arith.constant dense<0.000000e+00> : vector<64x192xf32>
    %193 = tpu.matmul %192, %190, %cst_179 {dimension_numbers = #tpu.dot_dimension_numbers<[1], [0], [0], [1], [0, 0, 1, 1], [], []>} : vector<64x64xf32>, vector<64x192xf32>, vector<64x192xf32> -> vector<64x192xf32>
    %c0_180 = arith.constant 0 : index
    %c0_181 = arith.constant 0 : index
    %c0_182 = arith.constant 0 : index
    %194 = vector.load %arg2[%c0_180, %c0_181, %c0_182] : memref<3x192x256xf32, #tpu.memory_space<vmem>>, vector<1x192x256xf32>
    %195 = vector.shape_cast %194 : vector<1x192x256xf32> to vector<192x256xf32>
    %cst_183 = arith.constant dense<0.000000e+00> : vector<64x256xf32>
    %196 = tpu.matmul %193, %195, %cst_183 {dimension_numbers = #tpu.dot_dimension_numbers<[1], [0], [0], [1], [0, 0, 1, 1], [], []>} : vector<64x192xf32>, vector<192x256xf32>, vector<64x256xf32> -> vector<64x256xf32>
    %c1_184 = arith.constant 1 : index
    %c0_185 = arith.constant 0 : index
    %c0_186 = arith.constant 0 : index
    %197 = vector.load %arg2[%c1_184, %c0_185, %c0_186] : memref<3x192x256xf32, #tpu.memory_space<vmem>>, vector<1x192x256xf32>
    %198 = vector.shape_cast %197 : vector<1x192x256xf32> to vector<192x256xf32>
    %cst_187 = arith.constant dense<0.000000e+00> : vector<64x256xf32>
    %199 = tpu.matmul %190, %198, %cst_187 {dimension_numbers = #tpu.dot_dimension_numbers<[1], [0], [0], [1], [0, 0, 1, 1], [], []>} : vector<64x192xf32>, vector<192x256xf32>, vector<64x256xf32> -> vector<64x256xf32>
    %200 = arith.addf %196, %199 : vector<64x256xf32>
    %c1_188 = arith.constant 1 : index
    %c0_189 = arith.constant 0 : index
    %c0_190 = arith.constant 0 : index
    %201 = vector.load %arg3[%c1_188, %c0_189, %c0_190] : memref<2x64x64xf32, #tpu.memory_space<vmem>>, vector<1x64x64xf32>
    %202 = vector.shape_cast %201 : vector<1x64x64xf32> to vector<64x64xf32>
    %cst_191 = arith.constant dense<0.000000e+00> : vector<64x192xf32>
    %203 = tpu.matmul %202, %190, %cst_191 {dimension_numbers = #tpu.dot_dimension_numbers<[1], [0], [0], [1], [0, 0, 1, 1], [], []>} : vector<64x64xf32>, vector<64x192xf32>, vector<64x192xf32> -> vector<64x192xf32>
    %c2_192 = arith.constant 2 : index
    %c0_193 = arith.constant 0 : index
    %c0_194 = arith.constant 0 : index
    %204 = vector.load %arg2[%c2_192, %c0_193, %c0_194] : memref<3x192x256xf32, #tpu.memory_space<vmem>>, vector<1x192x256xf32>
    %205 = vector.shape_cast %204 : vector<1x192x256xf32> to vector<192x256xf32>
    %cst_195 = arith.constant dense<0.000000e+00> : vector<64x256xf32>
    %206 = tpu.matmul %203, %205, %cst_195 {dimension_numbers = #tpu.dot_dimension_numbers<[1], [0], [0], [1], [0, 0, 1, 1], [], []>} : vector<64x192xf32>, vector<192x256xf32>, vector<64x256xf32> -> vector<64x256xf32>
    %207 = arith.addf %200, %206 : vector<64x256xf32>
    %c0_196 = arith.constant 0 : index
    %c0_197 = arith.constant 0 : index
    %c0_198 = arith.constant 0 : index
    %208 = vector.load %arg4[%c0_196, %c0_197, %c0_198] : memref<2x1x256xf32, #tpu.memory_space<vmem>>, vector<1x1x256xf32>
    %209 = vector.shape_cast %208 : vector<1x1x256xf32> to vector<1x256xf32>
    %210 = vector.broadcast %209 : vector<1x256xf32> to vector<64x256xf32>
    %211 = arith.mulf %207, %210 : vector<64x256xf32>
    %c1_199 = arith.constant 1 : index
    %c0_200 = arith.constant 0 : index
    %c0_201 = arith.constant 0 : index
    %212 = vector.load %arg4[%c1_199, %c0_200, %c0_201] : memref<2x1x256xf32, #tpu.memory_space<vmem>>, vector<1x1x256xf32>
    %213 = vector.shape_cast %212 : vector<1x1x256xf32> to vector<1x256xf32>
    %214 = vector.broadcast %213 : vector<1x256xf32> to vector<64x256xf32>
    %215 = arith.addf %211, %214 : vector<64x256xf32>
    %cst_202 = arith.constant 0.000000e+00 : f32
    %216 = vector.broadcast %cst_202 : f32 to vector<64x256xf32>
    %217 = arith.maximumf %215, %216 : vector<64x256xf32>
    %c0_203 = arith.constant 0 : index
    %c0_204 = arith.constant 0 : index
    %c0_205 = arith.constant 0 : index
    %218 = vector.load %arg5[%c0_203, %c0_204, %c0_205] : memref<2x32x64xf32, #tpu.memory_space<vmem>>, vector<1x32x64xf32>
    %219 = vector.shape_cast %218 : vector<1x32x64xf32> to vector<32x64xf32>
    %cst_206 = arith.constant dense<0.000000e+00> : vector<32x256xf32>
    %220 = tpu.matmul %219, %217, %cst_206 {dimension_numbers = #tpu.dot_dimension_numbers<[1], [0], [0], [1], [0, 0, 1, 1], [], []>} : vector<32x64xf32>, vector<64x256xf32>, vector<32x256xf32> -> vector<32x256xf32>
    %c1_207 = arith.constant 1 : index
    %c0_208 = arith.constant 0 : index
    %c0_209 = arith.constant 0 : index
    %221 = vector.load %arg5[%c1_207, %c0_208, %c0_209] : memref<2x32x64xf32, #tpu.memory_space<vmem>>, vector<1x32x64xf32>
    %222 = vector.shape_cast %221 : vector<1x32x64xf32> to vector<32x64xf32>
    %cst_210 = arith.constant dense<0.000000e+00> : vector<32x256xf32>
    %223 = tpu.matmul %222, %217, %cst_210 {dimension_numbers = #tpu.dot_dimension_numbers<[1], [0], [0], [1], [0, 0, 1, 1], [], []>} : vector<32x64xf32>, vector<64x256xf32>, vector<32x256xf32> -> vector<32x256xf32>
    %224 = arith.maximumf %220, %223 : vector<32x256xf32>
    %c0_211 = arith.constant 0 : index
    %c0_212 = arith.constant 0 : index
    %c0_213 = arith.constant 0 : index
    %225 = vector.load %arg6[%c0_211, %c0_212, %c0_213] : memref<2x256x128xf32, #tpu.memory_space<vmem>>, vector<1x256x128xf32>
    %226 = vector.shape_cast %225 : vector<1x256x128xf32> to vector<256x128xf32>
    %cst_214 = arith.constant dense<0.000000e+00> : vector<32x128xf32>
    %227 = tpu.matmul %224, %226, %cst_214 {dimension_numbers = #tpu.dot_dimension_numbers<[1], [0], [0], [1], [0, 0, 1, 1], [], []>} : vector<32x256xf32>, vector<256x128xf32>, vector<32x128xf32> -> vector<32x128xf32>
    %c1_215 = arith.constant 1 : index
    %c0_216 = arith.constant 0 : index
    %c0_217 = arith.constant 0 : index
    %228 = vector.load %arg6[%c1_215, %c0_216, %c0_217] : memref<2x256x128xf32, #tpu.memory_space<vmem>>, vector<1x256x128xf32>
    %229 = vector.shape_cast %228 : vector<1x256x128xf32> to vector<256x128xf32>
    %cst_218 = arith.constant dense<0.000000e+00> : vector<32x128xf32>
    %230 = tpu.matmul %224, %229, %cst_218 {dimension_numbers = #tpu.dot_dimension_numbers<[1], [0], [0], [1], [0, 0, 1, 1], [], []>} : vector<32x256xf32>, vector<256x128xf32>, vector<32x128xf32> -> vector<32x128xf32>
    %231 = arith.maximumf %227, %230 : vector<32x128xf32>
    %c0_219 = arith.constant 0 : index
    %c0_220 = arith.constant 0 : index
    %c0_221 = arith.constant 0 : index
    %232 = vector.load %arg8[%c0_219, %c0_220, %c0_221] : memref<2x32x32xf32, #tpu.memory_space<vmem>>, vector<1x32x32xf32>
    %233 = vector.shape_cast %232 : vector<1x32x32xf32> to vector<32x32xf32>
    %cst_222 = arith.constant dense<0.000000e+00> : vector<32x128xf32>
    %234 = tpu.matmul %233, %231, %cst_222 {dimension_numbers = #tpu.dot_dimension_numbers<[1], [0], [0], [1], [0, 0, 1, 1], [], []>} : vector<32x32xf32>, vector<32x128xf32>, vector<32x128xf32> -> vector<32x128xf32>
    %c0_223 = arith.constant 0 : index
    %c0_224 = arith.constant 0 : index
    %c0_225 = arith.constant 0 : index
    %235 = vector.load %arg7[%c0_223, %c0_224, %c0_225] : memref<3x128x128xf32, #tpu.memory_space<vmem>>, vector<1x128x128xf32>
    %236 = vector.shape_cast %235 : vector<1x128x128xf32> to vector<128x128xf32>
    %cst_226 = arith.constant dense<0.000000e+00> : vector<32x128xf32>
    %237 = tpu.matmul %234, %236, %cst_226 {dimension_numbers = #tpu.dot_dimension_numbers<[1], [0], [0], [1], [0, 0, 1, 1], [], []>} : vector<32x128xf32>, vector<128x128xf32>, vector<32x128xf32> -> vector<32x128xf32>
    %c1_227 = arith.constant 1 : index
    %c0_228 = arith.constant 0 : index
    %c0_229 = arith.constant 0 : index
    %238 = vector.load %arg7[%c1_227, %c0_228, %c0_229] : memref<3x128x128xf32, #tpu.memory_space<vmem>>, vector<1x128x128xf32>
    %239 = vector.shape_cast %238 : vector<1x128x128xf32> to vector<128x128xf32>
    %cst_230 = arith.constant dense<0.000000e+00> : vector<32x128xf32>
    %240 = tpu.matmul %231, %239, %cst_230 {dimension_numbers = #tpu.dot_dimension_numbers<[1], [0], [0], [1], [0, 0, 1, 1], [], []>} : vector<32x128xf32>, vector<128x128xf32>, vector<32x128xf32> -> vector<32x128xf32>
    %241 = arith.addf %237, %240 : vector<32x128xf32>
    %c1_231 = arith.constant 1 : index
    %c0_232 = arith.constant 0 : index
    %c0_233 = arith.constant 0 : index
    %242 = vector.load %arg8[%c1_231, %c0_232, %c0_233] : memref<2x32x32xf32, #tpu.memory_space<vmem>>, vector<1x32x32xf32>
    %243 = vector.shape_cast %242 : vector<1x32x32xf32> to vector<32x32xf32>
    %cst_234 = arith.constant dense<0.000000e+00> : vector<32x128xf32>
    %244 = tpu.matmul %243, %231, %cst_234 {dimension_numbers = #tpu.dot_dimension_numbers<[1], [0], [0], [1], [0, 0, 1, 1], [], []>} : vector<32x32xf32>, vector<32x128xf32>, vector<32x128xf32> -> vector<32x128xf32>
    %c2_235 = arith.constant 2 : index
    %c0_236 = arith.constant 0 : index
    %c0_237 = arith.constant 0 : index
    %245 = vector.load %arg7[%c2_235, %c0_236, %c0_237] : memref<3x128x128xf32, #tpu.memory_space<vmem>>, vector<1x128x128xf32>
    %246 = vector.shape_cast %245 : vector<1x128x128xf32> to vector<128x128xf32>
    %cst_238 = arith.constant dense<0.000000e+00> : vector<32x128xf32>
    %247 = tpu.matmul %244, %246, %cst_238 {dimension_numbers = #tpu.dot_dimension_numbers<[1], [0], [0], [1], [0, 0, 1, 1], [], []>} : vector<32x128xf32>, vector<128x128xf32>, vector<32x128xf32> -> vector<32x128xf32>
    %248 = arith.addf %241, %247 : vector<32x128xf32>
    %c0_239 = arith.constant 0 : index
    %c0_240 = arith.constant 0 : index
    %c0_241 = arith.constant 0 : index
    %249 = vector.load %arg9[%c0_239, %c0_240, %c0_241] : memref<2x1x128xf32, #tpu.memory_space<vmem>>, vector<1x1x128xf32>
    %250 = vector.shape_cast %249 : vector<1x1x128xf32> to vector<1x128xf32>
    %251 = vector.broadcast %250 : vector<1x128xf32> to vector<32x128xf32>
    %252 = arith.mulf %248, %251 : vector<32x128xf32>
    %c1_242 = arith.constant 1 : index
    %c0_243 = arith.constant 0 : index
    %c0_244 = arith.constant 0 : index
    %253 = vector.load %arg9[%c1_242, %c0_243, %c0_244] : memref<2x1x128xf32, #tpu.memory_space<vmem>>, vector<1x1x128xf32>
    %254 = vector.shape_cast %253 : vector<1x1x128xf32> to vector<1x128xf32>
    %255 = vector.broadcast %254 : vector<1x128xf32> to vector<32x128xf32>
    %256 = arith.addf %252, %255 : vector<32x128xf32>
    %cst_245 = arith.constant 0.000000e+00 : f32
    %257 = vector.broadcast %cst_245 : f32 to vector<32x128xf32>
    %258 = arith.maximumf %256, %257 : vector<32x128xf32>
    %c0_246 = arith.constant 0 : index
    %c0_247 = arith.constant 0 : index
    %c0_248 = arith.constant 0 : index
    %259 = vector.load %arg10[%c0_246, %c0_247, %c0_248] : memref<2x16x32xf32, #tpu.memory_space<vmem>>, vector<1x16x32xf32>
    %260 = vector.shape_cast %259 : vector<1x16x32xf32> to vector<16x32xf32>
    %cst_249 = arith.constant dense<0.000000e+00> : vector<16x128xf32>
    %261 = tpu.matmul %260, %258, %cst_249 {dimension_numbers = #tpu.dot_dimension_numbers<[1], [0], [0], [1], [0, 0, 1, 1], [], []>} : vector<16x32xf32>, vector<32x128xf32>, vector<16x128xf32> -> vector<16x128xf32>
    %c1_250 = arith.constant 1 : index
    %c0_251 = arith.constant 0 : index
    %c0_252 = arith.constant 0 : index
    %262 = vector.load %arg10[%c1_250, %c0_251, %c0_252] : memref<2x16x32xf32, #tpu.memory_space<vmem>>, vector<1x16x32xf32>
    %263 = vector.shape_cast %262 : vector<1x16x32xf32> to vector<16x32xf32>
    %cst_253 = arith.constant dense<0.000000e+00> : vector<16x128xf32>
    %264 = tpu.matmul %263, %258, %cst_253 {dimension_numbers = #tpu.dot_dimension_numbers<[1], [0], [0], [1], [0, 0, 1, 1], [], []>} : vector<16x32xf32>, vector<32x128xf32>, vector<16x128xf32> -> vector<16x128xf32>
    %265 = arith.maximumf %261, %264 : vector<16x128xf32>
    %c0_254 = arith.constant 0 : index
    %c0_255 = arith.constant 0 : index
    %c0_256 = arith.constant 0 : index
    %266 = vector.load %arg11[%c0_254, %c0_255, %c0_256] : memref<2x128x64xf32, #tpu.memory_space<vmem>>, vector<1x128x64xf32>
    %267 = vector.shape_cast %266 : vector<1x128x64xf32> to vector<128x64xf32>
    %cst_257 = arith.constant dense<0.000000e+00> : vector<16x64xf32>
    %268 = tpu.matmul %265, %267, %cst_257 {dimension_numbers = #tpu.dot_dimension_numbers<[1], [0], [0], [1], [0, 0, 1, 1], [], []>} : vector<16x128xf32>, vector<128x64xf32>, vector<16x64xf32> -> vector<16x64xf32>
    %c1_258 = arith.constant 1 : index
    %c0_259 = arith.constant 0 : index
    %c0_260 = arith.constant 0 : index
    %269 = vector.load %arg11[%c1_258, %c0_259, %c0_260] : memref<2x128x64xf32, #tpu.memory_space<vmem>>, vector<1x128x64xf32>
    %270 = vector.shape_cast %269 : vector<1x128x64xf32> to vector<128x64xf32>
    %cst_261 = arith.constant dense<0.000000e+00> : vector<16x64xf32>
    %271 = tpu.matmul %265, %270, %cst_261 {dimension_numbers = #tpu.dot_dimension_numbers<[1], [0], [0], [1], [0, 0, 1, 1], [], []>} : vector<16x128xf32>, vector<128x64xf32>, vector<16x64xf32> -> vector<16x64xf32>
    %272 = arith.maximumf %268, %271 : vector<16x64xf32>
    %c0_262 = arith.constant 0 : index
    %c0_263 = arith.constant 0 : index
    %c0_264 = arith.constant 0 : index
    %273 = vector.load %arg13[%c0_262, %c0_263, %c0_264] : memref<2x16x16xf32, #tpu.memory_space<vmem>>, vector<1x16x16xf32>
    %274 = vector.shape_cast %273 : vector<1x16x16xf32> to vector<16x16xf32>
    %cst_265 = arith.constant dense<0.000000e+00> : vector<16x64xf32>
    %275 = tpu.matmul %274, %272, %cst_265 {dimension_numbers = #tpu.dot_dimension_numbers<[1], [0], [0], [1], [0, 0, 1, 1], [], []>} : vector<16x16xf32>, vector<16x64xf32>, vector<16x64xf32> -> vector<16x64xf32>
    %c0_266 = arith.constant 0 : index
    %c0_267 = arith.constant 0 : index
    %c0_268 = arith.constant 0 : index
    %276 = vector.load %arg12[%c0_266, %c0_267, %c0_268] : memref<3x64x64xf32, #tpu.memory_space<vmem>>, vector<1x64x64xf32>
    %277 = vector.shape_cast %276 : vector<1x64x64xf32> to vector<64x64xf32>
    %cst_269 = arith.constant dense<0.000000e+00> : vector<16x64xf32>
    %278 = tpu.matmul %275, %277, %cst_269 {dimension_numbers = #tpu.dot_dimension_numbers<[1], [0], [0], [1], [0, 0, 1, 1], [], []>} : vector<16x64xf32>, vector<64x64xf32>, vector<16x64xf32> -> vector<16x64xf32>
    %c1_270 = arith.constant 1 : index
    %c0_271 = arith.constant 0 : index
    %c0_272 = arith.constant 0 : index
    %279 = vector.load %arg12[%c1_270, %c0_271, %c0_272] : memref<3x64x64xf32, #tpu.memory_space<vmem>>, vector<1x64x64xf32>
    %280 = vector.shape_cast %279 : vector<1x64x64xf32> to vector<64x64xf32>
    %cst_273 = arith.constant dense<0.000000e+00> : vector<16x64xf32>
    %281 = tpu.matmul %272, %280, %cst_273 {dimension_numbers = #tpu.dot_dimension_numbers<[1], [0], [0], [1], [0, 0, 1, 1], [], []>} : vector<16x64xf32>, vector<64x64xf32>, vector<16x64xf32> -> vector<16x64xf32>
    %282 = arith.addf %278, %281 : vector<16x64xf32>
    %c1_274 = arith.constant 1 : index
    %c0_275 = arith.constant 0 : index
    %c0_276 = arith.constant 0 : index
    %283 = vector.load %arg13[%c1_274, %c0_275, %c0_276] : memref<2x16x16xf32, #tpu.memory_space<vmem>>, vector<1x16x16xf32>
    %284 = vector.shape_cast %283 : vector<1x16x16xf32> to vector<16x16xf32>
    %cst_277 = arith.constant dense<0.000000e+00> : vector<16x64xf32>
    %285 = tpu.matmul %284, %272, %cst_277 {dimension_numbers = #tpu.dot_dimension_numbers<[1], [0], [0], [1], [0, 0, 1, 1], [], []>} : vector<16x16xf32>, vector<16x64xf32>, vector<16x64xf32> -> vector<16x64xf32>
    %c2_278 = arith.constant 2 : index
    %c0_279 = arith.constant 0 : index
    %c0_280 = arith.constant 0 : index
    %286 = vector.load %arg12[%c2_278, %c0_279, %c0_280] : memref<3x64x64xf32, #tpu.memory_space<vmem>>, vector<1x64x64xf32>
    %287 = vector.shape_cast %286 : vector<1x64x64xf32> to vector<64x64xf32>
    %cst_281 = arith.constant dense<0.000000e+00> : vector<16x64xf32>
    %288 = tpu.matmul %285, %287, %cst_281 {dimension_numbers = #tpu.dot_dimension_numbers<[1], [0], [0], [1], [0, 0, 1, 1], [], []>} : vector<16x64xf32>, vector<64x64xf32>, vector<16x64xf32> -> vector<16x64xf32>
    %289 = arith.addf %282, %288 : vector<16x64xf32>
    %c0_282 = arith.constant 0 : index
    %c0_283 = arith.constant 0 : index
    %c0_284 = arith.constant 0 : index
    %290 = vector.load %arg14[%c0_282, %c0_283, %c0_284] : memref<2x1x64xf32, #tpu.memory_space<vmem>>, vector<1x1x64xf32>
    %291 = vector.shape_cast %290 : vector<1x1x64xf32> to vector<1x64xf32>
    %292 = vector.broadcast %291 : vector<1x64xf32> to vector<16x64xf32>
    %293 = arith.mulf %289, %292 : vector<16x64xf32>
    %c1_285 = arith.constant 1 : index
    %c0_286 = arith.constant 0 : index
    %c0_287 = arith.constant 0 : index
    %294 = vector.load %arg14[%c1_285, %c0_286, %c0_287] : memref<2x1x64xf32, #tpu.memory_space<vmem>>, vector<1x1x64xf32>
    %295 = vector.shape_cast %294 : vector<1x1x64xf32> to vector<1x64xf32>
    %296 = vector.broadcast %295 : vector<1x64xf32> to vector<16x64xf32>
    %297 = arith.addf %293, %296 : vector<16x64xf32>
    %cst_288 = arith.constant 0.000000e+00 : f32
    %298 = vector.broadcast %cst_288 : f32 to vector<16x64xf32>
    %299 = arith.maximumf %297, %298 : vector<16x64xf32>
    %c0_289 = arith.constant 0 : index
    %c0_290 = arith.constant 0 : index
    %c0_291 = arith.constant 0 : index
    %300 = vector.load %arg15[%c0_289, %c0_290, %c0_291] : memref<2x8x16xf32, #tpu.memory_space<vmem>>, vector<1x8x16xf32>
    %301 = vector.shape_cast %300 : vector<1x8x16xf32> to vector<8x16xf32>
    %cst_292 = arith.constant dense<0.000000e+00> : vector<8x64xf32>
    %302 = tpu.matmul %301, %299, %cst_292 {dimension_numbers = #tpu.dot_dimension_numbers<[1], [0], [0], [1], [0, 0, 1, 1], [], []>} : vector<8x16xf32>, vector<16x64xf32>, vector<8x64xf32> -> vector<8x64xf32>
    %c1_293 = arith.constant 1 : index
    %c0_294 = arith.constant 0 : index
    %c0_295 = arith.constant 0 : index
    %303 = vector.load %arg15[%c1_293, %c0_294, %c0_295] : memref<2x8x16xf32, #tpu.memory_space<vmem>>, vector<1x8x16xf32>
    %304 = vector.shape_cast %303 : vector<1x8x16xf32> to vector<8x16xf32>
    %cst_296 = arith.constant dense<0.000000e+00> : vector<8x64xf32>
    %305 = tpu.matmul %304, %299, %cst_296 {dimension_numbers = #tpu.dot_dimension_numbers<[1], [0], [0], [1], [0, 0, 1, 1], [], []>} : vector<8x16xf32>, vector<16x64xf32>, vector<8x64xf32> -> vector<8x64xf32>
    %306 = arith.maximumf %302, %305 : vector<8x64xf32>
    %c0_297 = arith.constant 0 : index
    %c0_298 = arith.constant 0 : index
    %c0_299 = arith.constant 0 : index
    %307 = vector.load %arg16[%c0_297, %c0_298, %c0_299] : memref<2x64x32xf32, #tpu.memory_space<vmem>>, vector<1x64x32xf32>
    %308 = vector.shape_cast %307 : vector<1x64x32xf32> to vector<64x32xf32>
    %cst_300 = arith.constant dense<0.000000e+00> : vector<8x32xf32>
    %309 = tpu.matmul %306, %308, %cst_300 {dimension_numbers = #tpu.dot_dimension_numbers<[1], [0], [0], [1], [0, 0, 1, 1], [], []>} : vector<8x64xf32>, vector<64x32xf32>, vector<8x32xf32> -> vector<8x32xf32>
    %c1_301 = arith.constant 1 : index
    %c0_302 = arith.constant 0 : index
    %c0_303 = arith.constant 0 : index
    %310 = vector.load %arg16[%c1_301, %c0_302, %c0_303] : memref<2x64x32xf32, #tpu.memory_space<vmem>>, vector<1x64x32xf32>
    %311 = vector.shape_cast %310 : vector<1x64x32xf32> to vector<64x32xf32>
    %cst_304 = arith.constant dense<0.000000e+00> : vector<8x32xf32>
    %312 = tpu.matmul %306, %311, %cst_304 {dimension_numbers = #tpu.dot_dimension_numbers<[1], [0], [0], [1], [0, 0, 1, 1], [], []>} : vector<8x64xf32>, vector<64x32xf32>, vector<8x32xf32> -> vector<8x32xf32>
    %313 = arith.maximumf %309, %312 : vector<8x32xf32>
    %c1_305 = arith.constant 1 : index
    %c0_306 = arith.constant 0 : index
    %314 = vector.load %arg1[%c1_305, %c0_306] : memref<2x64xf32, #tpu.memory_space<vmem>>, vector<1x64xf32>
    %c0_307 = arith.constant 0 : index
    %c0_308 = arith.constant 0 : index
    %315 = vector.load %arg18[%c0_307, %c0_308] : memref<64x128xf32, #tpu.memory_space<vmem>>, vector<64x128xf32>
    %cst_309 = arith.constant dense<0.000000e+00> : vector<1x128xf32>
    %316 = tpu.matmul %314, %315, %cst_309 {dimension_numbers = #tpu.dot_dimension_numbers<[1], [0], [0], [1], [0, 0, 1, 1], [], []>} : vector<1x64xf32>, vector<64x128xf32>, vector<1x128xf32> -> vector<1x128xf32>
    %c0_310 = arith.constant 0 : index
    %c0_311 = arith.constant 0 : index
    %317 = vector.load %arg19[%c0_310, %c0_311] : memref<1x128xf32, #tpu.memory_space<vmem>>, vector<1x128xf32>
    %318 = arith.addf %316, %317 : vector<1x128xf32>
    %319 = vector.extract_strided_slice %313 {offsets = [0, 0], sizes = [1, 32], strides = [1, 1]} : vector<8x32xf32> to vector<1x32xf32>
    %c0_312 = arith.constant 0 : index
    %c0_313 = arith.constant 0 : index
    %c0_314 = arith.constant 0 : index
    %320 = vector.load %arg17[%c0_312, %c0_313, %c0_314] : memref<8x32x128xf32, #tpu.memory_space<vmem>>, vector<1x32x128xf32>
    %321 = vector.shape_cast %320 : vector<1x32x128xf32> to vector<32x128xf32>
    %cst_315 = arith.constant dense<0.000000e+00> : vector<1x128xf32>
    %322 = tpu.matmul %319, %321, %cst_315 {dimension_numbers = #tpu.dot_dimension_numbers<[1], [0], [0], [1], [0, 0, 1, 1], [], []>} : vector<1x32xf32>, vector<32x128xf32>, vector<1x128xf32> -> vector<1x128xf32>
    %323 = arith.addf %318, %322 : vector<1x128xf32>
    %324 = vector.extract_strided_slice %313 {offsets = [1, 0], sizes = [1, 32], strides = [1, 1]} : vector<8x32xf32> to vector<1x32xf32>
    %c1_316 = arith.constant 1 : index
    %c0_317 = arith.constant 0 : index
    %c0_318 = arith.constant 0 : index
    %325 = vector.load %arg17[%c1_316, %c0_317, %c0_318] : memref<8x32x128xf32, #tpu.memory_space<vmem>>, vector<1x32x128xf32>
    %326 = vector.shape_cast %325 : vector<1x32x128xf32> to vector<32x128xf32>
    %cst_319 = arith.constant dense<0.000000e+00> : vector<1x128xf32>
    %327 = tpu.matmul %324, %326, %cst_319 {dimension_numbers = #tpu.dot_dimension_numbers<[1], [0], [0], [1], [0, 0, 1, 1], [], []>} : vector<1x32xf32>, vector<32x128xf32>, vector<1x128xf32> -> vector<1x128xf32>
    %328 = arith.addf %323, %327 : vector<1x128xf32>
    %329 = vector.extract_strided_slice %313 {offsets = [2, 0], sizes = [1, 32], strides = [1, 1]} : vector<8x32xf32> to vector<1x32xf32>
    %c2_320 = arith.constant 2 : index
    %c0_321 = arith.constant 0 : index
    %c0_322 = arith.constant 0 : index
    %330 = vector.load %arg17[%c2_320, %c0_321, %c0_322] : memref<8x32x128xf32, #tpu.memory_space<vmem>>, vector<1x32x128xf32>
    %331 = vector.shape_cast %330 : vector<1x32x128xf32> to vector<32x128xf32>
    %cst_323 = arith.constant dense<0.000000e+00> : vector<1x128xf32>
    %332 = tpu.matmul %329, %331, %cst_323 {dimension_numbers = #tpu.dot_dimension_numbers<[1], [0], [0], [1], [0, 0, 1, 1], [], []>} : vector<1x32xf32>, vector<32x128xf32>, vector<1x128xf32> -> vector<1x128xf32>
    %333 = arith.addf %328, %332 : vector<1x128xf32>
    %334 = vector.extract_strided_slice %313 {offsets = [3, 0], sizes = [1, 32], strides = [1, 1]} : vector<8x32xf32> to vector<1x32xf32>
    %c3_324 = arith.constant 3 : index
    %c0_325 = arith.constant 0 : index
    %c0_326 = arith.constant 0 : index
    %335 = vector.load %arg17[%c3_324, %c0_325, %c0_326] : memref<8x32x128xf32, #tpu.memory_space<vmem>>, vector<1x32x128xf32>
    %336 = vector.shape_cast %335 : vector<1x32x128xf32> to vector<32x128xf32>
    %cst_327 = arith.constant dense<0.000000e+00> : vector<1x128xf32>
    %337 = tpu.matmul %334, %336, %cst_327 {dimension_numbers = #tpu.dot_dimension_numbers<[1], [0], [0], [1], [0, 0, 1, 1], [], []>} : vector<1x32xf32>, vector<32x128xf32>, vector<1x128xf32> -> vector<1x128xf32>
    %338 = arith.addf %333, %337 : vector<1x128xf32>
    %339 = vector.extract_strided_slice %313 {offsets = [4, 0], sizes = [1, 32], strides = [1, 1]} : vector<8x32xf32> to vector<1x32xf32>
    %c4_328 = arith.constant 4 : index
    %c0_329 = arith.constant 0 : index
    %c0_330 = arith.constant 0 : index
    %340 = vector.load %arg17[%c4_328, %c0_329, %c0_330] : memref<8x32x128xf32, #tpu.memory_space<vmem>>, vector<1x32x128xf32>
    %341 = vector.shape_cast %340 : vector<1x32x128xf32> to vector<32x128xf32>
    %cst_331 = arith.constant dense<0.000000e+00> : vector<1x128xf32>
    %342 = tpu.matmul %339, %341, %cst_331 {dimension_numbers = #tpu.dot_dimension_numbers<[1], [0], [0], [1], [0, 0, 1, 1], [], []>} : vector<1x32xf32>, vector<32x128xf32>, vector<1x128xf32> -> vector<1x128xf32>
    %343 = arith.addf %338, %342 : vector<1x128xf32>
    %344 = vector.extract_strided_slice %313 {offsets = [5, 0], sizes = [1, 32], strides = [1, 1]} : vector<8x32xf32> to vector<1x32xf32>
    %c5_332 = arith.constant 5 : index
    %c0_333 = arith.constant 0 : index
    %c0_334 = arith.constant 0 : index
    %345 = vector.load %arg17[%c5_332, %c0_333, %c0_334] : memref<8x32x128xf32, #tpu.memory_space<vmem>>, vector<1x32x128xf32>
    %346 = vector.shape_cast %345 : vector<1x32x128xf32> to vector<32x128xf32>
    %cst_335 = arith.constant dense<0.000000e+00> : vector<1x128xf32>
    %347 = tpu.matmul %344, %346, %cst_335 {dimension_numbers = #tpu.dot_dimension_numbers<[1], [0], [0], [1], [0, 0, 1, 1], [], []>} : vector<1x32xf32>, vector<32x128xf32>, vector<1x128xf32> -> vector<1x128xf32>
    %348 = arith.addf %343, %347 : vector<1x128xf32>
    %349 = vector.extract_strided_slice %313 {offsets = [6, 0], sizes = [1, 32], strides = [1, 1]} : vector<8x32xf32> to vector<1x32xf32>
    %c6_336 = arith.constant 6 : index
    %c0_337 = arith.constant 0 : index
    %c0_338 = arith.constant 0 : index
    %350 = vector.load %arg17[%c6_336, %c0_337, %c0_338] : memref<8x32x128xf32, #tpu.memory_space<vmem>>, vector<1x32x128xf32>
    %351 = vector.shape_cast %350 : vector<1x32x128xf32> to vector<32x128xf32>
    %cst_339 = arith.constant dense<0.000000e+00> : vector<1x128xf32>
    %352 = tpu.matmul %349, %351, %cst_339 {dimension_numbers = #tpu.dot_dimension_numbers<[1], [0], [0], [1], [0, 0, 1, 1], [], []>} : vector<1x32xf32>, vector<32x128xf32>, vector<1x128xf32> -> vector<1x128xf32>
    %353 = arith.addf %348, %352 : vector<1x128xf32>
    %354 = vector.extract_strided_slice %313 {offsets = [7, 0], sizes = [1, 32], strides = [1, 1]} : vector<8x32xf32> to vector<1x32xf32>
    %c7_340 = arith.constant 7 : index
    %c0_341 = arith.constant 0 : index
    %c0_342 = arith.constant 0 : index
    %355 = vector.load %arg17[%c7_340, %c0_341, %c0_342] : memref<8x32x128xf32, #tpu.memory_space<vmem>>, vector<1x32x128xf32>
    %356 = vector.shape_cast %355 : vector<1x32x128xf32> to vector<32x128xf32>
    %cst_343 = arith.constant dense<0.000000e+00> : vector<1x128xf32>
    %357 = tpu.matmul %354, %356, %cst_343 {dimension_numbers = #tpu.dot_dimension_numbers<[1], [0], [0], [1], [0, 0, 1, 1], [], []>} : vector<1x32xf32>, vector<32x128xf32>, vector<1x128xf32> -> vector<1x128xf32>
    %358 = arith.addf %353, %357 : vector<1x128xf32>
    %cst_344 = arith.constant 0.000000e+00 : f32
    %359 = vector.broadcast %cst_344 : f32 to vector<1x128xf32>
    %360 = arith.maximumf %358, %359 : vector<1x128xf32>
    %c0_345 = arith.constant 0 : index
    %c0_346 = arith.constant 0 : index
    %361 = vector.load %arg20[%c0_345, %c0_346] : memref<128x8xf32, #tpu.memory_space<vmem>>, vector<128x8xf32>
    %cst_347 = arith.constant dense<0.000000e+00> : vector<1x8xf32>
    %362 = tpu.matmul %360, %361, %cst_347 {dimension_numbers = #tpu.dot_dimension_numbers<[1], [0], [0], [1], [0, 0, 1, 1], [], []>} : vector<1x128xf32>, vector<128x8xf32>, vector<1x8xf32> -> vector<1x8xf32>
    %c0_348 = arith.constant 0 : index
    %c0_349 = arith.constant 0 : index
    %363 = vector.load %arg21[%c0_348, %c0_349] : memref<1x8xf32, #tpu.memory_space<vmem>>, vector<1x8xf32>
    %364 = arith.addf %362, %363 : vector<1x8xf32>
    %cst_350 = arith.constant 0.000000e+00 : f32
    %365 = vector.broadcast %cst_350 : f32 to vector<1x8xf32>
    %366 = arith.maximumf %364, %365 : vector<1x8xf32>
    %367 = vector.extract_strided_slice %366 {offsets = [0, 0], sizes = [1, 2], strides = [1, 1]} : vector<1x8xf32> to vector<1x2xf32>
    %cst_351 = arith.constant dense<0xFF800000> : vector<1xf32>
    %368 = vector.multi_reduction <maximumf>, %367, %cst_351 [1] : vector<1x2xf32> to vector<1xf32>
    %369 = vector.shape_cast %368 : vector<1xf32> to vector<1x1xf32>
    %370 = vector.broadcast %369 : vector<1x1xf32> to vector<1x2xf32>
    %371 = arith.subf %367, %370 : vector<1x2xf32>
    %372 = math.exp %371 : vector<1x2xf32>
    %cst_352 = arith.constant dense<0.000000e+00> : vector<1xf32>
    %373 = vector.multi_reduction <add>, %372, %cst_352 [1] : vector<1x2xf32> to vector<1xf32>
    %374 = vector.shape_cast %373 : vector<1xf32> to vector<1x1xf32>
    %375 = vector.broadcast %374 : vector<1x1xf32> to vector<1x2xf32>
    %376 = arith.divf %372, %375 : vector<1x2xf32>
    %c1_353 = arith.constant 1 : index
    %c0_354 = arith.constant 0 : index
    %377 = vector.load %arg22[%c1_353, %c0_354] : memref<2x2xf32, #tpu.memory_space<vmem>>, vector<1x2xf32>
    tpu.vector_store %arg22[%c1_353, %c0_354], %376 {strides = array<i32>} : memref<2x2xf32, #tpu.memory_space<vmem>>, vector<1x2xf32>,
    return
  }
}

</mosaic_0001>

<bundles_post_ra>
// kernel: simple_cnn_forward.1
= control target key start
LH: loop header
LB: loop body
LE: loop exit
PB: predicated region body
PF: predicated region fallthrough
CT: control target
= control target key end

     0   :  { %s9252_s0 = inlined_call_operand.vmem [shape: f32[2,64,192], index: 0, kind: input, shape index: {}]   ;;  %s9253_s1 = inlined_call_operand.vmem [shape: f32[2,64], index: 1, kind: input, shape index: {}]   ;;  %s9254_s2 = inlined_call_operand.vmem [shape: f32[3,192,256], index: 2, kind: input, shape index: {}]   ;;  %s9255_s3 = inlined_call_operand.vmem [shape: f32[2,64,64], index: 3, kind: input, shape index: {}]   ;;  %s9256_s4 = inlined_call_operand.vmem [shape: f32[2,1,256], index: 4, kind: input, shape index: {}]   ;;  %s9257_s5 = inlined_call_operand.hbm [shape: f32[2,32,64], index: 5, kind: input, shape index: {}]   ;;  %s9258_s6 = inlined_call_operand.hbm [shape: f32[2,256,128], index: 6, kind: input, shape index: {}]   ;;  %s9259_s7 = inlined_call_operand.vmem [shape: f32[3,128,128], index: 7, kind: input, shape index: {}]   ;;  %s9260_s8 = inlined_call_operand.hbm [shape: f32[2,32,32], index: 8, kind: input, shape index: {}]   ;;  %s9261_s9 = inlined_call_operand.hbm [shape: f32[2,1,128], index: 9, kind: input, shape index: {}]   ;;  %s9262_s10 = inlined_call_operand.hbm [shape: f32[2,16,32], index: 10, kind: input, shape index: {}]   ;;  %s9263_s11 = inlined_call_operand.vmem [shape: f32[2,128,64], index: 11, kind: input, shape index: {}]   ;;  %s9264_s12 = inlined_call_operand.hbm [shape: f32[3,64,64], index: 12, kind: input, shape index: {}]   ;;  %s9265_s13 = inlined_call_operand.hbm [shape: f32[2,16,16], index: 13, kind: input, shape index: {}]   ;;  %s9266_s14 = inlined_call_operand.hbm [shape: f32[2,1,64], index: 14, kind: input, shape index: {}]   ;;  %s9267_s15 = inlined_call_operand.vmem [shape: f32[2,8,16], index: 15, kind: input, shape index: {}]   ;;  %s9268_s16 = inlined_call_operand.vmem [shape: f32[2,64,32], index: 16, kind: input, shape index: {}]   ;;  %s9269_s17 = inlined_call_operand.vmem [shape: f32[8,32,128], index: 17, kind: input, shape index: {}]   ;;  %s9270_s18 = inlined_call_operand.hbm [shape: f32[64,128], index: 18, kind: input, shape index: {}]   ;;  %s9271_s19 = inlined_call_operand.hbm [shape: f32[1,128], index: 19, kind: input, shape index: {}]   ;;  %s9272_s20 = inlined_call_operand.vmem [shape: f32[128,8], index: 20, kind: input, shape index: {}]   ;;  %s9273_s21 = inlined_call_operand.hbm [shape: f32[1,8], index: 21, kind: input, shape index: {}]   ;;  %s9274_s22 = inlined_call_operand.hbm [shape: f32[2,2], index: 22, kind: output, shape index: {}]  }
   0x1   :  { %9282 = sst [smem:[#allocation59_spill]] %s9252_s0 }
   0x2   :  { %9283 = sst [smem:[#allocation60_spill]] %s9253_s1 }
   0x3   :  { %9284 = sst [smem:[#allocation61_spill]] %s9254_s2 }
   0x4   :  { %9285 = sst [smem:[#allocation62_spill]] %s9255_s3 }
   0x5   :  { %9286 = sst [smem:[#allocation63_spill]] %s9256_s4 }
   0x6   :  { %9287 = sst [smem:[#allocation64_spill]] %s9257_s5 }
   0x7   :  { %9288 = sst [smem:[#allocation65_spill]] %s9258_s6 }
   0x8   :  { %9289 = sst [smem:[#allocation66_spill]] %s9274_s22 }
   0x9   :  { %27 = vsyncpa [#allocation3], 0 }
   0xa   :  { %28 = vsyncpa [#allocation6], 0 }
   0xb   :  { %29 = vsyncpa [#allocation9], 0 }
   0xc   :  { %30 = vsyncpa [#allocation12], 0 }
   0xd   :  { %31 = vsyncpa [#allocation15], 0 }
   0xe   :  { %32 = vsyncpa [#allocation18], 0 }
   0xf   :  { %33 = vsyncpa [#allocation4], 0  ;;  %s9290_s29 = sld [smem:[#allocation65_spill]]  ;;  %s6043_s4 = smov [#allocation5]  }
  0x10   :  { %s63_s0 = sshll.u32 %s6043_s4, 4  ;;  %s89_s5 = sshll.u32 %s9261_s9, 4  ;;  %s64_s0 = int_to_ptr.vmem [resolvable:$true] %s63_s0  ;;  %s90_s5 = int_to_ptr.hbm [resolvable:$true] %s89_s5 }
  0x11   :  { %s9280_s24 = smov 128   ;;  %s6045_s6 = smov 8  }
  0x12   :  { %s6046_s25 = smov [#allocation8]   ;;  %s6047_s2 = smov 16  }
  0x13   :  { %s91_s26 = sshll.u32 %s6046_s25, 4  ;;  %s6048_s27 = smov 1   ;;  %s92_s26 = int_to_ptr.vmem [resolvable:$true] %s91_s26 }
  0x14   :  { %97 = dma.hbm_to_vmem [thread:$0]  %s90_s5, 32, %s92_s26, [#allocation9], %s6047_s2, %s6047_s2, %s6048_s27  }
  0x15   :  { %s61_s30 = sshll.u32 %s9290_s29, 4  ;;  %s117_s29 = sshll.u32 %s9264_s12, 4  ;;  %s62_s30 = int_to_ptr.hbm [resolvable:$true] %s61_s30  ;;  %s118_s29 = int_to_ptr.hbm [resolvable:$true] %s117_s29 }
  0x16   :  { %69 = dma.hbm_to_vmem [thread:$0]  %s62_s30, 8192, %s64_s0, [#allocation6], %s9280_s24, %s9280_s24, %s6045_s6  }
  0x17   :  { %s6049_s4 = smov [#allocation11]   ;;  %s143_s22 = sshll.u32 %s9266_s14, 4  ;;  %s144_s22 = int_to_ptr.hbm [resolvable:$true] %s143_s22 }
  0x18   :  { %s119_s9 = sshll.u32 %s6049_s4, 4  ;;  %s6050_s30 = smov [#allocation14]   ;;  %s120_s9 = int_to_ptr.vmem [resolvable:$true] %s119_s9 }
  0x19   :  { %125 = dma.hbm_to_vmem [thread:$0]  %s118_s29, 3072, %s120_s9, [#allocation12], %s9280_s24, %s9280_s24, %s6045_s6  }
  0x1a   :  { %s145_s0 = sshll.u32 %s6050_s30, 4  ;;  %s176_s26 = sshll.u32 %s9271_s19, 4  ;;  %s146_s0 = int_to_ptr.vmem [resolvable:$true] %s145_s0  ;;  %s177_s26 = int_to_ptr.hbm [resolvable:$true] %s176_s26 }
  0x1b   :  { %151 = dma.hbm_to_vmem [thread:$0]  %s144_s22, 32, %s146_s0, [#allocation15], %s6047_s2, %s6047_s2, %s6048_s27  }
  0x1c   :  { %s9291_s28 = sld [smem:[#allocation64_spill]]  ;;  %s6051_s23 = smov [#allocation17]  }
  0x1d   :  { %s178_s14 = sshll.u32 %s6051_s23, 4  ;;  %s6052_s29 = smov [#allocation2]   ;;  %s179_s14 = int_to_ptr.vmem [resolvable:$true] %s178_s14 }
  0x1e   :  { %181 = dma.hbm_to_vmem [thread:$0]  %s177_s26, 16, %s179_s14, [#allocation18]  }
  0x1f   :  { %s50_s9 = sshll.u32 %s6052_s29, 4  ;;  %s76_s24 = sshll.u32 %s9260_s8, 4  ;;  %s51_s9 = int_to_ptr.vmem [resolvable:$true] %s50_s9  ;;  %s77_s24 = int_to_ptr.hbm [resolvable:$true] %s76_s24 }
  0x20   :  { %s9292_s19 = smov 128   ;;  %s102_s27 = sshll.u32 %s9262_s10, 4  ;;  %s103_s27 = int_to_ptr.hbm [resolvable:$true] %s102_s27 }
  0x21   :  { %s6053_s0 = smov [#allocation7]   ;;  %s6054_s25 = smov [#allocation10]  }
  0x22   :  { %s48_s4 = sshll.u32 %s9291_s28, 4  ;;  %s78_s5 = sshll.u32 %s6053_s0, 4  ;;  %s49_s4 = int_to_ptr.hbm [resolvable:$true] %s48_s4  ;;  %s79_s5 = int_to_ptr.vmem [resolvable:$true] %s78_s5 }
  0x23   :  { %56 = dma.hbm_to_vmem [thread:$0]  %s49_s4, 1024, %s51_s9, [#allocation3], %s9292_s19, %s9292_s19, %s6045_s6  }
  0x24   :  { %84 = dma.hbm_to_vmem [thread:$0]  %s77_s24, 1024, %s79_s5, [#allocation6], %s9292_s19, %s9292_s19, %s6045_s6  }
  0x25   :  { %s104_s8 = sshll.u32 %s6054_s25, 4  ;;  %s130_s3 = sshll.u32 %s9265_s13, 4  ;;  %s105_s8 = int_to_ptr.vmem [resolvable:$true] %s104_s8  ;;  %s131_s3 = int_to_ptr.hbm [resolvable:$true] %s130_s3 }
  0x26   :  { %110 = dma.hbm_to_vmem [thread:$0]  %s103_s27, 512, %s105_s8, [#allocation9], %s9292_s19, %s9292_s19, %s6045_s6  }
  0x27   :  { %s162_s4 = sshll.u32 %s9270_s18, 4  ;;  %s6055_s23 = smov [#allocation13]   ;;  %s163_s4 = int_to_ptr.hbm [resolvable:$true] %s162_s4 }
  0x28   :  { %s132_s14 = sshll.u32 %s6055_s23, 4  ;;  %s6056_s24 = smov [#allocation16]   ;;  %s133_s14 = int_to_ptr.vmem [resolvable:$true] %s132_s14 }
  0x29   :  { %138 = dma.hbm_to_vmem [thread:$0]  %s131_s3, 512, %s133_s14, [#allocation12], %s9292_s19, %s9292_s19, %s6045_s6  }
  0x2a   :  { %s164_s13 = sshll.u32 %s6056_s24, 4  ;;  %s189_s1 = sshll.u32 %s9273_s21, 4  ;;  %s165_s13 = int_to_ptr.vmem [resolvable:$true] %s164_s13  ;;  %s190_s1 = int_to_ptr.hbm [resolvable:$true] %s189_s1 }
  0x2b   :  { %170 = dma.hbm_to_vmem [thread:$0]  %s163_s4, 1024, %s165_s13, [#allocation15], %s9292_s19, %s9292_s19, %s6045_s6  }
  0x2c   :  { %s6057_s18 = smov [#allocation19]  }
  0x2d   :  { %s191_s30 = sshll.u32 %s6057_s18, 4  ;;  %s192_s30 = int_to_ptr.vmem [resolvable:$true] %s191_s30 }
  0x2e   :  { %194 = dma.hbm_to_vmem [thread:$0]  %s190_s1, 16, %s192_s30, [#allocation18]  }
  0x2f   :  { %6029 = dma.done.wait [#allocation3], 1024  }
  0x30   :  { %6030 = vsyncadd [#allocation3], 4294966272 }
  0x31   :  { %6031 = dma.done.wait [#allocation6], 9216  }
  0x32   :  { %6032 = vsyncadd [#allocation6], 4294958080 }
  0x33   :  { %6033 = dma.done.wait [#allocation9], 544  }
  0x34   :  { %6034 = vsyncadd [#allocation9], 4294966752 }
  0x35   :  { %6035 = dma.done.wait [#allocation12], 3584  }
  0x36   :  { %6036 = vsyncadd [#allocation12], 4294963712 }
  0x37   :  { %6037 = dma.done.wait [#allocation15], 1056  }
  0x38   :  { %6038 = vsyncadd [#allocation15], 4294966240 }
  0x39   :  { %6039 = dma.done.wait [#allocation18], 32  }
  0x3a   :  { %6040 = vsyncadd [#allocation18], 4294967264  ;;  %s9293_s6 = sld [smem:[#allocation59_spill]]  ;;  %vm263_vm0 = vcmask 523264   ;;  %vm1618_vm1 = vcmask 261120   ;;  %vm2016_vm2 = vcmask 130048  }
  0x3b   :  { %s9294_s19 = sld [smem:[#allocation61_spill]]  ;;  %vm2622_vm3 = vcmask 8192  }
  0x3c   :  { %s9295_s28 = sld [smem:[#allocation62_spill]] }
  0x3d   :  { %s9325_s21 = sld [smem:[#allocation63_spill]] }
  0x3e   :  { %s9355_s5 = sld [smem:[#allocation60_spill]] }
  0x3f   :  { %s9418_s12 = sld [smem:[#allocation66_spill]] }
  0x40   :  { %v6231_v0 = vld [vmem:[%s9293_s6 + $0x70] sm:$0xff]  ;;  %v6236_v1 = vld [vmem:[%s9293_s6 + $0x78] sm:$0xff]  ;;  %v6241_v2 = vld [vmem:[%s9293_s6 + $0x60] sm:$0xff] }
  0x41   :  { %296 = vmatpush.msra.mxu0 %v6231_v0  ;;  %337 = vmatpush.msra.mxu1 %v6236_v1  ;;  %v6248_v3 = vld [vmem:[%s9293_s6 + $0x68] sm:$0xff]  ;;  %v6253_v4 = vld [vmem:[%s9293_s6 + $0x50] sm:$0xff]  ;;  %v6258_v5 = vld [vmem:[%s9293_s6 + $0x58] sm:$0xff] }
  0x42   :  { %v6265_v6 = vld [vmem:[%s9293_s6 + $0x40] sm:$0xff]  ;;  %v6270_v7 = vld [vmem:[%s9293_s6 + $0x48] sm:$0xff]  ;;  %v6277_v8 = vld [vmem:[%s9293_s6 + $0x30] sm:$0xff] }
  0x43   :  { %297 = vmatpush.msra.mxu0 %v6241_v2  ;;  %338 = vmatpush.msra.mxu1 %v6248_v3  ;;  %v6282_v9 = vld [vmem:[%s9293_s6 + $0x38] sm:$0xff]  ;;  %v6287_v10 = vld [vmem:[%s9293_s6 + $0x20] sm:$0xff]  ;;  %v6294_v11 = vld [vmem:[%s9293_s6 + $0x28] sm:$0xff] }
  0x44   :  { %v5097_v12 = vld [vmem:[%s9294_s19 + $0x270] sm:$0xff]  ;;  %v6309_v14 = vld [vmem:[%s9293_s6 + $0x18] sm:$0xff]  ;;  %v6316_v15 = vld [vmem:[%s9293_s6] sm:$0xff] }
  0x45   :  { %298 = vmatpush.msra.mxu0 %v6253_v4  ;;  %339 = vmatpush.msra.mxu1 %v6258_v5  ;;  %v6304_v13 = vld [vmem:[%s9293_s6 + $0x10] sm:$0xff]  ;;  %v6321_v16 = vld [vmem:[%s9293_s6 + $0x8] sm:$0xff]  ;;  %v255_v17 = vld [vmem:[%s9295_s28] sm:$0xff] }
  0x46   :  { %491 = vmatpush.msra.mxu2 %v5097_v12  ;;  %v5095_v18 = vld [vmem:[%s9294_s19 + $0x260] sm:$0xff]  ;;  %v5098_v19 = vld [vmem:[%s9294_s19 + $0x278] sm:$0xff]  ;;  %v5093_v20 = vld [vmem:[%s9294_s19 + $0x250] sm:$0xff] }
  0x47   :  { %299 = vmatpush.msra.mxu0 %v6265_v6  ;;  %340 = vmatpush.msra.mxu1 %v6270_v7  ;;  %v5096_v21 = vld [vmem:[%s9294_s19 + $0x268] sm:$0xff]  ;;  %v5091_v22 = vld [vmem:[%s9294_s19 + $0x240] sm:$0xff]  ;;  %v5094_v23 = vld [vmem:[%s9294_s19 + $0x258] sm:$0xff] }
  0x48   :  { %492 = vmatpush.msra.mxu2 %v5095_v18  ;;  %v5089_v24 = vld [vmem:[%s9294_s19 + $0x230] sm:$0xff]  ;;  %v5092_v25 = vld [vmem:[%s9294_s19 + $0x248] sm:$0xff]  ;;  %v5087_v27 = vld [vmem:[%s9294_s19 + $0x220] sm:$0xff] }
  0x49   :  { %300 = vmatpush.msra.mxu0 %v6277_v8  ;;  %341 = vmatpush.msra.mxu1 %v6282_v9  ;;  %v256_v26 = vld [vmem:[%s9295_s28 + $0x8] sm:$0xff]  ;;  %v5090_v28 = vld [vmem:[%s9294_s19 + $0x238] sm:$0xff]  ;;  %v5085_v29 = vld [vmem:[%s9294_s19 + $0x210] sm:$0xff] }
  0x4a   :  { %493 = vmatpush.msra.mxu2 %v5093_v20  ;;  %v5088_v30 = vld [vmem:[%s9294_s19 + $0x228] sm:$0xff]  ;;  %v5083_v31 = vld [vmem:[%s9294_s19 + $0x200] sm:$0xff]  ;;  %v5086_v32 = vld [vmem:[%s9294_s19 + $0x218] sm:$0xff] }
  0x4b   :  { %301 = vmatpush.msra.mxu0 %v6287_v10  ;;  %342 = vmatpush.msra.mxu1 %v6294_v11  ;;  %v5113_v33 = vld [vmem:[%s9294_s19 + $0x2f0] sm:$0xff]  ;;  %v5084_v35 = vld [vmem:[%s9294_s19 + $0x208] sm:$0xff]  ;;  %v5079_v37 = vld [vmem:[%s9294_s19 + $0x1e0] sm:$0xff] }
  0x4c   :  { %494 = vmatpush.msra.mxu2 %v5091_v22  ;;  %v5081_v34 = vld [vmem:[%s9294_s19 + $0x1f0] sm:$0xff]  ;;  %540 = vmatpush.msra.mxu3 %v5113_v33  ;;  %v5111_v38 = vld [vmem:[%s9294_s19 + $0x2e0] sm:$0xff]  ;;  %v5082_v39 = vld [vmem:[%s9294_s19 + $0x1f8] sm:$0xff] }
  0x4d   :  { %302 = vmatpush.msra.mxu0 %v6304_v13  ;;  %343 = vmatpush.msra.mxu1 %v6309_v14  ;;  %v257_v36 = vld [vmem:[%s9295_s28 + $0x10] sm:$0xff]  ;;  %v5114_v40 = vld [vmem:[%s9294_s19 + $0x2f8] sm:$0xff]  ;;  %v5080_v43 = vld [vmem:[%s9294_s19 + $0x1e8] sm:$0xff] }
  0x4e   :  { %495 = vmatpush.msra.mxu2 %v5089_v24  ;;  %541 = vmatpush.msra.mxu3 %v5111_v38  ;;  %v5077_v41 = vld [vmem:[%s9294_s19 + $0x1d0] sm:$0xff]  ;;  %v5112_v44 = vld [vmem:[%s9294_s19 + $0x2e8] sm:$0xff]  ;;  %v5075_v45 = vld [vmem:[%s9294_s19 + $0x1c0] sm:$0xff] }
  0x4f   :  { %303 = vmatpush.msra.mxu0 %v6316_v15  ;;  %344 = vmatpush.msra.mxu1 %v6321_v16  ;;  %v5109_v42 = vld [vmem:[%s9294_s19 + $0x2d0] sm:$0xff]  ;;  %v5107_v46 = vld [vmem:[%s9294_s19 + $0x2c0] sm:$0xff]  ;;  %v5078_v47 = vld [vmem:[%s9294_s19 + $0x1d8] sm:$0xff] }
  0x50   :  { %5051 = vmatmul.msk.f32.vlgmr.msra.gmra.mxu0 %vm263_vm0, %v255_v17  ;;  %5059 = vmatmul.msk.f32.vlgmr.msra.gmra.mxu1 %vm263_vm0, %v255_v17  ;;  %v5110_v48 = vld [vmem:[%s9294_s19 + $0x2d8] sm:$0xff]  ;;  %v5073_v49 = vld [vmem:[%s9294_s19 + $0x1b0] sm:$0xff]  ;;  %v5076_v52 = vld [vmem:[%s9294_s19 + $0x1c8] sm:$0xff] }
  0x51   :  { %573 = vmatpush.msrb.mxu0 %v5098_v19  ;;  %496 = vmatpush.msra.mxu2 %v5087_v27  ;;  %v5105_v50 = vld [vmem:[%s9294_s19 + $0x2b0] sm:$0xff]  ;;  %v258_v51 = vld [vmem:[%s9295_s28 + $0x18] sm:$0xff]  ;;  %v5108_v53 = vld [vmem:[%s9294_s19 + $0x2c8] sm:$0xff] }
  0x52   :  { %622 = vmatpush.msrb.mxu1 %v5114_v40  ;;  %542 = vmatpush.msra.mxu3 %v5109_v42  ;;  %v5071_v54 = vld [vmem:[%s9294_s19 + $0x1a0] sm:$0xff]  ;;  %v5074_v56 = vld [vmem:[%s9294_s19 + $0x1b8] sm:$0xff]  ;;  %v5069_v58 = vld [vmem:[%s9294_s19 + $0x190] sm:$0xff] }
  0x53   :  { %574 = vmatpush.msrb.mxu0 %v5096_v21  ;;  %497 = vmatpush.msra.mxu2 %v5085_v29  ;;  %v5103_v55 = vld [vmem:[%s9294_s19 + $0x2a0] sm:$0xff]  ;;  %v5106_v57 = vld [vmem:[%s9294_s19 + $0x2b8] sm:$0xff]  ;;  %v5101_v59 = vld [vmem:[%s9294_s19 + $0x290] sm:$0xff] }
  0x54   :  { %623 = vmatpush.msrb.mxu1 %v5112_v44  ;;  %543 = vmatpush.msra.mxu3 %v5107_v46  ;;  %v5072_v60 = vld [vmem:[%s9294_s19 + $0x1a8] sm:$0xff]  ;;  %v5067_v62 = vld [vmem:[%s9294_s19 + $0x180] sm:$0xff]  ;;  %v5070_v12 = vld [vmem:[%s9294_s19 + $0x198] sm:$0xff] }
  0x55   :  { %575 = vmatpush.msrb.mxu0 %v5094_v23  ;;  %498 = vmatpush.msra.mxu2 %v5083_v31  ;;  %v5104_v61 = vld [vmem:[%s9294_s19 + $0x2a8] sm:$0xff]  ;;  %v5099_v63 = vld [vmem:[%s9294_s19 + $0x280] sm:$0xff]  ;;  %v5102_v17 = vld [vmem:[%s9294_s19 + $0x298] sm:$0xff] }
  0x56   :  { %624 = vmatpush.msrb.mxu1 %v5110_v48  ;;  %544 = vmatpush.msra.mxu3 %v5105_v50  ;;  %v259_v18 = vld [vmem:[%s9295_s28 + $0x20] sm:$0xff]  ;;  %v5068_v19 = vld [vmem:[%s9294_s19 + $0x188] sm:$0xff]  ;;  %v261_v22 = vld [vmem:[%s9295_s28 + $0x30] sm:$0xff] }
  0x57   :  { %576 = vmatpush.msrb.mxu0 %v5092_v25  ;;  %499 = vmatpush.msra.mxu2 %v5081_v34  ;;  %v5100_v20 = vld [vmem:[%s9294_s19 + $0x288] sm:$0xff]  ;;  %v262_v23 = vld [vmem:[%s9295_s28 + $0x38] sm:$0xff]  ;;  %v400_v24 = vld [vmem:[%s9294_s19 + $0xf0] sm:$0xff] }
  0x58   :  { %5052 = vmatmul.msk.f32.gmra.mxu0 %vm263_vm0, %v256_v26  ;;  %5060 = vmatmul.msk.f32.gmra.mxu1 %vm263_vm0, %v256_v26  ;;  %v260_v21 = vld [vmem:[%s9295_s28 + $0x28] sm:$0xff]  ;;  %v398_v25 = vld [vmem:[%s9294_s19 + $0xe0] sm:$0xff]  ;;  %v401_v26 = vld [vmem:[%s9294_s19 + $0xf8] sm:$0xff] }
  0x59   :  { %577 = vmatpush.msrb.mxu0 %v5090_v28  ;;  %500 = vmatpush.msra.mxu2 %v5079_v37  ;;  %v396_v27 = vld [vmem:[%s9294_s19 + $0xd0] sm:$0xff]  ;;  %v399_v28 = vld [vmem:[%s9294_s19 + $0xe8] sm:$0xff]  ;;  %v394_v29 = vld [vmem:[%s9294_s19 + $0xc0] sm:$0xff] }
  0x5a   :  { %625 = vmatpush.msrb.mxu1 %v5108_v53  ;;  %545 = vmatpush.msra.mxu3 %v5103_v55  ;;  %v392_v31 = vld [vmem:[%s9294_s19 + $0xb0] sm:$0xff]  ;;  %v390_v33 = vld [vmem:[%s9294_s19 + $0xa0] sm:$0xff]  ;;  %v393_v34 = vld [vmem:[%s9294_s19 + $0xb8] sm:$0xff] }
  0x5b   :  { %578 = vmatpush.msrb.mxu0 %v5088_v30  ;;  %501 = vmatpush.msra.mxu2 %v5077_v41  ;;  %v397_v30 = vld [vmem:[%s9294_s19 + $0xd8] sm:$0xff]  ;;  %v391_v37 = vld [vmem:[%s9294_s19 + $0xa8] sm:$0xff]  ;;  %v386_v38 = vld [vmem:[%s9294_s19 + $0x80] sm:$0xff] }
  0x5c   :  { %626 = vmatpush.msrb.mxu1 %v5106_v57  ;;  %546 = vmatpush.msra.mxu3 %v5101_v59  ;;  %v384_v40 = vld [vmem:[%s9294_s19 + $0x70] sm:$0xff]  ;;  %v387_v41 = vld [vmem:[%s9294_s19 + $0x88] sm:$0xff]  ;;  %v414_v42 = vld [vmem:[%s9294_s19 + $0x160] sm:$0xff] }
  0x5d   :  { %579 = vmatpush.msrb.mxu0 %v5086_v32  ;;  %502 = vmatpush.msra.mxu2 %v5075_v45  ;;  %v395_v32 = vld [vmem:[%s9294_s19 + $0xc8] sm:$0xff]  ;;  %v382_v44 = vld [vmem:[%s9294_s19 + $0x60] sm:$0xff]  ;;  %v385_v45 = vld [vmem:[%s9294_s19 + $0x78] sm:$0xff] }
  0x5e   :  { %627 = vmatpush.msrb.mxu1 %v5104_v61  ;;  %547 = vmatpush.msra.mxu3 %v5099_v63  ;;  %v412_v46 = vld [vmem:[%s9294_s19 + $0x150] sm:$0xff]  ;;  %v378_v50 = vld [vmem:[%s9294_s19 + $0x40] sm:$0xff]  ;;  %v413_v53 = vld [vmem:[%s9294_s19 + $0x158] sm:$0xff] }
  0x5f   :  { %580 = vmatpush.msrb.mxu0 %v5084_v35  ;;  %503 = vmatpush.msra.mxu2 %v5073_v49  ;;  %v416_v35 = vld [vmem:[%s9294_s19 + $0x170] sm:$0xff]  ;;  %v383_v49 = vld [vmem:[%s9294_s19 + $0x68] sm:$0xff]  ;;  %v406_v59 = vld [vmem:[%s9294_s19 + $0x120] sm:$0xff] }
  0x60   :  { %5053 = vmatmul.msk.f32.gmra.mxu0 %vm263_vm0, %v257_v36  ;;  %5061 = vmatmul.msk.f32.gmra.mxu1 %vm263_vm0, %v257_v36  ;;  %v388_v36 = vld [vmem:[%s9294_s19 + $0x90] sm:$0xff]  ;;  %v411_v57 = vld [vmem:[%s9294_s19 + $0x148] sm:$0xff]  ;;  %v409_v61 = vld [vmem:[%s9294_s19 + $0x138] sm:$0xff] }
  0x61   :  { %581 = vmatpush.msrb.mxu0 %v5082_v39  ;;  %504 = vmatpush.msra.mxu2 %v5071_v54  ;;  %v389_v39 = vld [vmem:[%s9294_s19 + $0x98] sm:$0xff]  ;;  %v380_v48 = vld [vmem:[%s9294_s19 + $0x50] sm:$0xff] }
  0x62   :  { %628 = vmatpush.msrb.mxu1 %v5102_v17  ;;  %5115 = vmatmul.msk.f32.vlgmr.msra.gmra.mxu3 %vm263_vm0, %v6321_v16  ;;  %v376_v54 = vld [vmem:[%s9294_s19 + $0x30] sm:$0xff]  ;;  %v407_v17 = vld [vmem:[%s9294_s19 + $0x128] sm:$0xff] }
  0x63   :  { %582 = vmatpush.msrb.mxu0 %v5080_v43  ;;  %505 = vmatpush.msra.mxu2 %v5069_v58  ;;  %v417_v43 = vld [vmem:[%s9294_s19 + $0x178] sm:$0xff]  ;;  %v408_v55 = vld [vmem:[%s9294_s19 + $0x130] sm:$0xff]  ;;  %v374_v58 = vld [vmem:[%s9294_s19 + $0x20] sm:$0xff] }
  0x64   :  { %629 = vmatpush.msrb.mxu1 %v5100_v20  ;;  %679 = vmatpush.msrb.mxu3 %v400_v24  ;;  %v404_v63 = vld [vmem:[%s9294_s19 + $0x110] sm:$0xff]  ;;  %v373_v20 = vld [vmem:[%s9294_s19 + $0x18] sm:$0xff] }
  0x65   :  { %583 = vmatpush.msrb.mxu0 %v5078_v47  ;;  %506 = vmatpush.msra.mxu2 %v5067_v62  ;;  %v415_v47 = vld [vmem:[%s9294_s19 + $0x168] sm:$0xff]  ;;  %v372_v62 = vld [vmem:[%s9294_s19 + $0x10] sm:$0xff] }
  0x66   :  { %507 = vmatmul.f32.vlgmr.msra.gmra.mxu2 %v6316_v15  ;;  %680 = vmatpush.msrb.mxu3 %v398_v25 }
  0x67   :  { %584 = vmatpush.msrb.mxu0 %v5076_v52  ;;  %728 = vmatpush.msrb.mxu2 %v416_v35  ;;  %v381_v52 = vld [vmem:[%s9294_s19 + $0x58] sm:$0xff] }
  0x68   :  { %5054 = vmatmul.msk.f32.gmra.mxu0 %vm263_vm0, %v258_v51  ;;  %5062 = vmatmul.msk.f32.gmra.mxu1 %vm263_vm0, %v258_v51  ;;  %v410_v51 = vld [vmem:[%s9294_s19 + $0x140] sm:$0xff]  ;;  %v5150_v35 = vld [vmem:[%s9295_s28 + $0x58] sm:$0xff] }
  0x69   :  { %585 = vmatpush.msrb.mxu0 %v5074_v56  ;;  %681 = vmatpush.msrb.mxu3 %v396_v27  ;;  %v379_v56 = vld [vmem:[%s9294_s19 + $0x48] sm:$0xff] }
  0x6a   :  { %5116 = vmatmul.msk.f32.gmra.mxu3 %vm263_vm0, %v6309_v14  ;;  %729 = vmatpush.msrb.mxu2 %v414_v42  ;;  %v5153_v42 = vld [vmem:[%s9295_s28 + $0x70] sm:$0xff] }
  0x6b   :  { %586 = vmatpush.msrb.mxu0 %v5072_v60  ;;  %682 = vmatpush.msrb.mxu3 %v394_v29  ;;  %v377_v60 = vld [vmem:[%s9294_s19 + $0x38] sm:$0xff]  ;;  %v5148_v29 = vld [vmem:[%s9295_s28 + $0x48] sm:$0xff] }
  0x6c   :  { %810 = vmatpush.msra.mxu1 %v417_v43  ;;  %730 = vmatpush.msrb.mxu2 %v412_v46 }
  0x6d   :  { %587 = vmatpush.msrb.mxu0 %v5070_v12  ;;  %683 = vmatpush.msrb.mxu3 %v392_v31  ;;  %v375_v12 = vld [vmem:[%s9294_s19 + $0x28] sm:$0xff] }
  0x6e   :  { %510 = vmatmul.f32.gmra.mxu2 %v6304_v13  ;;  %811 = vmatpush.msra.mxu1 %v415_v47 }
  0x6f   :  { %588 = vmatpush.msrb.mxu0 %v5068_v19  ;;  %684 = vmatpush.msrb.mxu3 %v390_v33  ;;  %v402_v19 = vld [vmem:[%s9294_s19 + $0x100] sm:$0xff] }
  0x70   :  { %5055 = vmatmul.msk.f32.gmra.mxu0 %vm263_vm0, %v259_v18  ;;  %5063 = vmatmul.msk.f32.gmra.mxu1 %vm263_vm0, %v259_v18  ;;  %v370_v18 = vld [vmem:[%s9294_s19] sm:$0xff] }
  0x71   :  { %761 = vmatpush.msra.mxu0 %v401_v26  ;;  %685 = vmatpush.msrb.mxu3 %v388_v36  ;;  %v5147_v26 = vld [vmem:[%s9295_s28 + $0x40] sm:$0xff] }
  0x72   :  { %5117 = vmatmul.msk.f32.gmra.mxu3 %vm263_vm0, %v6294_v11  ;;  %731 = vmatpush.msrb.mxu2 %v410_v51  ;;  %v5202_v51 = vld [vmem:[%s9294_s19 + $0x3f8] sm:$0xff] }
  0x73   :  { %762 = vmatpush.msra.mxu0 %v399_v28  ;;  %686 = vmatpush.msrb.mxu3 %v386_v38  ;;  %v5151_v38 = vld [vmem:[%s9295_s28 + $0x60] sm:$0xff] }
  0x74   :  { %812 = vmatpush.msra.mxu1 %v413_v53  ;;  %732 = vmatpush.msrb.mxu2 %v408_v55  ;;  %v5200_v53 = vld [vmem:[%s9294_s19 + $0x3e8] sm:$0xff]  ;;  %v5198_v55 = vld [vmem:[%s9294_s19 + $0x3d8] sm:$0xff] }
  0x75   :  { %763 = vmatpush.msra.mxu0 %v397_v30  ;;  %687 = vmatpush.msrb.mxu3 %v384_v40 }
  0x76   :  { %513 = vmatmul.f32.gmra.mxu2 %v6287_v10  ;;  %813 = vmatpush.msra.mxu1 %v411_v57  ;;  %v5196_v57 = vld [vmem:[%s9294_s19 + $0x3c8] sm:$0xff] }
  0x77   :  { %764 = vmatpush.msra.mxu0 %v395_v32  ;;  %688 = vmatpush.msrb.mxu3 %v382_v44  ;;  %v5149_v32 = vld [vmem:[%s9295_s28 + $0x50] sm:$0xff] }
  0x78   :  { %5056 = vmatmul.msk.f32.gmra.mxu0 %vm263_vm0, %v260_v21  ;;  %5064 = vmatmul.msk.f32.gmra.mxu1 %vm263_vm0, %v260_v21  ;;  %v405_v21 = vld [vmem:[%s9294_s19 + $0x118] sm:$0xff] }
  0x79   :  { %765 = vmatpush.msra.mxu0 %v393_v34  ;;  %689 = vmatpush.msrb.mxu3 %v380_v48 }
  0x7a   :  { %5118 = vmatmul.msk.f32.gmra.mxu3 %vm263_vm0, %v6282_v9  ;;  %733 = vmatpush.msrb.mxu2 %v406_v59 }
  0x7b   :  { %766 = vmatpush.msra.mxu0 %v391_v37  ;;  %690 = vmatpush.msrb.mxu3 %v378_v50  ;;  %v5201_v50 = vld [vmem:[%s9294_s19 + $0x3f0] sm:$0xff] }
  0x7c   :  { %814 = vmatpush.msra.mxu1 %v409_v61  ;;  %734 = vmatpush.msrb.mxu2 %v404_v63  ;;  %v5194_v61 = vld [vmem:[%s9294_s19 + $0x3b8] sm:$0xff]  ;;  %v5192_v63 = vld [vmem:[%s9294_s19 + $0x3a8] sm:$0xff] }
  0x7d   :  { %767 = vmatpush.msra.mxu0 %v389_v39  ;;  %691 = vmatpush.msrb.mxu3 %v376_v54  ;;  %v5152_v39 = vld [vmem:[%s9295_s28 + $0x68] sm:$0xff]  ;;  %v5197_v54 = vld [vmem:[%s9294_s19 + $0x3d0] sm:$0xff] }
  0x7e   :  { %516 = vmatmul.f32.gmra.mxu2 %v6277_v8  ;;  %815 = vmatpush.msra.mxu1 %v407_v17  ;;  %v5190_v17 = vld [vmem:[%s9294_s19 + $0x398] sm:$0xff] }
  0x7f   :  { %768 = vmatpush.msra.mxu0 %v387_v41  ;;  %692 = vmatpush.msrb.mxu3 %v374_v58 }
  0x80   :  { %5057 = vmatmul.msk.f32.gmra.mxu0 %vm263_vm0, %v261_v22  ;;  %5065 = vmatmul.msk.f32.gmra.mxu1 %vm263_vm0, %v261_v22  ;;  %v371_v22 = vld [vmem:[%s9294_s19 + $0x8] sm:$0xff] }
  0x81   :  { %769 = vmatpush.msra.mxu0 %v385_v45  ;;  %693 = vmatpush.msrb.mxu3 %v372_v62  ;;  %v5154_v45 = vld [vmem:[%s9295_s28 + $0x78] sm:$0xff]  ;;  %v5191_v62 = vld [vmem:[%s9294_s19 + $0x3a0] sm:$0xff] }
  0x82   :  { %5119 = vmatmul.msk.f32.gmra.mxu3 %vm263_vm0, %v6270_v7  ;;  %735 = vmatpush.msrb.mxu2 %v402_v19  ;;  %v5188_v19 = vld [vmem:[%s9294_s19 + $0x388] sm:$0xff] }
  0x83   :  { %770 = vmatpush.msra.mxu0 %v383_v49  ;;  %694 = vmatpush.msrb.mxu3 %v370_v18  ;;  %v5187_v18 = vld [vmem:[%s9294_s19 + $0x380] sm:$0xff] }
  0x84   :  { %816 = vmatpush.msra.mxu1 %v405_v21  ;;  %925 = vmatpush.msra.mxu2 %v6236_v1 }
  0x85   :  { %771 = vmatpush.msra.mxu0 %v381_v52  ;;  %884 = vmatpush.msra.mxu3 %v6231_v0  ;;  %v5199_v52 = vld [vmem:[%s9294_s19 + $0x3e0] sm:$0xff] }
  0x86   :  { %519 = vmatmul.f32.gmra.mxu2 %v6265_v6 }
  0x87   :  { %772 = vmatpush.msra.mxu0 %v379_v56  ;;  %885 = vmatpush.msra.mxu3 %v6241_v2  ;;  %v5195_v56 = vld [vmem:[%s9294_s19 + $0x3c0] sm:$0xff] }
  0x88   :  { %5058 = vmatmul.msk.f32.gmra.mxu0 %vm263_vm0, %v262_v23  ;;  %5066 = vmatmul.msk.f32.gmra.mxu1 %vm263_vm0, %v262_v23  ;;  %v403_v23 = vld [vmem:[%s9294_s19 + $0x108] sm:$0xff] }
  0x89   :  { %773 = vmatpush.msra.mxu0 %v377_v60  ;;  %817 = vmatpush.msra.mxu1 %v403_v23  ;;  %v5193_v60 = vld [vmem:[%s9294_s19 + $0x3b0] sm:$0xff] }
  0x8a   :  { %5120 = vmatmul.msk.f32.gmra.mxu3 %vm263_vm0, %v6258_v5  ;;  %926 = vmatpush.msra.mxu2 %v6248_v3  ;;  %v5217_v23 = vld [vmem:[%s9294_s19 + $0x470] sm:$0xff] }
  0x8b   :  { %774 = vmatpush.msra.mxu0 %v375_v12  ;;  %886 = vmatpush.msra.mxu3 %v6253_v4  ;;  %v5189_v12 = vld [vmem:[%s9294_s19 + $0x390] sm:$0xff] }
  0x8c   :  { %927 = vmatpush.msra.mxu2 %v6258_v5 }
  0x8d   :  { %775 = vmatpush.msra.mxu0 %v373_v20  ;;  %887 = vmatpush.msra.mxu3 %v6265_v6 }
  0x8e   :  { %522 = vmatmul.f32.gmra.mxu2 %v6253_v4 }
  0x8f   :  { %776 = vmatpush.msra.mxu0 %v371_v22  ;;  %928 = vmatpush.msra.mxu2 %v6270_v7  ;;  %v5185_v22 = vld [vmem:[%s9294_s19 + $0x370] sm:$0xff] }
  0x90   :  { %589 = vmatmul.f32.vlgmr.msrb.gmra.mxu0 %v6316_v15  ;;  %5123 = vmatmul.msk.f32.vlgmr.msrb.gmra.mxu1 %vm263_vm0, %v6321_v16 }
  0x91   :  { %888 = vmatpush.msra.mxu3 %v6277_v8  ;;  %929 = vmatpush.msra.mxu2 %v6282_v9 }
  0x92   :  { %5121 = vmatmul.msk.f32.gmra.mxu3 %vm263_vm0, %v6248_v3  ;;  %1031 = vmatpush.msrb.mxu0 %v5201_v50  ;;  %v5173_v50 = vld [vmem:[%s9294_s19 + $0x310] sm:$0xff] }
  0x93   :  { %889 = vmatpush.msra.mxu3 %v6287_v10  ;;  %930 = vmatpush.msra.mxu2 %v6294_v11 }
  0x94   :  { %1032 = vmatpush.msrb.mxu0 %v5199_v52  ;;  %1080 = vmatpush.msrb.mxu1 %v5217_v23  ;;  %v5174_v52 = vld [vmem:[%s9294_s19 + $0x318] sm:$0xff] }
  0x95   :  { %890 = vmatpush.msra.mxu3 %v6304_v13  ;;  %931 = vmatpush.msra.mxu2 %v6309_v14 }
  0x96   :  { %525 = vmatmul.f32.gmra.mxu2 %v6241_v2  ;;  %1033 = vmatpush.msrb.mxu0 %v5197_v54 }
  0x97   :  { %891 = vmatpush.msra.mxu3 %v6316_v15  ;;  %932 = vmatpush.msra.mxu2 %v6321_v16 }
  0x98   :  { %592 = vmatmul.f32.gmra.mxu0 %v6304_v13  ;;  %5124 = vmatmul.msk.f32.gmra.mxu1 %vm263_vm0, %v6309_v14 }
  0x99   :  { %1034 = vmatpush.msrb.mxu0 %v5195_v56  ;;  %v5171_v56 = vld [vmem:[%s9294_s19 + $0x300] sm:$0xff] }
  0x9a   :  { %5122 = vmatmul.msk.f32.gmra.mxu3 %vm263_vm0, %v6236_v1 }
  0x9b   :  { %1035 = vmatpush.msrb.mxu0 %v5193_v60  ;;  %v5172_v60 = vld [vmem:[%s9294_s19 + $0x308] sm:$0xff] }
  0x9d   :  { %1036 = vmatpush.msrb.mxu0 %v5191_v62 }
  0x9e   :  { %528 = vmatmul.f32.gmra.mxu2 %v6231_v0 }
  0x9f   :  { %1037 = vmatpush.msrb.mxu0 %v5189_v12 }
  0xa0   :  { %595 = vmatmul.f32.gmra.mxu0 %v6287_v10  ;;  %5125 = vmatmul.msk.f32.gmra.mxu1 %vm263_vm0, %v6294_v11 }
  0xa1   :  { %1038 = vmatpush.msrb.mxu0 %v5187_v18 }
  0xa3   :  { %1039 = vmatpush.msrb.mxu0 %v5185_v22 }
  0xa8   :  { %598 = vmatmul.f32.gmra.mxu0 %v6277_v8  ;;  %5126 = vmatmul.msk.f32.gmra.mxu1 %vm263_vm0, %v6282_v9 }
  0xb0   :  { %601 = vmatmul.f32.gmra.mxu0 %v6265_v6  ;;  %5127 = vmatmul.msk.f32.gmra.mxu1 %vm263_vm0, %v6270_v7 }
  0xb8   :  { %604 = vmatmul.f32.gmra.mxu0 %v6253_v4  ;;  %5128 = vmatmul.msk.f32.gmra.mxu1 %vm263_vm0, %v6258_v5 }
  0xc0   :  { %607 = vmatmul.f32.gmra.mxu0 %v6241_v2  ;;  %5129 = vmatmul.msk.f32.gmra.mxu1 %vm263_vm0, %v6248_v3 }
  0xc8   :  { %610 = vmatmul.f32.gmra.mxu0 %v6231_v0  ;;  %5130 = vmatmul.msk.f32.gmra.mxu1 %vm263_vm0, %v6236_v1 }
  0xcd   :  { %v305_v4 = vpop.f32.mrf.mxu0  ;;  %v346_v5 = vpop.f32.mrf.mxu1 }
  0xce   :  { %695 = vmatmul.f32.vlgmr.msrb.gmra.mxu3 %v305_v4  ;;  %5131 = vmatmul.msk.f32.vlgmr.msrb.gmra.mxu2 %vm263_vm0, %v346_v5 }
  0xcf   :  { %1113 = vmatpush.msrb.mxu3 %v5202_v51  ;;  %v5205_v51 = vld [vmem:[%s9294_s19 + $0x410] sm:$0xff] }
  0xd0   :  { %777 = vmatmul.f32.vlgmr.msra.gmra.mxu0 %v305_v4  ;;  %5139 = vmatmul.msk.f32.vlgmr.msra.gmra.mxu1 %vm263_vm0, %v346_v5  ;;  %v5186_v4 = vld [vmem:[%s9294_s19 + $0x378] sm:$0xff] }
  0xd1   :  { %1114 = vmatpush.msrb.mxu3 %v5200_v53  ;;  %v5218_v5 = vld [vmem:[%s9294_s19 + $0x478] sm:$0xff] }
  0xd2   :  { %1162 = vmatpush.msrb.mxu2 %v5218_v5  ;;  %v5206_v53 = vld [vmem:[%s9294_s19 + $0x418] sm:$0xff] }
  0xd3   :  { %1115 = vmatpush.msrb.mxu3 %v5198_v55 }
  0xd5   :  { %v308_v2 = vpop.f32.mrf.mxu0  ;;  %v349_v3 = vpop.f32.mrf.mxu1  ;;  %1116 = vmatpush.msrb.mxu3 %v5196_v57  ;;  %v5203_v57 = vld [vmem:[%s9294_s19 + $0x400] sm:$0xff] }
  0xd6   :  { %698 = vmatmul.f32.gmra.mxu3 %v308_v2  ;;  %5132 = vmatmul.msk.f32.gmra.mxu2 %vm263_vm0, %v349_v3 }
  0xd7   :  { %1117 = vmatpush.msrb.mxu3 %v5194_v61 }
  0xd8   :  { %780 = vmatmul.f32.gmra.mxu0 %v308_v2  ;;  %5140 = vmatmul.msk.f32.gmra.mxu1 %vm263_vm0, %v349_v3  ;;  %v5183_v2 = vld [vmem:[%s9294_s19 + $0x360] sm:$0xff] }
  0xd9   :  { %1118 = vmatpush.msrb.mxu3 %v5192_v63  ;;  %v5215_v3 = vld [vmem:[%s9294_s19 + $0x460] sm:$0xff]  ;;  %1040 = vmatpush.msrb.mxu0 %v5183_v2  ;;  %v5204_v63 = vld [vmem:[%s9294_s19 + $0x408] sm:$0xff] }
  0xda   :  { %1081 = vmatpush.msrb.mxu1 %v5215_v3 }
  0xdb   :  { %1119 = vmatpush.msrb.mxu3 %v5190_v17 }
  0xdd   :  { %v311_v0 = vpop.f32.mrf.mxu0  ;;  %v352_v6 = vpop.f32.mrf.mxu1  ;;  %1120 = vmatpush.msrb.mxu3 %v5188_v19 }
  0xde   :  { %701 = vmatmul.f32.gmra.mxu3 %v311_v0  ;;  %5133 = vmatmul.msk.f32.gmra.mxu2 %vm263_vm0, %v352_v6 }
  0xdf   :  { %1121 = vmatpush.msrb.mxu3 %v5186_v4 }
  0xe0   :  { %783 = vmatmul.f32.gmra.mxu0 %v311_v0  ;;  %5141 = vmatmul.msk.f32.gmra.mxu1 %vm263_vm0, %v352_v6  ;;  %v5184_v0 = vld [vmem:[%s9294_s19 + $0x368] sm:$0xff] }
  0xe1   :  { %v5216_v6 = vld [vmem:[%s9294_s19 + $0x468] sm:$0xff]  ;;  %1122 = vmatpush.msrb.mxu3 %v5184_v0 }
  0xe2   :  { %1163 = vmatpush.msrb.mxu2 %v5216_v6 }
  0xe5   :  { %v314_v1 = vpop.f32.mrf.mxu0  ;;  %v355_v7 = vpop.f32.mrf.mxu1 }
  0xe6   :  { %704 = vmatmul.f32.gmra.mxu3 %v314_v1  ;;  %5134 = vmatmul.msk.f32.gmra.mxu2 %vm263_vm0, %v355_v7  ;;  %v6732_v16 = vpop.f32.mrf.mxu3 }
  0xe8   :  { %786 = vmatmul.f32.gmra.mxu0 %v314_v1  ;;  %5142 = vmatmul.msk.f32.gmra.mxu1 %vm263_vm0, %v355_v7  ;;  %v5181_v1 = vld [vmem:[%s9294_s19 + $0x350] sm:$0xff] }
  0xe9   :  { %v6730_v15 = vpop.f32.mrf.mxu2  ;;  %v5213_v7 = vld [vmem:[%s9294_s19 + $0x450] sm:$0xff]  ;;  %1041 = vmatpush.msrb.mxu0 %v5181_v1 }
  0xea   :  { %1082 = vmatpush.msrb.mxu1 %v5213_v7 }
  0xed   :  { %v317_v8 = vpop.f32.mrf.mxu0  ;;  %v358_v9 = vpop.f32.mrf.mxu1 }
  0xee   :  { %707 = vmatmul.f32.gmra.mxu3 %v317_v8  ;;  %5135 = vmatmul.msk.f32.gmra.mxu2 %vm263_vm0, %v358_v9  ;;  %v6741_v28 = vpop.f32.mrf.mxu3 }
  0xf0   :  { %789 = vmatmul.f32.gmra.mxu0 %v317_v8  ;;  %5143 = vmatmul.msk.f32.gmra.mxu1 %vm263_vm0, %v358_v9  ;;  %v5182_v8 = vld [vmem:[%s9294_s19 + $0x358] sm:$0xff] }
  0xf1   :  { %v6739_v27 = vpop.f32.mrf.mxu2  ;;  %v5214_v9 = vld [vmem:[%s9294_s19 + $0x458] sm:$0xff]  ;;  %1123 = vmatpush.msrb.mxu3 %v5182_v8 }
  0xf2   :  { %1164 = vmatpush.msrb.mxu2 %v5214_v9 }
  0xf5   :  { %v320_v10 = vpop.f32.mrf.mxu0  ;;  %v361_v11 = vpop.f32.mrf.mxu1 }
  0xf6   :  { %710 = vmatmul.f32.gmra.mxu3 %v320_v10  ;;  %5136 = vmatmul.msk.f32.gmra.mxu2 %vm263_vm0, %v361_v11  ;;  %v6750_v31 = vpop.f32.mrf.mxu3 }
  0xf8   :  { %792 = vmatmul.f32.gmra.mxu0 %v320_v10  ;;  %5144 = vmatmul.msk.f32.gmra.mxu1 %vm263_vm0, %v361_v11  ;;  %v5179_v10 = vld [vmem:[%s9294_s19 + $0x340] sm:$0xff] }
  0xf9   :  { %v6748_v30 = vpop.f32.mrf.mxu2  ;;  %v5211_v11 = vld [vmem:[%s9294_s19 + $0x440] sm:$0xff]  ;;  %1042 = vmatpush.msrb.mxu0 %v5179_v10 }
  0xfa   :  { %1083 = vmatpush.msrb.mxu1 %v5211_v11 }
  0xfd   :  { %v323_v13 = vpop.f32.mrf.mxu0  ;;  %v364_v14 = vpop.f32.mrf.mxu1 }
  0xfe   :  { %713 = vmatmul.f32.gmra.mxu3 %v323_v13  ;;  %5137 = vmatmul.msk.f32.gmra.mxu2 %vm263_vm0, %v364_v14  ;;  %v6761_v34 = vpop.f32.mrf.mxu3 }
 0x100   :  { %795 = vmatmul.f32.gmra.mxu0 %v323_v13  ;;  %5145 = vmatmul.msk.f32.gmra.mxu1 %vm263_vm0, %v364_v14  ;;  %v5180_v13 = vld [vmem:[%s9294_s19 + $0x348] sm:$0xff] }
 0x101   :  { %v6759_v33 = vpop.f32.mrf.mxu2  ;;  %1124 = vmatpush.msrb.mxu3 %v5180_v13 }
 0x105   :  { %v326_v24 = vpop.f32.mrf.mxu0  ;;  %v367_v25 = vpop.f32.mrf.mxu1 }
 0x106   :  { %716 = vmatmul.f32.gmra.mxu3 %v326_v24  ;;  %5138 = vmatmul.msk.f32.gmra.mxu2 %vm263_vm0, %v367_v25  ;;  %v6770_v37 = vpop.f32.mrf.mxu3 }
 0x108   :  { %798 = vmatmul.f32.gmra.mxu0 %v326_v24  ;;  %5146 = vmatmul.msk.f32.gmra.mxu1 %vm263_vm0, %v367_v25  ;;  %v5212_v25 = vld [vmem:[%s9294_s19 + $0x448] sm:$0xff] }
 0x109   :  { %v6768_v36 = vpop.f32.mrf.mxu2  ;;  %1165 = vmatpush.msrb.mxu2 %v5212_v25 }
 0x10d   :  { %v6952_v54 = vpop.f32.mrf.mxu0  ;;  %v6954_v55 = vpop.f32.mrf.mxu1 }
 0x10e   :  { %5155 = vmatmul.msk.f32.vlgmr.msra.gmra.mxu3 %vm263_vm0, %v5147_v26  ;;  %5163 = vmatmul.msk.f32.vlgmr.msra.gmra.mxu2 %vm263_vm0, %v5147_v26  ;;  %v6782_v41 = vpop.f32.mrf.mxu3  ;;  %v5177_v26 = vld [vmem:[%s9294_s19 + $0x330] sm:$0xff] }
 0x10f   :  { %1043 = vmatpush.msrb.mxu0 %v5177_v26 }
 0x111   :  { %v6780_v40 = vpop.f32.mrf.mxu2 }
 0x115   :  { %v6976_v18 = vpop.f32.mrf.mxu0  ;;  %v6978_v19 = vpop.f32.mrf.mxu1 }
 0x116   :  { %5156 = vmatmul.msk.f32.gmra.mxu3 %vm263_vm0, %v5148_v29  ;;  %5164 = vmatmul.msk.f32.gmra.mxu2 %vm263_vm0, %v5148_v29  ;;  %v6791_v44 = vpop.f32.mrf.mxu3  ;;  %v5209_v29 = vld [vmem:[%s9294_s19 + $0x430] sm:$0xff] }
 0x117   :  { %1084 = vmatpush.msrb.mxu1 %v5209_v29 }
 0x119   :  { %v6789_v43 = vpop.f32.mrf.mxu2 }
 0x11d   :  { %v6984_v4 = vpop.f32.mrf.mxu0  ;;  %v6986_v5 = vpop.f32.mrf.mxu1 }
 0x11e   :  { %5157 = vmatmul.msk.f32.gmra.mxu3 %vm263_vm0, %v5149_v32  ;;  %5165 = vmatmul.msk.f32.gmra.mxu2 %vm263_vm0, %v5149_v32  ;;  %v6802_v47 = vpop.f32.mrf.mxu3  ;;  %v5178_v32 = vld [vmem:[%s9294_s19 + $0x338] sm:$0xff] }
 0x11f   :  { %1125 = vmatpush.msrb.mxu3 %v5178_v32 }
 0x121   :  { %v6800_v46 = vpop.f32.mrf.mxu2 }
 0x125   :  { %v6992_v0 = vpop.f32.mrf.mxu0  ;;  %v6994_v6 = vpop.f32.mrf.mxu1 }
 0x126   :  { %5158 = vmatmul.msk.f32.gmra.mxu3 %vm263_vm0, %v5150_v35  ;;  %5166 = vmatmul.msk.f32.gmra.mxu2 %vm263_vm0, %v5150_v35  ;;  %v5210_v35 = vld [vmem:[%s9294_s19 + $0x438] sm:$0xff] }
 0x127   :  { %1166 = vmatpush.msrb.mxu2 %v5210_v35 }
 0x12d   :  { %v6998_v8 = vpop.f32.mrf.mxu0  ;;  %v7000_v9 = vpop.f32.mrf.mxu1 }
 0x12e   :  { %5159 = vmatmul.msk.f32.gmra.mxu3 %vm263_vm0, %v5151_v38  ;;  %5167 = vmatmul.msk.f32.gmra.mxu2 %vm263_vm0, %v5151_v38  ;;  %v5175_v38 = vld [vmem:[%s9294_s19 + $0x320] sm:$0xff] }
 0x12f   :  { %1044 = vmatpush.msrb.mxu0 %v5175_v38 }
 0x131   :  { %1045 = vmatpush.msrb.mxu0 %v5173_v50 }
 0x133   :  { %1046 = vmatpush.msrb.mxu0 %v5171_v56 }
 0x135   :  { %v7004_v26 = vpop.f32.mrf.mxu0  ;;  %v7006_v29 = vpop.f32.mrf.mxu1 }
 0x136   :  { %5160 = vmatmul.msk.f32.gmra.mxu3 %vm263_vm0, %v5152_v39  ;;  %5168 = vmatmul.msk.f32.gmra.mxu2 %vm263_vm0, %v5152_v39  ;;  %v5207_v39 = vld [vmem:[%s9294_s19 + $0x420] sm:$0xff] }
 0x137   :  { %1085 = vmatpush.msrb.mxu1 %v5207_v39 }
 0x139   :  { %1086 = vmatpush.msrb.mxu1 %v5205_v51 }
 0x13b   :  { %1087 = vmatpush.msrb.mxu1 %v5203_v57 }
 0x13d   :  { %v7012_v38 = vpop.f32.mrf.mxu0  ;;  %v7014_v39 = vpop.f32.mrf.mxu1 }
 0x13e   :  { %5161 = vmatmul.msk.f32.gmra.mxu3 %vm263_vm0, %v5153_v42  ;;  %5169 = vmatmul.msk.f32.gmra.mxu2 %vm263_vm0, %v5153_v42  ;;  %v5176_v42 = vld [vmem:[%s9294_s19 + $0x328] sm:$0xff] }
 0x13f   :  { %1126 = vmatpush.msrb.mxu3 %v5176_v42 }
 0x141   :  { %1127 = vmatpush.msrb.mxu3 %v5174_v52 }
 0x143   :  { %1128 = vmatpush.msrb.mxu3 %v5172_v60 }
 0x145   :  { %v7018_v50 = vpop.f32.mrf.mxu0  ;;  %v7020_v51 = vpop.f32.mrf.mxu1 }
 0x146   :  { %5162 = vmatmul.msk.f32.gmra.mxu3 %vm263_vm0, %v5154_v45  ;;  %5170 = vmatmul.msk.f32.gmra.mxu2 %vm263_vm0, %v5154_v45  ;;  %v5208_v45 = vld [vmem:[%s9294_s19 + $0x428] sm:$0xff] }
 0x147   :  { %1167 = vmatpush.msrb.mxu2 %v5208_v45 }
 0x149   :  { %1168 = vmatpush.msrb.mxu2 %v5206_v53 }
 0x14b   :  { %1169 = vmatpush.msrb.mxu2 %v5204_v63 }
 0x14d   :  { %v7024_v56 = vpop.f32.mrf.mxu0  ;;  %v7026_v57 = vpop.f32.mrf.mxu1 }
 0x14e   :  { %9300 = vst [vmem:[#allocation32_spill] sm:$0xff] %v7026_v57 }
 0x151   :  { %v6804_v48 = vpop.f32.mrf.mxu3  ;;  %v6806_v49 = vpop.f32.mrf.mxu2 }
 0x159   :  { %v6832_v58 = vpop.f32.mrf.mxu3  ;;  %v6834_v59 = vpop.f32.mrf.mxu2 }
 0x161   :  { %v6860_v20 = vpop.f32.mrf.mxu3  ;;  %v6862_v21 = vpop.f32.mrf.mxu2 }
 0x169   :  { %v6909_v14 = vpop.f32.mrf.mxu3  ;;  %v6911_v24 = vpop.f32.mrf.mxu2 }
 0x16a   :  { %9296 = vst [vmem:[#allocation28_spill] sm:$0xff] %v6911_v24 }
 0x171   :  { %v6965_v61 = vpop.f32.mrf.mxu3  ;;  %v6967_v62 = vpop.f32.mrf.mxu2 }
 0x172   :  { %9297 = vst [vmem:[#allocation29_spill] sm:$0xff] %v6967_v62 }
 0x179   :  { %v6972_v12 = vpop.f32.mrf.mxu3  ;;  %v6974_v17 = vpop.f32.mrf.mxu2 }
 0x17a   :  { %9298 = vst [vmem:[#allocation30_spill] sm:$0xff] %v6974_v17 }
 0x181   :  { %v6980_v22 = vpop.f32.mrf.mxu3  ;;  %v6982_v23 = vpop.f32.mrf.mxu2 }
 0x189   :  { %v6988_v2 = vpop.f32.mrf.mxu3  ;;  %v6990_v3 = vpop.f32.mrf.mxu2 }
 0x18a   :  { %9299 = vst [vmem:[#allocation31_spill] sm:$0xff] %v6990_v3 }
 0x191   :  { %v893_v1 = vpop.f32.mrf.mxu3  ;;  %v934_v7 = vpop.f32.mrf.mxu2 }
 0x192   :  { %1047 = vmatmul.f32.vlgmr.msrb.gmra.mxu0 %v893_v1  ;;  %5219 = vmatmul.msk.f32.vlgmr.msrb.gmra.mxu1 %vm263_vm0, %v934_v7 }
 0x193   :  { %1129 = vmatmul.f32.vlgmr.msrb.gmra.mxu3 %v893_v1  ;;  %5227 = vmatmul.msk.f32.vlgmr.msrb.gmra.mxu2 %vm263_vm0, %v934_v7 }
 0x199   :  { %v896_v10 = vpop.f32.mrf.mxu3  ;;  %v937_v11 = vpop.f32.mrf.mxu2 }
 0x19a   :  { %1050 = vmatmul.f32.gmra.mxu0 %v896_v10  ;;  %5220 = vmatmul.msk.f32.gmra.mxu1 %vm263_vm0, %v937_v11 }
 0x19b   :  { %1132 = vmatmul.f32.gmra.mxu3 %v896_v10  ;;  %5228 = vmatmul.msk.f32.gmra.mxu2 %vm263_vm0, %v937_v11  ;;  %v781_v10 = vpop.f32.mrf.mxu0  ;;  %v7031_v11 = vpop.f32.mrf.mxu1 }
 0x1a1   :  { %v899_v13 = vpop.f32.mrf.mxu3  ;;  %v940_v25 = vpop.f32.mrf.mxu2 }
 0x1a2   :  { %1053 = vmatmul.f32.gmra.mxu0 %v899_v13  ;;  %5221 = vmatmul.msk.f32.gmra.mxu1 %vm263_vm0, %v940_v25 }
 0x1a3   :  { %1135 = vmatmul.f32.gmra.mxu3 %v899_v13  ;;  %5229 = vmatmul.msk.f32.gmra.mxu2 %vm263_vm0, %v940_v25  ;;  %v784_v13 = vpop.f32.mrf.mxu0  ;;  %v7034_v25 = vpop.f32.mrf.mxu1 }
 0x1a9   :  { %v902_v32 = vpop.f32.mrf.mxu3  ;;  %v943_v35 = vpop.f32.mrf.mxu2 }
 0x1aa   :  { %1056 = vmatmul.f32.gmra.mxu0 %v902_v32  ;;  %5222 = vmatmul.msk.f32.gmra.mxu1 %vm263_vm0, %v943_v35 }
 0x1ab   :  { %1138 = vmatmul.f32.gmra.mxu3 %v902_v32  ;;  %5230 = vmatmul.msk.f32.gmra.mxu2 %vm263_vm0, %v943_v35  ;;  %v787_v32 = vpop.f32.mrf.mxu0  ;;  %v7036_v35 = vpop.f32.mrf.mxu1 }
 0x1ac   :  { %9301 = vst [vmem:[#allocation33_spill] sm:$0xff] %v7036_v35 }
 0x1b1   :  { %v905_v42 = vpop.f32.mrf.mxu3  ;;  %v946_v45 = vpop.f32.mrf.mxu2 }
 0x1b2   :  { %1059 = vmatmul.f32.gmra.mxu0 %v905_v42  ;;  %5223 = vmatmul.msk.f32.gmra.mxu1 %vm263_vm0, %v946_v45 }
 0x1b3   :  { %1141 = vmatmul.f32.gmra.mxu3 %v905_v42  ;;  %5231 = vmatmul.msk.f32.gmra.mxu2 %vm263_vm0, %v946_v45  ;;  %v7038_v42 = vpop.f32.mrf.mxu0  ;;  %v7040_v45 = vpop.f32.mrf.mxu1 }
 0x1b4   :  { %9302 = vst [vmem:[#allocation34_spill] sm:$0xff] %v7040_v45 }
 0x1b9   :  { %v908_v52 = vpop.f32.mrf.mxu3  ;;  %v949_v53 = vpop.f32.mrf.mxu2 }
 0x1ba   :  { %1062 = vmatmul.f32.gmra.mxu0 %v908_v52  ;;  %5224 = vmatmul.msk.f32.gmra.mxu1 %vm263_vm0, %v949_v53 }
 0x1bb   :  { %1144 = vmatmul.f32.gmra.mxu3 %v908_v52  ;;  %5232 = vmatmul.msk.f32.gmra.mxu2 %vm263_vm0, %v949_v53  ;;  %v7042_v52 = vpop.f32.mrf.mxu0  ;;  %v7044_v53 = vpop.f32.mrf.mxu1 }
 0x1bc   :  { %9303 = vst [vmem:[#allocation35_spill] sm:$0xff] %v7044_v53 }
 0x1c1   :  { %v911_v60 = vpop.f32.mrf.mxu3  ;;  %v952_v63 = vpop.f32.mrf.mxu2 }
 0x1c2   :  { %1065 = vmatmul.f32.gmra.mxu0 %v911_v60  ;;  %5225 = vmatmul.msk.f32.gmra.mxu1 %vm263_vm0, %v952_v63 }
 0x1c3   :  { %1147 = vmatmul.f32.gmra.mxu3 %v911_v60  ;;  %5233 = vmatmul.msk.f32.gmra.mxu2 %vm263_vm0, %v952_v63  ;;  %v7046_v60 = vpop.f32.mrf.mxu0  ;;  %v7048_v63 = vpop.f32.mrf.mxu1 }
 0x1c4   :  { %9304 = vst [vmem:[#allocation36_spill] sm:$0xff] %v7046_v60 }
 0x1c5   :  { %9305 = vst [vmem:[#allocation37_spill] sm:$0xff] %v7048_v63 }
 0x1c9   :  { %v914_v1 = vpop.f32.mrf.mxu3  ;;  %v955_v7 = vpop.f32.mrf.mxu2 }
 0x1ca   :  { %1068 = vmatmul.f32.gmra.mxu0 %v914_v1  ;;  %5226 = vmatmul.msk.f32.gmra.mxu1 %vm263_vm0, %v955_v7 }
 0x1cb   :  { %1150 = vmatmul.f32.gmra.mxu3 %v914_v1  ;;  %5234 = vmatmul.msk.f32.gmra.mxu2 %vm263_vm0, %v955_v7  ;;  %v7050_v1 = vpop.f32.mrf.mxu0  ;;  %v7052_v7 = vpop.f32.mrf.mxu1 }
 0x1cc   :  { %9306 = vst [vmem:[#allocation38_spill] sm:$0xff] %v7050_v1 }
 0x1cd   :  { %9307 = vst [vmem:[#allocation39_spill] sm:$0xff] %v7052_v7 }
 0x20f   :  { %v7054_v57 = vpop.f32.mrf.mxu0  ;;  %v7056_v24 = vpop.f32.mrf.mxu1 }
 0x210   :  { %9308 = vst [vmem:[#allocation40_spill] sm:$0xff] %v7054_v57 }
 0x211   :  { %9309 = vst [vmem:[#allocation41_spill] sm:$0xff] %v7056_v24 }
 0x216   :  { %v7058_v3 = vpop.f32.mrf.mxu3  ;;  %v7060_v62 = vpop.f32.mrf.mxu2 }
 0x217   :  { %9310 = vst [vmem:[#allocation42_spill] sm:$0xff] %v7058_v3  ;;  %v7062_v45 = vpop.f32.mrf.mxu0  ;;  %v7064_v17 = vpop.f32.mrf.mxu1 }
 0x218   :  { %9311 = vst [vmem:[#allocation43_spill] sm:$0xff] %v7060_v62 }
 0x219   :  { %9312 = vst [vmem:[#allocation44_spill] sm:$0xff] %v7062_v45 }
 0x21a   :  { %9313 = vst [vmem:[#allocation45_spill] sm:$0xff] %v7064_v17 }
 0x21e   :  { %v7066_v53 = vpop.f32.mrf.mxu3  ;;  %v7068_v60 = vpop.f32.mrf.mxu2 }
 0x21f   :  { %9314 = vst [vmem:[#allocation46_spill] sm:$0xff] %v7066_v53  ;;  %v7070_v63 = vpop.f32.mrf.mxu0  ;;  %v7072_v1 = vpop.f32.mrf.mxu1 }
 0x220   :  { %9315 = vst [vmem:[#allocation47_spill] sm:$0xff] %v7068_v60 }
 0x221   :  { %9316 = vst [vmem:[#allocation48_spill] sm:$0xff] %v7070_v63 }
 0x222   :  { %9317 = vst [vmem:[#allocation49_spill] sm:$0xff] %v7072_v1 }
 0x226   :  { %v7074_v7 = vpop.f32.mrf.mxu3  ;;  %v7076_v57 = vpop.f32.mrf.mxu2 }
 0x227   :  { %9318 = vst [vmem:[#allocation50_spill] sm:$0xff] %v7074_v7  ;;  %v7078_v24 = vpop.f32.mrf.mxu0  ;;  %v7080_v3 = vpop.f32.mrf.mxu1  ;;  %v635_v7 = vadd.f32 %v6978_v19, %v6976_v18  ;;  %v641_v18 = vadd.f32 %v6994_v6, %v6992_v0  ;;  %v562_v19 = vadd.f32 %v6770_v37, %v6768_v36 }
 0x228   :  { %9319 = vst [vmem:[#allocation51_spill] sm:$0xff] %v7076_v57  ;;  %v638_v57 = vadd.f32 %v6986_v5, %v6984_v4  ;;  %v650_v4 = vadd.f32 %v7014_v39, %v7012_v38 }
 0x229   :  { %9320 = vst [vmem:[#allocation52_spill] sm:$0xff] %v7080_v3  ;;  %v550_v3 = vadd.f32 %v6732_v16, %v6730_v15  ;;  %v568_v15 = vadd.f32 %v6791_v44, %v6789_v43  ;;  %v647_v44 = vadd.f32 %v7006_v29, %v7004_v26  ;;  %v9327_v29 = vld [vmem:[#allocation30_spill] sm:$0xff] }
 0x22a   :  { %v785_v37 = vadd.f32 %v784_v13, %v638_v57  ;;  %v9329_v57 = vld [vmem:[#allocation36_spill] sm:$0xff]  ;;  %v9331_v13 = vld [vmem:[#allocation31_spill] sm:$0xff] }
 0x22b   :  { %v715_v43 = vadd.f32 %v6980_v22, %v568_v15  ;;  %v794_v26 = vadd.f32 %v7042_v52, %v647_v44 }
 0x22e   :  { %v7082_v62 = vpop.f32.mrf.mxu3  ;;  %v7084_v45 = vpop.f32.mrf.mxu2 }
 0x22f   :  { %9321 = vst [vmem:[#allocation53_spill] sm:$0xff] %v7082_v62  ;;  %v1060_v17 = vpop.f32.mrf.mxu0  ;;  %v1101_v53 = vpop.f32.mrf.mxu1  ;;  %v556_v62 = vadd.f32 %v6750_v31, %v6748_v30  ;;  %v565_v30 = vadd.f32 %v6782_v41, %v6780_v40  ;;  %v697_v31 = vadd.f32 %v6804_v48, %v550_v3  ;;  %v653_v40 = vadd.f32 %v7020_v51, %v7018_v50 }
 0x230   :  { %9322 = vst [vmem:[#allocation54_spill] sm:$0xff] %v7084_v45  ;;  %v553_v45 = vadd.f32 %v6741_v28, %v6739_v27  ;;  %v644_v28 = vadd.f32 %v7000_v9, %v6998_v8  ;;  %v709_v3 = vadd.f32 %v6965_v61, %v562_v19  ;;  %v1211_v61 = vld [vmem:[%s9325_s21] sm:$0x3]  ;;  %v1102_v39 = vadd.f32 %v1101_v53, %v1060_v17  ;;  %v5235_v53 = vld [vmem:[%s9325_s21 + $0x2] sm:$0x3] }
 0x231   :  { %v703_v41 = vadd.f32 %v6860_v20, %v556_v62  ;;  %v7131_v22 = vadd.f32 %v6806_v49, %v697_v31  ;;  %v7140_v20 = vadd.f32 %v7034_v25, %v785_v37  ;;  %v756_v62 = vadd.f32 %v6982_v23, %v715_v43  ;;  %v9335_v19 = vld [vmem:[#allocation35_spill] sm:$0xff]  ;;  %v9337_v31 = vld [vmem:[#allocation49_spill] sm:$0xff] }
 0x232   :  { %v700_v36 = vadd.f32 %v6832_v58, %v553_v45  ;;  %v791_v9 = vadd.f32 %v7038_v42, %v644_v28  ;;  %v7156_v42 = vperm.slane %v1211_v61, 0  ;;  %v9332_v45 = vld [vmem:[#allocation52_spill] sm:$0xff]  ;;  %v835_v15 = vadd.f32 %v9335_v19, %v794_v26  ;;  %v9339_v37 = vld [vmem:[#allocation39_spill] sm:$0xff] }
 0x233   :  { %v1099_v52 = vadd.f32 %v9332_v45, %v7078_v24 }
 0x234   :  { %v741_v6 = vadd.f32 %v6834_v59, %v700_v36 }
 0x236   :  { %v7086_v35 = vpop.f32.mrf.mxu3  ;;  %v7088_v60 = vpop.f32.mrf.mxu2 }
 0x237   :  { %9323 = vst [vmem:[#allocation55_spill] sm:$0xff] %v7086_v35  ;;  %v1063_v63 = vpop.f32.mrf.mxu0  ;;  %v1104_v1 = vpop.f32.mrf.mxu1  ;;  %v632_v35 = vadd.f32 %v6954_v55, %v6952_v54  ;;  %v571_v55 = vadd.f32 %v6802_v47, %v6800_v46  ;;  %v788_v46 = vadd.f32 %v787_v32, %v641_v18  ;;  %v712_v47 = vadd.f32 %v6972_v12, %v565_v30  ;;  %v9336_v30 = vld [vmem:[#allocation48_spill] sm:$0xff] }
 0x238   :  { %9324 = vst [vmem:[#allocation56_spill] sm:$0xff] %v7088_v60  ;;  %v559_v60 = vadd.f32 %v6761_v34, %v6759_v33  ;;  %v782_v33 = vadd.f32 %v781_v10, %v635_v7  ;;  %v1105_v8 = vadd.f32 %v1104_v1, %v1063_v63  ;;  %v744_v12 = vadd.f32 %v6862_v21, %v703_v41  ;;  %v9330_v10 = vld [vmem:[#allocation38_spill] sm:$0xff]  ;;  %v9333_v63 = vld [vmem:[#allocation28_spill] sm:$0xff]  ;;  %v9341_v41 = vld [vmem:[#allocation45_spill] sm:$0xff] }
 0x239   :  { %v7127_v48 = vadd.f32 %v7024_v56, %v632_v35  ;;  %v718_v0 = vadd.f32 %v6988_v2, %v571_v55  ;;  %v9326_v2 = vld [vmem:[#allocation33_spill] sm:$0xff]  ;;  %v753_v38 = vadd.f32 %v9327_v29, %v712_v47  ;;  %v9334_v7 = vld [vmem:[#allocation34_spill] sm:$0xff] }
 0x23a   :  { %v7134_v5 = vadd.f32 %v7031_v11, %v782_v33  ;;  %v706_v49 = vadd.f32 %v6909_v14, %v559_v60  ;;  %v829_v59 = vadd.f32 %v9326_v2, %v788_v46  ;;  %v9328_v56 = vld [vmem:[#allocation29_spill] sm:$0xff]  ;;  %v797_v14 = vadd.f32 %v9329_v57, %v650_v4 }
 0x23b   :  { %v750_v21 = vadd.f32 %v9328_v56, %v709_v3  ;;  %v800_v11 = vadd.f32 %v9330_v10, %v653_v40  ;;  %v759_v25 = vadd.f32 %v9331_v13, %v718_v0  ;;  %v1205_v60 = vadd.f32 %v1105_v8, %v753_v38  ;;  %v9338_v55 = vld [vmem:[#allocation37_spill] sm:$0xff]  ;;  %v9340_v40 = vld [vmem:[#allocation44_spill] sm:$0xff]  ;;  %v9347_v56 = vld [vmem:[#allocation54_spill] sm:$0xff] }
 0x23c   :  { %v747_v1 = vadd.f32 %v9333_v63, %v706_v49  ;;  %v832_v18 = vadd.f32 %v9334_v7, %v791_v9  ;;  %v1096_v33 = vadd.f32 %v9337_v31, %v9336_v30  ;;  %v838_v36 = vadd.f32 %v9338_v55, %v797_v14  ;;  %v9342_v0 = vld [vmem:[#allocation40_spill] sm:$0xff]  ;;  %v9351_v7 = vld [vmem:[#allocation47_spill] sm:$0xff]  ;;  %v9352_v30 = vld [vmem:[#allocation42_spill] sm:$0xff] }
 0x23d   :  { %v841_v43 = vadd.f32 %v9339_v37, %v800_v11  ;;  %v7171_v4 = vperm.slane %v5235_v53, 0  ;;  %v1093_v46 = vadd.f32 %v9341_v41, %v9340_v40  ;;  %v7179_v49 = vperm.slane %v1211_v61, 1  ;;  %v9353_v31 = vld [vmem:[#allocation43_spill] sm:$0xff]  ;;  %v9354_v37 = vld [vmem:[#allocation32_spill] sm:$0xff] }
 0x23e   :  { %v1145_v16 = vpop.f32.mrf.mxu3  ;;  %v1186_v27 = vpop.f32.mrf.mxu2  ;;  %v1201_v47 = vadd.f32 %v1099_v52, %v747_v1  ;;  %v9344_v9 = vld [vmem:[#allocation55_spill] sm:$0xff]  ;;  %v7188_v61 = vperm.slane %v5235_v53, 1  ;;  %v9350_v1 = vld [vmem:[#allocation46_spill] sm:$0xff] }
 0x23f   :  { %v1066_v34 = vpop.f32.mrf.mxu0  ;;  %v1107_v54 = vpop.f32.mrf.mxu1  ;;  %v1187_v44 = vadd.f32 %v1186_v27, %v1145_v16  ;;  %v9345_v26 = vld [vmem:[#allocation56_spill] sm:$0xff]  ;;  %v1199_v16 = vadd.f32 %v1096_v33, %v744_v12  ;;  %v1197_v10 = vadd.f32 %v1093_v46, %v741_v6  ;;  %v1175_v19 = vadd.f32 %v9351_v7, %v9350_v1  ;;  %v1532_v1 = vld [vmem:[#allocation5 + $0x160] sm:$0xff] }
 0x240   :  { %v1108_v58 = vadd.f32 %v1107_v54, %v1066_v34  ;;  %v1203_v34 = vadd.f32 %v1102_v39, %v750_v21  ;;  %v1184_v2 = vadd.f32 %v9345_v26, %v9344_v9  ;;  %v1223_v11 = vmul.f32 %v7156_v42, %v1201_v47  ;;  %v1457_v7 = vld [vmem:[#allocation5 + $0xe0] sm:$0xff] }
 0x241   :  { %v1206_v57 = vadd.f32 %v1187_v44, %v835_v15  ;;  %v1221_v63 = vmul.f32 %v7156_v42, %v1199_v16  ;;  %v1172_v33 = vadd.f32 %v9353_v31, %v9352_v30  ;;  %v1198_v46 = vadd.f32 %v1175_v19, %v7134_v5  ;;  %v1548_v19 = vld [vmem:[#allocation5 + $0x1e0] sm:$0xff]  ;;  %v1274_v30 = vld [vmem:[#allocation2 + $0x10] sm:$0xff]  ;;  %v1531_v31 = vld [vmem:[#allocation5 + $0x158] sm:$0xff] }
 0x242   :  { %v1207_v50 = vadd.f32 %v1108_v58, %v756_v62  ;;  %v1227_v58 = vmul.f32 %v7156_v42, %v1205_v60  ;;  %v9343_v62 = vld [vmem:[#allocation41_spill] sm:$0xff]  ;;  %v1225_v27 = vmul.f32 %v7156_v42, %v1203_v34  ;;  %v1204_v45 = vadd.f32 %v1184_v2, %v832_v18 }
 0x243   :  { %v1090_v8 = vadd.f32 %v9343_v62, %v9342_v0  ;;  %v1244_v41 = vadd.f32 %v7171_v4, %v1221_v63  ;;  %v1220_v26 = vmul.f32 %v7179_v49, %v1198_v46  ;;  %v1458_v63 = vld [vmem:[#allocation5 + $0xe8] sm:$0xff]  ;;  %v1528_v46 = vld [vmem:[#allocation5 + $0x140] sm:$0xff] }
 0x244   :  { %v1229_v54 = vmul.f32 %v7156_v42, %v1207_v50  ;;  %v1250_v12 = vadd.f32 %v7171_v4, %v1227_v58  ;;  %v1248_v6 = vadd.f32 %v7171_v4, %v1225_v27  ;;  %v1226_v55 = vmul.f32 %v7179_v49, %v1204_v45  ;;  %v1459_v45 = vld [vmem:[#allocation5 + $0xf0] sm:$0xff] }
 0x245   :  { %v1260_v5 = vmax.f32 %v1244_v41, 0.0  ;;  %v1275_v41 = vld [vmem:[#allocation2 + $0x18] sm:$0xff] }
 0x246   :  { %v1148_v23 = vpop.f32.mrf.mxu3  ;;  %v1189_v51 = vpop.f32.mrf.mxu2  ;;  %v1266_v34 = vmax.f32 %v1250_v12, 0.0  ;;  %v1264_v40 = vmax.f32 %v1248_v6, 0.0  ;;  %v1441_v6 = vld [vmem:[#allocation5 + $0x60] sm:$0xff] }
 0x247   :  { %v1069_v32 = vpop.f32.mrf.mxu0  ;;  %v1110_v35 = vpop.f32.mrf.mxu1  ;;  %v1190_v28 = vadd.f32 %v1189_v51, %v1148_v23  ;;  %v1252_v23 = vadd.f32 %v7171_v4, %v1229_v54  ;;  %v9346_v51 = vld [vmem:[#allocation53_spill] sm:$0xff]  ;;  %v1246_v54 = vadd.f32 %v7171_v4, %v1223_v11 }
 0x248   :  { %v1111_v17 = vadd.f32 %v1110_v35, %v1069_v32  ;;  %v1181_v21 = vadd.f32 %v9347_v56, %v9346_v51  ;;  %v9349_v32 = vld [vmem:[#allocation51_spill] sm:$0xff]  ;;  %v1443_v11 = vld [vmem:[#allocation5 + $0x70] sm:$0xff] }
 0x249   :  { %v1208_v29 = vadd.f32 %v1190_v28, %v838_v36  ;;  %v1268_v53 = vmax.f32 %v1252_v23, 0.0  ;;  %v1228_v28 = vmul.f32 %v7179_v49, %v1206_v57  ;;  %v1243_v23 = vadd.f32 %v7188_v61, %v1220_v26  ;;  %v1347_v51 = vld [vmem:[#allocation2 + $0x20] sm:$0xff]  ;;  %v1444_v57 = vld [vmem:[#allocation5 + $0x78] sm:$0xff]  ;;  %v1525_v26 = vld [vmem:[#allocation5 + $0x128] sm:$0xff] }
 0x24a   :  { %v1209_v24 = vadd.f32 %v1111_v17, %v759_v25  ;;  %v9348_v25 = vld [vmem:[#allocation50_spill] sm:$0xff]  ;;  %v1195_v17 = vadd.f32 %v1090_v8, %v7131_v22  ;;  %v1202_v15 = vadd.f32 %v1181_v21, %v829_v59  ;;  %v1219_v22 = vmul.f32 %v7156_v42, %v1197_v10 }
 0x24b   :  { %v1178_v35 = vadd.f32 %v9349_v32, %v9348_v25  ;;  %v1230_v52 = vmul.f32 %v7179_v49, %v1208_v29  ;;  %v1251_v58 = vadd.f32 %v7188_v61, %v1228_v28  ;;  %v1249_v8 = vadd.f32 %v7188_v61, %v1226_v55  ;;  %v1272_v56 = vld [vmem:[#allocation2] sm:$0xff]  ;;  %v1460_v25 = vld [vmem:[#allocation5 + $0xf8] sm:$0xff]  ;;  %v1438_v55 = vld [vmem:[#allocation5 + $0x48] sm:$0xff] }
 0x24c   :  { %v1231_v3 = vmul.f32 %v7156_v42, %v1209_v24  ;;  %v1217_v44 = vmul.f32 %v7156_v42, %v1195_v17  ;;  %v1242_v0 = vadd.f32 %v7171_v4, %v1219_v22  ;;  %v1259_v10 = vmax.f32 %v1243_v23, 0.0  ;;  %v1551_v32 = vld [vmem:[#allocation5 + $0x1f8] sm:$0xff]  ;;  %v1533_v17 = vld [vmem:[#allocation5 + $0x168] sm:$0xff]  ;;  %v1439_v22 = vld [vmem:[#allocation5 + $0x50] sm:$0xff] }
 0x24d   :  { %v1200_v24 = vadd.f32 %v1178_v35, %v7140_v20  ;;  %v1253_v36 = vadd.f32 %v7188_v61, %v1230_v52  ;;  %v1224_v20 = vmul.f32 %v7179_v49, %v1202_v15  ;;  %v1267_v2 = vmax.f32 %v1251_v58, 0.0  ;;  %v1273_v35 = vld [vmem:[#allocation2 + $0x8] sm:$0xff]  ;;  %v1550_v52 = vld [vmem:[#allocation5 + $0x1f0] sm:$0xff]  ;;  %v1440_v15 = vld [vmem:[#allocation5 + $0x58] sm:$0xff] }
 0x24e   :  { %v1254_v38 = vadd.f32 %v7171_v4, %v1231_v3  ;;  %v1151_v39 = vpop.f32.mrf.mxu3  ;;  %v1192_v50 = vpop.f32.mrf.mxu2  ;;  %v1262_v3 = vmax.f32 %v1246_v54, 0.0  ;;  %v1240_v9 = vadd.f32 %v7171_v4, %v1217_v44  ;;  %v1258_v16 = vmax.f32 %v1242_v0, 0.0  ;;  %v1456_v28 = vld [vmem:[#allocation5 + $0xd8] sm:$0xff]  ;;  %v1530_v54 = vld [vmem:[#allocation5 + $0x150] sm:$0xff]  ;;  %v1453_v44 = vld [vmem:[#allocation5 + $0xc0] sm:$0xff] }
 0x24f   :  { %v1193_v14 = vadd.f32 %v1192_v50, %v1151_v39  ;;  %v1222_v42 = vmul.f32 %v7179_v49, %v1200_v24  ;;  %v1269_v62 = vmax.f32 %v1253_v36, 0.0  ;;  %v1247_v29 = vadd.f32 %v7188_v61, %v1224_v20  ;;  %v1546_v24 = vld [vmem:[#allocation5 + $0x1d0] sm:$0xff]  ;;  %v1529_v36 = vld [vmem:[#allocation5 + $0x148] sm:$0xff]  ;;  %v1544_v20 = vld [vmem:[#allocation5 + $0x1c0] sm:$0xff] }
 0x250   :  { %v1270_v13 = vmax.f32 %v1254_v38, 0.0  ;;  %v1265_v38 = vmax.f32 %v1249_v8, 0.0  ;;  %v1256_v4 = vmax.f32 %v1240_v9, 0.0  ;;  %v1452_v58 = vld [vmem:[#allocation5 + $0xb8] sm:$0xff]  ;;  %v1542_v8 = vld [vmem:[#allocation5 + $0x1b0] sm:$0xff]  ;;  %v1450_v9 = vld [vmem:[#allocation5 + $0xa8] sm:$0xff] }
 0x251   :  { %v1210_v60 = vadd.f32 %v1193_v14, %v841_v43  ;;  %v820_v43 = vadd.f32 %v9354_v37, %v7127_v48  ;;  %v1245_v39 = vadd.f32 %v7188_v61, %v1222_v42  ;;  %v1263_v50 = vmax.f32 %v1247_v29, 0.0  ;;  %v1535_v14 = vld [vmem:[#allocation5 + $0x178] sm:$0xff]  ;;  %v1545_v37 = vld [vmem:[#allocation5 + $0x1c8] sm:$0xff]  ;;  %v1451_v42 = vld [vmem:[#allocation5 + $0xb0] sm:$0xff] }
 0x252   :  { %1296 = vmatpush.msra.mxu0 %v1270_v13  ;;  %1371 = vmatpush.msra.mxu3 %v1270_v13  ;;  %v1534_v13 = vld [vmem:[#allocation5 + $0x170] sm:$0xff]  ;;  %v1543_v0 = vld [vmem:[#allocation5 + $0x1b8] sm:$0xff]  ;;  %v1433_v29 = vld [vmem:[#allocation5 + $0x20] sm:$0xff] }
 0x253   :  { %v1232_v18 = vmul.f32 %v7179_v49, %v1210_v60  ;;  %v1196_v48 = vadd.f32 %v1172_v33, %v820_v43  ;;  %v1442_v60 = vld [vmem:[#allocation5 + $0x68] sm:$0xff]  ;;  %v1547_v33 = vld [vmem:[#allocation5 + $0x1d8] sm:$0xff]  ;;  %v1437_v43 = vld [vmem:[#allocation5 + $0x40] sm:$0xff] }
 0x254   :  { %1297 = vmatpush.msra.mxu0 %v1268_v53  ;;  %1372 = vmatpush.msra.mxu3 %v1268_v53  ;;  %v1549_v53 = vld [vmem:[#allocation5 + $0x1e8] sm:$0xff]  ;;  %v1539_v23 = vld [vmem:[#allocation5 + $0x198] sm:$0xff] }
 0x255   :  { %v1255_v59 = vadd.f32 %v7188_v61, %v1232_v18  ;;  %v1218_v27 = vmul.f32 %v7179_v49, %v1196_v48  ;;  %v1261_v49 = vmax.f32 %v1245_v39, 0.0  ;;  %v1349_v18 = vld [vmem:[#allocation2 + $0x30] sm:$0xff]  ;;  %v1432_v39 = vld [vmem:[#allocation5 + $0x18] sm:$0xff] }
 0x256   :  { %1298 = vmatpush.msra.mxu0 %v1266_v34  ;;  %1373 = vmatpush.msra.mxu3 %v1266_v34  ;;  %v1455_v34 = vld [vmem:[#allocation5 + $0xd0] sm:$0xff] }
 0x257   :  { %v1271_v47 = vmax.f32 %v1255_v59, 0.0  ;;  %v1241_v21 = vadd.f32 %v7188_v61, %v1218_v27  ;;  %v1348_v61 = vld [vmem:[#allocation2 + $0x28] sm:$0xff]  ;;  %v1435_v48 = vld [vmem:[#allocation5 + $0x30] sm:$0xff]  ;;  %v1524_v27 = vld [vmem:[#allocation5 + $0x120] sm:$0xff] }
 0x258   :  { %1299 = vmatpush.msra.mxu0 %v1264_v40  ;;  %1374 = vmatpush.msra.mxu3 %v1264_v40  ;;  %v1454_v59 = vld [vmem:[#allocation5 + $0xc8] sm:$0xff]  ;;  %v1350_v40 = vld [vmem:[#allocation2 + $0x38] sm:$0xff] }
 0x259   :  { %1325 = vmatpush.msra.mxu1 %v1271_v47  ;;  %1400 = vmatpush.msra.mxu2 %v1271_v47  ;;  %v1257_v12 = vmax.f32 %v1241_v21, 0.0  ;;  %v1436_v47 = vld [vmem:[#allocation5 + $0x38] sm:$0xff]  ;;  %v1538_v21 = vld [vmem:[#allocation5 + $0x190] sm:$0xff] }
 0x25a   :  { %1300 = vmatpush.msra.mxu0 %v1262_v3  ;;  %1375 = vmatpush.msra.mxu3 %v1262_v3  ;;  %v1527_v3 = vld [vmem:[#allocation5 + $0x138] sm:$0xff] }
 0x25b   :  { %1326 = vmatpush.msra.mxu1 %v1269_v62  ;;  %1401 = vmatpush.msra.mxu2 %v1269_v62  ;;  %v1526_v62 = vld [vmem:[#allocation5 + $0x130] sm:$0xff] }
 0x25c   :  { %1301 = vmatpush.msra.mxu0 %v1260_v5  ;;  %1376 = vmatpush.msra.mxu3 %v1260_v5  ;;  %v1434_v5 = vld [vmem:[#allocation5 + $0x28] sm:$0xff] }
 0x25d   :  { %1327 = vmatpush.msra.mxu1 %v1267_v2  ;;  %1402 = vmatpush.msra.mxu2 %v1267_v2  ;;  %v1541_v2 = vld [vmem:[#allocation5 + $0x1a8] sm:$0xff] }
 0x25e   :  { %1302 = vmatpush.msra.mxu0 %v1258_v16  ;;  %1377 = vmatpush.msra.mxu3 %v1258_v16  ;;  %v1449_v16 = vld [vmem:[#allocation5 + $0xa0] sm:$0xff] }
 0x25f   :  { %1328 = vmatpush.msra.mxu1 %v1265_v38  ;;  %1403 = vmatpush.msra.mxu2 %v1265_v38  ;;  %v1540_v38 = vld [vmem:[#allocation5 + $0x1a0] sm:$0xff] }
 0x260   :  { %1303 = vmatpush.msra.mxu0 %v1256_v4  ;;  %1378 = vmatpush.msra.mxu3 %v1256_v4  ;;  %v1448_v4 = vld [vmem:[#allocation5 + $0x98] sm:$0xff] }
 0x261   :  { %1329 = vmatpush.msra.mxu1 %v1263_v50  ;;  %1404 = vmatpush.msra.mxu2 %v1263_v50  ;;  %v1523_v50 = vld [vmem:[#allocation5 + $0x118] sm:$0xff] }
 0x262   :  { %5244 = vmatmul.msk.f32.vlgmr.msra.gmra.mxu3 %vm263_vm0, %v1347_v51  ;;  %5236 = vmatmul.msk.f32.vlgmr.msra.gmra.mxu0 %vm263_vm0, %v1272_v56 }
 0x263   :  { %1330 = vmatpush.msra.mxu1 %v1261_v49  ;;  %1405 = vmatpush.msra.mxu2 %v1261_v49  ;;  %v1522_v49 = vld [vmem:[#allocation5 + $0x110] sm:$0xff] }
 0x264   :  { %1461 = vmatpush.msrb.mxu0 %v1444_v57  ;;  %1552 = vmatpush.msrb.mxu3 %v1535_v14  ;;  %v1430_v57 = vld [vmem:[#allocation5 + $0x8] sm:$0xff] }
 0x265   :  { %1331 = vmatpush.msra.mxu1 %v1259_v10  ;;  %1406 = vmatpush.msra.mxu2 %v1259_v10  ;;  %v1446_v14 = vld [vmem:[#allocation5 + $0x88] sm:$0xff] }
 0x266   :  { %1462 = vmatpush.msrb.mxu0 %v1443_v11  ;;  %1553 = vmatpush.msrb.mxu3 %v1534_v13  ;;  %v1521_v10 = vld [vmem:[#allocation5 + $0x108] sm:$0xff]  ;;  %v1429_v13 = vld [vmem:[#allocation5] sm:$0xff] }
 0x267   :  { %1332 = vmatpush.msra.mxu1 %v1257_v12  ;;  %1407 = vmatpush.msra.mxu2 %v1257_v12  ;;  %v1537_v11 = vld [vmem:[#allocation5 + $0x188] sm:$0xff]  ;;  %v1445_v12 = vld [vmem:[#allocation5 + $0x80] sm:$0xff] }
 0x268   :  { %5248 = vmatmul.msk.f32.vlgmr.msra.gmra.mxu2 %vm263_vm0, %v1347_v51  ;;  %5240 = vmatmul.msk.f32.vlgmr.msra.gmra.mxu1 %vm263_vm0, %v1272_v56  ;;  %v1431_v51 = vld [vmem:[#allocation5 + $0x10] sm:$0xff] }
 0x269   :  { %1490 = vmatpush.msrb.mxu1 %v1460_v25  ;;  %1581 = vmatpush.msrb.mxu2 %v1551_v32  ;;  %v1447_v56 = vld [vmem:[#allocation5 + $0x90] sm:$0xff]  ;;  %v1520_v25 = vld [vmem:[#allocation5 + $0x100] sm:$0xff] }
 0x26a   :  { %5245 = vmatmul.msk.f32.gmra.mxu3 %vm263_vm0, %v1348_v61  ;;  %5237 = vmatmul.msk.f32.gmra.mxu0 %vm263_vm0, %v1273_v35  ;;  %v1536_v32 = vld [vmem:[#allocation5 + $0x180] sm:$0xff] }
 0x26b   :  { %1491 = vmatpush.msrb.mxu1 %v1459_v45  ;;  %1582 = vmatpush.msrb.mxu2 %v1550_v52 }
 0x26c   :  { %1463 = vmatpush.msrb.mxu0 %v1442_v60  ;;  %1554 = vmatpush.msrb.mxu3 %v1533_v17  ;;  %v5271_v60 = vld [vmem:[%s9259_s7 + $0xf8] sm:$0xff]  ;;  %v5270_v17 = vld [vmem:[%s9259_s7 + $0xf0] sm:$0xff] }
 0x26d   :  { %1492 = vmatpush.msrb.mxu1 %v1458_v63  ;;  %1583 = vmatpush.msrb.mxu2 %v1549_v53  ;;  %v5269_v53 = vld [vmem:[%s9259_s7 + $0xe8] sm:$0xff] }
 0x26e   :  { %1464 = vmatpush.msrb.mxu0 %v1441_v6  ;;  %1555 = vmatpush.msrb.mxu3 %v1532_v1  ;;  %v5268_v6 = vld [vmem:[%s9259_s7 + $0xe0] sm:$0xff] }
 0x26f   :  { %1493 = vmatpush.msrb.mxu1 %v1457_v7  ;;  %1584 = vmatpush.msrb.mxu2 %v1548_v19  ;;  %v5267_v19 = vld [vmem:[%s9259_s7 + $0xd8] sm:$0xff] }
 0x270   :  { %5249 = vmatmul.msk.f32.gmra.mxu2 %vm263_vm0, %v1348_v61  ;;  %5241 = vmatmul.msk.f32.gmra.mxu1 %vm263_vm0, %v1273_v35 }
 0x271   :  { %1465 = vmatpush.msrb.mxu0 %v1440_v15  ;;  %1494 = vmatpush.msrb.mxu1 %v1456_v28 }
 0x272   :  { %5246 = vmatmul.msk.f32.gmra.mxu3 %vm263_vm0, %v1349_v18  ;;  %5238 = vmatmul.msk.f32.gmra.mxu0 %vm263_vm0, %v1274_v30 }
 0x273   :  { %1556 = vmatpush.msrb.mxu3 %v1531_v31  ;;  %1585 = vmatpush.msrb.mxu2 %v1547_v33  ;;  %v5265_v31 = vld [vmem:[%s9259_s7 + $0xc8] sm:$0xff] }
 0x274   :  { %1466 = vmatpush.msrb.mxu0 %v1439_v22  ;;  %1495 = vmatpush.msrb.mxu1 %v1455_v34  ;;  %v5264_v22 = vld [vmem:[%s9259_s7 + $0xc0] sm:$0xff] }
 0x275   :  { %1557 = vmatpush.msrb.mxu3 %v1530_v54  ;;  %1586 = vmatpush.msrb.mxu2 %v1546_v24  ;;  %v5263_v24 = vld [vmem:[%s9259_s7 + $0xb8] sm:$0xff] }
 0x276   :  { %1467 = vmatpush.msrb.mxu0 %v1438_v55  ;;  %1496 = vmatpush.msrb.mxu1 %v1454_v59 }
 0x277   :  { %1558 = vmatpush.msrb.mxu3 %v1529_v36  ;;  %1587 = vmatpush.msrb.mxu2 %v1545_v37  ;;  %v5262_v36 = vld [vmem:[%s9259_s7 + $0xb0] sm:$0xff] }
 0x278   :  { %5250 = vmatmul.msk.f32.gmra.mxu2 %vm263_vm0, %v1349_v18  ;;  %5242 = vmatmul.msk.f32.gmra.mxu1 %vm263_vm0, %v1274_v30  ;;  %v5266_v30 = vld [vmem:[%s9259_s7 + $0xd0] sm:$0xff] }
 0x279   :  { %1468 = vmatpush.msrb.mxu0 %v1437_v43  ;;  %1497 = vmatpush.msrb.mxu1 %v1453_v44 }
 0x27a   :  { %5247 = vmatmul.msk.f32.gmra.mxu3 %vm263_vm0, %v1350_v40  ;;  %5239 = vmatmul.msk.f32.gmra.mxu0 %vm263_vm0, %v1275_v41 }
 0x27b   :  { %1559 = vmatpush.msrb.mxu3 %v1528_v46  ;;  %1588 = vmatpush.msrb.mxu2 %v1544_v20 }
 0x27c   :  { %1469 = vmatpush.msrb.mxu0 %v1436_v47  ;;  %1498 = vmatpush.msrb.mxu1 %v1452_v58 }
 0x27d   :  { %1560 = vmatpush.msrb.mxu3 %v1527_v3  ;;  %1589 = vmatpush.msrb.mxu2 %v1543_v0  ;;  %v5261_v3 = vld [vmem:[%s9259_s7 + $0xa8] sm:$0xff]  ;;  %v5260_v0 = vld [vmem:[%s9259_s7 + $0xa0] sm:$0xff] }
 0x27e   :  { %1470 = vmatpush.msrb.mxu0 %v1435_v48  ;;  %1499 = vmatpush.msrb.mxu1 %v1451_v42  ;;  %v5259_v48 = vld [vmem:[%s9259_s7 + $0x98] sm:$0xff]  ;;  %v5258_v42 = vld [vmem:[%s9259_s7 + $0x90] sm:$0xff] }
 0x27f   :  { %1561 = vmatpush.msrb.mxu3 %v1526_v62  ;;  %1590 = vmatpush.msrb.mxu2 %v1542_v8  ;;  %v5257_v62 = vld [vmem:[%s9259_s7 + $0x88] sm:$0xff]  ;;  %v5256_v8 = vld [vmem:[%s9259_s7 + $0x80] sm:$0xff] }
 0x280   :  { %5251 = vmatmul.msk.f32.gmra.mxu2 %vm263_vm0, %v1350_v40  ;;  %5243 = vmatmul.msk.f32.gmra.mxu1 %vm263_vm0, %v1275_v41 }
 0x281   :  { %1471 = vmatpush.msrb.mxu0 %v1434_v5  ;;  %1500 = vmatpush.msrb.mxu1 %v1450_v9 }
 0x282   :  { %1562 = vmatpush.msrb.mxu3 %v1525_v26  ;;  %1591 = vmatpush.msrb.mxu2 %v1541_v2 }
 0x283   :  { %1472 = vmatpush.msrb.mxu0 %v1433_v29  ;;  %1501 = vmatpush.msrb.mxu1 %v1449_v16 }
 0x284   :  { %1563 = vmatpush.msrb.mxu3 %v1524_v27  ;;  %1592 = vmatpush.msrb.mxu2 %v1540_v38 }
 0x285   :  { %1473 = vmatpush.msrb.mxu0 %v1432_v39  ;;  %1502 = vmatpush.msrb.mxu1 %v1448_v4 }
 0x286   :  { %1564 = vmatpush.msrb.mxu3 %v1523_v50  ;;  %1593 = vmatpush.msrb.mxu2 %v1539_v23 }
 0x287   :  { %1474 = vmatpush.msrb.mxu0 %v1431_v51  ;;  %1503 = vmatpush.msrb.mxu1 %v1447_v56 }
 0x288   :  { %1565 = vmatpush.msrb.mxu3 %v1522_v49  ;;  %1594 = vmatpush.msrb.mxu2 %v1538_v21 }
 0x289   :  { %1475 = vmatpush.msrb.mxu0 %v1430_v57  ;;  %1504 = vmatpush.msrb.mxu1 %v1446_v14 }
 0x28a   :  { %1566 = vmatpush.msrb.mxu3 %v1521_v10  ;;  %1595 = vmatpush.msrb.mxu2 %v1537_v11 }
 0x28b   :  { %1476 = vmatpush.msrb.mxu0 %v1429_v13  ;;  %1505 = vmatpush.msrb.mxu1 %v1445_v12 }
 0x28c   :  { %1567 = vmatpush.msrb.mxu3 %v1520_v25  ;;  %1596 = vmatpush.msrb.mxu2 %v1536_v32 }
 0x28d   :  { %1693 = vmatpush.msra.mxu1 %v5271_v60  ;;  %v1614_v60 = vld [vmem:[#allocation7] sm:$0xff] }
 0x28f   :  { %1694 = vmatpush.msra.mxu1 %v5270_v17  ;;  %v1752_v17 = vld [vmem:[#allocation7 + $0x20] sm:$0xff] }
 0x291   :  { %1695 = vmatpush.msra.mxu1 %v5269_v53  ;;  %v1753_v53 = vld [vmem:[#allocation7 + $0x28] sm:$0xff] }
 0x293   :  { %1696 = vmatpush.msra.mxu1 %v5268_v6  ;;  %v1616_v6 = vld [vmem:[#allocation7 + $0x10] sm:$0xff] }
 0x295   :  { %1697 = vmatpush.msra.mxu1 %v5267_v19  ;;  %v1755_v19 = vld [vmem:[#allocation7 + $0x38] sm:$0xff] }
 0x297   :  { %1698 = vmatpush.msra.mxu1 %v5266_v30  ;;  %v1672_v30 = vld [vmem:[%s9259_s7 + $0x60] sm:$0xff] }
 0x299   :  { %1699 = vmatpush.msra.mxu1 %v5265_v31  ;;  %v1671_v31 = vld [vmem:[%s9259_s7 + $0x58] sm:$0xff] }
 0x29b   :  { %1700 = vmatpush.msra.mxu1 %v5264_v22  ;;  %v1670_v22 = vld [vmem:[%s9259_s7 + $0x50] sm:$0xff] }
 0x29d   :  { %1701 = vmatpush.msra.mxu1 %v5263_v24  ;;  %v5289_v24 = vld [vmem:[%s9259_s7 + $0x168] sm:$0xff] }
 0x29f   :  { %1702 = vmatpush.msra.mxu1 %v5262_v36  ;;  %v1667_v36 = vld [vmem:[%s9259_s7 + $0x38] sm:$0xff] }
 0x2a1   :  { %1703 = vmatpush.msra.mxu1 %v5261_v3  ;;  %v1662_v3 = vld [vmem:[%s9259_s7 + $0x10] sm:$0xff] }
 0x2a3   :  { %1704 = vmatpush.msra.mxu1 %v5260_v0  ;;  %v5282_v0 = vld [vmem:[%s9259_s7 + $0x130] sm:$0xff] }
 0x2a5   :  { %1705 = vmatpush.msra.mxu1 %v5259_v48  ;;  %v1661_v48 = vld [vmem:[%s9259_s7 + $0x8] sm:$0xff] }
 0x2a7   :  { %1706 = vmatpush.msra.mxu1 %v5258_v42  ;;  %v5281_v42 = vld [vmem:[%s9259_s7 + $0x128] sm:$0xff] }
 0x2a9   :  { %1707 = vmatpush.msra.mxu1 %v5257_v62  ;;  %v1660_v62 = vld [vmem:[%s9259_s7] sm:$0xff] }
 0x2ab   :  { %1708 = vmatpush.msra.mxu1 %v5256_v8  ;;  %v5280_v8 = vld [vmem:[%s9259_s7 + $0x120] sm:$0xff] }
 0x2df   :  { %v1305_v61 = vpop.f32.mrf.mxu0 }
 0x2e5   :  { %v1334_v35 = vpop.f32.mrf.mxu1  ;;  %v1380_v45 = vpop.f32.mrf.mxu3 }
 0x2e6   :  { %v1421_v52 = vmax.f32 %v1305_v61, %v1380_v45 }
 0x2e7   :  { %v1308_v63 = vpop.f32.mrf.mxu0 }
 0x2e8   :  { %1477 = vmatmul.f32.vlgmr.msrb.gmra.mxu0 %v1421_v52  ;;  %1568 = vmatmul.f32.vlgmr.msrb.gmra.mxu3 %v1421_v52 }
 0x2eb   :  { %v1409_v1 = vpop.f32.mrf.mxu2 }
 0x2ec   :  { %v1422_v7 = vmax.f32 %v1334_v35, %v1409_v1  ;;  %v1754_v1 = vld [vmem:[#allocation7 + $0x30] sm:$0xff] }
 0x2ed   :  { %v1337_v15 = vpop.f32.mrf.mxu1  ;;  %v1383_v28 = vpop.f32.mrf.mxu3 }
 0x2ee   :  { %1506 = vmatmul.f32.vlgmr.msrb.gmra.mxu1 %v1422_v7  ;;  %1597 = vmatmul.f32.vlgmr.msrb.gmra.mxu2 %v1422_v7  ;;  %v1423_v18 = vmax.f32 %v1308_v63, %v1383_v28  ;;  %v1615_v63 = vld [vmem:[#allocation7 + $0x8] sm:$0xff]  ;;  %v1617_v7 = vld [vmem:[#allocation7 + $0x18] sm:$0xff]  ;;  %v1674_v28 = vld [vmem:[%s9259_s7 + $0x70] sm:$0xff] }
 0x2ef   :  { %v1311_v33 = vpop.f32.mrf.mxu0 }
 0x2f0   :  { %1480 = vmatmul.f32.gmra.mxu0 %v1423_v18  ;;  %1571 = vmatmul.f32.gmra.mxu3 %v1423_v18  ;;  %v1673_v18 = vld [vmem:[%s9259_s7 + $0x68] sm:$0xff] }
 0x2f3   :  { %v1412_v34 = vpop.f32.mrf.mxu2 }
 0x2f4   :  { %v1424_v54 = vmax.f32 %v1337_v15, %v1412_v34  ;;  %v1675_v15 = vld [vmem:[%s9259_s7 + $0x78] sm:$0xff]  ;;  %v5290_v34 = vld [vmem:[%s9259_s7 + $0x170] sm:$0xff] }
 0x2f5   :  { %v1386_v55 = vpop.f32.mrf.mxu3  ;;  %v1340_v37 = vpop.f32.mrf.mxu1  ;;  %1722 = vmatpush.msra.mxu3 %v1675_v15  ;;  %v5307_v15 = vld [vmem:[%s9263_s11 + $0xd8] sm:$0xff] }
 0x2f6   :  { %1509 = vmatmul.f32.gmra.mxu1 %v1424_v54  ;;  %1600 = vmatmul.f32.gmra.mxu2 %v1424_v54  ;;  %v1425_v59 = vmax.f32 %v1311_v33, %v1386_v55  ;;  %v5291_v33 = vld [vmem:[%s9259_s7 + $0x178] sm:$0xff]  ;;  %v1669_v54 = vld [vmem:[%s9259_s7 + $0x48] sm:$0xff]  ;;  %v1668_v55 = vld [vmem:[%s9259_s7 + $0x40] sm:$0xff] }
 0x2f7   :  { %v1314_v44 = vpop.f32.mrf.mxu0  ;;  %1723 = vmatpush.msra.mxu3 %v1674_v28  ;;  %v5725_v28 = vld [vmem:[#allocation8] ss:$0 sm:$0xff] }
 0x2f8   :  { %1483 = vmatmul.f32.gmra.mxu0 %v1425_v59  ;;  %1574 = vmatmul.f32.gmra.mxu3 %v1425_v59  ;;  %v5288_v59 = vld [vmem:[%s9259_s7 + $0x160] sm:$0xff] }
 0x2f9   :  { %1724 = vmatpush.msra.mxu3 %v1673_v18 }
 0x2fb   :  { %v1415_v43 = vpop.f32.mrf.mxu2  ;;  %1725 = vmatpush.msra.mxu3 %v1672_v30 }
 0x2fc   :  { %v1426_v40 = vmax.f32 %v1340_v37, %v1415_v43  ;;  %v5287_v37 = vld [vmem:[%s9259_s7 + $0x158] sm:$0xff]  ;;  %v1666_v43 = vld [vmem:[%s9259_s7 + $0x30] sm:$0xff] }
 0x2fd   :  { %v1389_v41 = vpop.f32.mrf.mxu3  ;;  %v1343_v20 = vpop.f32.mrf.mxu1  ;;  %1726 = vmatpush.msra.mxu3 %v1671_v31 }
 0x2fe   :  { %1512 = vmatmul.f32.gmra.mxu1 %v1426_v40  ;;  %1603 = vmatmul.f32.gmra.mxu2 %v1426_v40  ;;  %v1427_v46 = vmax.f32 %v1314_v44, %v1389_v41  ;;  %v5286_v44 = vld [vmem:[%s9259_s7 + $0x150] sm:$0xff]  ;;  %v1665_v40 = vld [vmem:[%s9259_s7 + $0x28] sm:$0xff] }
 0x2ff   :  { %1727 = vmatpush.msra.mxu3 %v1670_v22  ;;  %v5285_v41 = vld [vmem:[%s9259_s7 + $0x148] sm:$0xff]  ;;  %v5306_v22 = vld [vmem:[%s9263_s11 + $0xd0] sm:$0xff] }
 0x300   :  { %1486 = vmatmul.f32.gmra.mxu0 %v1427_v46  ;;  %1577 = vmatmul.f32.gmra.mxu3 %v1427_v46  ;;  %v1664_v46 = vld [vmem:[%s9259_s7 + $0x20] sm:$0xff] }
 0x301   :  { %1728 = vmatpush.msra.mxu3 %v1669_v54 }
 0x303   :  { %v1418_v47 = vpop.f32.mrf.mxu2  ;;  %1729 = vmatpush.msra.mxu3 %v1668_v55  ;;  %v1942_v55 = vld [vmem:[%s9263_s11 + $0x48] sm:$0xff] }
 0x304   :  { %v1428_v58 = vmax.f32 %v1343_v20, %v1418_v47  ;;  %v5284_v20 = vld [vmem:[%s9259_s7 + $0x140] sm:$0xff]  ;;  %v1663_v47 = vld [vmem:[%s9259_s7 + $0x18] sm:$0xff] }
 0x305   :  { %1730 = vmatpush.msra.mxu3 %v1667_v36 }
 0x306   :  { %1515 = vmatmul.f32.gmra.mxu1 %v1428_v58  ;;  %1606 = vmatmul.f32.gmra.mxu2 %v1428_v58  ;;  %v5283_v58 = vld [vmem:[%s9259_s7 + $0x138] sm:$0xff] }
 0x307   :  { %1731 = vmatpush.msra.mxu3 %v1666_v43  ;;  %v5726_v43 = vld [vmem:[#allocation8 + $0x1] ss:$0 sm:$0xff] }
 0x309   :  { %1732 = vmatpush.msra.mxu3 %v1665_v40  ;;  %v5304_v40 = vld [vmem:[%s9263_s11 + $0xc0] sm:$0xff] }
 0x30b   :  { %1733 = vmatpush.msra.mxu3 %v1664_v46 }
 0x30d   :  { %1734 = vmatpush.msra.mxu3 %v1663_v47 }
 0x30f   :  { %1735 = vmatpush.msra.mxu3 %v1662_v3  ;;  %v1940_v3 = vld [vmem:[%s9263_s11 + $0x38] sm:$0xff] }
 0x311   :  { %1736 = vmatpush.msra.mxu3 %v1661_v48 }
 0x313   :  { %1737 = vmatpush.msra.mxu3 %v1660_v62  ;;  %v1939_v62 = vld [vmem:[%s9263_s11 + $0x30] sm:$0xff] }
 0x365   :  { %v1478_v5 = vpop.f32.mrf.mxu0 }
 0x36b   :  { %v1507_v9 = vpop.f32.mrf.mxu1  ;;  %v1569_v26 = vpop.f32.mrf.mxu3 }
 0x36c   :  { %v1508_v29 = vadd.f32 %v1507_v9, %v1478_v5  ;;  %v5279_v5 = vld [vmem:[%s9259_s7 + $0x118] sm:$0xff]  ;;  %v5278_v9 = vld [vmem:[%s9259_s7 + $0x110] sm:$0xff] }
 0x36d   :  { %v1481_v27 = vpop.f32.mrf.mxu0 }
 0x371   :  { %v1598_v2 = vpop.f32.mrf.mxu2 }
 0x372   :  { %v1599_v16 = vadd.f32 %v1598_v2, %v1569_v26  ;;  %v5277_v26 = vld [vmem:[%s9259_s7 + $0x108] sm:$0xff]  ;;  %v5276_v2 = vld [vmem:[%s9259_s7 + $0x100] sm:$0xff] }
 0x373   :  { %v1510_v38 = vpop.f32.mrf.mxu1  ;;  %v1572_v39 = vpop.f32.mrf.mxu3 }
 0x374   :  { %v1610_v4 = vmax.f32 %v1508_v29, %v1599_v16  ;;  %v1511_v23 = vadd.f32 %v1510_v38, %v1481_v27 }
 0x375   :  { %v1484_v49 = vpop.f32.mrf.mxu0 }
 0x376   :  { %1709 = vmatmul.f32.vlgmr.msra.gmra.mxu1 %v1610_v4 }
 0x379   :  { %v1601_v50 = vpop.f32.mrf.mxu2 }
 0x37a   :  { %v1602_v51 = vadd.f32 %v1601_v50, %v1572_v39 }
 0x37b   :  { %v1513_v21 = vpop.f32.mrf.mxu1  ;;  %v1575_v57 = vpop.f32.mrf.mxu3 }
 0x37c   :  { %v1611_v56 = vmax.f32 %v1511_v23, %v1602_v51  ;;  %v1514_v10 = vadd.f32 %v1513_v21, %v1484_v49 }
 0x37d   :  { %v1487_v12 = vpop.f32.mrf.mxu0 }
 0x37e   :  { %1712 = vmatmul.f32.gmra.mxu1 %v1611_v56 }
 0x381   :  { %v1604_v14 = vpop.f32.mrf.mxu2 }
 0x382   :  { %v1605_v11 = vadd.f32 %v1604_v14, %v1575_v57 }
 0x383   :  { %v1516_v25 = vpop.f32.mrf.mxu1  ;;  %v1578_v32 = vpop.f32.mrf.mxu3 }
 0x384   :  { %v1612_v13 = vmax.f32 %v1514_v10, %v1605_v11  ;;  %v1517_v35 = vadd.f32 %v1516_v25, %v1487_v12  ;;  %v1948_v12 = vld [vmem:[%s9263_s11 + $0x78] sm:$0xff] }
 0x385   :  { %v5311_v25 = vld [vmem:[%s9263_s11 + $0xf8] sm:$0xff] }
 0x386   :  { %1715 = vmatmul.f32.gmra.mxu1 %v1612_v13 }
 0x389   :  { %v1607_v61 = vpop.f32.mrf.mxu2 }
 0x38a   :  { %v1608_v45 = vadd.f32 %v1607_v61, %v1578_v32  ;;  %v1947_v61 = vld [vmem:[%s9263_s11 + $0x70] sm:$0xff] }
 0x38c   :  { %v1613_v52 = vmax.f32 %v1517_v35, %v1608_v45  ;;  %v5310_v35 = vld [vmem:[%s9263_s11 + $0xf0] sm:$0xff]  ;;  %v1946_v45 = vld [vmem:[%s9263_s11 + $0x68] sm:$0xff] }
 0x38e   :  { %1643 = vmatpush.msra.mxu0 %v1613_v52  ;;  %1718 = vmatmul.f32.gmra.mxu1 %v1613_v52 }
 0x38f   :  { %1780 = vmatpush.msra.mxu2 %v1613_v52  ;;  %v5309_v52 = vld [vmem:[%s9263_s11 + $0xe8] sm:$0xff] }
 0x390   :  { %1644 = vmatpush.msra.mxu0 %v1612_v13 }
 0x391   :  { %1781 = vmatpush.msra.mxu2 %v1612_v13 }
 0x392   :  { %1645 = vmatpush.msra.mxu0 %v1611_v56 }
 0x393   :  { %1782 = vmatpush.msra.mxu2 %v1611_v56 }
 0x394   :  { %1646 = vmatpush.msra.mxu0 %v1610_v4 }
 0x395   :  { %1783 = vmatpush.msra.mxu2 %v1610_v4  ;;  %5252 = vmatmul.msk.f32.vlgmr.msra.gmra.mxu0 %vm1618_vm1, %v1614_v60 }
 0x396   :  { %5272 = vmatmul.msk.f32.vlgmr.msra.gmra.mxu2 %vm1618_vm1, %v1752_v17  ;;  %1814 = vmatpush.msrb.mxu0 %v5291_v33  ;;  %v1945_v17 = vld [vmem:[%s9263_s11 + $0x60] sm:$0xff]  ;;  %v1943_v33 = vld [vmem:[%s9263_s11 + $0x50] sm:$0xff] }
 0x397   :  { %1949 = vmatpush.msrb.mxu2 %v1948_v12 }
 0x398   :  { %1815 = vmatpush.msrb.mxu0 %v5290_v34 }
 0x399   :  { %1950 = vmatpush.msrb.mxu2 %v1947_v61 }
 0x39a   :  { %1816 = vmatpush.msrb.mxu0 %v5289_v24 }
 0x39b   :  { %1951 = vmatpush.msrb.mxu2 %v1946_v45 }
 0x39c   :  { %1817 = vmatpush.msrb.mxu0 %v5288_v59  ;;  %v5305_v59 = vld [vmem:[%s9263_s11 + $0xc8] sm:$0xff] }
 0x39d   :  { %5253 = vmatmul.msk.f32.gmra.mxu0 %vm1618_vm1, %v1615_v63  ;;  %v5308_v63 = vld [vmem:[%s9263_s11 + $0xe0] sm:$0xff]  ;;  %1952 = vmatpush.msrb.mxu2 %v1945_v17  ;;  %v2057_v17 = vld [vmem:[#allocation11 + $0x50] sm:$0xff] }
 0x39e   :  { %5273 = vmatmul.msk.f32.gmra.mxu2 %vm1618_vm1, %v1753_v53  ;;  %1818 = vmatpush.msrb.mxu0 %v5287_v37 }
 0x3a0   :  { %1819 = vmatpush.msrb.mxu0 %v5286_v44  ;;  %v1941_v44 = vld [vmem:[%s9263_s11 + $0x40] sm:$0xff] }
 0x3a2   :  { %1820 = vmatpush.msrb.mxu0 %v5285_v41 }
 0x3a4   :  { %1821 = vmatpush.msrb.mxu0 %v5284_v20 }
 0x3a5   :  { %5254 = vmatmul.msk.f32.gmra.mxu0 %vm1618_vm1, %v1616_v6 }
 0x3a6   :  { %5274 = vmatmul.msk.f32.gmra.mxu2 %vm1618_vm1, %v1754_v1  ;;  %1822 = vmatpush.msrb.mxu0 %v5283_v58 }
 0x3a8   :  { %1823 = vmatpush.msrb.mxu0 %v5282_v0  ;;  %v5303_v0 = vld [vmem:[%s9263_s11 + $0xb8] sm:$0xff] }
 0x3aa   :  { %1824 = vmatpush.msrb.mxu0 %v5281_v42 }
 0x3ac   :  { %1825 = vmatpush.msrb.mxu0 %v5280_v8  ;;  %v5302_v8 = vld [vmem:[%s9263_s11 + $0xb0] sm:$0xff] }
 0x3ad   :  { %5255 = vmatmul.msk.f32.gmra.mxu0 %vm1618_vm1, %v1617_v7 }
 0x3ae   :  { %5275 = vmatmul.msk.f32.gmra.mxu2 %vm1618_vm1, %v1755_v19  ;;  %1826 = vmatpush.msrb.mxu0 %v5279_v5  ;;  %v1944_v19 = vld [vmem:[%s9263_s11 + $0x58] sm:$0xff] }
 0x3af   :  { %1953 = vmatpush.msrb.mxu2 %v1944_v19 }
 0x3b0   :  { %1827 = vmatpush.msrb.mxu0 %v5278_v9  ;;  %v1938_v9 = vld [vmem:[%s9263_s11 + $0x28] sm:$0xff] }
 0x3b1   :  { %1954 = vmatpush.msrb.mxu2 %v1943_v33  ;;  %v2122_v33 = vld [vmem:[#allocation13 + $0x10] sm:$0xff] }
 0x3b2   :  { %1828 = vmatpush.msrb.mxu0 %v5277_v26  ;;  %v5301_v26 = vld [vmem:[%s9263_s11 + $0xa8] sm:$0xff] }
 0x3b3   :  { %1955 = vmatpush.msrb.mxu2 %v1942_v55  ;;  %v2015_v55 = vld [vmem:[#allocation13 + $0x8] sm:$0xff] }
 0x3b4   :  { %1829 = vmatpush.msrb.mxu0 %v5276_v2 }
 0x3b5   :  { %1956 = vmatpush.msrb.mxu2 %v1941_v44  ;;  %v2047_v44 = vld [vmem:[#allocation11 + $0x8] sm:$0xff] }
 0x3b6   :  { %1989 = vmatpush.msra.mxu0 %v5311_v25 }
 0x3b7   :  { %1957 = vmatpush.msrb.mxu2 %v1940_v3 }
 0x3b8   :  { %1990 = vmatpush.msra.mxu0 %v5310_v35 }
 0x3b9   :  { %1958 = vmatpush.msrb.mxu2 %v1939_v62 }
 0x3ba   :  { %1991 = vmatpush.msra.mxu0 %v5309_v52  ;;  %v2059_v52 = vld [vmem:[#allocation11 + $0x60] sm:$0xff] }
 0x3bb   :  { %1959 = vmatpush.msrb.mxu2 %v1938_v9  ;;  %v2265_v9 = vld [vmem:[%s9268_s16 + $0x38] sm:$0xff] }
 0x3bc   :  { %1992 = vmatpush.msra.mxu0 %v5308_v63  ;;  %v2056_v63 = vld [vmem:[#allocation11 + $0x48] sm:$0xff] }
 0x3be   :  { %1993 = vmatpush.msra.mxu0 %v5307_v15 }
 0x3c0   :  { %1994 = vmatpush.msra.mxu0 %v5306_v22  ;;  %v2053_v22 = vld [vmem:[#allocation11 + $0x38] sm:$0xff] }
 0x3c2   :  { %1995 = vmatpush.msra.mxu0 %v5305_v59  ;;  %v2123_v59 = vld [vmem:[#allocation13 + $0x18] sm:$0xff] }
 0x3c4   :  { %1996 = vmatpush.msra.mxu0 %v5304_v40  ;;  %v2158_v40 = vld [vmem:[#allocation11 + $0xa0] sm:$0xff] }
 0x3c6   :  { %1997 = vmatpush.msra.mxu0 %v5303_v0 }
 0x3c8   :  { %1998 = vmatpush.msra.mxu0 %v5302_v8 }
 0x3ca   :  { %1999 = vmatpush.msra.mxu0 %v5301_v26  ;;  %v5333_v26 = vld [vmem:[%s9268_s16 + $0x78] sm:$0xff] }
 0x3f3   :  { %v1710_v51 = vpop.f32.mrf.mxu1 }
 0x3fb   :  { %v1713_v21 = vpop.f32.mrf.mxu1 }
 0x403   :  { %v1716_v10 = vpop.f32.mrf.mxu1 }
 0x40b   :  { %v1719_v1 = vpop.f32.mrf.mxu1 }
 0x412   :  { %v1648_v29 = vpop.f32.mrf.mxu0 }
 0x413   :  { %1738 = vmatmul.f32.vlgmr.msra.gmra.mxu3 %v1648_v29  ;;  %v1900_v29 = vld [vmem:[#allocation10 + $0x10] sm:$0xff] }
 0x419   :  { %v1785_v16 = vpop.f32.mrf.mxu2 }
 0x41a   :  { %v1651_v27 = vpop.f32.mrf.mxu0  ;;  %1830 = vmatmul.f32.vlgmr.msrb.gmra.mxu0 %v1785_v16  ;;  %v1868_v16 = vld [vmem:[#allocation10] sm:$0xff] }
 0x41b   :  { %1741 = vmatmul.f32.gmra.mxu3 %v1651_v27  ;;  %v1937_v27 = vld [vmem:[%s9263_s11 + $0x20] sm:$0xff] }
 0x41c   :  { %1960 = vmatpush.msrb.mxu2 %v1937_v27 }
 0x421   :  { %v1788_v38 = vpop.f32.mrf.mxu2 }
 0x422   :  { %v1654_v39 = vpop.f32.mrf.mxu0  ;;  %1833 = vmatmul.f32.gmra.mxu0 %v1788_v38  ;;  %v5300_v38 = vld [vmem:[%s9263_s11 + $0xa0] sm:$0xff] }
 0x423   :  { %1744 = vmatmul.f32.gmra.mxu3 %v1654_v39  ;;  %v1936_v39 = vld [vmem:[%s9263_s11 + $0x18] sm:$0xff]  ;;  %2000 = vmatpush.msra.mxu0 %v5300_v38 }
 0x424   :  { %1961 = vmatpush.msrb.mxu2 %v1936_v39 }
 0x429   :  { %v1791_v4 = vpop.f32.mrf.mxu2 }
 0x42a   :  { %v1657_v50 = vpop.f32.mrf.mxu0  ;;  %1836 = vmatmul.f32.gmra.mxu0 %v1791_v4  ;;  %v5299_v4 = vld [vmem:[%s9263_s11 + $0x98] sm:$0xff] }
 0x42b   :  { %1747 = vmatmul.f32.gmra.mxu3 %v1657_v50  ;;  %v1935_v50 = vld [vmem:[%s9263_s11 + $0x10] sm:$0xff]  ;;  %2001 = vmatpush.msra.mxu0 %v5299_v4  ;;  %v5727_v4 = vld [vmem:[#allocation14] ss:$0 sm:$0xff] }
 0x42c   :  { %1962 = vmatpush.msrb.mxu2 %v1935_v50 }
 0x431   :  { %v1794_v23 = vpop.f32.mrf.mxu2 }
 0x432   :  { %1839 = vmatmul.f32.gmra.mxu0 %v1794_v23  ;;  %v5298_v23 = vld [vmem:[%s9263_s11 + $0x90] sm:$0xff] }
 0x433   :  { %2002 = vmatpush.msra.mxu0 %v5298_v23 }
 0x496   :  { %v1739_v56 = vpop.f32.mrf.mxu3 }
 0x497   :  { %v1831_v49 = vpop.f32.mrf.mxu0  ;;  %v1740_v53 = vadd.f32 %v1739_v56, %v1710_v51  ;;  %v1901_v51 = vld [vmem:[#allocation10 + $0x18] sm:$0xff]  ;;  %v1869_v56 = vld [vmem:[#allocation10 + $0x8] sm:$0xff] }
 0x499   :  { %v1843_v34 = vadd.f32 %v1831_v49, %v1740_v53  ;;  %v1934_v49 = vld [vmem:[%s9263_s11 + $0x8] sm:$0xff] }
 0x49a   :  { %1963 = vmatpush.msrb.mxu2 %v1934_v49  ;;  %v2055_v53 = vld [vmem:[#allocation11 + $0x40] sm:$0xff] }
 0x49b   :  { %v1851_v41 = vmul.f32 %v5725_v28, %v1843_v34  ;;  %v2052_v34 = vld [vmem:[#allocation11 + $0x30] sm:$0xff]  ;;  %v5728_v49 = vld [vmem:[#allocation14 + $0x1] ss:$0 sm:$0xff] }
 0x49d   :  { %v1860_v42 = vadd.f32 %v5726_v43, %v1851_v41  ;;  %v2046_v41 = vld [vmem:[#allocation11] sm:$0xff] }
 0x49e   :  { %v1742_v57 = vpop.f32.mrf.mxu3 }
 0x49f   :  { %v1834_v14 = vpop.f32.mrf.mxu0  ;;  %v1743_v60 = vadd.f32 %v1742_v57, %v1713_v21  ;;  %v1864_v2 = vmax.f32 %v1860_v42, 0.0  ;;  %v5297_v21 = vld [vmem:[%s9263_s11 + $0x88] sm:$0xff]  ;;  %v1933_v57 = vld [vmem:[%s9263_s11] sm:$0xff] }
 0x4a0   :  { %2003 = vmatpush.msra.mxu0 %v5297_v21  ;;  %1964 = vmatpush.msrb.mxu2 %v1933_v57 }
 0x4a1   :  { %v1844_v18 = vadd.f32 %v1834_v14, %v1743_v60  ;;  %v5296_v14 = vld [vmem:[%s9263_s11 + $0x80] sm:$0xff] }
 0x4a2   :  { %2004 = vmatpush.msra.mxu0 %v5296_v14  ;;  %v2058_v60 = vld [vmem:[#allocation11 + $0x58] sm:$0xff] }
 0x4a3   :  { %v1852_v36 = vmul.f32 %v5725_v28, %v1844_v18 }
 0x4a5   :  { %v1861_v58 = vadd.f32 %v5726_v43, %v1852_v36  ;;  %v2049_v36 = vld [vmem:[#allocation11 + $0x18] sm:$0xff] }
 0x4a6   :  { %v1745_v11 = vpop.f32.mrf.mxu3 }
 0x4a7   :  { %v1837_v13 = vpop.f32.mrf.mxu0  ;;  %v1746_v32 = vadd.f32 %v1745_v11, %v1716_v10  ;;  %v1865_v5 = vmax.f32 %v1861_v58, 0.0  ;;  %v2062_v10 = vld [vmem:[#allocation11 + $0x78] sm:$0xff]  ;;  %v2061_v11 = vld [vmem:[#allocation11 + $0x70] sm:$0xff]  ;;  %v2154_v58 = vld [vmem:[#allocation11 + $0x80] sm:$0xff] }
 0x4a9   :  { %v1845_v6 = vadd.f32 %v1837_v13, %v1746_v32  ;;  %v2060_v13 = vld [vmem:[#allocation11 + $0x68] sm:$0xff] }
 0x4ab   :  { %v1853_v54 = vmul.f32 %v5725_v28, %v1845_v6  ;;  %v2161_v6 = vld [vmem:[#allocation11 + $0xb8] sm:$0xff] }
 0x4ad   :  { %v1862_v20 = vadd.f32 %v5726_v43, %v1853_v54  ;;  %v2051_v54 = vld [vmem:[#allocation11 + $0x28] sm:$0xff] }
 0x4ae   :  { %v1748_v7 = vpop.f32.mrf.mxu3 }
 0x4af   :  { %v1749_v30 = vadd.f32 %v1748_v7, %v1719_v1  ;;  %v1840_v31 = vpop.f32.mrf.mxu0  ;;  %v1866_v48 = vmax.f32 %v1862_v20, 0.0  ;;  %v2160_v1 = vld [vmem:[#allocation11 + $0xb0] sm:$0xff] }
 0x4b0   :  { %v2156_v20 = vld [vmem:[#allocation11 + $0x90] sm:$0xff] }
 0x4b1   :  { %v1846_v24 = vadd.f32 %v1840_v31, %v1749_v30  ;;  %v2014_v31 = vld [vmem:[#allocation13] sm:$0xff] }
 0x4b3   :  { %v1854_v37 = vmul.f32 %v5725_v28, %v1846_v24  ;;  %v2050_v24 = vld [vmem:[#allocation11 + $0x20] sm:$0xff] }
 0x4b5   :  { %v1863_v46 = vadd.f32 %v5726_v43, %v1854_v37  ;;  %v2048_v37 = vld [vmem:[#allocation11 + $0x10] sm:$0xff]  ;;  %v2159_v43 = vld [vmem:[#allocation11 + $0xa8] sm:$0xff] }
 0x4b7   :  { %v1867_v47 = vmax.f32 %v1863_v46, 0.0  ;;  %v2157_v46 = vld [vmem:[#allocation11 + $0x98] sm:$0xff] }
 0x4b9   :  { %1888 = vmatpush.msrb.mxu1 %v1867_v47  ;;  %1920 = vmatpush.msrb.mxu3 %v1867_v47  ;;  %v2155_v47 = vld [vmem:[#allocation11 + $0x88] sm:$0xff] }
 0x4bb   :  { %1889 = vmatpush.msrb.mxu1 %v1866_v48  ;;  %1921 = vmatpush.msrb.mxu3 %v1866_v48 }
 0x4bd   :  { %1890 = vmatpush.msrb.mxu1 %v1865_v5  ;;  %1922 = vmatpush.msrb.mxu3 %v1865_v5 }
 0x4bf   :  { %1891 = vmatpush.msrb.mxu1 %v1864_v2  ;;  %1923 = vmatpush.msrb.mxu3 %v1864_v2  ;;  %v2264_v2 = vld [vmem:[%s9268_s16 + $0x30] sm:$0xff] }
 0x4c0   :  { %5294 = vmatmul.msk.f32.vlgmr.msrb.gmra.mxu3 %vm1618_vm1, %v1900_v29  ;;  %5292 = vmatmul.msk.f32.vlgmr.msrb.gmra.mxu1 %vm1618_vm1, %v1868_v16  ;;  %v5332_v29 = vld [vmem:[%s9268_s16 + $0x70] sm:$0xff] }
 0x4c1   :  { %2077 = vmatpush.msra.mxu3 %v2062_v10 }
 0x4c3   :  { %2078 = vmatpush.msra.mxu3 %v2061_v11 }
 0x4c5   :  { %2079 = vmatpush.msra.mxu3 %v2060_v13  ;;  %v2208_v13 = vld [vmem:[%s9267_s15] sm:$0xff] }
 0x4c7   :  { %2080 = vmatpush.msra.mxu3 %v2059_v52  ;;  %v5329_v52 = vld [vmem:[%s9268_s16 + $0x58] sm:$0xff] }
 0x4c8   :  { %5295 = vmatmul.msk.f32.gmra.mxu3 %vm1618_vm1, %v1901_v51  ;;  %5293 = vmatmul.msk.f32.gmra.mxu1 %vm1618_vm1, %v1869_v56 }
 0x4c9   :  { %2081 = vmatpush.msra.mxu3 %v2058_v60  ;;  %v2260_v60 = vld [vmem:[%s9268_s16 + $0x10] sm:$0xff] }
 0x4cb   :  { %2082 = vmatpush.msra.mxu3 %v2057_v17  ;;  %v5328_v17 = vld [vmem:[%s9268_s16 + $0x50] sm:$0xff] }
 0x4cd   :  { %2083 = vmatpush.msra.mxu3 %v2056_v63  ;;  %v2259_v63 = vld [vmem:[%s9268_s16 + $0x8] sm:$0xff] }
 0x4cf   :  { %2084 = vmatpush.msra.mxu3 %v2055_v53  ;;  %v5327_v53 = vld [vmem:[%s9268_s16 + $0x48] sm:$0xff] }
 0x4d1   :  { %2176 = vmatpush.msrb.mxu3 %v2161_v6  ;;  %v2258_v6 = vld [vmem:[%s9268_s16] sm:$0xff] }
 0x4d3   :  { %2177 = vmatpush.msrb.mxu3 %v2160_v1  ;;  %v5326_v1 = vld [vmem:[%s9268_s16 + $0x40] sm:$0xff] }
 0x4d5   :  { %2178 = vmatpush.msrb.mxu3 %v2159_v43  ;;  %v5339_v43 = vld [vmem:[%s9269_s17 + $0x30] sm:$0xff] }
 0x4d7   :  { %2179 = vmatpush.msrb.mxu3 %v2158_v40  ;;  %v2319_v40 = vld [vmem:[%s9355_s5] sm:$0x1] }
 0x4d9   :  { %2180 = vmatpush.msrb.mxu3 %v2157_v46  ;;  %v5338_v46 = vld [vmem:[%s9269_s17 + $0x28] sm:$0xff] }
 0x4db   :  { %2181 = vmatpush.msrb.mxu3 %v2156_v20  ;;  %v5343_v20 = vld [vmem:[%s9269_s17 + $0x48] sm:$0xff] }
 0x4dd   :  { %2182 = vmatpush.msrb.mxu3 %v2155_v47  ;;  %v5337_v47 = vld [vmem:[%s9269_s17 + $0x20] sm:$0xff] }
 0x4df   :  { %2183 = vmatpush.msrb.mxu3 %v2154_v58  ;;  %v5342_v58 = vld [vmem:[%s9269_s17 + $0x40] sm:$0xff] }
 0x53d   :  { %v1893_v12 = vpop.f32.mrf.mxu1 }
 0x543   :  { %v1925_v25 = vpop.f32.mrf.mxu3 }
 0x544   :  { %v1931_v32 = vmax.f32 %v1893_v12, %v1925_v25  ;;  %v5323_v12 = vld [vmem:[%s9267_s15 + $0x8] sm:$0xff] }
 0x545   :  { %v1896_v61 = vpop.f32.mrf.mxu1  ;;  %v2263_v25 = vld [vmem:[%s9268_s16 + $0x28] sm:$0xff] }
 0x546   :  { %1965 = vmatmul.f32.vlgmr.msrb.gmra.mxu2 %v1931_v32  ;;  %2005 = vmatmul.f32.vlgmr.msra.gmra.mxu0 %v1931_v32  ;;  %v5331_v32 = vld [vmem:[%s9268_s16 + $0x68] sm:$0xff] }
 0x54b   :  { %v1928_v35 = vpop.f32.mrf.mxu3 }
 0x54c   :  { %v1932_v45 = vmax.f32 %v1896_v61, %v1928_v35  ;;  %v2262_v61 = vld [vmem:[%s9268_s16 + $0x20] sm:$0xff] }
 0x54d   :  { %v5330_v35 = vld [vmem:[%s9268_s16 + $0x60] sm:$0xff] }
 0x54e   :  { %1968 = vmatmul.f32.gmra.mxu2 %v1932_v45  ;;  %2008 = vmatmul.f32.gmra.mxu0 %v1932_v45  ;;  %v2261_v45 = vld [vmem:[%s9268_s16 + $0x18] sm:$0xff] }
 0x5c3   :  { %v2006_v7 = vpop.f32.mrf.mxu0 }
 0x5c9   :  { %v1966_v19 = vpop.f32.mrf.mxu2 }
 0x5ca   :  { %v2012_v15 = vmax.f32 %v1966_v19, %v2006_v7  ;;  %v2327_v7 = vld [vmem:[#allocation16 + $0x38] sm:$0xff]  ;;  %v2326_v19 = vld [vmem:[#allocation16 + $0x30] sm:$0xff] }
 0x5cb   :  { %v2009_v28 = vpop.f32.mrf.mxu0  ;;  %2340 = vmatpush.msrb.mxu0 %v2327_v7  ;;  %v5432_v7 = vld [vmem:[%s9294_s19 + $0x260] sm:$0xff] }
 0x5cc   :  { %5314 = vmatmul.msk.f32.vlgmr.msra.gmra.mxu3 %vm263_vm0, %v2012_v15 }
 0x5cd   :  { %2306 = vmatpush.msra.mxu3 %v5333_v26  ;;  %2341 = vmatpush.msrb.mxu0 %v2326_v19  ;;  %v5353_v26 = vld [vmem:[%s9269_s17 + $0x88] sm:$0xff] }
 0x5ce   :  { %v2666_v19 = vld [vmem:[%s9295_s28 + $0x8] sm:$0xff] }
 0x5cf   :  { %2307 = vmatpush.msra.mxu3 %v5332_v29  ;;  %v5352_v29 = vld [vmem:[%s9269_s17 + $0x80] sm:$0xff] }
 0x5d1   :  { %v1969_v18 = vpop.f32.mrf.mxu2  ;;  %2308 = vmatpush.msra.mxu3 %v5331_v32 }
 0x5d2   :  { %v2013_v30 = vmax.f32 %v1969_v18, %v2009_v28  ;;  %v2355_v28 = vld [vmem:[%s9269_s17 + $0x18] sm:$0xff]  ;;  %v2354_v18 = vld [vmem:[%s9269_s17 + $0x10] sm:$0xff] }
 0x5d3   :  { %2309 = vmatpush.msra.mxu3 %v5330_v35  ;;  %v7688_v35 = vld [vmem:[%s9293_s6 + $0xc0] sm:$0xff] }
 0x5d4   :  { %2037 = vmatpush.msra.mxu1 %v2013_v30  ;;  %5315 = vmatmul.msk.f32.gmra.mxu3 %vm263_vm0, %v2013_v30 }
 0x5d5   :  { %2144 = vmatpush.msra.mxu2 %v2013_v30  ;;  %2310 = vmatpush.msra.mxu3 %v5329_v52  ;;  %v5340_v30 = vld [vmem:[%s9269_s17 + $0x38] sm:$0xff]  ;;  %v7701_v52 = vld [vmem:[%s9293_s6 + $0xa0] sm:$0xff] }
 0x5d6   :  { %2038 = vmatpush.msra.mxu1 %v2012_v15 }
 0x5d7   :  { %2145 = vmatpush.msra.mxu2 %v2012_v15  ;;  %5312 = vmatmul.msk.f32.vlgmr.msra.gmra.mxu1 %vm2016_vm2, %v2014_v31  ;;  %v2325_v15 = vld [vmem:[#allocation16 + $0x28] sm:$0xff]  ;;  %v5345_v31 = vld [vmem:[%s9269_s17 + $0x58] sm:$0xff] }
 0x5d8   :  { %5318 = vmatmul.msk.f32.vlgmr.msra.gmra.mxu2 %vm2016_vm2, %v2122_v33  ;;  %2106 = vmatpush.msrb.mxu1 %v2053_v22  ;;  %v2324_v33 = vld [vmem:[#allocation16 + $0x20] sm:$0xff]  ;;  %v2323_v22 = vld [vmem:[#allocation16 + $0x18] sm:$0xff] }
 0x5d9   :  { %2277 = vmatpush.msrb.mxu2 %v2265_v9  ;;  %2311 = vmatpush.msra.mxu3 %v5328_v17  ;;  %v5347_v9 = vld [vmem:[%s9269_s17 + $0x60] sm:$0xff]  ;;  %v7707_v17 = vld [vmem:[%s9293_s6 + $0x90] sm:$0xff] }
 0x5da   :  { %2107 = vmatpush.msrb.mxu1 %v2052_v34  ;;  %2342 = vmatpush.msrb.mxu0 %v2325_v15  ;;  %v2322_v34 = vld [vmem:[#allocation16 + $0x10] sm:$0xff] }
 0x5db   :  { %2278 = vmatpush.msrb.mxu2 %v2264_v2  ;;  %2312 = vmatpush.msra.mxu3 %v5327_v53  ;;  %v5358_v2 = vld [vmem:[%s9269_s17 + $0xa8] sm:$0xff]  ;;  %v7714_v53 = vld [vmem:[%s9293_s6 + $0x80] sm:$0xff]  ;;  %v5430_v15 = vld [vmem:[%s9294_s19 + $0x250] sm:$0xff] }
 0x5dc   :  { %2108 = vmatpush.msrb.mxu1 %v2051_v54  ;;  %2343 = vmatpush.msrb.mxu0 %v2324_v33  ;;  %v2321_v54 = vld [vmem:[#allocation16 + $0x8] sm:$0xff]  ;;  %v5424_v33 = vld [vmem:[%s9294_s19 + $0x220] sm:$0xff] }
 0x5dd   :  { %2279 = vmatpush.msrb.mxu2 %v2263_v25  ;;  %2313 = vmatpush.msra.mxu3 %v5326_v1  ;;  %v5362_v25 = vld [vmem:[%s9269_s17 + $0xc0] sm:$0xff]  ;;  %v5434_v1 = vld [vmem:[%s9294_s19 + $0x270] sm:$0xff] }
 0x5de   :  { %2109 = vmatpush.msrb.mxu1 %v2050_v24  ;;  %2344 = vmatpush.msrb.mxu0 %v2323_v22  ;;  %v2667_v22 = vld [vmem:[%s9295_s28 + $0x10] sm:$0xff] }
 0x5df   :  { %5313 = vmatmul.msk.f32.gmra.mxu1 %vm2016_vm2, %v2015_v55  ;;  %2280 = vmatpush.msrb.mxu2 %v2262_v61 }
 0x5e0   :  { %5319 = vmatmul.msk.f32.gmra.mxu2 %vm2016_vm2, %v2123_v59  ;;  %2110 = vmatpush.msrb.mxu1 %v2049_v36  ;;  %v2320_v36 = vld [vmem:[#allocation16] sm:$0xff] }
 0x5e1   :  { %2281 = vmatpush.msrb.mxu2 %v2261_v45  ;;  %2345 = vmatpush.msrb.mxu0 %v2322_v34  ;;  %v7695_v45 = vld [vmem:[%s9293_s6 + $0xb0] sm:$0xff]  ;;  %v7764_v34 = vld [vmem:[%s9293_s6 + $0xd8] sm:$0xff] }
 0x5e2   :  { %2111 = vmatpush.msrb.mxu1 %v2048_v37  ;;  %v2353_v37 = vld [vmem:[%s9269_s17 + $0x8] sm:$0xff] }
 0x5e3   :  { %2282 = vmatpush.msrb.mxu2 %v2260_v60  ;;  %2346 = vmatpush.msrb.mxu0 %v2321_v54  ;;  %v5422_v54 = vld [vmem:[%s9294_s19 + $0x210] sm:$0xff] }
 0x5e4   :  { %2112 = vmatpush.msrb.mxu1 %v2047_v44  ;;  %v5344_v44 = vld [vmem:[%s9269_s17 + $0x50] sm:$0xff] }
 0x5e5   :  { %2283 = vmatpush.msrb.mxu2 %v2259_v63  ;;  %2347 = vmatpush.msrb.mxu0 %v2320_v36  ;;  %v5418_v36 = vld [vmem:[%s9294_s19 + $0x1f0] sm:$0xff] }
 0x5e6   :  { %2113 = vmatpush.msrb.mxu1 %v2046_v41  ;;  %v2352_v41 = vld [vmem:[%s9269_s17] sm:$0xff]  ;;  %5335 = vmatmul.msk.f32.vlgmr.msrb.gmra.mxu0 %vm263_vm0, %v2319_v40  ;;  %v7804_v40 = vld [vmem:[%s9293_s6 + $0x98] sm:$0xff] }
 0x5e7   :  { %2284 = vmatpush.msrb.mxu2 %v2258_v6  ;;  %v2665_v6 = vld [vmem:[%s9295_s28] sm:$0xff] }
 0x5e9   :  { %2400 = vmatpush.msra.mxu2 %v5340_v30  ;;  %v7748_v30 = vld [vmem:[%s9293_s6 + $0xe8] sm:$0xff] }
 0x5eb   :  { %2401 = vmatpush.msra.mxu2 %v5339_v43  ;;  %v5416_v43 = vld [vmem:[%s9294_s19 + $0x1e0] sm:$0xff] }
 0x5ed   :  { %2402 = vmatpush.msra.mxu2 %v5338_v46  ;;  %v7812_v46 = vld [vmem:[%s9293_s6 + $0x88] sm:$0xff] }
 0x5ef   :  { %2403 = vmatpush.msra.mxu2 %v5337_v47  ;;  %v5410_v47 = vld [vmem:[%s9294_s19 + $0x1b0] sm:$0xff] }
 0x64f   :  { %v2086_v62 = vpop.f32.mrf.mxu3 }
 0x654   :  { %v2040_v3 = vpop.f32.mrf.mxu1 }
 0x655   :  { %5316 = vmatmul.msk.f32.vlgmr.msrb.gmra.mxu1 %vm263_vm0, %v2040_v3  ;;  %v5350_v3 = vld [vmem:[%s9269_s17 + $0x78] sm:$0xff] }
 0x657   :  { %v2089_v8 = vpop.f32.mrf.mxu3 }
 0x65b   :  { %v2147_v0 = vpop.f32.mrf.mxu2 }
 0x65c   :  { %5320 = vmatmul.msk.f32.vlgmr.msrb.gmra.mxu3 %vm263_vm0, %v2147_v0  ;;  %v2043_v48 = vpop.f32.mrf.mxu1  ;;  %v5349_v0 = vld [vmem:[%s9269_s17 + $0x70] sm:$0xff] }
 0x65d   :  { %5317 = vmatmul.msk.f32.gmra.mxu1 %vm263_vm0, %v2043_v48  ;;  %2429 = vmatpush.msrb.mxu3 %v5345_v31  ;;  %v5355_v48 = vld [vmem:[%s9269_s17 + $0x98] sm:$0xff]  ;;  %v5426_v31 = vld [vmem:[%s9294_s19 + $0x230] sm:$0xff] }
 0x65f   :  { %2430 = vmatpush.msrb.mxu3 %v5344_v44  ;;  %v2668_v44 = vld [vmem:[%s9295_s28 + $0x18] sm:$0xff] }
 0x661   :  { %2431 = vmatpush.msrb.mxu3 %v5343_v20  ;;  %v5412_v20 = vld [vmem:[%s9294_s19 + $0x1c0] sm:$0xff] }
 0x663   :  { %v2150_v42 = vpop.f32.mrf.mxu2  ;;  %2432 = vmatpush.msrb.mxu3 %v5342_v58  ;;  %v2599_v58 = vld [vmem:[%s9272_s20 + $0x78] sm:$0xff] }
 0x664   :  { %5321 = vmatmul.msk.f32.gmra.mxu3 %vm263_vm0, %v2150_v42  ;;  %v5360_v42 = vld [vmem:[%s9269_s17 + $0xb8] sm:$0xff] }
 0x6d2   :  { %v2115_v5 = vpop.f32.mrf.mxu1 }
 0x6d3   :  { %v2116_v27 = vadd.f32 %v2115_v5, %v2086_v62  ;;  %v5348_v62 = vld [vmem:[%s9269_s17 + $0x68] sm:$0xff]  ;;  %v5359_v5 = vld [vmem:[%s9269_s17 + $0xb0] sm:$0xff] }
 0x6da   :  { %v2118_v38 = vpop.f32.mrf.mxu1 }
 0x6db   :  { %v2119_v50 = vadd.f32 %v2118_v38, %v2089_v8  ;;  %v5354_v8 = vld [vmem:[%s9269_s17 + $0x90] sm:$0xff] }
 0x6df   :  { %v2185_v16 = vpop.f32.mrf.mxu3 }
 0x6e0   :  { %v2191_v39 = vadd.f32 %v2185_v16, %v2116_v27  ;;  %v5357_v16 = vld [vmem:[%s9269_s17 + $0xa0] sm:$0xff] }
 0x6e2   :  { %v2197_v51 = vmul.f32 %v5727_v4, %v2191_v39 }
 0x6e4   :  { %v2204_v14 = vadd.f32 %v5728_v49, %v2197_v51  ;;  %v5365_v51 = vld [vmem:[%s9269_s17 + $0xd8] sm:$0xff] }
 0x6e6   :  { %v2206_v11 = vmax.f32 %v2204_v14, 0.0  ;;  %v7665_v14 = vld [vmem:[%s9293_s6 + $0xe0] sm:$0xff] }
 0x6e7   :  { %v2188_v23 = vpop.f32.mrf.mxu3 }
 0x6e8   :  { %v2192_v56 = vadd.f32 %v2188_v23, %v2119_v50 }
 0x6ea   :  { %v2198_v21 = vmul.f32 %v5727_v4, %v2192_v56  ;;  %v5370_v4 = vld [vmem:[%s9269_s17 + $0xf8] sm:$0xff]  ;;  %v5369_v56 = vld [vmem:[%s9269_s17 + $0xf0] sm:$0xff] }
 0x6ec   :  { %v2205_v57 = vadd.f32 %v5728_v49, %v2198_v21  ;;  %v7652_v49 = vld [vmem:[%s9293_s6 + $0xf0] sm:$0xff] }
 0x6ed   :  { %v5364_v21 = vld [vmem:[%s9269_s17 + $0xd0] sm:$0xff] }
 0x6ee   :  { %v2207_v10 = vmax.f32 %v2205_v57, 0.0  ;;  %v5368_v57 = vld [vmem:[%s9269_s17 + $0xe8] sm:$0xff] }
 0x6f0   :  { %2226 = vmatpush.msra.mxu1 %v2207_v10 }
 0x6f2   :  { %2227 = vmatpush.msra.mxu1 %v2206_v11 }
 0x6f3   :  { %5322 = vmatmul.msk.f32.vlgmr.msra.gmra.mxu1 %vm2016_vm2, %v2208_v13  ;;  %v7677_v13 = vld [vmem:[%s9293_s6 + $0xd0] sm:$0xff] }
 0x6f4   :  { %2251 = vmatpush.msrb.mxu1 %v2207_v10  ;;  %v5363_v10 = vld [vmem:[%s9269_s17 + $0xc8] sm:$0xff] }
 0x6f6   :  { %2252 = vmatpush.msrb.mxu1 %v2206_v11  ;;  %v5367_v11 = vld [vmem:[%s9269_s17 + $0xe0] sm:$0xff] }
 0x6f8   :  { %2371 = vmatpush.msra.mxu1 %v2355_v28  ;;  %v5428_v28 = vld [vmem:[%s9294_s19 + $0x240] sm:$0xff] }
 0x6fa   :  { %2372 = vmatpush.msra.mxu1 %v2354_v18  ;;  %v7742_v18 = vld [vmem:[%s9293_s6 + $0xf8] sm:$0xff] }
 0x6fb   :  { %5324 = vmatmul.msk.f32.vlgmr.msrb.gmra.mxu1 %vm2016_vm2, %v5323_v12  ;;  %2746 = vmatpush.msra.mxu0 %v7742_v18 }
 0x6fc   :  { %2373 = vmatpush.msra.mxu1 %v2353_v37  ;;  %v7790_v37 = vld [vmem:[%s9293_s6 + $0xa8] sm:$0xff] }
 0x6fd   :  { %2747 = vmatpush.msra.mxu0 %v7748_v30 }
 0x6fe   :  { %2374 = vmatpush.msra.mxu1 %v2352_v41  ;;  %v5414_v41 = vld [vmem:[%s9294_s19 + $0x1d0] sm:$0xff] }
 0x6ff   :  { %2748 = vmatpush.msra.mxu0 %v7764_v34 }
 0x700   :  { %2458 = vmatpush.msrb.mxu1 %v5350_v3  ;;  %v2598_v3 = vld [vmem:[%s9272_s20 + $0x70] sm:$0xff] }
 0x702   :  { %2459 = vmatpush.msrb.mxu1 %v5349_v0  ;;  %v5408_v0 = vld [vmem:[%s9294_s19 + $0x1a0] sm:$0xff] }
 0x704   :  { %2460 = vmatpush.msrb.mxu1 %v5348_v62  ;;  %v5406_v62 = vld [vmem:[%s9294_s19 + $0x190] sm:$0xff] }
 0x706   :  { %2461 = vmatpush.msrb.mxu1 %v5347_v9  ;;  %v2596_v9 = vld [vmem:[%s9272_s20 + $0x60] sm:$0xff] }
 0x770   :  { %v2229_v24 = vpop.f32.mrf.mxu1 }
 0x778   :  { %v2254_v55 = vpop.f32.mrf.mxu1 }
 0x779   :  { %v2257_v59 = vmax.f32 %v2229_v24, %v2254_v55  ;;  %v7772_v24 = vld [vmem:[%s9293_s6 + $0xc8] sm:$0xff]  ;;  %v5420_v55 = vld [vmem:[%s9294_s19 + $0x200] sm:$0xff] }
 0x77a   :  { %2749 = vmatpush.msra.mxu0 %v7772_v24 }
 0x77b   :  { %5325 = vmatmul.msk.f32.vlgmr.msrb.gmra.mxu2 %vm263_vm0, %v2257_v59  ;;  %5334 = vmatmul.msk.f32.vlgmr.msra.gmra.mxu3 %vm263_vm0, %v2257_v59  ;;  %v7781_v59 = vld [vmem:[%s9293_s6 + $0xb8] sm:$0xff] }
 0x77c   :  { %2487 = vmatpush.msrb.mxu2 %v5355_v48  ;;  %2516 = vmatpush.msra.mxu3 %v5360_v42  ;;  %v2669_v48 = vld [vmem:[%s9295_s28 + $0x20] sm:$0xff]  ;;  %v2597_v42 = vld [vmem:[%s9272_s20 + $0x68] sm:$0xff] }
 0x77d   :  { %2750 = vmatpush.msra.mxu0 %v7781_v59 }
 0x77e   :  { %2488 = vmatpush.msrb.mxu2 %v5354_v8  ;;  %2517 = vmatpush.msra.mxu3 %v5359_v5  ;;  %v5404_v8 = vld [vmem:[%s9294_s19 + $0x180] sm:$0xff]  ;;  %v2670_v5 = vld [vmem:[%s9295_s28 + $0x28] sm:$0xff] }
 0x77f   :  { %2751 = vmatpush.msra.mxu0 %v7790_v37 }
 0x780   :  { %2489 = vmatpush.msrb.mxu2 %v5353_v26  ;;  %2518 = vmatpush.msra.mxu3 %v5358_v2  ;;  %v2671_v26 = vld [vmem:[%s9295_s28 + $0x30] sm:$0xff]  ;;  %v2672_v2 = vld [vmem:[%s9295_s28 + $0x38] sm:$0xff] }
 0x781   :  { %2752 = vmatpush.msra.mxu0 %v7804_v40 }
 0x782   :  { %2490 = vmatpush.msrb.mxu2 %v5352_v29  ;;  %2519 = vmatpush.msra.mxu3 %v5357_v16  ;;  %v5435_v29 = vld [vmem:[%s9294_s19 + $0x278] sm:$0xff] }
 0x783   :  { %2753 = vmatpush.msra.mxu0 %v7812_v46  ;;  %v2595_v16 = vld [vmem:[%s9272_s20 + $0x58] sm:$0xff] }
 0x784   :  { %5396 = vmatmul.msk.f32.vlgmr.msra.gmra.mxu0 %vm263_vm0, %v2665_v6 }
 0x78c   :  { %5397 = vmatmul.msk.f32.gmra.mxu0 %vm263_vm0, %v2666_v19 }
 0x794   :  { %5398 = vmatmul.msk.f32.gmra.mxu0 %vm263_vm0, %v2667_v22 }
 0x79c   :  { %5399 = vmatmul.msk.f32.gmra.mxu0 %vm263_vm0, %v2668_v44 }
 0x7a4   :  { %5400 = vmatmul.msk.f32.gmra.mxu0 %vm263_vm0, %v2669_v48 }
 0x7ac   :  { %5401 = vmatmul.msk.f32.gmra.mxu0 %vm263_vm0, %v2670_v5 }
 0x7b4   :  { %5402 = vmatmul.msk.f32.gmra.mxu0 %vm263_vm0, %v2671_v26 }
 0x7bc   :  { %5403 = vmatmul.msk.f32.gmra.mxu0 %vm263_vm0, %v2672_v2 }
 0x7fe   :  { %v2286_v27 = vpop.f32.mrf.mxu2  ;;  %v2315_v38 = vpop.f32.mrf.mxu3 }
 0x7ff   :  { %v2318_v39 = vmax.f32 %v2286_v27, %v2315_v38  ;;  %v5433_v27 = vld [vmem:[%s9294_s19 + $0x268] sm:$0xff]  ;;  %v2594_v38 = vld [vmem:[%s9272_s20 + $0x50] sm:$0xff] }
 0x801   :  { %5336 = vmatmul.msk.f32.vlgmr.msra.gmra.mxu1 %vm1618_vm1, %v2318_v39  ;;  %v2385_v50 = vrot.slane %v2318_v39, 1  ;;  %v2414_v23 = vrot.slane %v2318_v39, 2  ;;  %v2443_v12 = vrot.slane %v2318_v39, 3  ;;  %v2472_v32 = vrot.slane %v2318_v39, 4 }
 0x802   :  { %2574 = vmatpush.msra.mxu1 %v5370_v4  ;;  %v2501_v61 = vrot.slane %v2318_v39, 5  ;;  %v2559_v60 = vrot.slane %v2318_v39, 7  ;;  %v2530_v63 = vrot.slane %v2318_v39, 6  ;;  %v5431_v39 = vld [vmem:[%s9294_s19 + $0x258] sm:$0xff]  ;;  %v2593_v4 = vld [vmem:[%s9272_s20 + $0x48] sm:$0xff] }
 0x803   :  { %5341 = vmatmul.msk.f32.vlgmr.msra.gmra.mxu2 %vm1618_vm1, %v2385_v50  ;;  %5346 = vmatmul.msk.f32.vlgmr.msrb.gmra.mxu3 %vm1618_vm1, %v2414_v23  ;;  %v5429_v50 = vld [vmem:[%s9294_s19 + $0x248] sm:$0xff]  ;;  %v2592_v23 = vld [vmem:[%s9272_s20 + $0x40] sm:$0xff] }
 0x804   :  { %2545 = vmatpush.msra.mxu2 %v5365_v51  ;;  %2575 = vmatpush.msra.mxu1 %v5369_v56  ;;  %v5427_v51 = vld [vmem:[%s9294_s19 + $0x238] sm:$0xff] }
 0x805   :  { %2705 = vmatpush.msrb.mxu3 %v7652_v49  ;;  %v2591_v56 = vld [vmem:[%s9272_s20 + $0x38] sm:$0xff] }
 0x806   :  { %2546 = vmatpush.msra.mxu2 %v5364_v21  ;;  %2576 = vmatpush.msra.mxu1 %v5368_v57  ;;  %v5425_v21 = vld [vmem:[%s9294_s19 + $0x228] sm:$0xff]  ;;  %v2590_v57 = vld [vmem:[%s9272_s20 + $0x30] sm:$0xff] }
 0x807   :  { %2706 = vmatpush.msrb.mxu3 %v7665_v14 }
 0x808   :  { %2547 = vmatpush.msra.mxu2 %v5363_v10  ;;  %2577 = vmatpush.msra.mxu1 %v5367_v11  ;;  %v5423_v10 = vld [vmem:[%s9294_s19 + $0x218] sm:$0xff]  ;;  %v2589_v11 = vld [vmem:[%s9272_s20 + $0x28] sm:$0xff] }
 0x809   :  { %5351 = vmatmul.msk.f32.vlgmr.msrb.gmra.mxu1 %vm1618_vm1, %v2443_v12  ;;  %2707 = vmatpush.msrb.mxu3 %v7677_v13  ;;  %v5421_v12 = vld [vmem:[%s9294_s19 + $0x208] sm:$0xff] }
 0x80a   :  { %2548 = vmatpush.msra.mxu2 %v5362_v25  ;;  %2899 = vmatpush.msrb.mxu1 %v5434_v1  ;;  %v2588_v25 = vld [vmem:[%s9272_s20 + $0x20] sm:$0xff]  ;;  %v2586_v1 = vld [vmem:[%s9272_s20 + $0x10] sm:$0xff] }
 0x80b   :  { %5356 = vmatmul.msk.f32.vlgmr.msrb.gmra.mxu2 %vm1618_vm1, %v2472_v32  ;;  %5361 = vmatmul.msk.f32.vlgmr.msra.gmra.mxu3 %vm1618_vm1, %v2501_v61  ;;  %v5419_v32 = vld [vmem:[%s9294_s19 + $0x1f8] sm:$0xff]  ;;  %v2809_v61 = vld [vmem:[%s9294_s19 + $0xf0] sm:$0xff] }
 0x80c   :  { %2708 = vmatpush.msrb.mxu3 %v7688_v35  ;;  %2900 = vmatpush.msrb.mxu1 %v5432_v7  ;;  %v5415_v7 = vld [vmem:[%s9294_s19 + $0x1d8] sm:$0xff] }
 0x80d   :  { %2601 = vmatpush.msrb.mxu2 %v2599_v58  ;;  %v5407_v58 = vld [vmem:[%s9294_s19 + $0x198] sm:$0xff] }
 0x80e   :  { %2709 = vmatpush.msrb.mxu3 %v7695_v45  ;;  %2901 = vmatpush.msrb.mxu1 %v5430_v15  ;;  %v2585_v15 = vld [vmem:[%s9272_s20 + $0x8] sm:$0xff] }
 0x80f   :  { %2602 = vmatpush.msrb.mxu2 %v2598_v3  ;;  %v5447_v3 = vld [vmem:[%s9294_s19 + $0x2d8] sm:$0xff] }
 0x810   :  { %2710 = vmatpush.msrb.mxu3 %v7701_v52  ;;  %2902 = vmatpush.msrb.mxu1 %v5428_v28  ;;  %v5413_v28 = vld [vmem:[%s9294_s19 + $0x1c8] sm:$0xff] }
 0x811   :  { %5371 = vmatmul.msk.f32.vlgmr.msra.gmra.mxu1 %vm1618_vm1, %v2559_v60  ;;  %2603 = vmatpush.msrb.mxu2 %v2597_v42  ;;  %v2587_v60 = vld [vmem:[%s9272_s20 + $0x18] sm:$0xff]  ;;  %v5405_v42 = vld [vmem:[%s9294_s19 + $0x188] sm:$0xff] }
 0x812   :  { %2711 = vmatpush.msrb.mxu3 %v7707_v17  ;;  %2903 = vmatpush.msrb.mxu1 %v5426_v31  ;;  %v2803_v31 = vld [vmem:[%s9294_s19 + $0xc0] sm:$0xff] }
 0x813   :  { %5366 = vmatmul.msk.f32.vlgmr.msra.gmra.mxu2 %vm1618_vm1, %v2530_v63  ;;  %v5417_v63 = vld [vmem:[%s9294_s19 + $0x1e8] sm:$0xff] }
 0x814   :  { %2712 = vmatpush.msrb.mxu3 %v7714_v53  ;;  %2904 = vmatpush.msrb.mxu1 %v5424_v33  ;;  %v2584_v33 = vld [vmem:[%s9272_s20] sm:$0xff] }
 0x815   :  { %5388 = vmatmul.msk.f32.vlgmr.msrb.gmra.mxu3 %vm263_vm0, %v2665_v6  ;;  %2604 = vmatpush.msrb.mxu2 %v2596_v9  ;;  %v2807_v6 = vld [vmem:[%s9294_s19 + $0xe0] sm:$0xff]  ;;  %v5443_v9 = vld [vmem:[%s9294_s19 + $0x2b8] sm:$0xff] }
 0x816   :  { %2905 = vmatpush.msrb.mxu1 %v5422_v54  ;;  %2981 = vmatpush.msra.mxu3 %v5435_v29  ;;  %v5411_v54 = vld [vmem:[%s9294_s19 + $0x1b8] sm:$0xff]  ;;  %v2349_v29 = vpop.f32.mrf.mxu0 }
 0x817   :  { %2605 = vmatpush.msrb.mxu2 %v2595_v16  ;;  %v5440_v16 = vld [vmem:[%s9294_s19 + $0x2a0] sm:$0xff] }
 0x818   :  { %2906 = vmatpush.msrb.mxu1 %v5420_v55  ;;  %2982 = vmatpush.msra.mxu3 %v5433_v27  ;;  %v5451_v55 = vld [vmem:[%s9294_s19 + $0x2f8] sm:$0xff]  ;;  %v5441_v27 = vld [vmem:[%s9294_s19 + $0x2a8] sm:$0xff] }
 0x819   :  { %2606 = vmatpush.msrb.mxu2 %v2594_v38  ;;  %3030 = vmatpush.msrb.mxu0 %v5451_v55  ;;  %v2791_v38 = vld [vmem:[%s9294_s19 + $0x60] sm:$0xff] }
 0x81a   :  { %2907 = vmatpush.msrb.mxu1 %v5418_v36  ;;  %2983 = vmatpush.msra.mxu3 %v5431_v39  ;;  %v2801_v36 = vld [vmem:[%s9294_s19 + $0xb0] sm:$0xff] }
 0x81b   :  { %2607 = vmatpush.msrb.mxu2 %v2593_v4  ;;  %v5438_v39 = vld [vmem:[%s9294_s19 + $0x290] sm:$0xff] }
 0x81c   :  { %2908 = vmatpush.msrb.mxu1 %v5416_v43  ;;  %2984 = vmatpush.msra.mxu3 %v5429_v50  ;;  %v5448_v43 = vld [vmem:[%s9294_s19 + $0x2e0] sm:$0xff]  ;;  %v5439_v50 = vld [vmem:[%s9294_s19 + $0x298] sm:$0xff] }
 0x81d   :  { %5389 = vmatmul.msk.f32.gmra.mxu3 %vm263_vm0, %v2666_v19  ;;  %2608 = vmatpush.msrb.mxu2 %v2592_v23  ;;  %v2805_v19 = vld [vmem:[%s9294_s19 + $0xd0] sm:$0xff] }
 0x81e   :  { %2909 = vmatpush.msrb.mxu1 %v5414_v41  ;;  %2985 = vmatpush.msra.mxu3 %v5427_v51  ;;  %v5449_v41 = vld [vmem:[%s9294_s19 + $0x2e8] sm:$0xff]  ;;  %v2789_v23 = vld [vmem:[%s9294_s19 + $0x50] sm:$0xff] }
 0x81f   :  { %2609 = vmatpush.msrb.mxu2 %v2591_v56  ;;  %3031 = vmatpush.msrb.mxu0 %v5449_v41  ;;  %v5436_v56 = vld [vmem:[%s9294_s19 + $0x280] sm:$0xff]  ;;  %v2808_v41 = vld [vmem:[%s9294_s19 + $0xe8] sm:$0xff] }
 0x820   :  { %2910 = vmatpush.msrb.mxu1 %v5412_v20  ;;  %2986 = vmatpush.msra.mxu3 %v5425_v21  ;;  %v2799_v20 = vld [vmem:[%s9294_s19 + $0xa0] sm:$0xff]  ;;  %v5437_v21 = vld [vmem:[%s9294_s19 + $0x288] sm:$0xff] }
 0x821   :  { %2610 = vmatpush.msrb.mxu2 %v2590_v57  ;;  %3032 = vmatpush.msrb.mxu0 %v5447_v3  ;;  %v2787_v57 = vld [vmem:[%s9294_s19 + $0x40] sm:$0xff]  ;;  %v2792_v3 = vld [vmem:[%s9294_s19 + $0x68] sm:$0xff] }
 0x822   :  { %2911 = vmatpush.msrb.mxu1 %v5410_v47  ;;  %2987 = vmatpush.msra.mxu3 %v5423_v10  ;;  %v5446_v47 = vld [vmem:[%s9294_s19 + $0x2d0] sm:$0xff] }
 0x823   :  { %2611 = vmatpush.msrb.mxu2 %v2589_v11  ;;  %v2785_v11 = vld [vmem:[%s9294_s19 + $0x30] sm:$0xff] }
 0x824   :  { %2912 = vmatpush.msrb.mxu1 %v5408_v0  ;;  %2988 = vmatpush.msra.mxu3 %v5421_v12  ;;  %v2797_v0 = vld [vmem:[%s9294_s19 + $0x90] sm:$0xff] }
 0x825   :  { %5390 = vmatmul.msk.f32.gmra.mxu3 %vm263_vm0, %v2667_v22  ;;  %2612 = vmatpush.msrb.mxu2 %v2588_v25  ;;  %v5450_v22 = vld [vmem:[%s9294_s19 + $0x2f0] sm:$0xff] }
 0x826   :  { %2913 = vmatpush.msrb.mxu1 %v5406_v62  ;;  %2989 = vmatpush.msra.mxu3 %v5419_v32  ;;  %v5445_v62 = vld [vmem:[%s9294_s19 + $0x2c8] sm:$0xff] }
 0x827   :  { %2613 = vmatpush.msrb.mxu2 %v2587_v60  ;;  %3033 = vmatpush.msrb.mxu0 %v5445_v62  ;;  %v2781_v60 = vld [vmem:[%s9294_s19 + $0x10] sm:$0xff]  ;;  %v2786_v62 = vld [vmem:[%s9294_s19 + $0x38] sm:$0xff] }
 0x828   :  { %2914 = vmatpush.msrb.mxu1 %v5404_v8  ;;  %2990 = vmatpush.msra.mxu3 %v5417_v63  ;;  %v2795_v8 = vld [vmem:[%s9294_s19 + $0x80] sm:$0xff] }
 0x829   :  { %2915 = vmatmul.f32.vlgmr.msrb.gmra.mxu1 %v7714_v53  ;;  %2614 = vmatpush.msrb.mxu2 %v2586_v1 }
 0x82a   :  { %3087 = vmatpush.msra.mxu1 %v2809_v61  ;;  %2991 = vmatpush.msra.mxu3 %v5415_v7  ;;  %v2783_v61 = vld [vmem:[%s9294_s19 + $0x20] sm:$0xff] }
 0x82b   :  { %2615 = vmatpush.msrb.mxu2 %v2585_v15  ;;  %3034 = vmatpush.msrb.mxu0 %v5443_v9  ;;  %v2784_v9 = vld [vmem:[%s9294_s19 + $0x28] sm:$0xff] }
 0x82c   :  { %3088 = vmatpush.msra.mxu1 %v2807_v6  ;;  %2992 = vmatpush.msra.mxu3 %v5413_v28  ;;  %v2779_v6 = vld [vmem:[%s9294_s19] sm:$0xff] }
 0x82d   :  { %5391 = vmatmul.msk.f32.gmra.mxu3 %vm263_vm0, %v2668_v44  ;;  %2616 = vmatpush.msrb.mxu2 %v2584_v33  ;;  %v5409_v44 = vld [vmem:[%s9294_s19 + $0x1a8] sm:$0xff] }
 0x82e   :  { %3089 = vmatpush.msra.mxu1 %v2805_v19  ;;  %2993 = vmatpush.msra.mxu3 %v5411_v54 }
 0x82f   :  { %2948 = vmatpush.msra.mxu2 %v5450_v22  ;;  %3035 = vmatpush.msrb.mxu0 %v5441_v27  ;;  %v2819_v27 = vld [vmem:[%s9294_s19 + $0x140] sm:$0xff] }
 0x830   :  { %3090 = vmatpush.msra.mxu1 %v2803_v31  ;;  %2994 = vmatpush.msra.mxu3 %v5409_v44  ;;  %v2810_v44 = vld [vmem:[%s9294_s19 + $0xf8] sm:$0xff] }
 0x831   :  { %2918 = vmatmul.f32.gmra.mxu1 %v7707_v17  ;;  %2949 = vmatpush.msra.mxu2 %v5448_v43 }
 0x832   :  { %3091 = vmatpush.msra.mxu1 %v2801_v36  ;;  %2995 = vmatpush.msra.mxu3 %v5407_v58  ;;  %v2796_v58 = vld [vmem:[%s9294_s19 + $0x88] sm:$0xff] }
 0x833   :  { %2950 = vmatpush.msra.mxu2 %v5446_v47  ;;  %3036 = vmatpush.msrb.mxu0 %v5439_v50  ;;  %v2818_v50 = vld [vmem:[%s9294_s19 + $0x138] sm:$0xff] }
 0x834   :  { %3092 = vmatpush.msra.mxu1 %v2799_v20  ;;  %2996 = vmatpush.msra.mxu3 %v5405_v42  ;;  %v2798_v20 = vld [vmem:[%s9294_s19 + $0x98] sm:$0xff]  ;;  %v2788_v42 = vld [vmem:[%s9294_s19 + $0x48] sm:$0xff] }
 0x835   :  { %5392 = vmatmul.msk.f32.gmra.mxu3 %vm263_vm0, %v2669_v48  ;;  %v5444_v48 = vld [vmem:[%s9294_s19 + $0x2c0] sm:$0xff]  ;;  %3037 = vmatpush.msrb.mxu0 %v5437_v21  ;;  %v2813_v21 = vld [vmem:[%s9294_s19 + $0x110] sm:$0xff] }
 0x836   :  { %3093 = vmatpush.msra.mxu1 %v2797_v0  ;;  %2951 = vmatpush.msra.mxu2 %v5444_v48  ;;  %v2790_v0 = vld [vmem:[%s9294_s19 + $0x58] sm:$0xff] }
 0x837   :  { %5460 = vmatmul.msk.f32.vlgmr.msrb.gmra.mxu0 %vm263_vm0, %v7812_v46  ;;  %3169 = vmatpush.msrb.mxu3 %v2810_v44 }
 0x838   :  { %3094 = vmatpush.msra.mxu1 %v2795_v8  ;;  %v2826_v8 = vld [vmem:[%s9294_s19 + $0x178] sm:$0xff] }
 0x839   :  { %2921 = vmatmul.f32.gmra.mxu1 %v7701_v52  ;;  %3170 = vmatpush.msrb.mxu3 %v2808_v41 }
 0x83a   :  { %3218 = vmatpush.msra.mxu0 %v2826_v8  ;;  %v5538_v8 = vld [vmem:[%s9294_s19 + $0x3f0] sm:$0xff] }
 0x83d   :  { %5393 = vmatmul.msk.f32.gmra.mxu3 %vm263_vm0, %v2670_v5  ;;  %v5442_v5 = vld [vmem:[%s9294_s19 + $0x2b0] sm:$0xff] }
 0x83e   :  { %2952 = vmatpush.msra.mxu2 %v5442_v5  ;;  %v2823_v5 = vld [vmem:[%s9294_s19 + $0x160] sm:$0xff] }
 0x83f   :  { %5461 = vmatmul.msk.f32.gmra.mxu0 %vm263_vm0, %v7804_v40 }
 0x840   :  { %2953 = vmatpush.msra.mxu2 %v5440_v16  ;;  %v2782_v16 = vld [vmem:[%s9294_s19 + $0x18] sm:$0xff] }
 0x841   :  { %2924 = vmatmul.f32.gmra.mxu1 %v7695_v45 }
 0x842   :  { %2954 = vmatpush.msra.mxu2 %v5438_v39  ;;  %v2820_v39 = vld [vmem:[%s9294_s19 + $0x148] sm:$0xff] }
 0x844   :  { %2955 = vmatpush.msra.mxu2 %v5436_v56  ;;  %v2816_v56 = vld [vmem:[%s9294_s19 + $0x128] sm:$0xff] }
 0x845   :  { %5394 = vmatmul.msk.f32.gmra.mxu3 %vm263_vm0, %v2671_v26  ;;  %v2793_v26 = vld [vmem:[%s9294_s19 + $0x70] sm:$0xff] }
 0x846   :  { %3095 = vmatpush.msra.mxu1 %v2793_v26  ;;  %v2824_v26 = vld [vmem:[%s9294_s19 + $0x168] sm:$0xff] }
 0x847   :  { %5462 = vmatmul.msk.f32.gmra.mxu0 %vm263_vm0, %v7790_v37 }
 0x848   :  { %3096 = vmatpush.msra.mxu1 %v2791_v38  ;;  %3219 = vmatpush.msra.mxu0 %v2824_v26  ;;  %v2780_v38 = vld [vmem:[%s9294_s19 + $0x8] sm:$0xff] }
 0x849   :  { %2927 = vmatmul.f32.gmra.mxu1 %v7688_v35 }
 0x84a   :  { %3097 = vmatpush.msra.mxu1 %v2789_v23  ;;  %v2815_v23 = vld [vmem:[%s9294_s19 + $0x120] sm:$0xff] }
 0x84c   :  { %3098 = vmatpush.msra.mxu1 %v2787_v57 }
 0x84d   :  { %5395 = vmatmul.msk.f32.gmra.mxu3 %vm263_vm0, %v2672_v2  ;;  %v2328_v2 = vld [vmem:[#allocation17] sm:$0x1] }
 0x84e   :  { %v2350_v4 = vadd.f32 %v2349_v29, %v2328_v2  ;;  %3099 = vmatpush.msra.mxu1 %v2785_v11  ;;  %v2821_v2 = vld [vmem:[%s9294_s19 + $0x150] sm:$0xff]  ;;  %v2811_v11 = vld [vmem:[%s9294_s19 + $0x100] sm:$0xff] }
 0x84f   :  { %5463 = vmatmul.msk.f32.gmra.mxu0 %vm263_vm0, %v7781_v59 }
 0x850   :  { %3100 = vmatpush.msra.mxu1 %v2783_v61 }
 0x851   :  { %2930 = vmatmul.f32.gmra.mxu1 %v7677_v13 }
 0x852   :  { %3101 = vmatpush.msra.mxu1 %v2781_v60 }
 0x854   :  { %3102 = vmatpush.msra.mxu1 %v2779_v6  ;;  %v5484_v6 = vld [vmem:[%s9295_s28 + $0x40] sm:$0xff] }
 0x855   :  { %2997 = vmatmul.f32.vlgmr.msra.gmra.mxu3 %v7714_v53 }
 0x856   :  { %3291 = vmatpush.msrb.mxu1 %v7652_v49 }
 0x857   :  { %5464 = vmatmul.msk.f32.gmra.mxu0 %vm263_vm0, %v7772_v24 }
 0x858   :  { %3292 = vmatpush.msrb.mxu1 %v7665_v14 }
 0x859   :  { %2933 = vmatmul.f32.gmra.mxu1 %v7665_v14 }
 0x85a   :  { %3293 = vmatpush.msrb.mxu1 %v7677_v13 }
 0x85c   :  { %3294 = vmatpush.msrb.mxu1 %v7688_v35 }
 0x85d   :  { %3000 = vmatmul.f32.gmra.mxu3 %v7707_v17 }
 0x85e   :  { %3295 = vmatpush.msrb.mxu1 %v7695_v45 }
 0x85f   :  { %5465 = vmatmul.msk.f32.gmra.mxu0 %vm263_vm0, %v7764_v34 }
 0x860   :  { %3296 = vmatpush.msrb.mxu1 %v7701_v52 }
 0x861   :  { %2936 = vmatmul.f32.gmra.mxu1 %v7652_v49 }
 0x862   :  { %3297 = vmatpush.msrb.mxu1 %v7707_v17  ;;  %v2804_v17 = vld [vmem:[%s9294_s19 + $0xc8] sm:$0xff] }
 0x864   :  { %3298 = vmatpush.msrb.mxu1 %v7714_v53  ;;  %v2800_v53 = vld [vmem:[%s9294_s19 + $0xa8] sm:$0xff] }
 0x865   :  { %3003 = vmatmul.f32.gmra.mxu3 %v7701_v52 }
 0x867   :  { %5466 = vmatmul.msk.f32.gmra.mxu0 %vm263_vm0, %v7748_v30 }
 0x86d   :  { %3006 = vmatmul.f32.gmra.mxu3 %v7695_v45  ;;  %v2806_v45 = vld [vmem:[%s9294_s19 + $0xd8] sm:$0xff] }
 0x86e   :  { %3171 = vmatpush.msrb.mxu3 %v2806_v45  ;;  %v5489_v45 = vld [vmem:[%s9295_s28 + $0x68] sm:$0xff] }
 0x86f   :  { %5467 = vmatmul.msk.f32.gmra.mxu0 %vm263_vm0, %v7742_v18 }
 0x870   :  { %3172 = vmatpush.msrb.mxu3 %v2804_v17 }
 0x875   :  { %3009 = vmatmul.f32.gmra.mxu3 %v7688_v35  ;;  %v2802_v35 = vld [vmem:[%s9294_s19 + $0xb8] sm:$0xff] }
 0x876   :  { %3173 = vmatpush.msrb.mxu3 %v2802_v35  ;;  %v5490_v35 = vld [vmem:[%s9295_s28 + $0x70] sm:$0xff] }
 0x878   :  { %3174 = vmatpush.msrb.mxu3 %v2800_v53 }
 0x87a   :  { %3175 = vmatpush.msrb.mxu3 %v2798_v20  ;;  %v5491_v20 = vld [vmem:[%s9295_s28 + $0x78] sm:$0xff] }
 0x87c   :  { %3176 = vmatpush.msrb.mxu3 %v2796_v58 }
 0x87d   :  { %3012 = vmatmul.f32.gmra.mxu3 %v7677_v13  ;;  %v2794_v13 = vld [vmem:[%s9294_s19 + $0x78] sm:$0xff] }
 0x87e   :  { %v2376_v51 = vpop.f32.mrf.mxu1  ;;  %3177 = vmatpush.msrb.mxu3 %v2794_v13 }
 0x87f   :  { %v2379_v10 = vadd.f32 %v2376_v51, %v2350_v4  ;;  %v2817_v4 = vld [vmem:[%s9294_s19 + $0x130] sm:$0xff]  ;;  %v2755_v51 = vpop.f32.mrf.mxu0 }
 0x880   :  { %3178 = vmatpush.msrb.mxu3 %v2792_v3 }
 0x882   :  { %3179 = vmatpush.msrb.mxu3 %v2790_v0 }
 0x884   :  { %3180 = vmatpush.msrb.mxu3 %v2788_v42 }
 0x885   :  { %3015 = vmatmul.f32.gmra.mxu3 %v7665_v14  ;;  %v2825_v14 = vld [vmem:[%s9294_s19 + $0x170] sm:$0xff] }
 0x886   :  { %v2405_v12 = vpop.f32.mrf.mxu2  ;;  %v2434_v25 = vpop.f32.mrf.mxu3  ;;  %3181 = vmatpush.msrb.mxu3 %v2786_v62 }
 0x887   :  { %v2408_v32 = vadd.f32 %v2405_v12, %v2379_v10  ;;  %v2463_v1 = vpop.f32.mrf.mxu1  ;;  %v2814_v10 = vld [vmem:[%s9294_s19 + $0x118] sm:$0xff]  ;;  %v2812_v12 = vld [vmem:[%s9294_s19 + $0x108] sm:$0xff] }
 0x888   :  { %3182 = vmatpush.msrb.mxu3 %v2784_v9 }
 0x889   :  { %v2437_v63 = vadd.f32 %v2434_v25, %v2408_v32  ;;  %v2758_v25 = vpop.f32.mrf.mxu0 }
 0x88a   :  { %3183 = vmatpush.msrb.mxu3 %v2782_v16  ;;  %v5539_v16 = vld [vmem:[%s9294_s19 + $0x3f8] sm:$0xff] }
 0x88b   :  { %v2466_v19 = vadd.f32 %v2463_v1, %v2437_v63 }
 0x88c   :  { %3184 = vmatpush.msrb.mxu3 %v2780_v38  ;;  %v5535_v38 = vld [vmem:[%s9294_s19 + $0x3d8] sm:$0xff] }
 0x88d   :  { %3018 = vmatmul.f32.gmra.mxu3 %v7652_v49  ;;  %v2822_v49 = vld [vmem:[%s9294_s19 + $0x158] sm:$0xff] }
 0x88e   :  { %v2492_v7 = vpop.f32.mrf.mxu2  ;;  %v2521_v15 = vpop.f32.mrf.mxu3  ;;  %3220 = vmatpush.msra.mxu0 %v2822_v49  ;;  %3437 = vmatpush.msra.mxu3 %v5538_v8  ;;  %v5530_v49 = vld [vmem:[%s9294_s19 + $0x3b0] sm:$0xff]  ;;  %v5517_v8 = vld [vmem:[%s9294_s19 + $0x348] sm:$0xff] }
 0x88f   :  { %v2495_v28 = vadd.f32 %v2492_v7, %v2466_v19  ;;  %v2579_v54 = vpop.f32.mrf.mxu1  ;;  %v5485_v7 = vld [vmem:[%s9295_s28 + $0x48] sm:$0xff]  ;;  %v5486_v19 = vld [vmem:[%s9295_s28 + $0x50] sm:$0xff] }
 0x890   :  { %3221 = vmatpush.msra.mxu0 %v2820_v39  ;;  %v5528_v39 = vld [vmem:[%s9294_s19 + $0x3a0] sm:$0xff] }
 0x891   :  { %v2524_v31 = vadd.f32 %v2521_v15, %v2495_v28  ;;  %v2761_v61 = vpop.f32.mrf.mxu0  ;;  %v5487_v28 = vld [vmem:[%s9295_s28 + $0x58] sm:$0xff] }
 0x892   :  { %3222 = vmatpush.msra.mxu0 %v2818_v50 }
 0x894   :  { %3223 = vmatpush.msra.mxu0 %v2816_v56  ;;  %v5524_v56 = vld [vmem:[%s9294_s19 + $0x380] sm:$0xff] }
 0x896   :  { %v2550_v33 = vpop.f32.mrf.mxu2  ;;  %3224 = vmatpush.msra.mxu0 %v2814_v10  ;;  %v5529_v10 = vld [vmem:[%s9294_s19 + $0x3a8] sm:$0xff] }
 0x897   :  { %v2553_v22 = vadd.f32 %v2550_v33, %v2524_v31  ;;  %v2600_v31 = vld [vmem:[#allocation19] sm:$0x1] }
 0x898   :  { %v8069_v55 = vpop.f32.mrf.mxu3  ;;  %3225 = vmatpush.msra.mxu0 %v2812_v12  ;;  %v5527_v12 = vld [vmem:[%s9294_s19 + $0x398] sm:$0xff] }
 0x899   :  { %v2582_v36 = vadd.f32 %v2579_v54, %v2553_v22  ;;  %3103 = vmatmul.f32.vlgmr.msra.gmra.mxu1 %v8069_v55  ;;  %3185 = vmatmul.f32.vlgmr.msrb.gmra.mxu3 %v8069_v55 }
 0x89a   :  { %5476 = vmatmul.msk.f32.vlgmr.msra.gmra.mxu0 %vm263_vm0, %v2755_v51  ;;  %3519 = vmatpush.msra.mxu1 %v5539_v16  ;;  %v5546_v16 = vld [vmem:[%s9294_s19 + $0x430] sm:$0xff] }
 0x89b   :  { %v2583_v43 = vmax.f32 %v2582_v36, 0.0  ;;  %v5488_v36 = vld [vmem:[%s9295_s28 + $0x60] sm:$0xff] }
 0x89d   :  { %2617 = vmatmul.f32.vlgmr.msrb.gmra.mxu2 %v2583_v43 }
 0x89e   :  { %3136 = vmatpush.msrb.mxu2 %v2825_v14 }
 0x8a0   :  { %v8088_v52 = vpop.f32.mrf.mxu3  ;;  %3137 = vmatpush.msrb.mxu2 %v2823_v5  ;;  %v5536_v5 = vld [vmem:[%s9294_s19 + $0x3e0] sm:$0xff] }
 0x8a1   :  { %3106 = vmatmul.f32.gmra.mxu1 %v8088_v52  ;;  %3188 = vmatmul.f32.gmra.mxu3 %v8088_v52 }
 0x8a2   :  { %3138 = vmatpush.msrb.mxu2 %v2821_v2  ;;  %5477 = vmatmul.msk.f32.gmra.mxu0 %vm263_vm0, %v2758_v25  ;;  %v5534_v2 = vld [vmem:[%s9294_s19 + $0x3d0] sm:$0xff] }
 0x8a3   :  { %3438 = vmatpush.msra.mxu3 %v5536_v5  ;;  %v5549_v5 = vld [vmem:[%s9294_s19 + $0x448] sm:$0xff] }
 0x8a4   :  { %3139 = vmatpush.msrb.mxu2 %v2819_v27  ;;  %v5537_v27 = vld [vmem:[%s9294_s19 + $0x3e8] sm:$0xff] }
 0x8a5   :  { %5452 = vmatmul.msk.f32.vlgmr.msra.gmra.mxu2 %vm263_vm0, %v7812_v46  ;;  %3439 = vmatpush.msra.mxu3 %v5534_v2 }
 0x8a6   :  { %3140 = vmatpush.msrb.mxu2 %v2817_v4  ;;  %3520 = vmatpush.msra.mxu1 %v5537_v27  ;;  %v5515_v27 = vld [vmem:[%s9294_s19 + $0x338] sm:$0xff] }
 0x8a8   :  { %v8108_v47 = vpop.f32.mrf.mxu3  ;;  %3141 = vmatpush.msrb.mxu2 %v2815_v23  ;;  %3521 = vmatpush.msra.mxu1 %v5535_v38  ;;  %v5526_v23 = vld [vmem:[%s9294_s19 + $0x390] sm:$0xff]  ;;  %v5547_v38 = vld [vmem:[%s9294_s19 + $0x438] sm:$0xff] }
 0x8a9   :  { %3109 = vmatmul.f32.gmra.mxu1 %v8108_v47  ;;  %3191 = vmatmul.f32.gmra.mxu3 %v8108_v47 }
 0x8aa   :  { %3142 = vmatpush.msrb.mxu2 %v2813_v21  ;;  %5478 = vmatmul.msk.f32.gmra.mxu0 %vm263_vm0, %v2761_v61  ;;  %v5531_v21 = vld [vmem:[%s9294_s19 + $0x3b8] sm:$0xff] }
 0x8ac   :  { %3143 = vmatpush.msrb.mxu2 %v2811_v11  ;;  %v5520_v11 = vld [vmem:[%s9294_s19 + $0x360] sm:$0xff] }
 0x8ad   :  { %5453 = vmatmul.msk.f32.gmra.mxu2 %vm263_vm0, %v7804_v40 }
 0x8ae   :  { %3332 = vmatpush.msra.mxu2 %v7742_v18 }
 0x8b0   :  { %v8128_v48 = vpop.f32.mrf.mxu3  ;;  %3333 = vmatpush.msra.mxu2 %v7748_v30 }
 0x8b1   :  { %3112 = vmatmul.f32.gmra.mxu1 %v8128_v48  ;;  %3194 = vmatmul.f32.gmra.mxu3 %v8128_v48 }
 0x8b2   :  { %3334 = vmatpush.msra.mxu2 %v7764_v34 }
 0x8b4   :  { %3335 = vmatpush.msra.mxu2 %v7772_v24 }
 0x8b5   :  { %5454 = vmatmul.msk.f32.gmra.mxu2 %vm263_vm0, %v7790_v37 }
 0x8b6   :  { %3336 = vmatpush.msra.mxu2 %v7781_v59 }
 0x8b8   :  { %v8160_v29 = vpop.f32.mrf.mxu3  ;;  %3337 = vmatpush.msra.mxu2 %v7790_v37 }
 0x8b9   :  { %3115 = vmatmul.f32.gmra.mxu1 %v8160_v29  ;;  %3197 = vmatmul.f32.gmra.mxu3 %v8160_v29  ;;  %v5532_v29 = vld [vmem:[%s9294_s19 + $0x3c0] sm:$0xff] }
 0x8ba   :  { %3338 = vmatpush.msra.mxu2 %v7804_v40  ;;  %3440 = vmatpush.msra.mxu3 %v5532_v29  ;;  %v5508_v29 = vld [vmem:[%s9294_s19 + $0x300] sm:$0xff] }
 0x8bc   :  { %3339 = vmatpush.msra.mxu2 %v7812_v46  ;;  %3441 = vmatpush.msra.mxu3 %v5530_v49 }
 0x8bd   :  { %5455 = vmatmul.msk.f32.gmra.mxu2 %vm263_vm0, %v7781_v59  ;;  %v8231_v59 = vpop.f32.mrf.mxu1 }
 0x8be   :  { %3442 = vmatpush.msra.mxu3 %v5528_v39  ;;  %v5544_v39 = vld [vmem:[%s9294_s19 + $0x420] sm:$0xff] }
 0x8c0   :  { %v2729_v57 = vpop.f32.mrf.mxu3  ;;  %3443 = vmatpush.msra.mxu3 %v5526_v23  ;;  %v5513_v23 = vld [vmem:[%s9294_s19 + $0x328] sm:$0xff] }
 0x8c1   :  { %3118 = vmatmul.f32.gmra.mxu1 %v2729_v57  ;;  %3200 = vmatmul.f32.gmra.mxu3 %v2729_v57  ;;  %v5522_v57 = vld [vmem:[%s9294_s19 + $0x370] sm:$0xff] }
 0x8c2   :  { %3444 = vmatpush.msra.mxu3 %v5524_v56  ;;  %v5542_v56 = vld [vmem:[%s9294_s19 + $0x410] sm:$0xff] }
 0x8c4   :  { %3445 = vmatpush.msra.mxu3 %v5522_v57  ;;  %v5543_v57 = vld [vmem:[%s9294_s19 + $0x418] sm:$0xff] }
 0x8c5   :  { %5456 = vmatmul.msk.f32.gmra.mxu2 %vm263_vm0, %v7772_v24  ;;  %v2764_v24 = vpop.f32.mrf.mxu0  ;;  %v8236_v37 = vpop.f32.mrf.mxu1 }
 0x8c6   :  { %5479 = vmatmul.msk.f32.gmra.mxu0 %vm263_vm0, %v2764_v24  ;;  %3446 = vmatpush.msra.mxu3 %v5520_v11 }
 0x8c8   :  { %v2732_v32 = vpop.f32.mrf.mxu3 }
 0x8c9   :  { %3121 = vmatmul.f32.gmra.mxu1 %v2732_v32  ;;  %3203 = vmatmul.f32.gmra.mxu3 %v2732_v32 }
 0x8cd   :  { %5457 = vmatmul.msk.f32.gmra.mxu2 %vm263_vm0, %v7764_v34  ;;  %v2767_v34 = vpop.f32.mrf.mxu0  ;;  %v8240_v40 = vpop.f32.mrf.mxu1 }
 0x8ce   :  { %5480 = vmatmul.msk.f32.gmra.mxu0 %vm263_vm0, %v2767_v34 }
 0x8d0   :  { %v2735_v60 = vpop.f32.mrf.mxu3 }
 0x8d1   :  { %3124 = vmatmul.f32.gmra.mxu1 %v2735_v60  ;;  %3206 = vmatmul.f32.gmra.mxu3 %v2735_v60  ;;  %v5525_v60 = vld [vmem:[%s9294_s19 + $0x388] sm:$0xff] }
 0x8d5   :  { %5458 = vmatmul.msk.f32.gmra.mxu2 %vm263_vm0, %v7748_v30  ;;  %v2770_v30 = vpop.f32.mrf.mxu0  ;;  %v8245_v63 = vpop.f32.mrf.mxu1 }
 0x8d6   :  { %5481 = vmatmul.msk.f32.gmra.mxu0 %vm263_vm0, %v2770_v30 }
 0x8d9   :  { %5492 = vmatmul.msk.f32.vlgmr.msrb.gmra.mxu1 %vm263_vm0, %v5484_v6 }
 0x8dd   :  { %5459 = vmatmul.msk.f32.gmra.mxu2 %vm263_vm0, %v7742_v18  ;;  %v2773_v18 = vpop.f32.mrf.mxu0  ;;  %v8252_v1 = vpop.f32.mrf.mxu1 }
 0x8de   :  { %5482 = vmatmul.msk.f32.gmra.mxu0 %vm263_vm0, %v2773_v18 }
 0x8e1   :  { %5493 = vmatmul.msk.f32.gmra.mxu1 %vm263_vm0, %v5485_v7 }
 0x8e5   :  { %5468 = vmatmul.msk.f32.vlgmr.msrb.gmra.mxu2 %vm263_vm0, %v2755_v51  ;;  %v2776_v46 = vpop.f32.mrf.mxu0  ;;  %v8263_v15 = vpop.f32.mrf.mxu1  ;;  %v5533_v51 = vld [vmem:[%s9294_s19 + $0x3c8] sm:$0xff] }
 0x8e6   :  { %5483 = vmatmul.msk.f32.gmra.mxu0 %vm263_vm0, %v2776_v46  ;;  %3522 = vmatpush.msra.mxu1 %v5533_v51  ;;  %v5545_v51 = vld [vmem:[%s9294_s19 + $0x428] sm:$0xff] }
 0x8e8   :  { %3523 = vmatpush.msra.mxu1 %v5531_v21  ;;  %v5511_v21 = vld [vmem:[%s9294_s19 + $0x318] sm:$0xff] }
 0x8e9   :  { %5494 = vmatmul.msk.f32.gmra.mxu1 %vm263_vm0, %v5486_v19 }
 0x8ea   :  { %3524 = vmatpush.msra.mxu1 %v5529_v10 }
 0x8ec   :  { %3525 = vmatpush.msra.mxu1 %v5527_v12  ;;  %v5540_v12 = vld [vmem:[%s9294_s19 + $0x400] sm:$0xff] }
 0x8ed   :  { %5469 = vmatmul.msk.f32.gmra.mxu2 %vm263_vm0, %v2758_v25  ;;  %v8271_v33 = vpop.f32.mrf.mxu1  ;;  %v8390_v25 = vpop.f32.mrf.mxu3 }
 0x8ee   :  { %3526 = vmatpush.msra.mxu1 %v5525_v60  ;;  %v8484_v10 = vpop.f32.mrf.mxu0  ;;  %v5541_v60 = vld [vmem:[%s9294_s19 + $0x408] sm:$0xff] }
 0x8f1   :  { %5495 = vmatmul.msk.f32.gmra.mxu1 %vm263_vm0, %v5487_v28 }
 0x8f5   :  { %5470 = vmatmul.msk.f32.gmra.mxu2 %vm263_vm0, %v2761_v61  ;;  %v8286_v41 = vpop.f32.mrf.mxu1  ;;  %v5518_v61 = vld [vmem:[%s9294_s19 + $0x350] sm:$0xff]  ;;  %v8458_v49 = vpop.f32.mrf.mxu3 }
 0x8f6   :  { %3447 = vmatpush.msra.mxu3 %v5518_v61  ;;  %v5509_v61 = vld [vmem:[%s9294_s19 + $0x308] sm:$0xff] }
 0x8f9   :  { %5496 = vmatmul.msk.f32.gmra.mxu1 %vm263_vm0, %v5488_v36 }
 0x8fd   :  { %5471 = vmatmul.msk.f32.gmra.mxu2 %vm263_vm0, %v2764_v24 }
 0x901   :  { %5497 = vmatmul.msk.f32.gmra.mxu1 %vm263_vm0, %v5489_v45 }
 0x905   :  { %5472 = vmatmul.msk.f32.gmra.mxu2 %vm263_vm0, %v2767_v34  ;;  %v5516_v34 = vld [vmem:[%s9294_s19 + $0x340] sm:$0xff] }
 0x906   :  { %3448 = vmatpush.msra.mxu3 %v5516_v34 }
 0x909   :  { %5498 = vmatmul.msk.f32.gmra.mxu1 %vm263_vm0, %v5490_v35 }
 0x90d   :  { %5473 = vmatmul.msk.f32.gmra.mxu2 %vm263_vm0, %v2770_v30  ;;  %v5554_v30 = vld [vmem:[%s9294_s19 + $0x470] sm:$0xff] }
 0x90e   :  { %3486 = vmatpush.msrb.mxu0 %v5554_v30  ;;  %v8497_v30 = vpop.f32.mrf.mxu3 }
 0x911   :  { %5499 = vmatmul.msk.f32.gmra.mxu1 %vm263_vm0, %v5491_v20 }
 0x915   :  { %5474 = vmatmul.msk.f32.gmra.mxu2 %vm263_vm0, %v2773_v18  ;;  %v5523_v18 = vld [vmem:[%s9294_s19 + $0x378] sm:$0xff] }
 0x916   :  { %v8295_v17 = vpop.f32.mrf.mxu1  ;;  %3527 = vmatpush.msra.mxu1 %v5523_v18 }
 0x91d   :  { %5475 = vmatmul.msk.f32.gmra.mxu2 %vm263_vm0, %v2776_v46  ;;  %v5555_v46 = vld [vmem:[%s9294_s19 + $0x478] sm:$0xff] }
 0x91e   :  { %v8308_v47 = vpop.f32.mrf.mxu1  ;;  %3568 = vmatpush.msrb.mxu2 %v5555_v46 }
 0x920   :  { %v2618_v22 = vpop.f32.mrf.mxu2 }
 0x921   :  { %v8273_v54 = vadd.f32 %v2618_v22, %v2600_v31  ;;  %v5512_v31 = vld [vmem:[%s9294_s19 + $0x320] sm:$0xff]  ;;  %v5550_v22 = vld [vmem:[%s9294_s19 + $0x450] sm:$0xff] }
 0x923   :  { %v2621_v55 = vmax.f32 %v8273_v54, 0.0 }
 0x925   :  { %5500 = vmatmul.msk.f32.vlgmr.msra.gmra.mxu2 %vm263_vm0, %v5484_v6  ;;  %v2623_v43 = vsel %vm2622_vm3, %v2621_v55, -inf  ;;  %v5514_v6 = vld [vmem:[%s9294_s19 + $0x330] sm:$0xff] }
 0x926   :  { %2624 = vmax.xlane.f32.xlu0 %v2623_v43  ;;  %v8314_v13 = vpop.f32.mrf.mxu1  ;;  %3449 = vmatpush.msra.mxu3 %v5514_v6  ;;  %v5551_v43 = vld [vmem:[%s9294_s19 + $0x458] sm:$0xff]  ;;  %v8501_v6 = vpop.f32.mrf.mxu0 }
 0x928   :  { %v8284_v44 = vpop.f32.mrf.mxu2  ;;  %3450 = vmatpush.msra.mxu3 %v5512_v31 }
 0x92d   :  { %5501 = vmatmul.msk.f32.gmra.mxu2 %vm263_vm0, %v5485_v7  ;;  %v5552_v7 = vld [vmem:[%s9294_s19 + $0x460] sm:$0xff] }
 0x92e   :  { %v8321_v48 = vpop.f32.mrf.mxu1  ;;  %3487 = vmatpush.msrb.mxu0 %v5552_v7  ;;  %v8503_v7 = vpop.f32.mrf.mxu3 }
 0x930   :  { %v8293_v52 = vpop.f32.mrf.mxu2  ;;  %3488 = vmatpush.msrb.mxu0 %v5550_v22 }
 0x935   :  { %5502 = vmatmul.msk.f32.gmra.mxu2 %vm263_vm0, %v5486_v19  ;;  %v5521_v19 = vld [vmem:[%s9294_s19 + $0x368] sm:$0xff] }
 0x936   :  { %v8326_v14 = vpop.f32.mrf.mxu1  ;;  %3528 = vmatpush.msra.mxu1 %v5521_v19 }
 0x938   :  { %v8302_v53 = vpop.f32.mrf.mxu2 }
 0x93d   :  { %5503 = vmatmul.msk.f32.gmra.mxu2 %vm263_vm0, %v5487_v28  ;;  %v5553_v28 = vld [vmem:[%s9294_s19 + $0x468] sm:$0xff] }
 0x93e   :  { %v8337_v9 = vpop.f32.mrf.mxu1  ;;  %3569 = vmatpush.msrb.mxu2 %v5553_v28 }
 0x940   :  { %v8311_v58 = vpop.f32.mrf.mxu2  ;;  %3570 = vmatpush.msrb.mxu2 %v5551_v43 }
 0x942   :  { %3571 = vmatpush.msrb.mxu2 %v5549_v5 }
 0x944   :  { %3572 = vmatpush.msrb.mxu2 %v5547_v38 }
 0x945   :  { %5504 = vmatmul.msk.f32.gmra.mxu2 %vm263_vm0, %v5488_v36  ;;  %v5519_v36 = vld [vmem:[%s9294_s19 + $0x358] sm:$0xff] }
 0x946   :  { %v8362_v4 = vpop.f32.mrf.mxu1  ;;  %3529 = vmatpush.msra.mxu1 %v5519_v36  ;;  %3573 = vmatpush.msrb.mxu2 %v5545_v51  ;;  %v8509_v36 = vpop.f32.mrf.mxu0 }
 0x948   :  { %v8316_v3 = vpop.f32.mrf.mxu2  ;;  %3530 = vmatpush.msra.mxu1 %v5517_v8  ;;  %3574 = vmatpush.msrb.mxu2 %v5543_v57 }
 0x94a   :  { %3531 = vmatpush.msra.mxu1 %v5515_v27  ;;  %3575 = vmatpush.msrb.mxu2 %v5541_v60 }
 0x94c   :  { %3532 = vmatpush.msra.mxu1 %v5513_v23 }
 0x94d   :  { %5505 = vmatmul.msk.f32.gmra.mxu2 %vm263_vm0, %v5489_v45 }
 0x94e   :  { %v8400_v24 = vpop.f32.mrf.mxu1  ;;  %3533 = vmatpush.msra.mxu1 %v5511_v21  ;;  %v8519_v54 = vpop.f32.mrf.mxu0 }
 0x94f   :  { %9359 = vst [vmem:[#allocation36_spill] sm:$0xff] %v8400_v24 }
 0x950   :  { %v8319_v0 = vpop.f32.mrf.mxu2  ;;  %3534 = vmatpush.msra.mxu1 %v5509_v61 }
 0x955   :  { %5506 = vmatmul.msk.f32.gmra.mxu2 %vm263_vm0, %v5490_v35  ;;  %v5510_v35 = vld [vmem:[%s9294_s19 + $0x310] sm:$0xff] }
 0x956   :  { %3451 = vmatpush.msra.mxu3 %v5510_v35  ;;  %v3300_v2 = vpop.f32.mrf.mxu1  ;;  %v8511_v35 = vpop.f32.mrf.mxu3 }
 0x957   :  { %3535 = vmatmul.f32.vlgmr.msra.gmra.mxu1 %v3300_v2  ;;  %v8525_v27 = vpop.f32.mrf.mxu0 }
 0x958   :  { %v8324_v42 = vpop.f32.mrf.mxu2  ;;  %3452 = vmatpush.msra.mxu3 %v5508_v29 }
 0x959   :  { %3453 = vmatmul.f32.vlgmr.msra.gmra.mxu3 %v3300_v2 }
 0x95d   :  { %5507 = vmatmul.msk.f32.gmra.mxu2 %vm263_vm0, %v5491_v20  ;;  %v5548_v20 = vld [vmem:[%s9294_s19 + $0x440] sm:$0xff] }
 0x95e   :  { %3489 = vmatpush.msrb.mxu0 %v5548_v20  ;;  %v3303_v34 = vpop.f32.mrf.mxu1 }
 0x95f   :  { %3538 = vmatmul.f32.gmra.mxu1 %v3303_v34 }
 0x960   :  { %v8329_v62 = vpop.f32.mrf.mxu2  ;;  %3490 = vmatpush.msrb.mxu0 %v5546_v16  ;;  %v8523_v16 = vpop.f32.mrf.mxu3 }
 0x961   :  { %3456 = vmatmul.f32.gmra.mxu3 %v3303_v34 }
 0x962   :  { %3491 = vmatpush.msrb.mxu0 %v5544_v39 }
 0x964   :  { %3492 = vmatpush.msrb.mxu0 %v5542_v56  ;;  %v8533_v56 = vpop.f32.mrf.mxu0 }
 0x966   :  { %3493 = vmatpush.msrb.mxu0 %v5540_v12  ;;  %v3306_v46 = vpop.f32.mrf.mxu1 }
 0x967   :  { %3541 = vmatmul.f32.gmra.mxu1 %v3306_v46 }
 0x968   :  { %v8339_v26 = vpop.f32.mrf.mxu2  ;;  %v8529_v23 = vpop.f32.mrf.mxu3 }
 0x969   :  { %9356 = vst [vmem:[#allocation33_spill] sm:$0xff] %v8339_v26  ;;  %3459 = vmatmul.f32.gmra.mxu3 %v3306_v46 }
 0x96c   :  { %v8539_v61 = vpop.f32.mrf.mxu0 }
 0x96e   :  { %v3309_v31 = vpop.f32.mrf.mxu1 }
 0x96f   :  { %3544 = vmatmul.f32.gmra.mxu1 %v3309_v31 }
 0x970   :  { %v8364_v50 = vpop.f32.mrf.mxu2  ;;  %v8535_v57 = vpop.f32.mrf.mxu3 }
 0x971   :  { %9357 = vst [vmem:[#allocation30_spill] sm:$0xff] %v8364_v50  ;;  %3462 = vmatmul.f32.gmra.mxu3 %v3309_v31 }
 0x974   :  { %v8545_v46 = vpop.f32.mrf.mxu0 }
 0x976   :  { %v3312_v8 = vpop.f32.mrf.mxu1 }
 0x977   :  { %3547 = vmatmul.f32.gmra.mxu1 %v3312_v8 }
 0x978   :  { %v8392_v32 = vpop.f32.mrf.mxu2  ;;  %v8541_v60 = vpop.f32.mrf.mxu3 }
 0x979   :  { %9358 = vst [vmem:[#allocation29_spill] sm:$0xff] %v8392_v32  ;;  %3465 = vmatmul.f32.gmra.mxu3 %v3312_v8 }
 0x97e   :  { %v3315_v29 = vpop.f32.mrf.mxu1 }
 0x97f   :  { %3550 = vmatmul.f32.gmra.mxu1 %v3315_v29 }
 0x980   :  { %v8438_v45 = vpop.f32.mrf.mxu2  ;;  %v8549_v31 = vpop.f32.mrf.mxu3 }
 0x981   :  { %9360 = vst [vmem:[#allocation38_spill] sm:$0xff] %v8438_v45  ;;  %3468 = vmatmul.f32.gmra.mxu3 %v3315_v29 }
 0x986   :  { %v3318_v39 = vpop.f32.mrf.mxu1 }
 0x987   :  { %3553 = vmatmul.f32.gmra.mxu1 %v3318_v39 }
 0x988   :  { %v8486_v11 = vpop.f32.mrf.mxu2  ;;  %v8555_v8 = vpop.f32.mrf.mxu3 }
 0x989   :  { %9361 = vst [vmem:[#allocation31_spill] sm:$0xff] %v8486_v11  ;;  %3471 = vmatmul.f32.gmra.mxu3 %v3318_v39 }
 0x98e   :  { %v3321_v21 = vpop.f32.mrf.mxu1 }
 0x98f   :  { %3556 = vmatmul.f32.gmra.mxu1 %v3321_v21 }
 0x990   :  { %v8499_v18 = vpop.f32.mrf.mxu2  ;;  %v8561_v29 = vpop.f32.mrf.mxu3 }
 0x991   :  { %9362 = vst [vmem:[#allocation52_spill] sm:$0xff] %v8499_v18  ;;  %3474 = vmatmul.f32.gmra.mxu3 %v3321_v21 }
 0x998   :  { %v8505_v19 = vpop.f32.mrf.mxu2  ;;  %v8565_v39 = vpop.f32.mrf.mxu3 }
 0x999   :  { %9363 = vst [vmem:[#allocation28_spill] sm:$0xff] %v8505_v19  ;;  %v2625_v28 = vpop.xlane.xlu0 %2624 }
 0x99a   :  { %v2626_v22 = vsub.f32 %v2621_v55, %v2625_v28 }
 0x99c   :  { %v2627_v43 = vmul.f32 1.442695, %v2626_v22  ;;  %v8551_v22 = vpop.f32.mrf.mxu0 }
 0x99d   :  { %9365 = vst [vmem:[#allocation35_spill] sm:$0xff] %v8551_v22 }
 0x99e   :  { %5733 = vpow2.f32 %v2627_v43 }
 0x9a0   :  { %v8513_v20 = vpop.f32.mrf.mxu2  ;;  %v8569_v21 = vpop.f32.mrf.mxu3 }
 0x9a1   :  { %9364 = vst [vmem:[#allocation34_spill] sm:$0xff] %v8513_v20 }
 0x9a4   :  { %v8515_v5 = vpop.eup %5733 }
 0x9a5   :  { %v2629_v2 = vsel %vm2622_vm3, %v8515_v5, 0.0 }
 0x9a6   :  { %2630 = vadd.xlane.f32.xlu1 %v2629_v2 }
 0x9a8   :  { %v3341_v55 = vpop.f32.mrf.mxu2 }
 0x9a9   :  { %5556 = vmatmul.msk.f32.vlgmr.msrb.gmra.mxu0 %vm263_vm0, %v3341_v55  ;;  %5564 = vmatmul.msk.f32.vlgmr.msrb.gmra.mxu2 %vm263_vm0, %v3341_v55  ;;  %v8559_v55 = vpop.f32.mrf.mxu0 }
 0x9b0   :  { %v3344_v38 = vpop.f32.mrf.mxu2 }
 0x9b1   :  { %5557 = vmatmul.msk.f32.gmra.mxu0 %vm263_vm0, %v3344_v38  ;;  %5565 = vmatmul.msk.f32.gmra.mxu2 %vm263_vm0, %v3344_v38  ;;  %v8563_v38 = vpop.f32.mrf.mxu0 }
 0x9b8   :  { %v3347_v51 = vpop.f32.mrf.mxu2 }
 0x9b9   :  { %5558 = vmatmul.msk.f32.gmra.mxu0 %vm263_vm0, %v3347_v51  ;;  %5566 = vmatmul.msk.f32.gmra.mxu2 %vm263_vm0, %v3347_v51  ;;  %v8567_v51 = vpop.f32.mrf.mxu0 }
 0x9ba   :  { %9366 = vst [vmem:[#allocation48_spill] sm:$0xff] %v8567_v51 }
 0x9c0   :  { %v3350_v12 = vpop.f32.mrf.mxu2 }
 0x9c1   :  { %5559 = vmatmul.msk.f32.gmra.mxu0 %vm263_vm0, %v3350_v12  ;;  %5567 = vmatmul.msk.f32.gmra.mxu2 %vm263_vm0, %v3350_v12  ;;  %v8571_v12 = vpop.f32.mrf.mxu0 }
 0x9c2   :  { %9367 = vst [vmem:[#allocation49_spill] sm:$0xff] %v8571_v12 }
 0x9c8   :  { %v3353_v34 = vpop.f32.mrf.mxu2 }
 0x9c9   :  { %5560 = vmatmul.msk.f32.gmra.mxu0 %vm263_vm0, %v3353_v34  ;;  %5568 = vmatmul.msk.f32.gmra.mxu2 %vm263_vm0, %v3353_v34  ;;  %v8573_v34 = vpop.f32.mrf.mxu3 }
 0x9d0   :  { %v3356_v28 = vpop.f32.mrf.mxu2 }
 0x9d1   :  { %5561 = vmatmul.msk.f32.gmra.mxu0 %vm263_vm0, %v3356_v28  ;;  %5569 = vmatmul.msk.f32.gmra.mxu2 %vm263_vm0, %v3356_v28  ;;  %v8575_v28 = vpop.f32.mrf.mxu0 }
 0x9d2   :  { %9368 = vst [vmem:[#allocation37_spill] sm:$0xff] %v8575_v28 }
 0x9d4   :  { %v8585_v11 = vpop.f32.mrf.mxu1 }
 0x9d5   :  { %9373 = vst [vmem:[#allocation41_spill] sm:$0xff] %v8585_v11 }
 0x9d8   :  { %v3359_v43 = vpop.f32.mrf.mxu2 }
 0x9d9   :  { %5562 = vmatmul.msk.f32.gmra.mxu0 %vm263_vm0, %v3359_v43  ;;  %5570 = vmatmul.msk.f32.gmra.mxu2 %vm263_vm0, %v3359_v43  ;;  %v8577_v43 = vpop.f32.mrf.mxu3 }
 0x9da   :  { %9369 = vst [vmem:[#allocation39_spill] sm:$0xff] %v8577_v43 }
 0x9dc   :  { %v8591_v24 = vpop.f32.mrf.mxu1 }
 0x9dd   :  { %9376 = vst [vmem:[#allocation53_spill] sm:$0xff] %v8591_v24 }
 0x9e0   :  { %v3362_v2 = vpop.f32.mrf.mxu2 }
 0x9e1   :  { %5563 = vmatmul.msk.f32.gmra.mxu0 %vm263_vm0, %v3362_v2  ;;  %5571 = vmatmul.msk.f32.gmra.mxu2 %vm263_vm0, %v3362_v2  ;;  %v8579_v2 = vpop.f32.mrf.mxu0  ;;  %v8581_v22 = vpop.f32.mrf.mxu3 }
 0x9e2   :  { %9370 = vst [vmem:[#allocation44_spill] sm:$0xff] %v8579_v2 }
 0x9e3   :  { %9371 = vst [vmem:[#allocation45_spill] sm:$0xff] %v8581_v22 }
 0x9e9   :  { %v8583_v20 = vpop.f32.mrf.mxu0  ;;  %v8587_v18 = vpop.f32.mrf.mxu3 }
 0x9ea   :  { %9372 = vst [vmem:[#allocation40_spill] sm:$0xff] %v8583_v20 }
 0x9eb   :  { %9374 = vst [vmem:[#allocation55_spill] sm:$0xff] %v8587_v18 }
 0x9f1   :  { %v8593_v11 = vpop.f32.mrf.mxu3 }
 0xa19   :  { %v2631_v45 = vpop.xlane.xlu1 %2630 }
 0xa1a   :  { %5735 = vrcp.f32 %v2631_v45  ;;  %v2643_v19 = vand.u32 2147483648, %v2631_v45  ;;  %v2641_v28 = vand.u32 2147483647, %v2631_v45  ;;  %vm2637_vm5 = vweird.f32 %v2631_v45 }
 0xa1c   :  { %v2644_v22 = vor.u32 1.1754944e-38, %v2643_v19  ;;  %vm2642_vm7 = vcmp.eq.f32.partialorder %v2641_v28, 8.507059e+37  ;;  %v8605_v19 = vpop.f32.mrf.mxu3 }
 0xa20   :  { %v5736_v32 = vpop.eup %5735 }
 0xa21   :  { %v2633_v50 = vmul.f32 %v5736_v32, %v2631_v45  ;;  %vm2638_vm4 = vweird.f32 %v5736_v32 }
 0xa22   :  { %vm2639_vm6 = vmor %vm2637_vm5, %vm2638_vm4 }
 0xa23   :  { %v2634_v26 = vsub.f32 1.0, %v2633_v50 }
 0xa25   :  { %v2635_v12 = vmul.f32 %v5736_v32, %v2634_v26 }
 0xa26   :  { %v8589_v43 = vpop.f32.mrf.mxu0 }
 0xa27   :  { %9375 = vst [vmem:[#allocation56_spill] sm:$0xff] %v8589_v43  ;;  %v2636_v2 = vadd.f32 %v5736_v32, %v2635_v12  ;;  %v8601_v43 = vpop.f32.mrf.mxu1 }
 0xa28   :  { %9379 = vst [vmem:[#allocation51_spill] sm:$0xff] %v8601_v43  ;;  %v2958_v43 = vadd.f32 %v8284_v44, %v8231_v59  ;;  %v3040_v59 = vadd.f32 %v8484_v10, %v8390_v25  ;;  %v2967_v44 = vadd.f32 %v8311_v58, %v8245_v63 }
 0xa29   :  { %v2640_v20 = vsel %vm2639_vm6, %v5736_v32, %v2636_v2 }
 0xa2a   :  { %v2645_v51 = vsel %vm2642_vm7, %v2644_v22, %v2640_v20 }
 0xa2b   :  { %v2646_v18 = vmul.f32 %v8515_v5, %v2645_v51  ;;  %v3466_v5 = vpop.f32.mrf.mxu3 }
 0xa2c   :  { %v8596_v50 = vpop.f32.mrf.mxu2 }
 0xa2d   :  { %9377 = vst [vmem:[#allocation54_spill] sm:$0xff] %v8596_v50 }
 0xa2e   :  { %2647 = vst.msk [vmem:[#allocation20] sm:$0x1] %vm2622_vm3, %v2646_v18  ;;  %v8599_v26 = vpop.f32.mrf.mxu0 }
 0xa2f   :  { %9378 = vst [vmem:[#allocation50_spill] sm:$0xff] %v8599_v26  ;;  %v8611_v28 = vpop.f32.mrf.mxu1 }
 0xa30   :  { %9382 = vst [vmem:[#allocation42_spill] sm:$0xff] %v8611_v28  ;;  %v3046_v28 = vadd.f32 %v8509_v36, %v8497_v30 }
 0xa32   :  { %v3193_v58 = vadd.f32 %v8555_v8, %v3046_v28  ;;  %v9393_v8 = vld [vmem:[#allocation39_spill] sm:$0xff] }
 0xa33   :  { %v3469_v2 = vpop.f32.mrf.mxu3 }
 0xa34   :  { %v8603_v45 = vpop.f32.mrf.mxu2 }
 0xa35   :  { %9380 = vst [vmem:[#allocation46_spill] sm:$0xff] %v8603_v45 }
 0xa36   :  { %v8607_v12 = vpop.f32.mrf.mxu0 }
 0xa37   :  { %v8617_v51 = vpop.f32.mrf.mxu1 }
 0xa38   :  { %9384 = vst [vmem:[#allocation32_spill] sm:$0xff] %v8617_v51  ;;  %v2961_v51 = vadd.f32 %v8293_v52, %v8236_v37  ;;  %v2970_v37 = vadd.f32 %v8316_v3, %v8252_v1  ;;  %v2976_v52 = vadd.f32 %v8324_v42, %v8271_v33  ;;  %v2979_v3 = vadd.f32 %v8329_v62, %v8286_v41 }
 0xa39   :  { %v3114_v33 = vadd.f32 %v8321_v48, %v2967_v44  ;;  %v8675_v48 = vadd.f32 %v8563_v38, %v3193_v58  ;;  %v9399_v44 = vld [vmem:[#allocation34_spill] sm:$0xff] }
 0xa3a   :  { %v3117_v36 = vadd.f32 %v8326_v14, %v2970_v37  ;;  %v9389_v14 = vld [vmem:[#allocation49_spill] sm:$0xff] }
 0xa3b   :  { %v3472_v26 = vpop.f32.mrf.mxu3 }
 0xa3c   :  { %v8609_v32 = vpop.f32.mrf.mxu2 }
 0xa3d   :  { %9381 = vst [vmem:[#allocation47_spill] sm:$0xff] %v8609_v32  ;;  %v3043_v32 = vadd.f32 %v8501_v6, %v8458_v49  ;;  %v3055_v49 = vadd.f32 %v8533_v56, %v8523_v16  ;;  %v3105_v6 = vadd.f32 %v8295_v17, %v2958_v43  ;;  %v3108_v17 = vadd.f32 %v8308_v47, %v2961_v51 }
 0xa3e   :  { %v8613_v20 = vpop.f32.mrf.mxu0  ;;  %v3123_v47 = vadd.f32 %v8362_v4, %v2976_v52  ;;  %v9390_v4 = vld [vmem:[#allocation28_spill] sm:$0xff] }
 0xa3f   :  { %v8621_v24 = vpop.f32.mrf.mxu1  ;;  %v3190_v63 = vadd.f32 %v8549_v31, %v3043_v32  ;;  %v3202_v42 = vadd.f32 %v8569_v21, %v3055_v49  ;;  %v9396_v32 = vld [vmem:[#allocation44_spill] sm:$0xff] }
 0xa40   :  { %9386 = vst [vmem:[#allocation58_spill] sm:$0xff] %v8621_v24  ;;  %v3052_v24 = vadd.f32 %v8525_v27, %v8511_v35  ;;  %v9388_v27 = vld [vmem:[#allocation36_spill] sm:$0xff] }
 0xa41   :  { %v8672_v62 = vadd.f32 %v8559_v55, %v3190_v63  ;;  %v9400_v63 = vld [vmem:[#allocation38_spill] sm:$0xff] }
 0xa42   :  { %v3155_v58 = vadd.f32 %v9400_v63, %v3114_v33  ;;  %v9416_v63 = vld [vmem:[#allocation54_spill] sm:$0xff] }
 0xa43   :  { %v3475_v21 = vpop.f32.mrf.mxu3 }
 0xa44   :  { %v8615_v22 = vpop.f32.mrf.mxu2 }
 0xa45   :  { %9383 = vst [vmem:[#allocation43_spill] sm:$0xff] %v8615_v22  ;;  %v3049_v22 = vadd.f32 %v8519_v54, %v8503_v7  ;;  %v3199_v7 = vadd.f32 %v8565_v39, %v3052_v24  ;;  %v9387_v24 = vld [vmem:[#allocation48_spill] sm:$0xff] }
 0xa46   :  { %v3507_v18 = vpop.f32.mrf.mxu0 }
 0xa47   :  { %v3196_v25 = vadd.f32 %v8561_v29, %v3049_v22  ;;  %v3554_v16 = vpop.f32.mrf.mxu1  ;;  %v3240_v56 = vadd.f32 %v9389_v14, %v3199_v7  ;;  %v3617_v29 = vld [vmem:[%s9325_s21] sm:$0x3]  ;;  %v3508_v38 = vadd.f32 %v3507_v18, %v3466_v5  ;;  %v9397_v22 = vld [vmem:[#allocation29_spill] sm:$0xff]  ;;  %v5572_v5 = vld [vmem:[%s9325_s21 + $0x2] sm:$0x3] }
 0xa48   :  { %v3619_v18 = vperm.slane %v3617_v29, 0 }
 0xa49   :  { %v8678_v54 = vadd.f32 %v9387_v24, %v3196_v25  ;;  %v9401_v25 = vld [vmem:[#allocation40_spill] sm:$0xff] }
 0xa4c   :  { %v8619_v50 = vpop.f32.mrf.mxu2 }
 0xa4d   :  { %9385 = vst [vmem:[#allocation57_spill] sm:$0xff] %v8619_v50  ;;  %v2964_v50 = vadd.f32 %v8302_v53, %v8240_v40  ;;  %v3058_v40 = vadd.f32 %v8539_v61, %v8529_v23  ;;  %v2973_v53 = vadd.f32 %v8319_v0, %v8263_v15  ;;  %v3061_v15 = vadd.f32 %v8545_v46, %v8535_v57 }
 0xa4e   :  { %v3510_v45 = vpop.f32.mrf.mxu0  ;;  %v8664_v0 = vadd.f32 %v8541_v60, %v3040_v59  ;;  %v3126_v23 = vadd.f32 %v9388_v27, %v2979_v3  ;;  %v3164_v57 = vadd.f32 %v9390_v4, %v3123_v47  ;;  %v9391_v60 = vld [vmem:[#allocation33_spill] sm:$0xff]  ;;  %v9402_v3 = vld [vmem:[#allocation58_spill] sm:$0xff] }
 0xa4f   :  { %v3111_v1 = vadd.f32 %v8314_v13, %v2964_v50  ;;  %v3205_v13 = vadd.f32 %v8573_v34, %v3058_v40  ;;  %v3120_v41 = vadd.f32 %v8337_v9, %v2973_v53  ;;  %v3511_v61 = vadd.f32 %v3510_v45, %v3469_v2  ;;  %v9392_v9 = vld [vmem:[#allocation37_spill] sm:$0xff]  ;;  %v9394_v34 = vld [vmem:[#allocation30_spill] sm:$0xff]  ;;  %v9395_v50 = vld [vmem:[#allocation52_spill] sm:$0xff] }
 0xa50   :  { %v3146_v46 = vadd.f32 %v9391_v60, %v3105_v6  ;;  %v3243_v31 = vadd.f32 %v9392_v9, %v3202_v42  ;;  %v3208_v55 = vadd.f32 %v9393_v8, %v3061_v15  ;;  %v3149_v43 = vadd.f32 %v9394_v34, %v3108_v17  ;;  %v9398_v2 = vld [vmem:[#allocation31_spill] sm:$0xff]  ;;  %v9404_v47 = vld [vmem:[#allocation50_spill] sm:$0xff]  ;;  %v3557_v8 = vpop.f32.mrf.mxu1 }
 0xa51   :  { %v3246_v28 = vadd.f32 %v9396_v32, %v3205_v13  ;;  %v3152_v51 = vadd.f32 %v9397_v22, %v3111_v1  ;;  %v3158_v59 = vadd.f32 %v9398_v2, %v3117_v36  ;;  %v3167_v49 = vadd.f32 %v9399_v44, %v3126_v23  ;;  %v9403_v36 = vld [vmem:[#allocation55_spill] sm:$0xff] }
 0xa52   :  { %v3505_v6 = vadd.f32 %v8613_v20, %v8605_v19  ;;  %v3502_v17 = vadd.f32 %v8607_v12, %v8593_v11  ;;  %v8705_v15 = vperm.slane %v5572_v5, 0  ;;  %v8707_v42 = vperm.slane %v3617_v29, 1  ;;  %v9407_v12 = vld [vmem:[#allocation45_spill] sm:$0xff] }
 0xa53   :  { %v3609_v1 = vadd.f32 %v3508_v38, %v3158_v59  ;;  %v3499_v13 = vadd.f32 %v9404_v47, %v9403_v36  ;;  %v8713_v11 = vperm.slane %v5572_v5, 1 }
 0xa54   :  { %v3592_v30 = vpop.f32.mrf.mxu2  ;;  %v9406_v33 = vld [vmem:[#allocation57_spill] sm:$0xff]  ;;  %v3605_v4 = vadd.f32 %v3502_v17, %v3152_v51 }
 0xa55   :  { %v3593_v7 = vadd.f32 %v3592_v30, %v9402_v3  ;;  %v9408_v30 = vld [vmem:[#allocation56_spill] sm:$0xff]  ;;  %v3631_v9 = vmul.f32 %v3619_v18, %v3609_v1  ;;  %v3603_v34 = vadd.f32 %v3499_v13, %v3149_v43 }
 0xa56   :  { %v3513_v10 = vpop.f32.mrf.mxu0  ;;  %v3496_v14 = vadd.f32 %v9408_v30, %v9407_v12 }
 0xa57   :  { %v3514_v35 = vadd.f32 %v3513_v10, %v3472_v26  ;;  %v3161_v26 = vadd.f32 %v9395_v50, %v3120_v41  ;;  %v3249_v10 = vadd.f32 %v9401_v25, %v3208_v55  ;;  %v9405_v41 = vld [vmem:[#allocation32_spill] sm:$0xff]  ;;  %v3612_v29 = vadd.f32 %v3593_v7, %v3243_v31  ;;  %v9411_v50 = vld [vmem:[#allocation51_spill] sm:$0xff]  ;;  %v9414_v31 = vld [vmem:[#allocation46_spill] sm:$0xff] }
 0xa58   :  { %v3590_v24 = vadd.f32 %v9406_v33, %v9405_v41  ;;  %v3601_v44 = vadd.f32 %v3496_v14, %v3146_v46  ;;  %v3625_v25 = vmul.f32 %v3619_v18, %v3603_v34  ;;  %v9417_v7 = vld [vmem:[#allocation35_spill] sm:$0xff]  ;;  %v3938_v34 = vld [vmem:[#allocation5 + $0x178] sm:$0xff] }
 0xa59   :  { %v3613_v45 = vadd.f32 %v3514_v35, %v3164_v57  ;;  %v3611_v40 = vadd.f32 %v3511_v61, %v3161_v26  ;;  %v3607_v35 = vadd.f32 %v3505_v6, %v3155_v58  ;;  %v9409_v57 = vld [vmem:[#allocation42_spill] sm:$0xff]  ;;  %v9410_v61 = vld [vmem:[#allocation43_spill] sm:$0xff]  ;;  %v3634_v43 = vmul.f32 %v8707_v42, %v3612_v29 }
 0xa5a   :  { %v3587_v60 = vadd.f32 %v9410_v61, %v9409_v57  ;;  %v9412_v26 = vld [vmem:[#allocation47_spill] sm:$0xff] }
 0xa5b   :  { %v3635_v19 = vmul.f32 %v3619_v18, %v3613_v45  ;;  %v3584_v32 = vadd.f32 %v9412_v26, %v9411_v50  ;;  %v3610_v45 = vadd.f32 %v3590_v24, %v3240_v56  ;;  %v3656_v41 = vadd.f32 %v8713_v11, %v3634_v43  ;;  %v3847_v50 = vld [vmem:[#allocation5 + $0x70] sm:$0xff] }
 0xa5c   :  { %v3595_v39 = vpop.f32.mrf.mxu2  ;;  %v3608_v5 = vadd.f32 %v3587_v60, %v8678_v54  ;;  %v3647_v24 = vadd.f32 %v8705_v15, %v3625_v25  ;;  %v3843_v43 = vld [vmem:[#allocation5 + $0x50] sm:$0xff]  ;;  %v3842_v25 = vld [vmem:[#allocation5 + $0x48] sm:$0xff] }
 0xa5d   :  { %v3596_v52 = vadd.f32 %v3595_v39, %v3554_v16  ;;  %v3633_v16 = vmul.f32 %v3619_v18, %v3611_v40  ;;  %v3606_v46 = vadd.f32 %v3584_v32, %v8675_v48  ;;  %v3632_v17 = vmul.f32 %v8707_v42, %v3610_v45  ;;  %v3846_v32 = vld [vmem:[#allocation5 + $0x68] sm:$0xff] }
 0xa5e   :  { %v3516_v37 = vpop.f32.mrf.mxu0  ;;  %v3630_v48 = vmul.f32 %v8707_v42, %v3608_v5  ;;  %v3672_v30 = vmax.f32 %v3656_v41, 0.0  ;;  %v3663_v57 = vmax.f32 %v3647_v24, 0.0  ;;  %v3678_v45 = vld [vmem:[#allocation2 + $0x8] sm:$0xff]  ;;  %v3951_v5 = vld [vmem:[#allocation5 + $0x1e0] sm:$0xff]  ;;  %v3945_v41 = vld [vmem:[#allocation5 + $0x1b0] sm:$0xff] }
 0xa5f   :  { %v3517_v53 = vadd.f32 %v3516_v37, %v3475_v21  ;;  %v3614_v27 = vadd.f32 %v3596_v52, %v3246_v28  ;;  %v3657_v21 = vadd.f32 %v8705_v15, %v3635_v19  ;;  %v3629_v28 = vmul.f32 %v3619_v18, %v3607_v35  ;;  %v3857_v24 = vld [vmem:[#allocation5 + $0xc0] sm:$0xff] }
 0xa60   :  { %v3655_v59 = vadd.f32 %v8705_v15, %v3633_v16  ;;  %v3627_v37 = vmul.f32 %v3619_v18, %v3605_v4  ;;  %v3653_v52 = vadd.f32 %v8705_v15, %v3631_v9  ;;  %v3228_v19 = vadd.f32 %v9417_v7, %v8664_v0  ;;  %v3840_v7 = vld [vmem:[#allocation5 + $0x38] sm:$0xff] }
 0xa61   :  { %v3615_v20 = vadd.f32 %v3517_v53, %v3167_v49  ;;  %v3636_v22 = vmul.f32 %v8707_v42, %v3614_v27  ;;  %v9413_v49 = vld [vmem:[#allocation53_spill] sm:$0xff]  ;;  %v3673_v56 = vmax.f32 %v3657_v21, 0.0  ;;  %v3628_v16 = vmul.f32 %v8707_v42, %v3606_v46 }
 0xa62   :  { %v3581_v6 = vadd.f32 %v9414_v31, %v9413_v49  ;;  %v9415_v53 = vld [vmem:[#allocation41_spill] sm:$0xff]  ;;  %v3671_v1 = vmax.f32 %v3655_v59, 0.0  ;;  %v3649_v47 = vadd.f32 %v8705_v15, %v3627_v37  ;;  %v3669_v35 = vmax.f32 %v3653_v52, 0.0  ;;  %v3845_v59 = vld [vmem:[#allocation5 + $0x60] sm:$0xff]  ;;  %v3952_v49 = vld [vmem:[#allocation5 + $0x1e8] sm:$0xff] }
 0xa63   :  { %v3637_v23 = vmul.f32 %v3619_v18, %v3615_v20  ;;  %v3578_v58 = vadd.f32 %v9416_v63, %v9415_v53  ;;  %v3658_v3 = vadd.f32 %v8713_v11, %v3636_v22  ;;  %v3623_v20 = vmul.f32 %v3619_v18, %v3601_v44  ;;  %v3937_v22 = vld [vmem:[#allocation5 + $0x170] sm:$0xff]  ;;  %v3936_v31 = vld [vmem:[#allocation5 + $0x168] sm:$0xff]  ;;  %v3935_v53 = vld [vmem:[#allocation5 + $0x160] sm:$0xff] }
 0xa64   :  { %v3598_v55 = vpop.f32.mrf.mxu2  ;;  %v3604_v36 = vadd.f32 %v3581_v6, %v8672_v62  ;;  %v3654_v62 = vadd.f32 %v8713_v11, %v3632_v17  ;;  %v3665_v12 = vmax.f32 %v3649_v47, 0.0  ;;  %v3652_v14 = vadd.f32 %v8713_v11, %v3630_v48  ;;  %v3863_v44 = vld [vmem:[#allocation5 + $0xf0] sm:$0xff]  ;;  %v3844_v6 = vld [vmem:[#allocation5 + $0x58] sm:$0xff]  ;;  %v3862_v37 = vld [vmem:[#allocation5 + $0xe8] sm:$0xff] }
 0xa65   :  { %v3659_v38 = vadd.f32 %v8705_v15, %v3637_v23  ;;  %v3599_v39 = vadd.f32 %v3598_v55, %v3557_v8  ;;  %v3602_v33 = vadd.f32 %v3578_v58, %v3228_v19  ;;  %v3674_v18 = vmax.f32 %v3658_v3, 0.0  ;;  %v3677_v55 = vld [vmem:[#allocation2] sm:$0xff]  ;;  %v3679_v52 = vld [vmem:[#allocation2 + $0x10] sm:$0xff]  ;;  %v3860_v46 = vld [vmem:[#allocation5 + $0xd8] sm:$0xff] }
 0xa66   :  { %v3645_v27 = vadd.f32 %v8705_v15, %v3623_v20  ;;  %v3626_v23 = vmul.f32 %v8707_v42, %v3604_v36  ;;  %v3670_v61 = vmax.f32 %v3654_v62, 0.0  ;;  %v3650_v60 = vadd.f32 %v8713_v11, %v3628_v16  ;;  %v3753_v63 = vld [vmem:[#allocation2 + $0x30] sm:$0xff]  ;;  %v3934_v17 = vld [vmem:[#allocation5 + $0x158] sm:$0xff]  ;;  %v3947_v3 = vld [vmem:[#allocation5 + $0x1c0] sm:$0xff] }
 0xa67   :  { %v3675_v51 = vmax.f32 %v3659_v38, 0.0  ;;  %v3616_v2 = vadd.f32 %v3599_v39, %v3249_v10  ;;  %v3651_v10 = vadd.f32 %v8705_v15, %v3629_v28  ;;  %v3624_v4 = vmul.f32 %v8707_v42, %v3602_v33  ;;  %v3751_v38 = vld [vmem:[#allocation2 + $0x20] sm:$0xff]  ;;  %v3848_v39 = vld [vmem:[#allocation5 + $0x78] sm:$0xff]  ;;  %v3949_v58 = vld [vmem:[#allocation5 + $0x1d0] sm:$0xff] }
 0xa68   :  { %v3661_v15 = vmax.f32 %v3645_v27, 0.0  ;;  %v3668_v9 = vmax.f32 %v3652_v14, 0.0  ;;  %v3648_v8 = vadd.f32 %v8713_v11, %v3626_v23  ;;  %v3864_v28 = vld [vmem:[#allocation5 + $0xf8] sm:$0xff]  ;;  %v3933_v19 = vld [vmem:[#allocation5 + $0x150] sm:$0xff]  ;;  %v3858_v47 = vld [vmem:[#allocation5 + $0xc8] sm:$0xff] }
 0xa69   :  { %v3638_v40 = vmul.f32 %v8707_v42, %v3616_v2  ;;  %3701 = vmatpush.msrb.mxu3 %v3675_v51  ;;  %3775 = vmatpush.msrb.mxu1 %v3675_v51  ;;  %v3667_v0 = vmax.f32 %v3651_v10, 0.0  ;;  %v3666_v42 = vmax.f32 %v3650_v60, 0.0  ;;  %v3646_v29 = vadd.f32 %v8713_v11, %v3624_v4  ;;  %v3752_v51 = vld [vmem:[#allocation2 + $0x28] sm:$0xff]  ;;  %v3953_v2 = vld [vmem:[#allocation5 + $0x1f0] sm:$0xff]  ;;  %v3946_v20 = vld [vmem:[#allocation5 + $0x1b8] sm:$0xff] }
 0xa6a   :  { %v3664_v21 = vmax.f32 %v3648_v8, 0.0  ;;  %v3948_v10 = vld [vmem:[#allocation5 + $0x1c8] sm:$0xff]  ;;  %v3680_v36 = vld [vmem:[#allocation2 + $0x18] sm:$0xff]  ;;  %v3931_v16 = vld [vmem:[#allocation5 + $0x140] sm:$0xff] }
 0xa6b   :  { %v3660_v54 = vadd.f32 %v8713_v11, %v3638_v40  ;;  %3702 = vmatpush.msrb.mxu3 %v3673_v56  ;;  %3776 = vmatpush.msrb.mxu1 %v3673_v56  ;;  %v3662_v26 = vmax.f32 %v3646_v29, 0.0  ;;  %v3954_v11 = vld [vmem:[#allocation5 + $0x1f8] sm:$0xff]  ;;  %v3861_v56 = vld [vmem:[#allocation5 + $0xe0] sm:$0xff]  ;;  %v3838_v33 = vld [vmem:[#allocation5 + $0x28] sm:$0xff] }
 0xa6c   :  { %v3950_v40 = vld [vmem:[#allocation5 + $0x1d8] sm:$0xff]  ;;  %v3943_v23 = vld [vmem:[#allocation5 + $0x1a0] sm:$0xff]  ;;  %v3929_v14 = vld [vmem:[#allocation5 + $0x130] sm:$0xff] }
 0xa6d   :  { %v3676_v13 = vmax.f32 %v3660_v54, 0.0  ;;  %3703 = vmatpush.msrb.mxu3 %v3671_v1  ;;  %3777 = vmatpush.msrb.mxu1 %v3671_v1  ;;  %v3841_v54 = vld [vmem:[#allocation5 + $0x40] sm:$0xff]  ;;  %v3859_v1 = vld [vmem:[#allocation5 + $0xd0] sm:$0xff]  ;;  %v3754_v48 = vld [vmem:[#allocation2 + $0x38] sm:$0xff] }
 0xa6e   :  { %v3856_v62 = vld [vmem:[#allocation5 + $0xb8] sm:$0xff]  ;;  %v3928_v60 = vld [vmem:[#allocation5 + $0x128] sm:$0xff]  ;;  %v3853_v8 = vld [vmem:[#allocation5 + $0xa0] sm:$0xff] }
 0xa6f   :  { %3704 = vmatpush.msrb.mxu3 %v3669_v35  ;;  %3730 = vmatpush.msra.mxu0 %v3676_v13  ;;  %v3930_v27 = vld [vmem:[#allocation5 + $0x138] sm:$0xff] }
 0xa70   :  { %3778 = vmatpush.msrb.mxu1 %v3669_v35  ;;  %3804 = vmatpush.msra.mxu2 %v3676_v13  ;;  %v3839_v13 = vld [vmem:[#allocation5 + $0x30] sm:$0xff]  ;;  %v3932_v35 = vld [vmem:[#allocation5 + $0x148] sm:$0xff]  ;;  %v3942_v4 = vld [vmem:[#allocation5 + $0x198] sm:$0xff] }
 0xa71   :  { %3705 = vmatpush.msrb.mxu3 %v3667_v0  ;;  %3731 = vmatpush.msra.mxu0 %v3674_v18  ;;  %v3852_v29 = vld [vmem:[#allocation5 + $0x98] sm:$0xff] }
 0xa72   :  { %3779 = vmatpush.msrb.mxu1 %v3667_v0  ;;  %3805 = vmatpush.msra.mxu2 %v3674_v18  ;;  %v3944_v0 = vld [vmem:[#allocation5 + $0x1a8] sm:$0xff]  ;;  %v3837_v18 = vld [vmem:[#allocation5 + $0x20] sm:$0xff] }
 0xa73   :  { %3706 = vmatpush.msrb.mxu3 %v3665_v12  ;;  %3732 = vmatpush.msra.mxu0 %v3672_v30 }
 0xa74   :  { %3780 = vmatpush.msrb.mxu1 %v3665_v12  ;;  %3806 = vmatpush.msra.mxu2 %v3672_v30  ;;  %v3836_v12 = vld [vmem:[#allocation5 + $0x18] sm:$0xff]  ;;  %v3855_v30 = vld [vmem:[#allocation5 + $0xb0] sm:$0xff] }
 0xa75   :  { %3707 = vmatpush.msrb.mxu3 %v3663_v57  ;;  %3733 = vmatpush.msra.mxu0 %v3670_v61 }
 0xa76   :  { %3781 = vmatpush.msrb.mxu1 %v3663_v57  ;;  %3807 = vmatpush.msra.mxu2 %v3670_v61  ;;  %v3835_v57 = vld [vmem:[#allocation5 + $0x10] sm:$0xff]  ;;  %v3854_v61 = vld [vmem:[#allocation5 + $0xa8] sm:$0xff] }
 0xa77   :  { %3708 = vmatpush.msrb.mxu3 %v3661_v15  ;;  %3734 = vmatpush.msra.mxu0 %v3668_v9 }
 0xa78   :  { %3782 = vmatpush.msrb.mxu1 %v3661_v15  ;;  %3808 = vmatpush.msra.mxu2 %v3668_v9  ;;  %v3941_v15 = vld [vmem:[#allocation5 + $0x190] sm:$0xff]  ;;  %v3834_v9 = vld [vmem:[#allocation5 + $0x8] sm:$0xff] }
 0xa79   :  { %3735 = vmatpush.msra.mxu0 %v3666_v42  ;;  %5573 = vmatmul.msk.f32.vlgmr.msrb.gmra.mxu3 %vm263_vm0, %v3677_v55 }
 0xa7a   :  { %3809 = vmatpush.msra.mxu2 %v3666_v42  ;;  %5581 = vmatmul.msk.f32.vlgmr.msrb.gmra.mxu1 %vm263_vm0, %v3751_v38  ;;  %v3833_v42 = vld [vmem:[#allocation5] sm:$0xff] }
 0xa7b   :  { %3736 = vmatpush.msra.mxu0 %v3664_v21  ;;  %3865 = vmatpush.msra.mxu3 %v3848_v39  ;;  %v3851_v39 = vld [vmem:[#allocation5 + $0x90] sm:$0xff] }
 0xa7c   :  { %3810 = vmatpush.msra.mxu2 %v3664_v21  ;;  %3955 = vmatpush.msra.mxu1 %v3938_v34  ;;  %v3925_v21 = vld [vmem:[#allocation5 + $0x110] sm:$0xff]  ;;  %v3940_v34 = vld [vmem:[#allocation5 + $0x188] sm:$0xff] }
 0xa7d   :  { %3737 = vmatpush.msra.mxu0 %v3662_v26  ;;  %3866 = vmatpush.msra.mxu3 %v3847_v50  ;;  %v3850_v50 = vld [vmem:[#allocation5 + $0x88] sm:$0xff] }
 0xa7e   :  { %3811 = vmatpush.msra.mxu2 %v3662_v26  ;;  %5577 = vmatmul.msk.f32.vlgmr.msra.gmra.mxu0 %vm263_vm0, %v3677_v55  ;;  %v3927_v55 = vld [vmem:[#allocation5 + $0x120] sm:$0xff]  ;;  %v3924_v26 = vld [vmem:[#allocation5 + $0x108] sm:$0xff] }
 0xa7f   :  { %5585 = vmatmul.msk.f32.vlgmr.msra.gmra.mxu2 %vm263_vm0, %v3751_v38  ;;  %3867 = vmatpush.msra.mxu3 %v3846_v32  ;;  %v3926_v38 = vld [vmem:[#allocation5 + $0x118] sm:$0xff]  ;;  %v3939_v32 = vld [vmem:[#allocation5 + $0x180] sm:$0xff] }
 0xa80   :  { %3984 = vmatpush.msrb.mxu2 %v3954_v11  ;;  %3894 = vmatpush.msrb.mxu0 %v3864_v28  ;;  %v3849_v11 = vld [vmem:[#allocation5 + $0x80] sm:$0xff] }
 0xa81   :  { %5574 = vmatmul.msk.f32.gmra.mxu3 %vm263_vm0, %v3678_v45  ;;  %3956 = vmatpush.msra.mxu1 %v3937_v22  ;;  %v3923_v28 = vld [vmem:[#allocation5 + $0x100] sm:$0xff] }
 0xa82   :  { %5582 = vmatmul.msk.f32.gmra.mxu1 %vm263_vm0, %v3752_v51  ;;  %3985 = vmatpush.msrb.mxu2 %v3953_v2 }
 0xa83   :  { %3868 = vmatpush.msra.mxu3 %v3845_v59  ;;  %3895 = vmatpush.msrb.mxu0 %v3863_v44  ;;  %v5608_v59 = vld [vmem:[%s9259_s7 + $0xf8] sm:$0xff]  ;;  %v5607_v44 = vld [vmem:[%s9259_s7 + $0xf0] sm:$0xff] }
 0xa84   :  { %3986 = vmatpush.msrb.mxu2 %v3952_v49  ;;  %3957 = vmatpush.msra.mxu1 %v3936_v31  ;;  %v5606_v31 = vld [vmem:[%s9259_s7 + $0xe8] sm:$0xff] }
 0xa85   :  { %3869 = vmatpush.msra.mxu3 %v3844_v6  ;;  %3896 = vmatpush.msrb.mxu0 %v3862_v37  ;;  %v5605_v6 = vld [vmem:[%s9259_s7 + $0xe0] sm:$0xff] }
 0xa86   :  { %5578 = vmatmul.msk.f32.gmra.mxu0 %vm263_vm0, %v3678_v45  ;;  %3987 = vmatpush.msrb.mxu2 %v3951_v5 }
 0xa87   :  { %5586 = vmatmul.msk.f32.gmra.mxu2 %vm263_vm0, %v3752_v51  ;;  %3870 = vmatpush.msra.mxu3 %v3843_v43 }
 0xa88   :  { %3988 = vmatpush.msrb.mxu2 %v3950_v40  ;;  %3897 = vmatpush.msrb.mxu0 %v3861_v56 }
 0xa89   :  { %5575 = vmatmul.msk.f32.gmra.mxu3 %vm263_vm0, %v3679_v52  ;;  %3958 = vmatpush.msra.mxu1 %v3935_v53 }
 0xa8a   :  { %5583 = vmatmul.msk.f32.gmra.mxu1 %vm263_vm0, %v3753_v63  ;;  %3989 = vmatpush.msrb.mxu2 %v3949_v58 }
 0xa8b   :  { %3871 = vmatpush.msra.mxu3 %v3842_v25  ;;  %3898 = vmatpush.msrb.mxu0 %v3860_v46 }
 0xa8c   :  { %3990 = vmatpush.msrb.mxu2 %v3948_v10  ;;  %3959 = vmatpush.msra.mxu1 %v3934_v17 }
 0xa8d   :  { %3872 = vmatpush.msra.mxu3 %v3841_v54  ;;  %3899 = vmatpush.msrb.mxu0 %v3859_v1 }
 0xa8e   :  { %5579 = vmatmul.msk.f32.gmra.mxu0 %vm263_vm0, %v3679_v52  ;;  %3991 = vmatpush.msrb.mxu2 %v3947_v3 }
 0xa8f   :  { %5587 = vmatmul.msk.f32.gmra.mxu2 %vm263_vm0, %v3753_v63  ;;  %3873 = vmatpush.msra.mxu3 %v3840_v7 }
 0xa90   :  { %3960 = vmatpush.msra.mxu1 %v3933_v19  ;;  %3992 = vmatpush.msrb.mxu2 %v3946_v20 }
 0xa91   :  { %5576 = vmatmul.msk.f32.gmra.mxu3 %vm263_vm0, %v3680_v36  ;;  %3900 = vmatpush.msrb.mxu0 %v3858_v47  ;;  %v5603_v47 = vld [vmem:[%s9259_s7 + $0xd0] sm:$0xff] }
 0xa92   :  { %5584 = vmatmul.msk.f32.gmra.mxu1 %vm263_vm0, %v3754_v48  ;;  %3874 = vmatpush.msra.mxu3 %v3839_v13  ;;  %v5601_v13 = vld [vmem:[%s9259_s7 + $0xc0] sm:$0xff] }
 0xa93   :  { %3961 = vmatpush.msra.mxu1 %v3932_v35  ;;  %3993 = vmatpush.msrb.mxu2 %v3945_v41  ;;  %v5600_v35 = vld [vmem:[%s9259_s7 + $0xb8] sm:$0xff]  ;;  %v5599_v41 = vld [vmem:[%s9259_s7 + $0xb0] sm:$0xff] }
 0xa94   :  { %3875 = vmatpush.msra.mxu3 %v3838_v33  ;;  %3901 = vmatpush.msrb.mxu0 %v3857_v24  ;;  %v5598_v33 = vld [vmem:[%s9259_s7 + $0xa8] sm:$0xff]  ;;  %v5597_v24 = vld [vmem:[%s9259_s7 + $0xa0] sm:$0xff] }
 0xa95   :  { %3962 = vmatpush.msra.mxu1 %v3931_v16  ;;  %3994 = vmatpush.msrb.mxu2 %v3944_v0  ;;  %v5596_v16 = vld [vmem:[%s9259_s7 + $0x98] sm:$0xff]  ;;  %v5595_v0 = vld [vmem:[%s9259_s7 + $0x90] sm:$0xff] }
 0xa96   :  { %5580 = vmatmul.msk.f32.gmra.mxu0 %vm263_vm0, %v3680_v36  ;;  %3876 = vmatpush.msra.mxu3 %v3837_v18  ;;  %v5604_v36 = vld [vmem:[%s9259_s7 + $0xd8] sm:$0xff]  ;;  %v5594_v18 = vld [vmem:[%s9259_s7 + $0x88] sm:$0xff] }
 0xa97   :  { %5588 = vmatmul.msk.f32.gmra.mxu2 %vm263_vm0, %v3754_v48  ;;  %3902 = vmatpush.msrb.mxu0 %v3856_v62  ;;  %v5602_v48 = vld [vmem:[%s9259_s7 + $0xc8] sm:$0xff]  ;;  %v5593_v62 = vld [vmem:[%s9259_s7 + $0x80] sm:$0xff] }
 0xa98   :  { %3963 = vmatpush.msra.mxu1 %v3930_v27  ;;  %3995 = vmatpush.msrb.mxu2 %v3943_v23 }
 0xa99   :  { %3877 = vmatpush.msra.mxu3 %v3836_v12  ;;  %3903 = vmatpush.msrb.mxu0 %v3855_v30 }
 0xa9a   :  { %3964 = vmatpush.msra.mxu1 %v3929_v14  ;;  %3996 = vmatpush.msrb.mxu2 %v3942_v4 }
 0xa9b   :  { %3878 = vmatpush.msra.mxu3 %v3835_v57  ;;  %3904 = vmatpush.msrb.mxu0 %v3854_v61 }
 0xa9c   :  { %3965 = vmatpush.msra.mxu1 %v3928_v60  ;;  %3997 = vmatpush.msrb.mxu2 %v3941_v15 }
 0xa9d   :  { %3879 = vmatpush.msra.mxu3 %v3834_v9  ;;  %3905 = vmatpush.msrb.mxu0 %v3853_v8 }
 0xa9e   :  { %3966 = vmatpush.msra.mxu1 %v3927_v55  ;;  %3998 = vmatpush.msrb.mxu2 %v3940_v34 }
 0xa9f   :  { %3880 = vmatpush.msra.mxu3 %v3833_v42  ;;  %3906 = vmatpush.msrb.mxu0 %v3852_v29 }
 0xaa0   :  { %3967 = vmatpush.msra.mxu1 %v3926_v38  ;;  %3999 = vmatpush.msrb.mxu2 %v3939_v32 }
 0xaa1   :  { %3907 = vmatpush.msrb.mxu0 %v3851_v39 }
 0xaa2   :  { %3968 = vmatpush.msra.mxu1 %v3925_v21 }
 0xaa3   :  { %3908 = vmatpush.msrb.mxu0 %v3850_v50 }
 0xaa4   :  { %3969 = vmatpush.msra.mxu1 %v3924_v26 }
 0xaa5   :  { %3909 = vmatpush.msrb.mxu0 %v3849_v11 }
 0xaa6   :  { %3970 = vmatpush.msra.mxu1 %v3923_v28 }
 0xaa7   :  { %4094 = vmatpush.msra.mxu0 %v5608_v59  ;;  %v4077_v59 = vld [vmem:[%s9259_s7 + $0x78] sm:$0xff] }
 0xaa8   :  { %4123 = vmatpush.msrb.mxu1 %v4077_v59 }
 0xaa9   :  { %4095 = vmatpush.msra.mxu0 %v5607_v44  ;;  %v4076_v44 = vld [vmem:[%s9259_s7 + $0x70] sm:$0xff] }
 0xaaa   :  { %4124 = vmatpush.msrb.mxu1 %v4076_v44 }
 0xaab   :  { %4096 = vmatpush.msra.mxu0 %v5606_v31  ;;  %v4017_v31 = vld [vmem:[#allocation7] sm:$0xff] }
 0xaad   :  { %4097 = vmatpush.msra.mxu0 %v5605_v6  ;;  %v4152_v6 = vld [vmem:[#allocation7 + $0x20] sm:$0xff] }
 0xaaf   :  { %4098 = vmatpush.msra.mxu0 %v5604_v36  ;;  %v4069_v36 = vld [vmem:[%s9259_s7 + $0x38] sm:$0xff] }
 0xab1   :  { %4099 = vmatpush.msra.mxu0 %v5603_v47  ;;  %v5620_v47 = vld [vmem:[%s9259_s7 + $0x138] sm:$0xff] }
 0xab3   :  { %4100 = vmatpush.msra.mxu0 %v5602_v48  ;;  %v4068_v48 = vld [vmem:[%s9259_s7 + $0x30] sm:$0xff] }
 0xab5   :  { %4101 = vmatpush.msra.mxu0 %v5601_v13  ;;  %v5619_v13 = vld [vmem:[%s9259_s7 + $0x130] sm:$0xff] }
 0xab7   :  { %4102 = vmatpush.msra.mxu0 %v5600_v35  ;;  %v4067_v35 = vld [vmem:[%s9259_s7 + $0x28] sm:$0xff] }
 0xab9   :  { %4103 = vmatpush.msra.mxu0 %v5599_v41  ;;  %v5618_v41 = vld [vmem:[%s9259_s7 + $0x128] sm:$0xff] }
 0xabb   :  { %4104 = vmatpush.msra.mxu0 %v5598_v33  ;;  %v4066_v33 = vld [vmem:[%s9259_s7 + $0x20] sm:$0xff] }
 0xabd   :  { %4105 = vmatpush.msra.mxu0 %v5597_v24  ;;  %v5617_v24 = vld [vmem:[%s9259_s7 + $0x120] sm:$0xff] }
 0xabf   :  { %4106 = vmatpush.msra.mxu0 %v5596_v16  ;;  %v4065_v16 = vld [vmem:[%s9259_s7 + $0x18] sm:$0xff] }
 0xac1   :  { %4107 = vmatpush.msra.mxu0 %v5595_v0  ;;  %v5616_v0 = vld [vmem:[%s9259_s7 + $0x118] sm:$0xff] }
 0xac3   :  { %4108 = vmatpush.msra.mxu0 %v5594_v18  ;;  %v4064_v18 = vld [vmem:[%s9259_s7 + $0x10] sm:$0xff] }
 0xac5   :  { %4109 = vmatpush.msra.mxu0 %v5593_v62  ;;  %v5615_v62 = vld [vmem:[%s9259_s7 + $0x110] sm:$0xff] }
 0xaf7   :  { %v3784_v45 = vpop.f32.mrf.mxu1 }
 0xafb   :  { %v3739_v22 = vpop.f32.mrf.mxu0 }
 0xafc   :  { %v3710_v51 = vpop.f32.mrf.mxu3 }
 0xafd   :  { %v3825_v2 = vmax.f32 %v3710_v51, %v3784_v45 }
 0xaff   :  { %3881 = vmatmul.f32.vlgmr.msra.gmra.mxu3 %v3825_v2  ;;  %v3787_v49 = vpop.f32.mrf.mxu1  ;;  %3971 = vmatmul.f32.vlgmr.msra.gmra.mxu1 %v3825_v2 }
 0xb02   :  { %v3813_v37 = vpop.f32.mrf.mxu2 }
 0xb03   :  { %v3826_v5 = vmax.f32 %v3739_v22, %v3813_v37  ;;  %v3742_v40 = vpop.f32.mrf.mxu0  ;;  %v5628_v37 = vld [vmem:[%s9259_s7 + $0x178] sm:$0xff] }
 0xb04   :  { %v3713_v43 = vpop.f32.mrf.mxu3 }
 0xb05   :  { %4000 = vmatmul.f32.vlgmr.msrb.gmra.mxu2 %v3826_v5  ;;  %v3827_v56 = vmax.f32 %v3713_v43, %v3787_v49  ;;  %3910 = vmatmul.f32.vlgmr.msrb.gmra.mxu0 %v3826_v5  ;;  %v4075_v49 = vld [vmem:[%s9259_s7 + $0x68] sm:$0xff]  ;;  %v4074_v5 = vld [vmem:[%s9259_s7 + $0x60] sm:$0xff]  ;;  %v5627_v43 = vld [vmem:[%s9259_s7 + $0x170] sm:$0xff] }
 0xb06   :  { %4125 = vmatpush.msrb.mxu1 %v4075_v49 }
 0xb07   :  { %3884 = vmatmul.f32.gmra.mxu3 %v3827_v56  ;;  %3974 = vmatmul.f32.gmra.mxu1 %v3827_v56  ;;  %v3790_v52 = vpop.f32.mrf.mxu1  ;;  %v5626_v56 = vld [vmem:[%s9259_s7 + $0x168] sm:$0xff] }
 0xb08   :  { %4126 = vmatpush.msrb.mxu1 %v4074_v5 }
 0xb0a   :  { %v3816_v53 = vpop.f32.mrf.mxu2 }
 0xb0b   :  { %v3828_v63 = vmax.f32 %v3742_v40, %v3816_v53  ;;  %v3745_v46 = vpop.f32.mrf.mxu0  ;;  %v4073_v40 = vld [vmem:[%s9259_s7 + $0x58] sm:$0xff]  ;;  %v5625_v53 = vld [vmem:[%s9259_s7 + $0x160] sm:$0xff] }
 0xb0c   :  { %v3716_v58 = vpop.f32.mrf.mxu3  ;;  %4127 = vmatpush.msrb.mxu1 %v4073_v40  ;;  %v5730_v40 = vld [vmem:[#allocation8 + $0x1] ss:$0 sm:$0xff] }
 0xb0d   :  { %4003 = vmatmul.f32.gmra.mxu2 %v3828_v63  ;;  %v3829_v25 = vmax.f32 %v3716_v58, %v3790_v52  ;;  %3913 = vmatmul.f32.gmra.mxu0 %v3828_v63  ;;  %v4072_v52 = vld [vmem:[%s9259_s7 + $0x50] sm:$0xff]  ;;  %v4018_v63 = vld [vmem:[#allocation7 + $0x8] sm:$0xff] }
 0xb0e   :  { %v4153_v58 = vld [vmem:[#allocation7 + $0x28] sm:$0xff]  ;;  %4128 = vmatpush.msrb.mxu1 %v4072_v52 }
 0xb0f   :  { %3887 = vmatmul.f32.gmra.mxu3 %v3829_v25  ;;  %3977 = vmatmul.f32.gmra.mxu1 %v3829_v25  ;;  %v3793_v17 = vpop.f32.mrf.mxu1  ;;  %v5624_v25 = vld [vmem:[%s9259_s7 + $0x158] sm:$0xff] }
 0xb12   :  { %v3819_v10 = vpop.f32.mrf.mxu2 }
 0xb13   :  { %v3830_v54 = vmax.f32 %v3745_v46, %v3819_v10  ;;  %v3748_v7 = vpop.f32.mrf.mxu0  ;;  %v5623_v46 = vld [vmem:[%s9259_s7 + $0x150] sm:$0xff] }
 0xb14   :  { %v3719_v1 = vpop.f32.mrf.mxu3  ;;  %v4019_v10 = vld [vmem:[#allocation7 + $0x10] sm:$0xff] }
 0xb15   :  { %4006 = vmatmul.f32.gmra.mxu2 %v3830_v54  ;;  %v3831_v3 = vmax.f32 %v3719_v1, %v3793_v17  ;;  %3916 = vmatmul.f32.gmra.mxu0 %v3830_v54  ;;  %v4154_v17 = vld [vmem:[#allocation7 + $0x30] sm:$0xff]  ;;  %v4020_v54 = vld [vmem:[#allocation7 + $0x18] sm:$0xff] }
 0xb16   :  { %v4155_v1 = vld [vmem:[#allocation7 + $0x38] sm:$0xff] }
 0xb17   :  { %3890 = vmatmul.f32.gmra.mxu3 %v3831_v3  ;;  %3980 = vmatmul.f32.gmra.mxu1 %v3831_v3  ;;  %v4071_v3 = vld [vmem:[%s9259_s7 + $0x48] sm:$0xff] }
 0xb18   :  { %4129 = vmatpush.msrb.mxu1 %v4071_v3  ;;  %v5646_v3 = vld [vmem:[%s9263_s11 + $0xe8] sm:$0xff] }
 0xb1a   :  { %v3822_v19 = vpop.f32.mrf.mxu2 }
 0xb1b   :  { %v3832_v20 = vmax.f32 %v3748_v7, %v3822_v19  ;;  %v5622_v7 = vld [vmem:[%s9259_s7 + $0x148] sm:$0xff]  ;;  %v4070_v19 = vld [vmem:[%s9259_s7 + $0x40] sm:$0xff] }
 0xb1c   :  { %4130 = vmatpush.msrb.mxu1 %v4070_v19  ;;  %v4343_v19 = vld [vmem:[%s9263_s11 + $0x68] sm:$0xff] }
 0xb1d   :  { %4009 = vmatmul.f32.gmra.mxu2 %v3832_v20  ;;  %3919 = vmatmul.f32.gmra.mxu0 %v3832_v20  ;;  %v5621_v20 = vld [vmem:[%s9259_s7 + $0x140] sm:$0xff] }
 0xb1e   :  { %4131 = vmatpush.msrb.mxu1 %v4069_v36 }
 0xb20   :  { %4132 = vmatpush.msrb.mxu1 %v4068_v48  ;;  %v5644_v48 = vld [vmem:[%s9263_s11 + $0xd8] sm:$0xff] }
 0xb22   :  { %4133 = vmatpush.msrb.mxu1 %v4067_v35  ;;  %v4267_v35 = vld [vmem:[#allocation10 + $0x8] sm:$0xff] }
 0xb24   :  { %4134 = vmatpush.msrb.mxu1 %v4066_v33  ;;  %v4298_v33 = vld [vmem:[#allocation10 + $0x18] sm:$0xff] }
 0xb26   :  { %4135 = vmatpush.msrb.mxu1 %v4065_v16  ;;  %v4341_v16 = vld [vmem:[%s9263_s11 + $0x58] sm:$0xff] }
 0xb28   :  { %4136 = vmatpush.msrb.mxu1 %v4064_v18  ;;  %v5642_v18 = vld [vmem:[%s9263_s11 + $0xc8] sm:$0xff] }
 0xb7c   :  { %v3972_v27 = vpop.f32.mrf.mxu1 }
 0xb82   :  { %v3882_v23 = vpop.f32.mrf.mxu3  ;;  %v3911_v12 = vpop.f32.mrf.mxu0 }
 0xb83   :  { %v3912_v14 = vadd.f32 %v3911_v12, %v3882_v23  ;;  %v5614_v23 = vld [vmem:[%s9259_s7 + $0x108] sm:$0xff]  ;;  %v4062_v12 = vld [vmem:[%s9259_s7] sm:$0xff] }
 0xb84   :  { %v3975_v15 = vpop.f32.mrf.mxu1 }
 0xb88   :  { %v4001_v30 = vpop.f32.mrf.mxu2 }
 0xb89   :  { %v4002_v4 = vadd.f32 %v4001_v30, %v3972_v27  ;;  %v4063_v27 = vld [vmem:[%s9259_s7 + $0x8] sm:$0xff]  ;;  %v5613_v30 = vld [vmem:[%s9259_s7 + $0x100] sm:$0xff] }
 0xb8a   :  { %v3885_v57 = vpop.f32.mrf.mxu3  ;;  %v3914_v61 = vpop.f32.mrf.mxu0  ;;  %4137 = vmatpush.msrb.mxu1 %v4063_v27  ;;  %v4339_v27 = vld [vmem:[%s9263_s11 + $0x48] sm:$0xff] }
 0xb8b   :  { %v4013_v60 = vmax.f32 %v3912_v14, %v4002_v4  ;;  %v3915_v8 = vadd.f32 %v3914_v61, %v3885_v57 }
 0xb8c   :  { %v3978_v39 = vpop.f32.mrf.mxu1  ;;  %4138 = vmatpush.msrb.mxu1 %v4062_v12  ;;  %v4338_v12 = vld [vmem:[%s9263_s11 + $0x40] sm:$0xff] }
 0xb8d   :  { %4110 = vmatmul.f32.vlgmr.msra.gmra.mxu0 %v4013_v60 }
 0xb90   :  { %v4004_v9 = vpop.f32.mrf.mxu2 }
 0xb91   :  { %v4005_v55 = vadd.f32 %v4004_v9, %v3975_v15 }
 0xb92   :  { %v3888_v29 = vpop.f32.mrf.mxu3  ;;  %v3917_v38 = vpop.f32.mrf.mxu0 }
 0xb93   :  { %v4014_v42 = vmax.f32 %v3915_v8, %v4005_v55  ;;  %v3918_v34 = vadd.f32 %v3917_v38, %v3888_v29 }
 0xb94   :  { %v3981_v28 = vpop.f32.mrf.mxu1 }
 0xb95   :  { %4113 = vmatmul.f32.gmra.mxu0 %v4014_v42 }
 0xb98   :  { %v4007_v21 = vpop.f32.mrf.mxu2 }
 0xb99   :  { %v4008_v50 = vadd.f32 %v4007_v21, %v3978_v39 }
 0xb9a   :  { %v3891_v32 = vpop.f32.mrf.mxu3  ;;  %v3920_v11 = vpop.f32.mrf.mxu0 }
 0xb9b   :  { %v4015_v26 = vmax.f32 %v3918_v34, %v4008_v50  ;;  %v3921_v22 = vadd.f32 %v3920_v11, %v3891_v32 }
 0xb9d   :  { %4116 = vmatmul.f32.gmra.mxu0 %v4015_v26 }
 0xba0   :  { %v4010_v45 = vpop.f32.mrf.mxu2 }
 0xba1   :  { %v4011_v51 = vadd.f32 %v4010_v45, %v3981_v28 }
 0xba3   :  { %v4016_v2 = vmax.f32 %v3921_v22, %v4011_v51 }
 0xba5   :  { %4045 = vmatpush.msrb.mxu3 %v4016_v2  ;;  %4180 = vmatpush.msra.mxu2 %v4016_v2 }
 0xba6   :  { %4119 = vmatmul.f32.gmra.mxu0 %v4016_v2  ;;  %v5729_v2 = vld [vmem:[#allocation8] ss:$0 sm:$0xff] }
 0xba7   :  { %4046 = vmatpush.msrb.mxu3 %v4015_v26  ;;  %4181 = vmatpush.msra.mxu2 %v4015_v26 }
 0xba9   :  { %4047 = vmatpush.msrb.mxu3 %v4014_v42  ;;  %4182 = vmatpush.msra.mxu2 %v4014_v42 }
 0xbab   :  { %4048 = vmatpush.msrb.mxu3 %v4013_v60  ;;  %4183 = vmatpush.msra.mxu2 %v4013_v60 }
 0xbac   :  { %5589 = vmatmul.msk.f32.vlgmr.msrb.gmra.mxu3 %vm1618_vm1, %v4017_v31  ;;  %5609 = vmatmul.msk.f32.vlgmr.msra.gmra.mxu2 %vm1618_vm1, %v4152_v6 }
 0xbad   :  { %4213 = vmatpush.msra.mxu3 %v5628_v37 }
 0xbaf   :  { %4214 = vmatpush.msra.mxu3 %v5627_v43 }
 0xbb1   :  { %4215 = vmatpush.msra.mxu3 %v5626_v56 }
 0xbb3   :  { %4216 = vmatpush.msra.mxu3 %v5625_v53 }
 0xbb4   :  { %5590 = vmatmul.msk.f32.gmra.mxu3 %vm1618_vm1, %v4018_v63  ;;  %5610 = vmatmul.msk.f32.gmra.mxu2 %vm1618_vm1, %v4153_v58 }
 0xbb5   :  { %4217 = vmatpush.msra.mxu3 %v5624_v25  ;;  %v5648_v25 = vld [vmem:[%s9263_s11 + $0xf8] sm:$0xff] }
 0xbb6   :  { %4385 = vmatpush.msrb.mxu2 %v5648_v25  ;;  %v4448_v25 = vld [vmem:[#allocation11 + $0x38] sm:$0xff] }
 0xbb7   :  { %4218 = vmatpush.msra.mxu3 %v5623_v46  ;;  %v5647_v46 = vld [vmem:[%s9263_s11 + $0xf0] sm:$0xff] }
 0xbb8   :  { %4386 = vmatpush.msrb.mxu2 %v5647_v46  ;;  %v4553_v46 = vld [vmem:[#allocation11 + $0xb8] sm:$0xff] }
 0xbb9   :  { %4219 = vmatpush.msra.mxu3 %v5622_v7 }
 0xbba   :  { %4387 = vmatpush.msrb.mxu2 %v5646_v3  ;;  %v4445_v3 = vld [vmem:[#allocation11 + $0x20] sm:$0xff] }
 0xbbb   :  { %4220 = vmatpush.msra.mxu3 %v5621_v20  ;;  %v5645_v20 = vld [vmem:[%s9263_s11 + $0xe0] sm:$0xff] }
 0xbbc   :  { %5591 = vmatmul.msk.f32.gmra.mxu3 %vm1618_vm1, %v4019_v10  ;;  %5611 = vmatmul.msk.f32.gmra.mxu2 %vm1618_vm1, %v4154_v17 }
 0xbbd   :  { %4221 = vmatpush.msra.mxu3 %v5620_v47  ;;  %v4266_v47 = vld [vmem:[#allocation10] sm:$0xff]  ;;  %4388 = vmatpush.msrb.mxu2 %v5645_v20  ;;  %v4549_v20 = vld [vmem:[#allocation11 + $0x98] sm:$0xff] }
 0xbbf   :  { %4222 = vmatpush.msra.mxu3 %v5619_v13  ;;  %v5643_v13 = vld [vmem:[%s9263_s11 + $0xd0] sm:$0xff]  ;;  %4389 = vmatpush.msrb.mxu2 %v5644_v48 }
 0xbc0   :  { %v4442_v48 = vld [vmem:[#allocation11 + $0x8] sm:$0xff] }
 0xbc1   :  { %4223 = vmatpush.msra.mxu3 %v5618_v41  ;;  %4390 = vmatpush.msrb.mxu2 %v5643_v13  ;;  %v4297_v41 = vld [vmem:[#allocation10 + $0x10] sm:$0xff]  ;;  %v4547_v13 = vld [vmem:[#allocation11 + $0x88] sm:$0xff] }
 0xbc3   :  { %4224 = vmatpush.msra.mxu3 %v5617_v24  ;;  %v4342_v24 = vld [vmem:[%s9263_s11 + $0x60] sm:$0xff]  ;;  %4391 = vmatpush.msrb.mxu2 %v5642_v18  ;;  %v4655_v18 = vld [vmem:[%s9268_s16 + $0x38] sm:$0xff] }
 0xbc4   :  { %5592 = vmatmul.msk.f32.gmra.mxu3 %vm1618_vm1, %v4020_v54  ;;  %5612 = vmatmul.msk.f32.gmra.mxu2 %vm1618_vm1, %v4155_v1  ;;  %v4345_v54 = vld [vmem:[%s9263_s11 + $0x78] sm:$0xff]  ;;  %v4344_v1 = vld [vmem:[%s9263_s11 + $0x70] sm:$0xff] }
 0xbc5   :  { %4225 = vmatpush.msra.mxu3 %v5616_v0  ;;  %4346 = vmatpush.msra.mxu1 %v4345_v54  ;;  %v4340_v0 = vld [vmem:[%s9263_s11 + $0x50] sm:$0xff] }
 0xbc6   :  { %v4446_v54 = vld [vmem:[#allocation11 + $0x28] sm:$0xff] }
 0xbc7   :  { %4226 = vmatpush.msra.mxu3 %v5615_v62  ;;  %4347 = vmatpush.msra.mxu1 %v4344_v1  ;;  %v5641_v62 = vld [vmem:[%s9263_s11 + $0xc0] sm:$0xff]  ;;  %v4551_v1 = vld [vmem:[#allocation11 + $0xa8] sm:$0xff] }
 0xbc8   :  { %4392 = vmatpush.msrb.mxu2 %v5641_v62  ;;  %v5670_v62 = vld [vmem:[%s9268_s16 + $0x78] sm:$0xff] }
 0xbc9   :  { %4227 = vmatpush.msra.mxu3 %v5614_v23  ;;  %4348 = vmatpush.msra.mxu1 %v4343_v19  ;;  %v5640_v23 = vld [vmem:[%s9263_s11 + $0xb8] sm:$0xff] }
 0xbca   :  { %4393 = vmatpush.msrb.mxu2 %v5640_v23  ;;  %v4444_v19 = vld [vmem:[#allocation11 + $0x18] sm:$0xff]  ;;  %v5669_v23 = vld [vmem:[%s9268_s16 + $0x70] sm:$0xff] }
 0xbcb   :  { %4228 = vmatpush.msra.mxu3 %v5613_v30  ;;  %4349 = vmatpush.msra.mxu1 %v4342_v24  ;;  %v5639_v30 = vld [vmem:[%s9263_s11 + $0xb0] sm:$0xff] }
 0xbcc   :  { %4394 = vmatpush.msrb.mxu2 %v5639_v30  ;;  %v5668_v30 = vld [vmem:[%s9268_s16 + $0x68] sm:$0xff] }
 0xbcd   :  { %4350 = vmatpush.msra.mxu1 %v4341_v16 }
 0xbcf   :  { %4351 = vmatpush.msra.mxu1 %v4340_v0 }
 0xbd1   :  { %4352 = vmatpush.msra.mxu1 %v4339_v27  ;;  %v4654_v27 = vld [vmem:[%s9268_s16 + $0x30] sm:$0xff] }
 0xbd3   :  { %4353 = vmatpush.msra.mxu1 %v4338_v12  ;;  %v4653_v12 = vld [vmem:[%s9268_s16 + $0x28] sm:$0xff] }
 0xc0a   :  { %v4111_v55 = vpop.f32.mrf.mxu0 }
 0xc12   :  { %v4114_v38 = vpop.f32.mrf.mxu0 }
 0xc1a   :  { %v4117_v50 = vpop.f32.mrf.mxu0 }
 0xc23   :  { %v4120_v22 = vpop.f32.mrf.mxu0 }
 0xc2f   :  { %v4050_v14 = vpop.f32.mrf.mxu3  ;;  %v4185_v4 = vpop.f32.mrf.mxu2 }
 0xc30   :  { %4139 = vmatmul.f32.vlgmr.msrb.gmra.mxu1 %v4050_v14  ;;  %4229 = vmatmul.f32.vlgmr.msra.gmra.mxu3 %v4185_v4  ;;  %v4337_v14 = vld [vmem:[%s9263_s11 + $0x38] sm:$0xff]  ;;  %v4336_v4 = vld [vmem:[%s9263_s11 + $0x30] sm:$0xff] }
 0xc31   :  { %4354 = vmatpush.msra.mxu1 %v4337_v14  ;;  %v4652_v14 = vld [vmem:[%s9268_s16 + $0x20] sm:$0xff] }
 0xc33   :  { %4355 = vmatpush.msra.mxu1 %v4336_v4  ;;  %v5667_v4 = vld [vmem:[%s9268_s16 + $0x60] sm:$0xff] }
 0xc37   :  { %v4053_v57 = vpop.f32.mrf.mxu3  ;;  %v4188_v61 = vpop.f32.mrf.mxu2 }
 0xc38   :  { %4142 = vmatmul.f32.gmra.mxu1 %v4053_v57  ;;  %4232 = vmatmul.f32.gmra.mxu3 %v4188_v61  ;;  %v5638_v57 = vld [vmem:[%s9263_s11 + $0xa8] sm:$0xff]  ;;  %v5637_v61 = vld [vmem:[%s9263_s11 + $0xa0] sm:$0xff] }
 0xc39   :  { %4395 = vmatpush.msrb.mxu2 %v5638_v57 }
 0xc3b   :  { %4396 = vmatpush.msrb.mxu2 %v5637_v61  ;;  %v4651_v61 = vld [vmem:[%s9268_s16 + $0x18] sm:$0xff] }
 0xc3f   :  { %v4056_v60 = vpop.f32.mrf.mxu3  ;;  %v4191_v15 = vpop.f32.mrf.mxu2 }
 0xc40   :  { %4145 = vmatmul.f32.gmra.mxu1 %v4056_v60  ;;  %4235 = vmatmul.f32.gmra.mxu3 %v4191_v15  ;;  %v4335_v60 = vld [vmem:[%s9263_s11 + $0x28] sm:$0xff]  ;;  %v5636_v15 = vld [vmem:[%s9263_s11 + $0x98] sm:$0xff] }
 0xc41   :  { %4356 = vmatpush.msra.mxu1 %v4335_v60  ;;  %4397 = vmatpush.msrb.mxu2 %v5636_v15  ;;  %v5666_v60 = vld [vmem:[%s9268_s16 + $0x58] sm:$0xff] }
 0xc47   :  { %v4059_v9 = vpop.f32.mrf.mxu3  ;;  %v4194_v8 = vpop.f32.mrf.mxu2 }
 0xc48   :  { %4148 = vmatmul.f32.gmra.mxu1 %v4059_v9  ;;  %4238 = vmatmul.f32.gmra.mxu3 %v4194_v8  ;;  %v4334_v9 = vld [vmem:[%s9263_s11 + $0x20] sm:$0xff]  ;;  %v5635_v8 = vld [vmem:[%s9263_s11 + $0x90] sm:$0xff] }
 0xc49   :  { %4357 = vmatpush.msra.mxu1 %v4334_v9  ;;  %4398 = vmatpush.msrb.mxu2 %v5635_v8  ;;  %v4650_v9 = vld [vmem:[%s9268_s16 + $0x10] sm:$0xff] }
 0xc4a   :  { %v5665_v8 = vld [vmem:[%s9268_s16 + $0x50] sm:$0xff] }
 0xcad   :  { %v4140_v42 = vpop.f32.mrf.mxu1 }
 0xcae   :  { %v4141_v51 = vadd.f32 %v4140_v42, %v4111_v55  ;;  %v4333_v55 = vld [vmem:[%s9263_s11 + $0x18] sm:$0xff]  ;;  %v4332_v42 = vld [vmem:[%s9263_s11 + $0x10] sm:$0xff] }
 0xcaf   :  { %4358 = vmatpush.msra.mxu1 %v4333_v55 }
 0xcb1   :  { %4359 = vmatpush.msra.mxu1 %v4332_v42 }
 0xcb3   :  { %v4230_v29 = vpop.f32.mrf.mxu3 }
 0xcb4   :  { %v4242_v31 = vadd.f32 %v4230_v29, %v4141_v51  ;;  %v5634_v29 = vld [vmem:[%s9263_s11 + $0x88] sm:$0xff] }
 0xcb5   :  { %v4143_v39 = vpop.f32.mrf.mxu1  ;;  %4399 = vmatpush.msrb.mxu2 %v5634_v29 }
 0xcb6   :  { %v4144_v28 = vadd.f32 %v4143_v39, %v4114_v38  ;;  %v4250_v56 = vmul.f32 %v5729_v2, %v4242_v31  ;;  %v4331_v38 = vld [vmem:[%s9263_s11 + $0x8] sm:$0xff]  ;;  %v5633_v39 = vld [vmem:[%s9263_s11 + $0x80] sm:$0xff] }
 0xcb7   :  { %4360 = vmatpush.msra.mxu1 %v4331_v38  ;;  %4400 = vmatpush.msrb.mxu2 %v5633_v39  ;;  %v4449_v31 = vld [vmem:[#allocation11 + $0x40] sm:$0xff] }
 0xcb8   :  { %v4258_v17 = vadd.f32 %v5730_v40, %v4250_v56  ;;  %v5731_v39 = vld [vmem:[#allocation14] ss:$0 sm:$0xff] }
 0xcba   :  { %v4262_v36 = vmax.f32 %v4258_v17, 0.0  ;;  %v4552_v17 = vld [vmem:[#allocation11 + $0xb0] sm:$0xff] }
 0xcbb   :  { %v4233_v21 = vpop.f32.mrf.mxu3 }
 0xcbc   :  { %v4243_v59 = vadd.f32 %v4233_v21, %v4144_v28  ;;  %v4330_v21 = vld [vmem:[%s9263_s11] sm:$0xff] }
 0xcbd   :  { %v4146_v34 = vpop.f32.mrf.mxu1  ;;  %4361 = vmatpush.msra.mxu1 %v4330_v21  ;;  %v4452_v28 = vld [vmem:[#allocation11 + $0x58] sm:$0xff] }
 0xcbe   :  { %v4147_v32 = vadd.f32 %v4146_v34, %v4117_v50  ;;  %v4251_v5 = vmul.f32 %v5729_v2, %v4243_v59  ;;  %v4456_v34 = vld [vmem:[#allocation11 + $0x78] sm:$0xff]  ;;  %v4455_v50 = vld [vmem:[#allocation11 + $0x70] sm:$0xff] }
 0xcbf   :  { %4500 = vmatpush.msrb.mxu1 %v4448_v25 }
 0xcc0   :  { %v4259_v58 = vadd.f32 %v5730_v40, %v4251_v5 }
 0xcc2   :  { %v4263_v7 = vmax.f32 %v4259_v58, 0.0  ;;  %v4516_v58 = vld [vmem:[#allocation13 + $0x18] sm:$0xff] }
 0xcc3   :  { %v4236_v26 = vpop.f32.mrf.mxu3 }
 0xcc4   :  { %v4244_v45 = vadd.f32 %v4236_v26, %v4147_v32  ;;  %v4454_v26 = vld [vmem:[#allocation11 + $0x68] sm:$0xff]  ;;  %v4453_v32 = vld [vmem:[#allocation11 + $0x60] sm:$0xff] }
 0xcc5   :  { %v4149_v11 = vpop.f32.mrf.mxu1 }
 0xcc6   :  { %v4150_v44 = vadd.f32 %v4149_v11, %v4120_v22  ;;  %v4252_v6 = vmul.f32 %v5729_v2, %v4244_v45 }
 0xcc8   :  { %v4260_v53 = vadd.f32 %v5730_v40, %v4252_v6 }
 0xcca   :  { %v4264_v10 = vmax.f32 %v4260_v53, 0.0  ;;  %v4515_v53 = vld [vmem:[#allocation13 + $0x10] sm:$0xff] }
 0xccb   :  { %v4239_v49 = vpop.f32.mrf.mxu3 }
 0xccc   :  { %v4245_v37 = vadd.f32 %v4239_v49, %v4150_v44  ;;  %v4451_v44 = vld [vmem:[#allocation11 + $0x50] sm:$0xff]  ;;  %v4450_v49 = vld [vmem:[#allocation11 + $0x48] sm:$0xff] }
 0xcce   :  { %v4253_v43 = vmul.f32 %v5729_v2, %v4245_v37 }
 0xcd0   :  { %v4261_v52 = vadd.f32 %v5730_v40, %v4253_v43 }
 0xcd2   :  { %v4265_v63 = vmax.f32 %v4261_v52, 0.0  ;;  %v4410_v52 = vld [vmem:[#allocation13] sm:$0xff] }
 0xcd4   :  { %4286 = vmatpush.msrb.mxu0 %v4265_v63 }
 0xcd6   :  { %4287 = vmatpush.msrb.mxu0 %v4264_v10 }
 0xcd8   :  { %4288 = vmatpush.msrb.mxu0 %v4263_v7 }
 0xcda   :  { %4289 = vmatpush.msrb.mxu0 %v4262_v36 }
 0xcdb   :  { %5629 = vmatmul.msk.f32.vlgmr.msrb.gmra.mxu0 %vm1618_vm1, %v4266_v47  ;;  %v4548_v47 = vld [vmem:[#allocation11 + $0x90] sm:$0xff] }
 0xcdc   :  { %4317 = vmatpush.msra.mxu0 %v4265_v63  ;;  %v4411_v63 = vld [vmem:[#allocation13 + $0x8] sm:$0xff] }
 0xcde   :  { %4318 = vmatpush.msra.mxu0 %v4264_v10  ;;  %v4447_v10 = vld [vmem:[#allocation11 + $0x30] sm:$0xff] }
 0xcdf   :  { %4501 = vmatpush.msrb.mxu1 %v4447_v10  ;;  %v4711_v10 = vld [vmem:[#allocation16 + $0x10] sm:$0xff] }
 0xce0   :  { %4319 = vmatpush.msra.mxu0 %v4263_v7  ;;  %v4550_v7 = vld [vmem:[#allocation11 + $0xa0] sm:$0xff] }
 0xce1   :  { %4502 = vmatpush.msrb.mxu1 %v4446_v54  ;;  %v4709_v54 = vld [vmem:[#allocation16] sm:$0xff] }
 0xce2   :  { %4320 = vmatpush.msra.mxu0 %v4262_v36  ;;  %v4443_v36 = vld [vmem:[#allocation11 + $0x10] sm:$0xff] }
 0xce3   :  { %5630 = vmatmul.msk.f32.gmra.mxu0 %vm1618_vm1, %v4267_v35  ;;  %4503 = vmatpush.msrb.mxu1 %v4445_v3  ;;  %v4441_v35 = vld [vmem:[#allocation11] sm:$0xff]  ;;  %v5682_v3 = vld [vmem:[%s9269_s17 + $0x58] sm:$0xff] }
 0xce4   :  { %4471 = vmatpush.msrb.mxu0 %v4456_v34 }
 0xce5   :  { %4504 = vmatpush.msrb.mxu1 %v4444_v19  ;;  %v5692_v19 = vld [vmem:[%s9269_s17 + $0x98] sm:$0xff] }
 0xce6   :  { %4472 = vmatpush.msrb.mxu0 %v4455_v50 }
 0xce7   :  { %4505 = vmatpush.msrb.mxu1 %v4443_v36  ;;  %v5681_v36 = vld [vmem:[%s9269_s17 + $0x50] sm:$0xff] }
 0xce8   :  { %4473 = vmatpush.msrb.mxu0 %v4454_v26 }
 0xce9   :  { %4506 = vmatpush.msrb.mxu1 %v4442_v48  ;;  %v4741_v48 = vld [vmem:[%s9269_s17] sm:$0xff] }
 0xcea   :  { %4474 = vmatpush.msrb.mxu0 %v4453_v32 }
 0xceb   :  { %5631 = vmatmul.msk.f32.vlgmr.msra.gmra.mxu0 %vm1618_vm1, %v4297_v41  ;;  %v4546_v41 = vld [vmem:[#allocation11 + $0x80] sm:$0xff]  ;;  %4507 = vmatpush.msrb.mxu1 %v4441_v35 }
 0xcec   :  { %4475 = vmatpush.msrb.mxu0 %v4452_v28  ;;  %v5680_v35 = vld [vmem:[%s9269_s17 + $0x48] sm:$0xff] }
 0xcee   :  { %4476 = vmatpush.msrb.mxu0 %v4451_v44  ;;  %v5660_v44 = vld [vmem:[%s9267_s15 + $0x8] sm:$0xff] }
 0xcf0   :  { %4477 = vmatpush.msrb.mxu0 %v4450_v49  ;;  %v4649_v49 = vld [vmem:[%s9268_s16 + $0x8] sm:$0xff] }
 0xcf2   :  { %4478 = vmatpush.msrb.mxu0 %v4449_v31  ;;  %v5664_v31 = vld [vmem:[%s9268_s16 + $0x48] sm:$0xff] }
 0xcf3   :  { %5632 = vmatmul.msk.f32.gmra.mxu0 %vm1618_vm1, %v4298_v33 }
 0xd58   :  { %v4291_v11 = vpop.f32.mrf.mxu0 }
 0xd60   :  { %v4294_v45 = vpop.f32.mrf.mxu0 }
 0xd68   :  { %v4322_v22 = vpop.f32.mrf.mxu0 }
 0xd69   :  { %v4328_v51 = vmax.f32 %v4291_v11, %v4322_v22  ;;  %v5732_v11 = vld [vmem:[#allocation14 + $0x1] ss:$0 sm:$0xff] }
 0xd6b   :  { %4401 = vmatmul.f32.vlgmr.msrb.gmra.mxu2 %v4328_v51  ;;  %4362 = vmatmul.f32.vlgmr.msra.gmra.mxu1 %v4328_v51 }
 0xd70   :  { %v4325_v2 = vpop.f32.mrf.mxu0 }
 0xd71   :  { %v4329_v59 = vmax.f32 %v4294_v45, %v4325_v2 }
 0xd73   :  { %4404 = vmatmul.f32.gmra.mxu2 %v4329_v59  ;;  %4365 = vmatmul.f32.gmra.mxu1 %v4329_v59  ;;  %v4599_v59 = vld [vmem:[%s9267_s15] sm:$0xff] }
 0xde8   :  { %v4363_v6 = vpop.f32.mrf.mxu1 }
 0xdee   :  { %v4402_v37 = vpop.f32.mrf.mxu2 }
 0xdef   :  { %v4408_v5 = vmax.f32 %v4363_v6, %v4402_v37  ;;  %v4648_v6 = vld [vmem:[%s9268_s16] sm:$0xff] }
 0xdf0   :  { %v4366_v43 = vpop.f32.mrf.mxu1  ;;  %v5663_v37 = vld [vmem:[%s9268_s16 + $0x40] sm:$0xff] }
 0xdf1   :  { %5651 = vmatmul.msk.f32.vlgmr.msrb.gmra.mxu0 %vm263_vm0, %v4408_v5 }
 0xdf6   :  { %v4405_v40 = vpop.f32.mrf.mxu2 }
 0xdf7   :  { %v4409_v56 = vmax.f32 %v4366_v43, %v4405_v40  ;;  %v4715_v43 = vld [vmem:[#allocation16 + $0x30] sm:$0xff] }
 0xdf8   :  { %v4744_v40 = vld [vmem:[%s9269_s17 + $0x18] sm:$0xff] }
 0xdf9   :  { %4432 = vmatpush.msrb.mxu3 %v4409_v56  ;;  %4537 = vmatpush.msra.mxu2 %v4409_v56 }
 0xdfa   :  { %5652 = vmatmul.msk.f32.gmra.mxu0 %vm263_vm0, %v4409_v56  ;;  %v4743_v56 = vld [vmem:[%s9269_s17 + $0x10] sm:$0xff] }
 0xdfb   :  { %4433 = vmatpush.msrb.mxu3 %v4408_v5  ;;  %4538 = vmatpush.msra.mxu2 %v4408_v5  ;;  %v4716_v5 = vld [vmem:[#allocation16 + $0x38] sm:$0xff] }
 0xdfc   :  { %5649 = vmatmul.msk.f32.vlgmr.msrb.gmra.mxu3 %vm2016_vm2, %v4410_v52  ;;  %5655 = vmatmul.msk.f32.vlgmr.msra.gmra.mxu2 %vm2016_vm2, %v4515_v53  ;;  %v4714_v52 = vld [vmem:[#allocation16 + $0x28] sm:$0xff]  ;;  %v4713_v53 = vld [vmem:[#allocation16 + $0x20] sm:$0xff] }
 0xdfd   :  { %4568 = vmatpush.msra.mxu3 %v4553_v46  ;;  %4667 = vmatpush.msrb.mxu2 %v4655_v18  ;;  %v4712_v46 = vld [vmem:[#allocation16 + $0x18] sm:$0xff] }
 0xdfe   :  { %v5684_v18 = vld [vmem:[%s9269_s17 + $0x60] sm:$0xff] }
 0xdff   :  { %4569 = vmatpush.msra.mxu3 %v4552_v17  ;;  %4668 = vmatpush.msrb.mxu2 %v4654_v27  ;;  %v4710_v17 = vld [vmem:[#allocation16 + $0x8] sm:$0xff]  ;;  %v5702_v27 = vld [vmem:[%s9269_s17 + $0xd8] sm:$0xff] }
 0xe01   :  { %4570 = vmatpush.msra.mxu3 %v4551_v1  ;;  %4669 = vmatpush.msrb.mxu2 %v4653_v12  ;;  %v4708_v1 = vld [vmem:[%s9355_s5 + $0x1] sm:$0x1]  ;;  %v5701_v12 = vld [vmem:[%s9269_s17 + $0xd0] sm:$0xff]  ;;  %s5036_s5 = sshll.u32 %s9418_s12, 4  ;;  %s5037_s5 = int_to_ptr.hbm [resolvable:$true] %s5036_s5 }
 0xe03   :  { %4571 = vmatpush.msra.mxu3 %v4550_v7  ;;  %4670 = vmatpush.msrb.mxu2 %v4652_v14  ;;  %v5687_v7 = vld [vmem:[%s9269_s17 + $0x78] sm:$0xff]  ;;  %v5674_v14 = vld [vmem:[%s9269_s17 + $0x20] sm:$0xff] }
 0xe04   :  { %5650 = vmatmul.msk.f32.gmra.mxu3 %vm2016_vm2, %v4411_v63  ;;  %5656 = vmatmul.msk.f32.gmra.mxu2 %vm2016_vm2, %v4516_v58 }
 0xe05   :  { %4572 = vmatpush.msra.mxu3 %v4549_v20  ;;  %4671 = vmatpush.msrb.mxu2 %v4651_v61  ;;  %v4742_v20 = vld [vmem:[%s9269_s17 + $0x8] sm:$0xff] }
 0xe06   :  { %v5705_v61 = vld [vmem:[%s9269_s17 + $0xe8] sm:$0xff] }
 0xe07   :  { %4573 = vmatpush.msra.mxu3 %v4548_v47  ;;  %4672 = vmatpush.msrb.mxu2 %v4650_v9  ;;  %v5686_v47 = vld [vmem:[%s9269_s17 + $0x70] sm:$0xff]  ;;  %v4981_v9 = vld [vmem:[%s9272_s20 + $0x78] sm:$0xff] }
 0xe09   :  { %4574 = vmatpush.msra.mxu3 %v4547_v13  ;;  %4673 = vmatpush.msrb.mxu2 %v4649_v49  ;;  %v5691_v13 = vld [vmem:[%s9269_s17 + $0x90] sm:$0xff]  ;;  %v4975_v49 = vld [vmem:[%s9272_s20 + $0x48] sm:$0xff] }
 0xe0b   :  { %4575 = vmatpush.msra.mxu3 %v4546_v41  ;;  %4674 = vmatpush.msrb.mxu2 %v4648_v6  ;;  %v5685_v41 = vld [vmem:[%s9269_s17 + $0x68] sm:$0xff]  ;;  %v4973_v6 = vld [vmem:[%s9272_s20 + $0x38] sm:$0xff] }
 0xe0d   :  { %4695 = vmatpush.msrb.mxu3 %v5670_v62  ;;  %4816 = vmatpush.msra.mxu2 %v5682_v3  ;;  %v5675_v62 = vld [vmem:[%s9269_s17 + $0x28] sm:$0xff] }
 0xe0f   :  { %4696 = vmatpush.msrb.mxu3 %v5669_v23  ;;  %4817 = vmatpush.msra.mxu2 %v5681_v36  ;;  %v5689_v23 = vld [vmem:[%s9269_s17 + $0x80] sm:$0xff] }
 0xe11   :  { %4697 = vmatpush.msrb.mxu3 %v5668_v30  ;;  %4818 = vmatpush.msra.mxu2 %v5680_v35  ;;  %v5707_v30 = vld [vmem:[%s9269_s17 + $0xf8] sm:$0xff] }
 0xe13   :  { %4698 = vmatpush.msrb.mxu3 %v5667_v4  ;;  %v5706_v4 = vld [vmem:[%s9269_s17 + $0xf0] sm:$0xff] }
 0xe15   :  { %4699 = vmatpush.msrb.mxu3 %v5666_v60  ;;  %v5699_v60 = vld [vmem:[%s9269_s17 + $0xc0] sm:$0xff] }
 0xe17   :  { %4700 = vmatpush.msrb.mxu3 %v5665_v8  ;;  %v4980_v8 = vld [vmem:[%s9272_s20 + $0x70] sm:$0xff] }
 0xe19   :  { %4701 = vmatpush.msrb.mxu3 %v5664_v31  ;;  %v4974_v31 = vld [vmem:[%s9272_s20 + $0x40] sm:$0xff] }
 0xe1b   :  { %4702 = vmatpush.msrb.mxu3 %v5663_v37  ;;  %v4972_v37 = vld [vmem:[%s9272_s20 + $0x30] sm:$0xff] }
 0xe6e   :  { %v4480_v15 = vpop.f32.mrf.mxu0 }
 0xe77   :  { %v4483_v21 = vpop.f32.mrf.mxu0 }
 0xe7f   :  { %v4435_v33 = vpop.f32.mrf.mxu3  ;;  %v4540_v24 = vpop.f32.mrf.mxu2 }
 0xe80   :  { %5653 = vmatmul.msk.f32.vlgmr.msrb.gmra.mxu1 %vm263_vm0, %v4435_v33  ;;  %5657 = vmatmul.msk.f32.vlgmr.msra.gmra.mxu3 %vm263_vm0, %v4540_v24  ;;  %v5690_v33 = vld [vmem:[%s9269_s17 + $0x88] sm:$0xff]  ;;  %v5677_v24 = vld [vmem:[%s9269_s17 + $0x38] sm:$0xff] }
 0xe81   :  { %4844 = vmatpush.msra.mxu3 %v5687_v7 }
 0xe83   :  { %4845 = vmatpush.msra.mxu3 %v5686_v47 }
 0xe85   :  { %4846 = vmatpush.msra.mxu3 %v5685_v41 }
 0xe87   :  { %v4438_v16 = vpop.f32.mrf.mxu3  ;;  %v4543_v0 = vpop.f32.mrf.mxu2  ;;  %4847 = vmatpush.msra.mxu3 %v5684_v18 }
 0xe88   :  { %5654 = vmatmul.msk.f32.gmra.mxu1 %vm263_vm0, %v4438_v16  ;;  %5658 = vmatmul.msk.f32.gmra.mxu3 %vm263_vm0, %v4543_v0  ;;  %v5676_v16 = vld [vmem:[%s9269_s17 + $0x30] sm:$0xff]  ;;  %v5679_v0 = vld [vmem:[%s9269_s17 + $0x40] sm:$0xff] }
 0xe89   :  { %4819 = vmatpush.msra.mxu2 %v5679_v0 }
 0xefd   :  { %v4509_v57 = vpop.f32.mrf.mxu1 }
 0xefe   :  { %v4510_v42 = vadd.f32 %v4509_v57, %v4480_v15  ;;  %v5700_v57 = vld [vmem:[%s9269_s17 + $0xc8] sm:$0xff]  ;;  %v5704_v15 = vld [vmem:[%s9269_s17 + $0xe0] sm:$0xff] }
 0xf03   :  { %v4577_v55 = vpop.f32.mrf.mxu3 }
 0xf04   :  { %v4583_v38 = vadd.f32 %v4577_v55, %v4510_v42  ;;  %v4979_v55 = vld [vmem:[%s9272_s20 + $0x68] sm:$0xff] }
 0xf05   :  { %v4512_v29 = vpop.f32.mrf.mxu1 }
 0xf06   :  { %v4513_v34 = vadd.f32 %v4512_v29, %v4483_v21  ;;  %v4589_v26 = vmul.f32 %v5731_v39, %v4583_v38 }
 0xf08   :  { %v4595_v22 = vadd.f32 %v5732_v11, %v4589_v26 }
 0xf0a   :  { %v4597_v2 = vmax.f32 %v4595_v22, 0.0 }
 0xf0b   :  { %v4580_v50 = vpop.f32.mrf.mxu3 }
 0xf0c   :  { %v4584_v32 = vadd.f32 %v4580_v50, %v4513_v34  ;;  %v5696_v50 = vld [vmem:[%s9269_s17 + $0xb0] sm:$0xff] }
 0xf0e   :  { %v4590_v28 = vmul.f32 %v5731_v39, %v4584_v32  ;;  %v5697_v39 = vld [vmem:[%s9269_s17 + $0xb8] sm:$0xff]  ;;  %v5695_v32 = vld [vmem:[%s9269_s17 + $0xa8] sm:$0xff] }
 0xf10   :  { %v4596_v45 = vadd.f32 %v5732_v11, %v4590_v28  ;;  %v5694_v11 = vld [vmem:[%s9269_s17 + $0xa0] sm:$0xff] }
 0xf12   :  { %v4598_v51 = vmax.f32 %v4596_v45, 0.0 }
 0xf14   :  { %4617 = vmatpush.msra.mxu0 %v4598_v51  ;;  %4641 = vmatpush.msra.mxu1 %v4598_v51 }
 0xf16   :  { %4618 = vmatpush.msra.mxu0 %v4597_v2  ;;  %4642 = vmatpush.msra.mxu1 %v4597_v2  ;;  %v4978_v2 = vld [vmem:[%s9272_s20 + $0x60] sm:$0xff] }
 0xf17   :  { %5659 = vmatmul.msk.f32.vlgmr.msra.gmra.mxu0 %vm2016_vm2, %v4599_v59  ;;  %5661 = vmatmul.msk.f32.vlgmr.msra.gmra.mxu1 %vm2016_vm2, %v5660_v44  ;;  %v4977_v59 = vld [vmem:[%s9272_s20 + $0x58] sm:$0xff]  ;;  %v4976_v44 = vld [vmem:[%s9272_s20 + $0x50] sm:$0xff] }
 0xf18   :  { %4729 = vmatpush.msrb.mxu0 %v4716_v5  ;;  %4760 = vmatpush.msrb.mxu1 %v4744_v40  ;;  %v4971_v5 = vld [vmem:[%s9272_s20 + $0x28] sm:$0xff]  ;;  %v4969_v40 = vld [vmem:[%s9272_s20 + $0x18] sm:$0xff] }
 0xf1a   :  { %4730 = vmatpush.msrb.mxu0 %v4715_v43  ;;  %4761 = vmatpush.msrb.mxu1 %v4743_v56  ;;  %v4970_v43 = vld [vmem:[%s9272_s20 + $0x20] sm:$0xff]  ;;  %v4968_v56 = vld [vmem:[%s9272_s20 + $0x10] sm:$0xff] }
 0xf1c   :  { %4731 = vmatpush.msrb.mxu0 %v4714_v52  ;;  %4762 = vmatpush.msrb.mxu1 %v4742_v20  ;;  %v4967_v52 = vld [vmem:[%s9272_s20 + $0x8] sm:$0xff] }
 0xf1e   :  { %4732 = vmatpush.msrb.mxu0 %v4713_v53  ;;  %4763 = vmatpush.msrb.mxu1 %v4741_v48  ;;  %v4966_v53 = vld [vmem:[%s9272_s20] sm:$0xff]  ;;  %s6058_s20 = smov [#allocation20]  }
 0xf1f   :  { %s5034_s25 = sshll.u32 %s6058_s20, 4  ;;  %s5035_s25 = int_to_ptr.vmem [resolvable:$true] %s5034_s25 }
 0xf20   :  { %4733 = vmatpush.msrb.mxu0 %v4712_v46  ;;  %4788 = vmatpush.msra.mxu1 %v5677_v24 }
 0xf22   :  { %4734 = vmatpush.msrb.mxu0 %v4711_v10  ;;  %4789 = vmatpush.msra.mxu1 %v5676_v16  ;;  %v4982_v16 = vld [vmem:[#allocation19] sm:$0x1] }
 0xf24   :  { %4735 = vmatpush.msrb.mxu0 %v4710_v17  ;;  %4790 = vmatpush.msra.mxu1 %v5675_v62 }
 0xf26   :  { %4736 = vmatpush.msrb.mxu0 %v4709_v54  ;;  %4791 = vmatpush.msra.mxu1 %v5674_v14 }
 0xf27   :  { %5672 = vmatmul.msk.f32.vlgmr.msrb.gmra.mxu0 %vm263_vm0, %v4708_v1 }
 0xf28   :  { %4872 = vmatpush.msra.mxu0 %v5692_v19 }
 0xf2a   :  { %4873 = vmatpush.msra.mxu0 %v5691_v13 }
 0xf2c   :  { %4874 = vmatpush.msra.mxu0 %v5690_v33 }
 0xf2e   :  { %4875 = vmatpush.msra.mxu0 %v5689_v23 }
 0xf30   :  { %4983 = vmatpush.msrb.mxu0 %v4981_v9 }
 0xf32   :  { %4984 = vmatpush.msrb.mxu0 %v4980_v8 }
 0xf34   :  { %4985 = vmatpush.msrb.mxu0 %v4979_v55 }
 0xf36   :  { %4986 = vmatpush.msrb.mxu0 %v4978_v2 }
 0xf38   :  { %4987 = vmatpush.msrb.mxu0 %v4977_v59 }
 0xf3a   :  { %4988 = vmatpush.msrb.mxu0 %v4976_v44 }
 0xf3c   :  { %4989 = vmatpush.msrb.mxu0 %v4975_v49 }
 0xf3e   :  { %4990 = vmatpush.msrb.mxu0 %v4974_v31 }
 0xf40   :  { %4991 = vmatpush.msrb.mxu0 %v4973_v6 }
 0xf42   :  { %4992 = vmatpush.msrb.mxu0 %v4972_v37 }
 0xf44   :  { %4993 = vmatpush.msrb.mxu0 %v4971_v5 }
 0xf46   :  { %4994 = vmatpush.msrb.mxu0 %v4970_v43 }
 0xf48   :  { %4995 = vmatpush.msrb.mxu0 %v4969_v40 }
 0xf4a   :  { %4996 = vmatpush.msrb.mxu0 %v4968_v56 }
 0xf4c   :  { %4997 = vmatpush.msrb.mxu0 %v4967_v52 }
 0xf4e   :  { %4998 = vmatpush.msrb.mxu0 %v4966_v53 }
 0xf94   :  { %v4620_v63 = vpop.f32.mrf.mxu0  ;;  %v4644_v58 = vpop.f32.mrf.mxu1 }
 0xf95   :  { %v4647_v25 = vmax.f32 %v4620_v63, %v4644_v58  ;;  %v4717_v58 = vld [vmem:[#allocation17] sm:$0x1] }
 0xf97   :  { %5662 = vmatmul.msk.f32.vlgmr.msrb.gmra.mxu2 %vm263_vm0, %v4647_v25  ;;  %5671 = vmatmul.msk.f32.vlgmr.msrb.gmra.mxu3 %vm263_vm0, %v4647_v25 }
 0xf98   :  { %4928 = vmatpush.msrb.mxu2 %v5702_v27  ;;  %4956 = vmatpush.msrb.mxu3 %v5707_v30 }
 0xf9a   :  { %4929 = vmatpush.msrb.mxu2 %v5701_v12  ;;  %4957 = vmatpush.msrb.mxu3 %v5706_v4 }
 0xf9c   :  { %4930 = vmatpush.msrb.mxu2 %v5700_v57  ;;  %4958 = vmatpush.msrb.mxu3 %v5705_v61 }
 0xf9e   :  { %4931 = vmatpush.msrb.mxu2 %v5699_v60  ;;  %4959 = vmatpush.msrb.mxu3 %v5704_v15 }
 0xfa4   :  { %v4738_v25 = vpop.f32.mrf.mxu0 }
 0xfa5   :  { %v4739_v46 = vadd.f32 %v4738_v25, %v4717_v58 }
0x101a   :  { %v4676_v42 = vpop.f32.mrf.mxu2  ;;  %v4704_v29 = vpop.f32.mrf.mxu3 }
0x101b   :  { %v4707_v38 = vmax.f32 %v4676_v42, %v4704_v29 }
0x101d   :  { %5673 = vmatmul.msk.f32.vlgmr.msrb.gmra.mxu1 %vm1618_vm1, %v4707_v38  ;;  %v4801_v21 = vrot.slane %v4707_v38, 2  ;;  %v4829_v34 = vrot.slane %v4707_v38, 3  ;;  %v4857_v26 = vrot.slane %v4707_v38, 4  ;;  %v4773_v28 = vrot.slane %v4707_v38, 1 }
0x101e   :  { %4900 = vmatpush.msrb.mxu1 %v5697_v39  ;;  %v4913_v45 = vrot.slane %v4707_v38, 6  ;;  %v4941_v22 = vrot.slane %v4707_v38, 7  ;;  %v4885_v51 = vrot.slane %v4707_v38, 5 }
0x101f   :  { %5683 = vmatmul.msk.f32.vlgmr.msra.gmra.mxu2 %vm1618_vm1, %v4801_v21  ;;  %5688 = vmatmul.msk.f32.vlgmr.msra.gmra.mxu3 %vm1618_vm1, %v4829_v34 }
0x1020   :  { %4901 = vmatpush.msrb.mxu1 %v5696_v50  ;;  %5693 = vmatmul.msk.f32.vlgmr.msra.gmra.mxu0 %vm1618_vm1, %v4857_v26 }
0x1022   :  { %4902 = vmatpush.msrb.mxu1 %v5695_v32 }
0x1024   :  { %4903 = vmatpush.msrb.mxu1 %v5694_v11 }
0x1025   :  { %5678 = vmatmul.msk.f32.vlgmr.msra.gmra.mxu1 %vm1618_vm1, %v4773_v28 }
0x1027   :  { %5703 = vmatmul.msk.f32.vlgmr.msrb.gmra.mxu2 %vm1618_vm1, %v4913_v45  ;;  %5708 = vmatmul.msk.f32.vlgmr.msrb.gmra.mxu3 %vm1618_vm1, %v4941_v22 }
0x102d   :  { %5698 = vmatmul.msk.f32.vlgmr.msrb.gmra.mxu1 %vm1618_vm1, %v4885_v51 }
0x109a   :  { %v4765_v63 = vpop.f32.mrf.mxu1 }
0x109b   :  { %v4768_v10 = vadd.f32 %v4765_v63, %v4739_v46 }
0x109d   :  { %v4877_v20 = vpop.f32.mrf.mxu0 }
0x10a2   :  { %v4793_v17 = vpop.f32.mrf.mxu1  ;;  %v4821_v54 = vpop.f32.mrf.mxu2 }
0x10a3   :  { %v4796_v1 = vadd.f32 %v4793_v17, %v4768_v10  ;;  %v4849_v3 = vpop.f32.mrf.mxu3 }
0x10a5   :  { %v4824_v7 = vadd.f32 %v4821_v54, %v4796_v1 }
0x10a7   :  { %v4852_v19 = vadd.f32 %v4849_v3, %v4824_v7 }
0x10a9   :  { %v4880_v36 = vadd.f32 %v4877_v20, %v4852_v19 }
0x10aa   :  { %v4905_v47 = vpop.f32.mrf.mxu1  ;;  %v4933_v13 = vpop.f32.mrf.mxu2 }
0x10ab   :  { %v4908_v48 = vadd.f32 %v4905_v47, %v4880_v36  ;;  %v4961_v41 = vpop.f32.mrf.mxu3 }
0x10ad   :  { %v4936_v35 = vadd.f32 %v4933_v13, %v4908_v48 }
0x10af   :  { %v4964_v33 = vadd.f32 %v4961_v41, %v4936_v35 }
0x10b1   :  { %v4965_v24 = vmax.f32 %v4964_v33, 0.0 }
0x10b3   :  { %4999 = vmatmul.f32.vlgmr.msrb.gmra.mxu0 %v4965_v24 }
0x1130   :  { %v5000_v0 = vpop.f32.mrf.mxu0 }
0x1131   :  { %v5001_v18 = vadd.f32 %v5000_v0, %v4982_v16 }
0x1133   :  { %v5003_v62 = vmax.f32 %v5001_v18, 0.0 }
0x1135   :  { %v5004_v27 = vsel %vm2622_vm3, %v5003_v62, -inf }
0x1136   :  { %5005 = vmax.xlane.f32.xlu0 %v5004_v27 }
0x11a9   :  { %v5006_v23 = vpop.xlane.xlu0 %5005 }
0x11aa   :  { %v5007_v12 = vsub.f32 %v5003_v62, %v5006_v23 }
0x11ac   :  { %v5008_v30 = vmul.f32 1.442695, %v5007_v12 }
0x11ae   :  { %5737 = vpow2.f32 %v5008_v30 }
0x11b4   :  { %v5738_v14 = vpop.eup %5737 }
0x11b5   :  { %v5010_v4 = vsel %vm2622_vm3, %v5738_v14, 0.0 }
0x11b6   :  { %5011 = vadd.xlane.f32.xlu1 %v5010_v4 }
0x1229   :  { %v5012_v57 = vpop.xlane.xlu1 %5011 }
0x122a   :  { %5739 = vrcp.f32 %v5012_v57  ;;  %v5024_v9 = vand.u32 2147483648, %v5012_v57  ;;  %v5022_v55 = vand.u32 2147483647, %v5012_v57  ;;  %vm5018_vm9 = vweird.f32 %v5012_v57 }
0x122c   :  { %v5025_v29 = vor.u32 1.1754944e-38, %v5024_v9  ;;  %vm5023_vm11 = vcmp.eq.f32.partialorder %v5022_v55, 8.507059e+37 }
0x1230   :  { %v5740_v61 = vpop.eup %5739 }
0x1231   :  { %v5014_v60 = vmul.f32 %v5740_v61, %v5012_v57  ;;  %vm5019_vm8 = vweird.f32 %v5740_v61 }
0x1232   :  { %vm5020_vm10 = vmor %vm5018_vm9, %vm5019_vm8 }
0x1233   :  { %v5015_v15 = vsub.f32 1.0, %v5014_v60 }
0x1235   :  { %v5016_v8 = vmul.f32 %v5740_v61, %v5015_v15 }
0x1237   :  { %v5017_v42 = vadd.f32 %v5740_v61, %v5016_v8 }
0x1239   :  { %v5021_v38 = vsel %vm5020_vm10, %v5740_v61, %v5017_v42 }
0x123a   :  { %v5026_v39 = vsel %vm5023_vm11, %v5025_v29, %v5021_v38 }
0x123b   :  { %v5027_v21 = vmul.f32 %v5738_v14, %v5026_v39 }
0x123d   :  { %5028 = vst.msk [vmem:[#allocation20 + $0x1] sm:$0x1] %vm2622_vm3, %v5027_v21 }
0x123e   :  { %5039 = dma.vmem_to_hbm [thread:$0]  %s5035_s25, 32, %s5037_s5, [#allocation4]  }
0x123f   :  { %6041 = dma.done.wait [#allocation4], 32  }
0x1240   :  { %6042 = vsyncadd [#allocation4], 4294967264 }
0x1241   :  { %5044 = vsyncpa [#allocation3], 1 }
0x1242   :  { %5045 = vsyncpa [#allocation6], 1 }
0x1243   :  { %5046 = vsyncpa [#allocation9], 1 }
0x1244   :  { %5047 = vsyncpa [#allocation12], 1 }
0x1245   :  { %5048 = vsyncpa [#allocation15], 1 }
0x1246   :  { %5049 = vsyncpa [#allocation18], 1 }
0x1247   :  { %5050 = vsyncpa [#allocation4], 1 }

</bundles_post_ra>
